<compile_context>
chip_gen: v7x
topology: tpu7x:2x2x1
jax: 0.10.0
libtpu: 0.0.40
codegen_flags: <defaults>
</compile_context>

<pallas_src>
import functools

import jax
import jax.numpy as jnp
from jax.experimental import pallas as pl
from jax.experimental.pallas import tpu as pltpu


_VMEM_LIMIT = 64 * 1024 * 1024


# ----------------------------------------------------------------------------
# Pallas kernels
# ----------------------------------------------------------------------------
def _mm_bias_kernel(x_ref, w_ref, b_ref, o_ref, acc_ref, *, relu):
    """Tiled matmul with f32 accumulator: out = act(x @ w + bias)."""
    @pl.when(pl.program_id(2) == 0)
    def _():
        acc_ref[...] = jnp.zeros_like(acc_ref)

    acc_ref[...] += jnp.dot(x_ref[...], w_ref[...],
                            preferred_element_type=jnp.float32)

    @pl.when(pl.program_id(2) == pl.num_programs(2) - 1)
    def _():
        out = acc_ref[...] + b_ref[...]
        if relu:
            out = jnp.maximum(out, 0.0)
        o_ref[...] = out.astype(o_ref.dtype)


def _direct_conv_kernel(*refs, offs, cin, relu, has_res):
    """Stride-1 kxk conv as k*k shifted matmuls over a flattened padded image.

    x_ref: (1, m_in, cin)  flattened padded image (whole image resident in VMEM)
    w_ref: (k*k*cin, tco)  im2col-ordered weights (ki, kj, cin)
    b_ref: (1, tco)        folded-BN bias (f32)
    r_ref: (1, m_out, tco) optional residual
    o_ref: (1, m_out, tco)
    """
    if has_res:
        x_ref, w_ref, b_ref, r_ref, o_ref = refs
    else:
        x_ref, w_ref, b_ref, o_ref = refs
    m_out = o_ref.shape[1]
    tco = o_ref.shape[2]
    acc = jnp.zeros((m_out, tco), jnp.float32)
    for t, off in enumerate(offs):
        xs = x_ref[0, off:off + m_out, :]
        ws = w_ref[t * cin:(t + 1) * cin, :]
        acc = acc + jnp.dot(xs, ws, preferred_element_type=jnp.float32)
    out = acc + b_ref[...]
    if has_res:
        out = out + r_ref[0].astype(jnp.float32)
    if relu:
        out = jnp.maximum(out, 0.0)
    o_ref[0] = out.astype(o_ref.dtype)


def _maxpool_kernel(p00_ref, p01_ref, p10_ref, p11_ref, o_ref, *, oh, ow):
    """3x3/stride-2 max pool from the 4 stride-2 phases of the padded image."""
    phases = {(0, 0): p00_ref, (0, 1): p01_ref, (1, 0): p10_ref, (1, 1): p11_ref}
    # 3x3 window tap (ki, kj) -> (row phase, row shift) x (col phase, col shift)
    srcs = [(0, 0), (1, 0), (0, 1)]   # (phase, shift) for ki (or kj) in {0, 1, 2}
    out = None
    for (ra, dy) in srcs:
        for (ca, dx) in srcs:
            v = phases[(ra, ca)][0, dy:dy + oh, dx:dx + ow, :]
            out = v if out is None else jnp.maximum(out, v)
    o_ref[0] = out


def _gap_kernel(x_ref, o_ref):
    """x_ref: (1, H*W, C) -> mean over spatial axis (f32)."""
    o_ref[...] = jnp.mean(x_ref[...].astype(jnp.float32), axis=1, keepdims=True)


# ----------------------------------------------------------------------------
# Pallas wrappers
# ----------------------------------------------------------------------------
def _round_up(v, m):
    return (v + m - 1) // m * m


def _tile(d, cap, align):
    """Return (padded_dim, tile). tile is a multiple of `align`, capped at `cap`."""
    dp = _round_up(d, align)
    if dp <= cap:
        return dp, dp
    return _round_up(d, cap), cap


def matmul_bias_act(x, w, bias, *, relu, out_dtype):
    """out = act(x @ w + bias), bf16 MXU compute, f32 accumulation/epilogue."""
    M, K = x.shape
    _, N = w.shape
    Mp, tm = _tile(M, cap=512, align=16)
    Np, tn = _tile(N, cap=512, align=128)
    Kp, tk = _tile(K, cap=512, align=128)

    xb = x.astype(jnp.bfloat16)
    wb = w.astype(jnp.bfloat16)
    if (Mp, Kp) != (M, K):
        xb = jnp.pad(xb, ((0, Mp - M), (0, Kp - K)))
    if (Kp, Np) != (K, N):
        wb = jnp.pad(wb, ((0, Kp - K), (0, Np - N)))
    b2 = bias.reshape(1, N).astype(jnp.float32)
    if Np != N:
        b2 = jnp.pad(b2, ((0, 0), (0, Np - N)))

    out = pl.pallas_call(
        functools.partial(_mm_bias_kernel, relu=relu),
        out_shape=jax.ShapeDtypeStruct((Mp, Np), out_dtype),
        grid=(Mp // tm, Np // tn, Kp // tk),
        in_specs=[
            pl.BlockSpec((tm, tk), lambda i, j, k: (i, k)),
            pl.BlockSpec((tk, tn), lambda i, j, k: (k, j)),
            pl.BlockSpec((1, tn), lambda i, j, k: (0, j)),
        ],
        out_specs=pl.BlockSpec((tm, tn), lambda i, j, k: (i, j)),
        scratch_shapes=[pltpu.VMEM((tm, tn), jnp.float32)],
        compiler_params=pltpu.CompilerParams(
            dimension_semantics=("parallel", "parallel", "arbitrary"),
            vmem_limit_bytes=_VMEM_LIMIT),
    )(xb, wb, b2)
    return out[:M, :N]


def conv_direct(x, p, *, k, pad, relu, residual=None):
    """Stride-1 ConvBN(+ReLU)(+residual) without HBM im2col materialization."""
    n, h, w_, c = x.shape
    assert residual is None or k == 1
    extra = 1 if k > 1 else 0          # one extra bottom pad row so all k*k shifted
    if pad or extra:                   # windows stay in bounds in flattened space
        x = jnp.pad(x, ((0, 0), (pad, pad + extra), (pad, pad), (0, 0)))
    hp, wp = h + 2 * pad, w_ + 2 * pad
    oh, ow = hp - k + 1, wp - k + 1
    m_in = (hp + extra) * wp
    m_out = oh * wp                    # computed over full padded width; garbage
    xf = x.reshape(n, m_in, c)         # columns [ow:wp) are sliced away afterwards

    w = p["w"]
    cout = w.shape[1]
    tco = 512 if (cout > 512 and cout % 512 == 0) else cout
    n_co = cout // tco
    b2 = p["b"].reshape(1, cout).astype(jnp.float32)

    has_res = residual is not None
    args = [xf, w, b2]
    in_specs = [
        pl.BlockSpec((1, m_in, c), lambda j, b: (b, 0, 0)),
        pl.BlockSpec((k * k * c, tco), lambda j, b: (0, j)),
        pl.BlockSpec((1, tco), lambda j, b: (0, j)),
    ]
    if has_res:
        rf = residual.reshape(n, m_out, cout)     # k == 1 => shapes match exactly
        args.append(rf)
        in_specs.append(pl.BlockSpec((1, m_out, tco), lambda j, b: (b, 0, j)))

    offs = tuple(ki * wp + kj for ki in range(k) for kj in range(k))
    kernel = functools.partial(_direct_conv_kernel, offs=offs, cin=c,
                               relu=relu, has_res=has_res)
    out = pl.pallas_call(
        kernel,
        out_shape=jax.ShapeDtypeStruct((n, m_out, cout), jnp.bfloat16),
        grid=(n_co, n),
        in_specs=in_specs,
        out_specs=pl.BlockSpec((1, m_out, tco), lambda j, b: (b, 0, j)),
        compiler_params=pltpu.CompilerParams(
            dimension_semantics=("parallel", "parallel"),
            vmem_limit_bytes=_VMEM_LIMIT),
    )(*args)

    out = out.reshape(n, oh, wp, cout)
    if ow != wp:
        out = out[:, :, :ow, :]
    return out


def _im2col(x, k, stride, pad):
    """x: (N, H, W, C) -> patches (N, oh, ow, k*k*C) with (ki, kj, cin) ordering."""
    n, h, w, c = x.shape
    if pad > 0:
        x = jnp.pad(x, ((0, 0), (pad, pad), (pad, pad), (0, 0)))
    hp, wp = h + 2 * pad, w + 2 * pad
    oh = (hp - k) // stride + 1
    ow = (wp - k) // stride + 1
    cols = []
    for ki in range(k):
        for kj in range(k):
            cols.append(
                x[:, ki:ki + stride * (oh - 1) + 1:stride,
                     kj:kj + stride * (ow - 1) + 1:stride, :]
            )
    return jnp.concatenate(cols, axis=-1), oh, ow


def conv_im2col(x, p, *, k, stride, pad, relu):
    """Strided ConvBN(+ReLU): im2col + tiled matmul (only stem / stride-2 layers)."""
    n, _, _, c = x.shape
    patches, oh, ow = _im2col(x, k, stride, pad)
    xm = patches.reshape(n * oh * ow, k * k * c)
    out = matmul_bias_act(xm, p["w"], p["b"], relu=relu, out_dtype=jnp.bfloat16)
    return out.reshape(n, oh, ow, -1)


def conv_bn(x, p, *, k, stride, pad, relu, residual=None):
    if stride == 1:
        return conv_direct(x, p, k=k, pad=pad, relu=relu, residual=residual)
    assert residual is None
    return conv_im2col(x, p, k=k, stride=stride, pad=pad, relu=relu)


def maxpool_3x3_s2_p1(x):
    """x: (N, H, W, C) NHWC, H/W even -> 3x3/stride-2/pad-1 max pool."""
    n, h, w_, c = x.shape
    assert h % 2 == 0 and w_ % 2 == 0
    oh, ow = h // 2, w_ // 2
    xp = jnp.pad(x, ((0, 0), (1, 1), (1, 1), (0, 0)), constant_values=-jnp.inf)
    hh, wh = (h + 2) // 2, (w_ + 2) // 2
    # stride-2 phases (total ~1x copy instead of 9x tap materialization)
    phases = [xp[:, a::2, b::2, :] for a in (0, 1) for b in (0, 1)]
    return pl.pallas_call(
        functools.partial(_maxpool_kernel, oh=oh, ow=ow),
        out_shape=jax.ShapeDtypeStruct((n, oh, ow, c), x.dtype),
        grid=(n,),
        in_specs=[pl.BlockSpec((1, hh, wh, c), lambda b: (b, 0, 0, 0))
                  for _ in range(4)],
        out_specs=pl.BlockSpec((1, oh, ow, c), lambda b: (b, 0, 0, 0)),
        compiler_params=pltpu.CompilerParams(
            dimension_semantics=("parallel",)),
    )(*phases)


def global_avg_pool(x):
    """x: (N, H, W, C) -> (N, C) in f32."""
    n, h, w_, c = x.shape
    xr = x.reshape(n, h * w_, c)
    out = pl.pallas_call(
        _gap_kernel,
        out_shape=jax.ShapeDtypeStruct((n, 1, c), jnp.float32),
        grid=(n,),
        in_specs=[pl.BlockSpec((1, h * w_, c), lambda b: (b, 0, 0))],
        out_specs=pl.BlockSpec((1, 1, c), lambda b: (b, 0, 0)),
        compiler_params=pltpu.CompilerParams(
            dimension_semantics=("parallel",)),
    )(xr)
    return out.reshape(n, c)


# ----------------------------------------------------------------------------
# Model structure
# ----------------------------------------------------------------------------
def base_block(x, p, stride):
    if p["shortcut"] is None:
        sc = x
    else:
        sc = conv_bn(x, p["shortcut"], k=1, stride=stride, pad=0, relu=False)
    out = conv_bn(x, p["conv1"], k=1, stride=1, pad=0, relu=True)
    out = conv_bn(out, p["conv2"], k=3, stride=stride, pad=1, relu=True)
    # conv3 (ConvBN) + shortcut add + ReLU fused in one Pallas call.
    out = conv_bn(out, p["conv3"], k=1, stride=1, pad=0, relu=True, residual=sc)
    return out


def repmlp_resnet_forward(params, x_nchw):
    # Single layout change: PyTorch NCHW -> NHWC, activations in bf16.
    x = jnp.transpose(x_nchw, (0, 2, 3, 1)).astype(jnp.bfloat16)
    x = conv_bn(x, params["stem"], k=7, stride=2, pad=3, relu=True)  # 7x7/2 ConvBNReLU
    x = maxpool_3x3_s2_p1(x)                                         # MaxPool2d(3,2,1)
    for si, stage in enumerate(params["stages"]):
        for bi, blk in enumerate(stage):
            stride = 2 if (si > 0 and bi == 0) else 1                # static config
            x = base_block(x, blk, stride)
    feat = global_avg_pool(x)                                        # AdaptiveAvgPool2d(1)
    lin = params["linear"]
    logits = matmul_bias_act(feat.astype(jnp.bfloat16), lin["w"], lin["b"],
                             relu=False, out_dtype=jnp.float32)
    return logits


# ----------------------------------------------------------------------------
# Deterministic parameter construction (eval-mode BN folded into weight + bias)
# ----------------------------------------------------------------------------
def _conv_bn_params(key, cin, cout, k):
    kw, kg, kb, km, kv = jax.random.split(key, 5)
    fan_in = cin * k * k
    w = jax.random.normal(kw, (k * k * cin, cout), jnp.float32) / jnp.sqrt(fan_in)
    gamma = 1.0 + 0.1 * jax.random.normal(kg, (cout,), jnp.float32)
    beta = 0.1 * jax.random.normal(kb, (cout,), jnp.float32)
    mean = 0.1 * jax.random.normal(km, (cout,), jnp.float32)
    var = 1.0 + 0.1 * jnp.abs(jax.random.normal(kv, (cout,), jnp.float32))
    scale = gamma / jnp.sqrt(var + 1e-5)
    bias = beta - mean * scale
    # Fold BN scale into the weight; store the weight in bf16 for the MXU.
    w_folded = (w * scale[None, :]).astype(jnp.bfloat16)
    return {"w": w_folded, "b": bias.astype(jnp.float32)}


def init_repmlp_resnet_params(key, num_blocks, num_classes, stem_channels, channels):
    keys = iter(jax.random.split(key, 1024))
    params = {"stem": _conv_bn_params(next(keys), 3, stem_channels, 7)}
    in_c = stem_channels
    stages = []
    for stage_idx, (ch, nb) in enumerate(zip(channels, num_blocks)):
        stage_stride = 1 if stage_idx == 0 else 2
        strides = [stage_stride] + [1] * (nb - 1)
        blocks = []
        for s in strides:
            mid = ch // 4
            blk = {}
            if s != 1 or in_c != ch:
                blk["shortcut"] = _conv_bn_params(next(keys), in_c, ch, 1)
            else:
                blk["shortcut"] = None
            blk["conv1"] = _conv_bn_params(next(keys), in_c, mid, 1)
            blk["conv2"] = _conv_bn_params(next(keys), mid, mid, 3)
            blk["conv3"] = _conv_bn_params(next(keys), mid, ch, 1)
            blocks.append(blk)
            in_c = ch
        stages.append(blocks)
    params["stages"] = stages
    kl, kb = jax.random.split(next(keys))
    params["linear"] = {
        "w": (jax.random.normal(kl, (channels[-1], num_classes), jnp.float32)
              / jnp.sqrt(channels[-1])).astype(jnp.bfloat16),
        "b": 0.1 * jax.random.normal(kb, (num_classes,), jnp.float32),
    }
    return params


# ----------------------------------------------------------------------------
if __name__ == "__main__":
    key = jax.random.PRNGKey(0)
    k_params, k_x = jax.random.split(key)

    # Width-scaled-down RepMLPResNet(block_type='base'): same structure,
    # stem=16 channels, stage channels [32, 64, 128, 256], blocks [2, 1, 1, 1]
    # (second stage-1 block exercises the identity-shortcut path).
    num_blocks = [2, 1, 1, 1]
    num_classes = 10
    stem_channels = 16
    channels = [32, 64, 128, 256]

    params = init_repmlp_resnet_params(
        k_params, num_blocks, num_classes, stem_channels, channels
    )

    # PyTorch-convention NCHW input.
    x = jax.random.normal(k_x, (2, 3, 32, 32), jnp.float32)

    fwd = jax.jit(repmlp_resnet_forward)
    logits = jax.block_until_ready(fwd(params, x))

    assert logits.shape == (2, num_classes), logits.shape
    assert bool(jnp.all(jnp.isfinite(logits)))
    print("KERNEL_OK")
</pallas_src>

<mosaic_0001>
module attributes {stable_mosaic.version = 11 : i64} {
  func.func @_mm_bias_kernel(%arg0: i32, %arg1: i32, %arg2: i32, %arg3: memref<512x256xbf16, #tpu.memory_space<vmem>>, %arg4: memref<256x128xbf16, #tpu.memory_space<vmem>>, %arg5: memref<1x128xf32, #tpu.memory_space<vmem>>, %arg6: memref<512x128xbf16, #tpu.memory_space<vmem>>, %arg7: memref<512x128xf32, #tpu.memory_space<vmem>>) attributes {dimension_semantics = [#tpu.dimension_semantics<parallel>, #tpu.dimension_semantics<parallel>, #tpu.dimension_semantics<arbitrary>], iteration_bounds = array<i64: 1, 1, 1>, scalar_prefetch = 0 : i64, scratch_operands = 1 : i64, tpu.core_type = #tpu.core_type<tc>, window_params = [{transform_indices = @transform_0, window_bounds = array<i64: 512, 256>}, {transform_indices = @transform_1, window_bounds = array<i64: 256, 128>}, {transform_indices = @transform_2, window_bounds = array<i64: 1, 128>}, {transform_indices = @transform_3, window_bounds = array<i64: 512, 128>}]} {
    %c0_i32 = arith.constant 0 : i32
    %0 = arith.cmpi eq, %arg2, %c0_i32 : i32
    %1 = arith.extui %0 : i1 to i32
    %c0_i32_0 = arith.constant 0 : i32
    %2 = arith.cmpi ne, %1, %c0_i32_0 : i32
    scf.if %2 {
      %cst_10 = arith.constant 0.000000e+00 : f32
      %12 = vector.broadcast %cst_10 : f32 to vector<512x128xf32>
      %c0_11 = arith.constant 0 : index
      %c0_12 = arith.constant 0 : index
      %13 = vector.load %arg7[%c0_11, %c0_12] : memref<512x128xf32, #tpu.memory_space<vmem>>, vector<512x128xf32>
      tpu.vector_store %arg7[%c0_11, %c0_12], %12 {strides = array<i32>} : memref<512x128xf32, #tpu.memory_space<vmem>>, vector<512x128xf32>,
    } else {
    }
    %c0 = arith.constant 0 : index
    %c0_1 = arith.constant 0 : index
    %3 = vector.load %arg7[%c0, %c0_1] : memref<512x128xf32, #tpu.memory_space<vmem>>, vector<512x128xf32>
    %c0_2 = arith.constant 0 : index
    %c0_3 = arith.constant 0 : index
    %4 = vector.load %arg3[%c0_2, %c0_3] : memref<512x256xbf16, #tpu.memory_space<vmem>>, vector<512x256xbf16>
    %c0_4 = arith.constant 0 : index
    %c0_5 = arith.constant 0 : index
    %5 = vector.load %arg4[%c0_4, %c0_5] : memref<256x128xbf16, #tpu.memory_space<vmem>>, vector<256x128xbf16>
    %cst = arith.constant dense<0.000000e+00> : vector<512x128xf32>
    %6 = tpu.matmul %4, %5, %cst {dimension_numbers = #tpu.dot_dimension_numbers<[1], [0], [0], [1], [0, 0, 1, 1], [], []>} : vector<512x256xbf16>, vector<256x128xbf16>, vector<512x128xf32> -> vector<512x128xf32>
    %7 = arith.addf %3, %6 : vector<512x128xf32>
    %c0_6 = arith.constant 0 : index
    %c0_7 = arith.constant 0 : index
    %8 = vector.load %arg7[%c0_6, %c0_7] : memref<512x128xf32, #tpu.memory_space<vmem>>, vector<512x128xf32>
    tpu.vector_store %arg7[%c0_6, %c0_7], %7 {strides = array<i32>} : memref<512x128xf32, #tpu.memory_space<vmem>>, vector<512x128xf32>,
    %c0_i32_8 = arith.constant 0 : i32
    %9 = arith.cmpi eq, %arg2, %c0_i32_8 : i32
    %10 = arith.extui %9 : i1 to i32
    %c0_i32_9 = arith.constant 0 : i32
    %11 = arith.cmpi ne, %10, %c0_i32_9 : i32
    scf.if %11 {
      %c0_10 = arith.constant 0 : index
      %c0_11 = arith.constant 0 : index
      %12 = vector.load %arg7[%c0_10, %c0_11] : memref<512x128xf32, #tpu.memory_space<vmem>>, vector<512x128xf32>
      %c0_12 = arith.constant 0 : index
      %c0_13 = arith.constant 0 : index
      %13 = vector.load %arg5[%c0_12, %c0_13] : memref<1x128xf32, #tpu.memory_space<vmem>>, vector<1x128xf32>
      %14 = vector.broadcast %13 : vector<1x128xf32> to vector<512x128xf32>
      %15 = arith.addf %12, %14 : vector<512x128xf32>
      %cst_14 = arith.constant 0.000000e+00 : f32
      %16 = vector.broadcast %cst_14 : f32 to vector<512x128xf32>
      %17 = arith.maximumf %15, %16 : vector<512x128xf32>
      %18 = arith.truncf %17 : vector<512x128xf32> to vector<512x128xbf16>
      %c0_15 = arith.constant 0 : index
      %c0_16 = arith.constant 0 : index
      %19 = vector.load %arg6[%c0_15, %c0_16] : memref<512x128xbf16, #tpu.memory_space<vmem>>, vector<512x128xbf16>
      tpu.vector_store %arg6[%c0_15, %c0_16], %18 {strides = array<i32>} : memref<512x128xbf16, #tpu.memory_space<vmem>>, vector<512x128xbf16>,
    } else {
    }
    return
  }
  func.func @transform_0(%arg0: i32, %arg1: i32, %arg2: i32) -> (i32, i32) {
    %c0_i32 = arith.constant 0 : i32
    return %arg0, %arg2 : i32, i32
  }
  func.func @transform_1(%arg0: i32, %arg1: i32, %arg2: i32) -> (i32, i32) {
    %c0_i32 = arith.constant 0 : i32
    return %arg2, %arg1 : i32, i32
  }
  func.func @transform_2(%arg0: i32, %arg1: i32, %arg2: i32) -> (i32, i32) {
    %c0_i32 = arith.constant 0 : i32
    %c0_i32_0 = arith.constant 0 : i32
    return %c0_i32, %arg1 : i32, i32
  }
  func.func @transform_3(%arg0: i32, %arg1: i32, %arg2: i32) -> (i32, i32) {
    %c0_i32 = arith.constant 0 : i32
    return %arg0, %arg1 : i32, i32
  }
}

module attributes {stable_mosaic.version = 11 : i64} {
  func.func @_maxpool_kernel(%arg0: i32, %arg1: memref<1x9x9x16xbf16, #tpu.memory_space<vmem>>, %arg2: memref<1x9x9x16xbf16, #tpu.memory_space<vmem>>, %arg3: memref<1x9x9x16xbf16, #tpu.memory_space<vmem>>, %arg4: memref<1x9x9x16xbf16, #tpu.memory_space<vmem>>, %arg5: memref<1x8x8x16xbf16, #tpu.memory_space<vmem>>) attributes {dimension_semantics = [#tpu.dimension_semantics<parallel>], iteration_bounds = array<i64: 2>, scalar_prefetch = 0 : i64, scratch_operands = 0 : i64, tpu.core_type = #tpu.core_type<tc>, window_params = [{transform_indices = @transform_0, window_bounds = array<i64: 1, 9, 9, 16>}, {transform_indices = @transform_1, window_bounds = array<i64: 1, 9, 9, 16>}, {transform_indices = @transform_2, window_bounds = array<i64: 1, 9, 9, 16>}, {transform_indices = @transform_3, window_bounds = array<i64: 1, 9, 9, 16>}, {transform_indices = @transform_4, window_bounds = array<i64: 1, 8, 8, 16>}]} {
    %c0 = arith.constant 0 : index
    %c0_0 = arith.constant 0 : index
    %c0_1 = arith.constant 0 : index
    %c0_2 = arith.constant 0 : index
    %0 = vector.load %arg1[%c0, %c0_0, %c0_1, %c0_2] : memref<1x9x9x16xbf16, #tpu.memory_space<vmem>>, vector<1x8x8x16xbf16>
    %1 = vector.shape_cast %0 : vector<1x8x8x16xbf16> to vector<8x8x16xbf16>
    %c0_3 = arith.constant 0 : index
    %c0_4 = arith.constant 0 : index
    %c0_5 = arith.constant 0 : index
    %c0_6 = arith.constant 0 : index
    %2 = vector.load %arg2[%c0_3, %c0_4, %c0_5, %c0_6] : memref<1x9x9x16xbf16, #tpu.memory_space<vmem>>, vector<1x8x8x16xbf16>
    %3 = vector.shape_cast %2 : vector<1x8x8x16xbf16> to vector<8x8x16xbf16>
    %4 = arith.maximumf %1, %3 : vector<8x8x16xbf16>
    %c0_7 = arith.constant 0 : index
    %c0_8 = arith.constant 0 : index
    %c1 = arith.constant 1 : index
    %c0_9 = arith.constant 0 : index
    %5 = vector.load %arg1[%c0_7, %c0_8, %c1, %c0_9] : memref<1x9x9x16xbf16, #tpu.memory_space<vmem>>, vector<1x8x8x16xbf16>
    %6 = vector.shape_cast %5 : vector<1x8x8x16xbf16> to vector<8x8x16xbf16>
    %7 = arith.maximumf %4, %6 : vector<8x8x16xbf16>
    %c0_10 = arith.constant 0 : index
    %c0_11 = arith.constant 0 : index
    %c0_12 = arith.constant 0 : index
    %c0_13 = arith.constant 0 : index
    %8 = vector.load %arg3[%c0_10, %c0_11, %c0_12, %c0_13] : memref<1x9x9x16xbf16, #tpu.memory_space<vmem>>, vector<1x8x8x16xbf16>
    %9 = vector.shape_cast %8 : vector<1x8x8x16xbf16> to vector<8x8x16xbf16>
    %10 = arith.maximumf %7, %9 : vector<8x8x16xbf16>
    %c0_14 = arith.constant 0 : index
    %c0_15 = arith.constant 0 : index
    %c0_16 = arith.constant 0 : index
    %c0_17 = arith.constant 0 : index
    %11 = vector.load %arg4[%c0_14, %c0_15, %c0_16, %c0_17] : memref<1x9x9x16xbf16, #tpu.memory_space<vmem>>, vector<1x8x8x16xbf16>
    %12 = vector.shape_cast %11 : vector<1x8x8x16xbf16> to vector<8x8x16xbf16>
    %13 = arith.maximumf %10, %12 : vector<8x8x16xbf16>
    %c0_18 = arith.constant 0 : index
    %c0_19 = arith.constant 0 : index
    %c1_20 = arith.constant 1 : index
    %c0_21 = arith.constant 0 : index
    %14 = vector.load %arg3[%c0_18, %c0_19, %c1_20, %c0_21] : memref<1x9x9x16xbf16, #tpu.memory_space<vmem>>, vector<1x8x8x16xbf16>
    %15 = vector.shape_cast %14 : vector<1x8x8x16xbf16> to vector<8x8x16xbf16>
    %16 = arith.maximumf %13, %15 : vector<8x8x16xbf16>
    %c0_22 = arith.constant 0 : index
    %c1_23 = arith.constant 1 : index
    %c0_24 = arith.constant 0 : index
    %c0_25 = arith.constant 0 : index
    %17 = vector.load %arg1[%c0_22, %c1_23, %c0_24, %c0_25] : memref<1x9x9x16xbf16, #tpu.memory_space<vmem>>, vector<1x8x8x16xbf16>
    %18 = vector.shape_cast %17 : vector<1x8x8x16xbf16> to vector<8x8x16xbf16>
    %19 = arith.maximumf %16, %18 : vector<8x8x16xbf16>
    %c0_26 = arith.constant 0 : index
    %c1_27 = arith.constant 1 : index
    %c0_28 = arith.constant 0 : index
    %c0_29 = arith.constant 0 : index
    %20 = vector.load %arg2[%c0_26, %c1_27, %c0_28, %c0_29] : memref<1x9x9x16xbf16, #tpu.memory_space<vmem>>, vector<1x8x8x16xbf16>
    %21 = vector.shape_cast %20 : vector<1x8x8x16xbf16> to vector<8x8x16xbf16>
    %22 = arith.maximumf %19, %21 : vector<8x8x16xbf16>
    %c0_30 = arith.constant 0 : index
    %c1_31 = arith.constant 1 : index
    %c1_32 = arith.constant 1 : index
    %c0_33 = arith.constant 0 : index
    %23 = vector.load %arg1[%c0_30, %c1_31, %c1_32, %c0_33] : memref<1x9x9x16xbf16, #tpu.memory_space<vmem>>, vector<1x8x8x16xbf16>
    %24 = vector.shape_cast %23 : vector<1x8x8x16xbf16> to vector<8x8x16xbf16>
    %25 = arith.maximumf %22, %24 : vector<8x8x16xbf16>
    %c0_34 = arith.constant 0 : index
    %c0_35 = arith.constant 0 : index
    %c0_36 = arith.constant 0 : index
    %c0_37 = arith.constant 0 : index
    %26 = vector.load %arg5[%c0_34, %c0_35, %c0_36, %c0_37] : memref<1x8x8x16xbf16, #tpu.memory_space<vmem>>, vector<1x8x8x16xbf16>
    %27 = vector.shape_cast %26 : vector<1x8x8x16xbf16> to vector<8x8x16xbf16>
    %28 = vector.shape_cast %25 : vector<8x8x16xbf16> to vector<1x8x8x16xbf16>
    tpu.vector_store %arg5[%c0_34, %c0_35, %c0_36, %c0_37], %28 {strides = array<i32>} : memref<1x8x8x16xbf16, #tpu.memory_space<vmem>>, vector<1x8x8x16xbf16>,
    return
  }
  func.func @transform_0(%arg0: i32) -> (i32, i32, i32, i32) {
    %c0_i32 = arith.constant 0 : i32
    %c0_i32_0 = arith.constant 0 : i32
    %c0_i32_1 = arith.constant 0 : i32
    %c0_i32_2 = arith.constant 0 : i32
    return %arg0, %c0_i32, %c0_i32_0, %c0_i32_1 : i32, i32, i32, i32
  }
  func.func @transform_1(%arg0: i32) -> (i32, i32, i32, i32) {
    %c0_i32 = arith.constant 0 : i32
    %c0_i32_0 = arith.constant 0 : i32
    %c0_i32_1 = arith.constant 0 : i32
    %c0_i32_2 = arith.constant 0 : i32
    return %arg0, %c0_i32, %c0_i32_0, %c0_i32_1 : i32, i32, i32, i32
  }
  func.func @transform_2(%arg0: i32) -> (i32, i32, i32, i32) {
    %c0_i32 = arith.constant 0 : i32
    %c0_i32_0 = arith.constant 0 : i32
    %c0_i32_1 = arith.constant 0 : i32
    %c0_i32_2 = arith.constant 0 : i32
    return %arg0, %c0_i32, %c0_i32_0, %c0_i32_1 : i32, i32, i32, i32
  }
  func.func @transform_3(%arg0: i32) -> (i32, i32, i32, i32) {
    %c0_i32 = arith.constant 0 : i32
    %c0_i32_0 = arith.constant 0 : i32
    %c0_i32_1 = arith.constant 0 : i32
    %c0_i32_2 = arith.constant 0 : i32
    return %arg0, %c0_i32, %c0_i32_0, %c0_i32_1 : i32, i32, i32, i32
  }
  func.func @transform_4(%arg0: i32) -> (i32, i32, i32, i32) {
    %c0_i32 = arith.constant 0 : i32
    %c0_i32_0 = arith.constant 0 : i32
    %c0_i32_1 = arith.constant 0 : i32
    %c0_i32_2 = arith.constant 0 : i32
    return %arg0, %c0_i32, %c0_i32_0, %c0_i32_1 : i32, i32, i32, i32
  }
}

module attributes {stable_mosaic.version = 11 : i64} {
  func.func @_direct_conv_kernel(%arg0: i32, %arg1: i32, %arg2: memref<1x64x16xbf16, #tpu.memory_space<vmem>>, %arg3: memref<16x8xbf16, #tpu.memory_space<vmem>>, %arg4: memref<1x8xf32, #tpu.memory_space<vmem>>, %arg5: memref<1x64x8xbf16, #tpu.memory_space<vmem>>) attributes {dimension_semantics = [#tpu.dimension_semantics<parallel>, #tpu.dimension_semantics<parallel>], iteration_bounds = array<i64: 1, 2>, scalar_prefetch = 0 : i64, scratch_operands = 0 : i64, tpu.core_type = #tpu.core_type<tc>, window_params = [{transform_indices = @transform_0, window_bounds = array<i64: 1, 64, 16>}, {transform_indices = @transform_1, window_bounds = array<i64: 16, 8>}, {transform_indices = @transform_2, window_bounds = array<i64: 1, 8>}, {transform_indices = @transform_3, window_bounds = array<i64: 1, 64, 8>}]} {
    %cst = arith.constant 0.000000e+00 : f32
    %0 = vector.broadcast %cst : f32 to vector<64x8xf32>
    %c0 = arith.constant 0 : index
    %c0_0 = arith.constant 0 : index
    %c0_1 = arith.constant 0 : index
    %1 = vector.load %arg2[%c0, %c0_0, %c0_1] : memref<1x64x16xbf16, #tpu.memory_space<vmem>>, vector<1x64x16xbf16>
    %2 = vector.shape_cast %1 : vector<1x64x16xbf16> to vector<64x16xbf16>
    %c0_2 = arith.constant 0 : index
    %c0_3 = arith.constant 0 : index
    %3 = vector.load %arg3[%c0_2, %c0_3] : memref<16x8xbf16, #tpu.memory_space<vmem>>, vector<16x8xbf16>
    %cst_4 = arith.constant dense<0.000000e+00> : vector<64x8xf32>
    %4 = tpu.matmul %2, %3, %cst_4 {dimension_numbers = #tpu.dot_dimension_numbers<[1], [0], [0], [1], [0, 0, 1, 1], [], []>} : vector<64x16xbf16>, vector<16x8xbf16>, vector<64x8xf32> -> vector<64x8xf32>
    %5 = arith.addf %0, %4 : vector<64x8xf32>
    %c0_5 = arith.constant 0 : index
    %c0_6 = arith.constant 0 : index
    %6 = vector.load %arg4[%c0_5, %c0_6] : memref<1x8xf32, #tpu.memory_space<vmem>>, vector<1x8xf32>
    %7 = vector.broadcast %6 : vector<1x8xf32> to vector<64x8xf32>
    %8 = arith.addf %5, %7 : vector<64x8xf32>
    %cst_7 = arith.constant 0.000000e+00 : f32
    %9 = vector.broadcast %cst_7 : f32 to vector<64x8xf32>
    %10 = arith.maximumf %8, %9 : vector<64x8xf32>
    %11 = arith.truncf %10 : vector<64x8xf32> to vector<64x8xbf16>
    %c0_8 = arith.constant 0 : index
    %c0_9 = arith.constant 0 : index
    %c0_10 = arith.constant 0 : index
    %12 = vector.load %arg5[%c0_8, %c0_9, %c0_10] : memref<1x64x8xbf16, #tpu.memory_space<vmem>>, vector<1x64x8xbf16>
    %13 = vector.shape_cast %12 : vector<1x64x8xbf16> to vector<64x8xbf16>
    %14 = vector.shape_cast %11 : vector<64x8xbf16> to vector<1x64x8xbf16>
    tpu.vector_store %arg5[%c0_8, %c0_9, %c0_10], %14 {strides = array<i32>} : memref<1x64x8xbf16, #tpu.memory_space<vmem>>, vector<1x64x8xbf16>,
    return
  }
  func.func @transform_0(%arg0: i32, %arg1: i32) -> (i32, i32, i32) {
    %c0_i32 = arith.constant 0 : i32
    %c0_i32_0 = arith.constant 0 : i32
    %c0_i32_1 = arith.constant 0 : i32
    return %arg1, %c0_i32, %c0_i32_0 : i32, i32, i32
  }
  func.func @transform_1(%arg0: i32, %arg1: i32) -> (i32, i32) {
    %c0_i32 = arith.constant 0 : i32
    %c0_i32_0 = arith.constant 0 : i32
    return %c0_i32, %arg0 : i32, i32
  }
  func.func @transform_2(%arg0: i32, %arg1: i32) -> (i32, i32) {
    %c0_i32 = arith.constant 0 : i32
    %c0_i32_0 = arith.constant 0 : i32
    return %c0_i32, %arg0 : i32, i32
  }
  func.func @transform_3(%arg0: i32, %arg1: i32) -> (i32, i32, i32) {
    %c0_i32 = arith.constant 0 : i32
    %c0_i32_0 = arith.constant 0 : i32
    return %arg1, %c0_i32, %arg0 : i32, i32, i32
  }
}

module attributes {stable_mosaic.version = 11 : i64} {
  func.func @_direct_conv_kernel(%arg0: i32, %arg1: i32, %arg2: memref<1x110x8xbf16, #tpu.memory_space<vmem>>, %arg3: memref<72x8xbf16, #tpu.memory_space<vmem>>, %arg4: memref<1x8xf32, #tpu.memory_space<vmem>>, %arg5: memref<1x80x8xbf16, #tpu.memory_space<vmem>>) attributes {dimension_semantics = [#tpu.dimension_semantics<parallel>, #tpu.dimension_semantics<parallel>], iteration_bounds = array<i64: 1, 2>, scalar_prefetch = 0 : i64, scratch_operands = 0 : i64, tpu.core_type = #tpu.core_type<tc>, window_params = [{transform_indices = @transform_0, window_bounds = array<i64: 1, 110, 8>}, {transform_indices = @transform_1, window_bounds = array<i64: 72, 8>}, {transform_indices = @transform_2, window_bounds = array<i64: 1, 8>}, {transform_indices = @transform_3, window_bounds = array<i64: 1, 80, 8>}]} {
    %cst = arith.constant 0.000000e+00 : f32
    %0 = vector.broadcast %cst : f32 to vector<80x8xf32>
    %c0 = arith.constant 0 : index
    %c0_0 = arith.constant 0 : index
    %c0_1 = arith.constant 0 : index
    %1 = vector.load %arg2[%c0, %c0_0, %c0_1] : memref<1x110x8xbf16, #tpu.memory_space<vmem>>, vector<1x80x8xbf16>
    %2 = vector.shape_cast %1 : vector<1x80x8xbf16> to vector<80x8xbf16>
    %c0_2 = arith.constant 0 : index
    %c0_3 = arith.constant 0 : index
    %3 = vector.load %arg3[%c0_2, %c0_3] : memref<72x8xbf16, #tpu.memory_space<vmem>>, vector<8x8xbf16>
    %cst_4 = arith.constant dense<0.000000e+00> : vector<80x8xf32>
    %4 = tpu.matmul %2, %3, %cst_4 {dimension_numbers = #tpu.dot_dimension_numbers<[1], [0], [0], [1], [0, 0, 1, 1], [], []>} : vector<80x8xbf16>, vector<8x8xbf16>, vector<80x8xf32> -> vector<80x8xf32>
    %5 = arith.addf %0, %4 : vector<80x8xf32>
    %c0_5 = arith.constant 0 : index
    %c1 = arith.constant 1 : index
    %c0_6 = arith.constant 0 : index
    %6 = vector.load %arg2[%c0_5, %c1, %c0_6] : memref<1x110x8xbf16, #tpu.memory_space<vmem>>, vector<1x80x8xbf16>
    %7 = vector.shape_cast %6 : vector<1x80x8xbf16> to vector<80x8xbf16>
    %c8 = arith.constant 8 : index
    %c0_7 = arith.constant 0 : index
    %8 = vector.load %arg3[%c8, %c0_7] : memref<72x8xbf16, #tpu.memory_space<vmem>>, vector<8x8xbf16>
    %cst_8 = arith.constant dense<0.000000e+00> : vector<80x8xf32>
    %9 = tpu.matmul %7, %8, %cst_8 {dimension_numbers = #tpu.dot_dimension_numbers<[1], [0], [0], [1], [0, 0, 1, 1], [], []>} : vector<80x8xbf16>, vector<8x8xbf16>, vector<80x8xf32> -> vector<80x8xf32>
    %10 = arith.addf %5, %9 : vector<80x8xf32>
    %c0_9 = arith.constant 0 : index
    %c2 = arith.constant 2 : index
    %c0_10 = arith.constant 0 : index
    %11 = vector.load %arg2[%c0_9, %c2, %c0_10] : memref<1x110x8xbf16, #tpu.memory_space<vmem>>, vector<1x80x8xbf16>
    %12 = vector.shape_cast %11 : vector<1x80x8xbf16> to vector<80x8xbf16>
    %c16 = arith.constant 16 : index
    %c0_11 = arith.constant 0 : index
    %13 = vector.load %arg3[%c16, %c0_11] : memref<72x8xbf16, #tpu.memory_space<vmem>>, vector<8x8xbf16>
    %cst_12 = arith.constant dense<0.000000e+00> : vector<80x8xf32>
    %14 = tpu.matmul %12, %13, %cst_12 {dimension_numbers = #tpu.dot_dimension_numbers<[1], [0], [0], [1], [0, 0, 1, 1], [], []>} : vector<80x8xbf16>, vector<8x8xbf16>, vector<80x8xf32> -> vector<80x8xf32>
    %15 = arith.addf %10, %14 : vector<80x8xf32>
    %c0_13 = arith.constant 0 : index
    %c10 = arith.constant 10 : index
    %c0_14 = arith.constant 0 : index
    %16 = vector.load %arg2[%c0_13, %c10, %c0_14] : memref<1x110x8xbf16, #tpu.memory_space<vmem>>, vector<1x80x8xbf16>
    %17 = vector.shape_cast %16 : vector<1x80x8xbf16> to vector<80x8xbf16>
    %c24 = arith.constant 24 : index
    %c0_15 = arith.constant 0 : index
    %18 = vector.load %arg3[%c24, %c0_15] : memref<72x8xbf16, #tpu.memory_space<vmem>>, vector<8x8xbf16>
    %cst_16 = arith.constant dense<0.000000e+00> : vector<80x8xf32>
    %19 = tpu.matmul %17, %18, %cst_16 {dimension_numbers = #tpu.dot_dimension_numbers<[1], [0], [0], [1], [0, 0, 1, 1], [], []>} : vector<80x8xbf16>, vector<8x8xbf16>, vector<80x8xf32> -> vector<80x8xf32>
    %20 = arith.addf %15, %19 : vector<80x8xf32>
    %c0_17 = arith.constant 0 : index
    %c11 = arith.constant 11 : index
    %c0_18 = arith.constant 0 : index
    %21 = vector.load %arg2[%c0_17, %c11, %c0_18] : memref<1x110x8xbf16, #tpu.memory_space<vmem>>, vector<1x80x8xbf16>
    %22 = vector.shape_cast %21 : vector<1x80x8xbf16> to vector<80x8xbf16>
    %c32 = arith.constant 32 : index
    %c0_19 = arith.constant 0 : index
    %23 = vector.load %arg3[%c32, %c0_19] : memref<72x8xbf16, #tpu.memory_space<vmem>>, vector<8x8xbf16>
    %cst_20 = arith.constant dense<0.000000e+00> : vector<80x8xf32>
    %24 = tpu.matmul %22, %23, %cst_20 {dimension_numbers = #tpu.dot_dimension_numbers<[1], [0], [0], [1], [0, 0, 1, 1], [], []>} : vector<80x8xbf16>, vector<8x8xbf16>, vector<80x8xf32> -> vector<80x8xf32>
    %25 = arith.addf %20, %24 : vector<80x8xf32>
    %c0_21 = arith.constant 0 : index
    %c12 = arith.constant 12 : index
    %c0_22 = arith.constant 0 : index
    %26 = vector.load %arg2[%c0_21, %c12, %c0_22] : memref<1x110x8xbf16, #tpu.memory_space<vmem>>, vector<1x80x8xbf16>
    %27 = vector.shape_cast %26 : vector<1x80x8xbf16> to vector<80x8xbf16>
    %c40 = arith.constant 40 : index
    %c0_23 = arith.constant 0 : index
    %28 = vector.load %arg3[%c40, %c0_23] : memref<72x8xbf16, #tpu.memory_space<vmem>>, vector<8x8xbf16>
    %cst_24 = arith.constant dense<0.000000e+00> : vector<80x8xf32>
    %29 = tpu.matmul %27, %28, %cst_24 {dimension_numbers = #tpu.dot_dimension_numbers<[1], [0], [0], [1], [0, 0, 1, 1], [], []>} : vector<80x8xbf16>, vector<8x8xbf16>, vector<80x8xf32> -> vector<80x8xf32>
    %30 = arith.addf %25, %29 : vector<80x8xf32>
    %c0_25 = arith.constant 0 : index
    %c20 = arith.constant 20 : index
    %c0_26 = arith.constant 0 : index
    %31 = vector.load %arg2[%c0_25, %c20, %c0_26] : memref<1x110x8xbf16, #tpu.memory_space<vmem>>, vector<1x80x8xbf16>
    %32 = vector.shape_cast %31 : vector<1x80x8xbf16> to vector<80x8xbf16>
    %c48 = arith.constant 48 : index
    %c0_27 = arith.constant 0 : index
    %33 = vector.load %arg3[%c48, %c0_27] : memref<72x8xbf16, #tpu.memory_space<vmem>>, vector<8x8xbf16>
    %cst_28 = arith.constant dense<0.000000e+00> : vector<80x8xf32>
    %34 = tpu.matmul %32, %33, %cst_28 {dimension_numbers = #tpu.dot_dimension_numbers<[1], [0], [0], [1], [0, 0, 1, 1], [], []>} : vector<80x8xbf16>, vector<8x8xbf16>, vector<80x8xf32> -> vector<80x8xf32>
    %35 = arith.addf %30, %34 : vector<80x8xf32>
    %c0_29 = arith.constant 0 : index
    %c21 = arith.constant 21 : index
    %c0_30 = arith.constant 0 : index
    %36 = vector.load %arg2[%c0_29, %c21, %c0_30] : memref<1x110x8xbf16, #tpu.memory_space<vmem>>, vector<1x80x8xbf16>
    %37 = vector.shape_cast %36 : vector<1x80x8xbf16> to vector<80x8xbf16>
    %c56 = arith.constant 56 : index
    %c0_31 = arith.constant 0 : index
    %38 = vector.load %arg3[%c56, %c0_31] : memref<72x8xbf16, #tpu.memory_space<vmem>>, vector<8x8xbf16>
    %cst_32 = arith.constant dense<0.000000e+00> : vector<80x8xf32>
    %39 = tpu.matmul %37, %38, %cst_32 {dimension_numbers = #tpu.dot_dimension_numbers<[1], [0], [0], [1], [0, 0, 1, 1], [], []>} : vector<80x8xbf16>, vector<8x8xbf16>, vector<80x8xf32> -> vector<80x8xf32>
    %40 = arith.addf %35, %39 : vector<80x8xf32>
    %c0_33 = arith.constant 0 : index
    %c22 = arith.constant 22 : index
    %c0_34 = arith.constant 0 : index
    %41 = vector.load %arg2[%c0_33, %c22, %c0_34] : memref<1x110x8xbf16, #tpu.memory_space<vmem>>, vector<1x80x8xbf16>
    %42 = vector.shape_cast %41 : vector<1x80x8xbf16> to vector<80x8xbf16>
    %c64 = arith.constant 64 : index
    %c0_35 = arith.constant 0 : index
    %43 = vector.load %arg3[%c64, %c0_35] : memref<72x8xbf16, #tpu.memory_space<vmem>>, vector<8x8xbf16>
    %cst_36 = arith.constant dense<0.000000e+00> : vector<80x8xf32>
    %44 = tpu.matmul %42, %43, %cst_36 {dimension_numbers = #tpu.dot_dimension_numbers<[1], [0], [0], [1], [0, 0, 1, 1], [], []>} : vector<80x8xbf16>, vector<8x8xbf16>, vector<80x8xf32> -> vector<80x8xf32>
    %45 = arith.addf %40, %44 : vector<80x8xf32>
    %c0_37 = arith.constant 0 : index
    %c0_38 = arith.constant 0 : index
    %46 = vector.load %arg4[%c0_37, %c0_38] : memref<1x8xf32, #tpu.memory_space<vmem>>, vector<1x8xf32>
    %47 = vector.broadcast %46 : vector<1x8xf32> to vector<80x8xf32>
    %48 = arith.addf %45, %47 : vector<80x8xf32>
    %cst_39 = arith.constant 0.000000e+00 : f32
    %49 = vector.broadcast %cst_39 : f32 to vector<80x8xf32>
    %50 = arith.maximumf %48, %49 : vector<80x8xf32>
    %51 = arith.truncf %50 : vector<80x8xf32> to vector<80x8xbf16>
    %c0_40 = arith.constant 0 : index
    %c0_41 = arith.constant 0 : index
    %c0_42 = arith.constant 0 : index
    %52 = vector.load %arg5[%c0_40, %c0_41, %c0_42] : memref<1x80x8xbf16, #tpu.memory_space<vmem>>, vector<1x80x8xbf16>
    %53 = vector.shape_cast %52 : vector<1x80x8xbf16> to vector<80x8xbf16>
    %54 = vector.shape_cast %51 : vector<80x8xbf16> to vector<1x80x8xbf16>
    tpu.vector_store %arg5[%c0_40, %c0_41, %c0_42], %54 {strides = array<i32>} : memref<1x80x8xbf16, #tpu.memory_space<vmem>>, vector<1x80x8xbf16>,
    return
  }
  func.func @transform_0(%arg0: i32, %arg1: i32) -> (i32, i32, i32) {
    %c0_i32 = arith.constant 0 : i32
    %c0_i32_0 = arith.constant 0 : i32
    %c0_i32_1 = arith.constant 0 : i32
    return %arg1, %c0_i32, %c0_i32_0 : i32, i32, i32
  }
  func.func @transform_1(%arg0: i32, %arg1: i32) -> (i32, i32) {
    %c0_i32 = arith.constant 0 : i32
    %c0_i32_0 = arith.constant 0 : i32
    return %c0_i32, %arg0 : i32, i32
  }
  func.func @transform_2(%arg0: i32, %arg1: i32) -> (i32, i32) {
    %c0_i32 = arith.constant 0 : i32
    %c0_i32_0 = arith.constant 0 : i32
    return %c0_i32, %arg0 : i32, i32
  }
  func.func @transform_3(%arg0: i32, %arg1: i32) -> (i32, i32, i32) {
    %c0_i32 = arith.constant 0 : i32
    %c0_i32_0 = arith.constant 0 : i32
    return %arg1, %c0_i32, %arg0 : i32, i32, i32
  }
}

module attributes {stable_mosaic.version = 11 : i64} {
  func.func @_direct_conv_kernel(%arg0: i32, %arg1: i32, %arg2: memref<1x64x16xbf16, #tpu.memory_space<vmem>>, %arg3: memref<16x32xbf16, #tpu.memory_space<vmem>>, %arg4: memref<1x32xf32, #tpu.memory_space<vmem>>, %arg5: memref<1x64x32xbf16, #tpu.memory_space<vmem>>) attributes {dimension_semantics = [#tpu.dimension_semantics<parallel>, #tpu.dimension_semantics<parallel>], iteration_bounds = array<i64: 1, 2>, scalar_prefetch = 0 : i64, scratch_operands = 0 : i64, tpu.core_type = #tpu.core_type<tc>, window_params = [{transform_indices = @transform_0, window_bounds = array<i64: 1, 64, 16>}, {transform_indices = @transform_1, window_bounds = array<i64: 16, 32>}, {transform_indices = @transform_2, window_bounds = array<i64: 1, 32>}, {transform_indices = @transform_3, window_bounds = array<i64: 1, 64, 32>}]} {
    %cst = arith.constant 0.000000e+00 : f32
    %0 = vector.broadcast %cst : f32 to vector<64x32xf32>
    %c0 = arith.constant 0 : index
    %c0_0 = arith.constant 0 : index
    %c0_1 = arith.constant 0 : index
    %1 = vector.load %arg2[%c0, %c0_0, %c0_1] : memref<1x64x16xbf16, #tpu.memory_space<vmem>>, vector<1x64x16xbf16>
    %2 = vector.shape_cast %1 : vector<1x64x16xbf16> to vector<64x16xbf16>
    %c0_2 = arith.constant 0 : index
    %c0_3 = arith.constant 0 : index
    %3 = vector.load %arg3[%c0_2, %c0_3] : memref<16x32xbf16, #tpu.memory_space<vmem>>, vector<16x32xbf16>
    %cst_4 = arith.constant dense<0.000000e+00> : vector<64x32xf32>
    %4 = tpu.matmul %2, %3, %cst_4 {dimension_numbers = #tpu.dot_dimension_numbers<[1], [0], [0], [1], [0, 0, 1, 1], [], []>} : vector<64x16xbf16>, vector<16x32xbf16>, vector<64x32xf32> -> vector<64x32xf32>
    %5 = arith.addf %0, %4 : vector<64x32xf32>
    %c0_5 = arith.constant 0 : index
    %c0_6 = arith.constant 0 : index
    %6 = vector.load %arg4[%c0_5, %c0_6] : memref<1x32xf32, #tpu.memory_space<vmem>>, vector<1x32xf32>
    %7 = vector.broadcast %6 : vector<1x32xf32> to vector<64x32xf32>
    %8 = arith.addf %5, %7 : vector<64x32xf32>
    %9 = arith.truncf %8 : vector<64x32xf32> to vector<64x32xbf16>
    %c0_7 = arith.constant 0 : index
    %c0_8 = arith.constant 0 : index
    %c0_9 = arith.constant 0 : index
    %10 = vector.load %arg5[%c0_7, %c0_8, %c0_9] : memref<1x64x32xbf16, #tpu.memory_space<vmem>>, vector<1x64x32xbf16>
    %11 = vector.shape_cast %10 : vector<1x64x32xbf16> to vector<64x32xbf16>
    %12 = vector.shape_cast %9 : vector<64x32xbf16> to vector<1x64x32xbf16>
    tpu.vector_store %arg5[%c0_7, %c0_8, %c0_9], %12 {strides = array<i32>} : memref<1x64x32xbf16, #tpu.memory_space<vmem>>, vector<1x64x32xbf16>,
    return
  }
  func.func @transform_0(%arg0: i32, %arg1: i32) -> (i32, i32, i32) {
    %c0_i32 = arith.constant 0 : i32
    %c0_i32_0 = arith.constant 0 : i32
    %c0_i32_1 = arith.constant 0 : i32
    return %arg1, %c0_i32, %c0_i32_0 : i32, i32, i32
  }
  func.func @transform_1(%arg0: i32, %arg1: i32) -> (i32, i32) {
    %c0_i32 = arith.constant 0 : i32
    %c0_i32_0 = arith.constant 0 : i32
    return %c0_i32, %arg0 : i32, i32
  }
  func.func @transform_2(%arg0: i32, %arg1: i32) -> (i32, i32) {
    %c0_i32 = arith.constant 0 : i32
    %c0_i32_0 = arith.constant 0 : i32
    return %c0_i32, %arg0 : i32, i32
  }
  func.func @transform_3(%arg0: i32, %arg1: i32) -> (i32, i32, i32) {
    %c0_i32 = arith.constant 0 : i32
    %c0_i32_0 = arith.constant 0 : i32
    return %arg1, %c0_i32, %arg0 : i32, i32, i32
  }
}

module attributes {stable_mosaic.version = 11 : i64} {
  func.func @_direct_conv_kernel(%arg0: i32, %arg1: i32, %arg2: memref<1x64x8xbf16, #tpu.memory_space<vmem>>, %arg3: memref<8x32xbf16, #tpu.memory_space<vmem>>, %arg4: memref<1x32xf32, #tpu.memory_space<vmem>>, %arg5: memref<1x64x32xbf16, #tpu.memory_space<vmem>>, %arg6: memref<1x64x32xbf16, #tpu.memory_space<vmem>>) attributes {dimension_semantics = [#tpu.dimension_semantics<parallel>, #tpu.dimension_semantics<parallel>], iteration_bounds = array<i64: 1, 2>, scalar_prefetch = 0 : i64, scratch_operands = 0 : i64, tpu.core_type = #tpu.core_type<tc>, window_params = [{transform_indices = @transform_0, window_bounds = array<i64: 1, 64, 8>}, {transform_indices = @transform_1, window_bounds = array<i64: 8, 32>}, {transform_indices = @transform_2, window_bounds = array<i64: 1, 32>}, {transform_indices = @transform_3, window_bounds = array<i64: 1, 64, 32>}, {transform_indices = @transform_4, window_bounds = array<i64: 1, 64, 32>}]} {
    %cst = arith.constant 0.000000e+00 : f32
    %0 = vector.broadcast %cst : f32 to vector<64x32xf32>
    %c0 = arith.constant 0 : index
    %c0_0 = arith.constant 0 : index
    %c0_1 = arith.constant 0 : index
    %1 = vector.load %arg2[%c0, %c0_0, %c0_1] : memref<1x64x8xbf16, #tpu.memory_space<vmem>>, vector<1x64x8xbf16>
    %2 = vector.shape_cast %1 : vector<1x64x8xbf16> to vector<64x8xbf16>
    %c0_2 = arith.constant 0 : index
    %c0_3 = arith.constant 0 : index
    %3 = vector.load %arg3[%c0_2, %c0_3] : memref<8x32xbf16, #tpu.memory_space<vmem>>, vector<8x32xbf16>
    %cst_4 = arith.constant dense<0.000000e+00> : vector<64x32xf32>
    %4 = tpu.matmul %2, %3, %cst_4 {dimension_numbers = #tpu.dot_dimension_numbers<[1], [0], [0], [1], [0, 0, 1, 1], [], []>} : vector<64x8xbf16>, vector<8x32xbf16>, vector<64x32xf32> -> vector<64x32xf32>
    %5 = arith.addf %0, %4 : vector<64x32xf32>
    %c0_5 = arith.constant 0 : index
    %c0_6 = arith.constant 0 : index
    %6 = vector.load %arg4[%c0_5, %c0_6] : memref<1x32xf32, #tpu.memory_space<vmem>>, vector<1x32xf32>
    %7 = vector.broadcast %6 : vector<1x32xf32> to vector<64x32xf32>
    %8 = arith.addf %5, %7 : vector<64x32xf32>
    %c0_7 = arith.constant 0 : index
    %c0_8 = arith.constant 0 : index
    %c0_9 = arith.constant 0 : index
    %9 = vector.load %arg5[%c0_7, %c0_8, %c0_9] : memref<1x64x32xbf16, #tpu.memory_space<vmem>>, vector<1x64x32xbf16>
    %10 = vector.shape_cast %9 : vector<1x64x32xbf16> to vector<64x32xbf16>
    %11 = arith.extf %10 : vector<64x32xbf16> to vector<64x32xf32>
    %12 = arith.addf %8, %11 : vector<64x32xf32>
    %cst_10 = arith.constant 0.000000e+00 : f32
    %13 = vector.broadcast %cst_10 : f32 to vector<64x32xf32>
    %14 = arith.maximumf %12, %13 : vector<64x32xf32>
    %15 = arith.truncf %14 : vector<64x32xf32> to vector<64x32xbf16>
    %c0_11 = arith.constant 0 : index
    %c0_12 = arith.constant 0 : index
    %c0_13 = arith.constant 0 : index
    %16 = vector.load %arg6[%c0_11, %c0_12, %c0_13] : memref<1x64x32xbf16, #tpu.memory_space<vmem>>, vector<1x64x32xbf16>
    %17 = vector.shape_cast %16 : vector<1x64x32xbf16> to vector<64x32xbf16>
    %18 = vector.shape_cast %15 : vector<64x32xbf16> to vector<1x64x32xbf16>
    tpu.vector_store %arg6[%c0_11, %c0_12, %c0_13], %18 {strides = array<i32>} : memref<1x64x32xbf16, #tpu.memory_space<vmem>>, vector<1x64x32xbf16>,
    return
  }
  func.func @transform_0(%arg0: i32, %arg1: i32) -> (i32, i32, i32) {
    %c0_i32 = arith.constant 0 : i32
    %c0_i32_0 = arith.constant 0 : i32
    %c0_i32_1 = arith.constant 0 : i32
    return %arg1, %c0_i32, %c0_i32_0 : i32, i32, i32
  }
  func.func @transform_1(%arg0: i32, %arg1: i32) -> (i32, i32) {
    %c0_i32 = arith.constant 0 : i32
    %c0_i32_0 = arith.constant 0 : i32
    return %c0_i32, %arg0 : i32, i32
  }
  func.func @transform_2(%arg0: i32, %arg1: i32) -> (i32, i32) {
    %c0_i32 = arith.constant 0 : i32
    %c0_i32_0 = arith.constant 0 : i32
    return %c0_i32, %arg0 : i32, i32
  }
  func.func @transform_3(%arg0: i32, %arg1: i32) -> (i32, i32, i32) {
    %c0_i32 = arith.constant 0 : i32
    %c0_i32_0 = arith.constant 0 : i32
    return %arg1, %c0_i32, %arg0 : i32, i32, i32
  }
  func.func @transform_4(%arg0: i32, %arg1: i32) -> (i32, i32, i32) {
    %c0_i32 = arith.constant 0 : i32
    %c0_i32_0 = arith.constant 0 : i32
    return %arg1, %c0_i32, %arg0 : i32, i32, i32
  }
}

module attributes {stable_mosaic.version = 11 : i64} {
  func.func @_direct_conv_kernel(%arg0: i32, %arg1: i32, %arg2: memref<1x64x32xbf16, #tpu.memory_space<vmem>>, %arg3: memref<32x8xbf16, #tpu.memory_space<vmem>>, %arg4: memref<1x8xf32, #tpu.memory_space<vmem>>, %arg5: memref<1x64x8xbf16, #tpu.memory_space<vmem>>) attributes {dimension_semantics = [#tpu.dimension_semantics<parallel>, #tpu.dimension_semantics<parallel>], iteration_bounds = array<i64: 1, 2>, scalar_prefetch = 0 : i64, scratch_operands = 0 : i64, tpu.core_type = #tpu.core_type<tc>, window_params = [{transform_indices = @transform_0, window_bounds = array<i64: 1, 64, 32>}, {transform_indices = @transform_1, window_bounds = array<i64: 32, 8>}, {transform_indices = @transform_2, window_bounds = array<i64: 1, 8>}, {transform_indices = @transform_3, window_bounds = array<i64: 1, 64, 8>}]} {
    %cst = arith.constant 0.000000e+00 : f32
    %0 = vector.broadcast %cst : f32 to vector<64x8xf32>
    %c0 = arith.constant 0 : index
    %c0_0 = arith.constant 0 : index
    %c0_1 = arith.constant 0 : index
    %1 = vector.load %arg2[%c0, %c0_0, %c0_1] : memref<1x64x32xbf16, #tpu.memory_space<vmem>>, vector<1x64x32xbf16>
    %2 = vector.shape_cast %1 : vector<1x64x32xbf16> to vector<64x32xbf16>
    %c0_2 = arith.constant 0 : index
    %c0_3 = arith.constant 0 : index
    %3 = vector.load %arg3[%c0_2, %c0_3] : memref<32x8xbf16, #tpu.memory_space<vmem>>, vector<32x8xbf16>
    %cst_4 = arith.constant dense<0.000000e+00> : vector<64x8xf32>
    %4 = tpu.matmul %2, %3, %cst_4 {dimension_numbers = #tpu.dot_dimension_numbers<[1], [0], [0], [1], [0, 0, 1, 1], [], []>} : vector<64x32xbf16>, vector<32x8xbf16>, vector<64x8xf32> -> vector<64x8xf32>
    %5 = arith.addf %0, %4 : vector<64x8xf32>
    %c0_5 = arith.constant 0 : index
    %c0_6 = arith.constant 0 : index
    %6 = vector.load %arg4[%c0_5, %c0_6] : memref<1x8xf32, #tpu.memory_space<vmem>>, vector<1x8xf32>
    %7 = vector.broadcast %6 : vector<1x8xf32> to vector<64x8xf32>
    %8 = arith.addf %5, %7 : vector<64x8xf32>
    %cst_7 = arith.constant 0.000000e+00 : f32
    %9 = vector.broadcast %cst_7 : f32 to vector<64x8xf32>
    %10 = arith.maximumf %8, %9 : vector<64x8xf32>
    %11 = arith.truncf %10 : vector<64x8xf32> to vector<64x8xbf16>
    %c0_8 = arith.constant 0 : index
    %c0_9 = arith.constant 0 : index
    %c0_10 = arith.constant 0 : index
    %12 = vector.load %arg5[%c0_8, %c0_9, %c0_10] : memref<1x64x8xbf16, #tpu.memory_space<vmem>>, vector<1x64x8xbf16>
    %13 = vector.shape_cast %12 : vector<1x64x8xbf16> to vector<64x8xbf16>
    %14 = vector.shape_cast %11 : vector<64x8xbf16> to vector<1x64x8xbf16>
    tpu.vector_store %arg5[%c0_8, %c0_9, %c0_10], %14 {strides = array<i32>} : memref<1x64x8xbf16, #tpu.memory_space<vmem>>, vector<1x64x8xbf16>,
    return
  }
  func.func @transform_0(%arg0: i32, %arg1: i32) -> (i32, i32, i32) {
    %c0_i32 = arith.constant 0 : i32
    %c0_i32_0 = arith.constant 0 : i32
    %c0_i32_1 = arith.constant 0 : i32
    return %arg1, %c0_i32, %c0_i32_0 : i32, i32, i32
  }
  func.func @transform_1(%arg0: i32, %arg1: i32) -> (i32, i32) {
    %c0_i32 = arith.constant 0 : i32
    %c0_i32_0 = arith.constant 0 : i32
    return %c0_i32, %arg0 : i32, i32
  }
  func.func @transform_2(%arg0: i32, %arg1: i32) -> (i32, i32) {
    %c0_i32 = arith.constant 0 : i32
    %c0_i32_0 = arith.constant 0 : i32
    return %c0_i32, %arg0 : i32, i32
  }
  func.func @transform_3(%arg0: i32, %arg1: i32) -> (i32, i32, i32) {
    %c0_i32 = arith.constant 0 : i32
    %c0_i32_0 = arith.constant 0 : i32
    return %arg1, %c0_i32, %arg0 : i32, i32, i32
  }
}

module attributes {stable_mosaic.version = 11 : i64} {
  func.func @_direct_conv_kernel(%arg0: i32, %arg1: i32, %arg2: memref<1x64x32xbf16, #tpu.memory_space<vmem>>, %arg3: memref<32x16xbf16, #tpu.memory_space<vmem>>, %arg4: memref<1x16xf32, #tpu.memory_space<vmem>>, %arg5: memref<1x64x16xbf16, #tpu.memory_space<vmem>>) attributes {dimension_semantics = [#tpu.dimension_semantics<parallel>, #tpu.dimension_semantics<parallel>], iteration_bounds = array<i64: 1, 2>, scalar_prefetch = 0 : i64, scratch_operands = 0 : i64, tpu.core_type = #tpu.core_type<tc>, window_params = [{transform_indices = @transform_0, window_bounds = array<i64: 1, 64, 32>}, {transform_indices = @transform_1, window_bounds = array<i64: 32, 16>}, {transform_indices = @transform_2, window_bounds = array<i64: 1, 16>}, {transform_indices = @transform_3, window_bounds = array<i64: 1, 64, 16>}]} {
    %cst = arith.constant 0.000000e+00 : f32
    %0 = vector.broadcast %cst : f32 to vector<64x16xf32>
    %c0 = arith.constant 0 : index
    %c0_0 = arith.constant 0 : index
    %c0_1 = arith.constant 0 : index
    %1 = vector.load %arg2[%c0, %c0_0, %c0_1] : memref<1x64x32xbf16, #tpu.memory_space<vmem>>, vector<1x64x32xbf16>
    %2 = vector.shape_cast %1 : vector<1x64x32xbf16> to vector<64x32xbf16>
    %c0_2 = arith.constant 0 : index
    %c0_3 = arith.constant 0 : index
    %3 = vector.load %arg3[%c0_2, %c0_3] : memref<32x16xbf16, #tpu.memory_space<vmem>>, vector<32x16xbf16>
    %cst_4 = arith.constant dense<0.000000e+00> : vector<64x16xf32>
    %4 = tpu.matmul %2, %3, %cst_4 {dimension_numbers = #tpu.dot_dimension_numbers<[1], [0], [0], [1], [0, 0, 1, 1], [], []>} : vector<64x32xbf16>, vector<32x16xbf16>, vector<64x16xf32> -> vector<64x16xf32>
    %5 = arith.addf %0, %4 : vector<64x16xf32>
    %c0_5 = arith.constant 0 : index
    %c0_6 = arith.constant 0 : index
    %6 = vector.load %arg4[%c0_5, %c0_6] : memref<1x16xf32, #tpu.memory_space<vmem>>, vector<1x16xf32>
    %7 = vector.broadcast %6 : vector<1x16xf32> to vector<64x16xf32>
    %8 = arith.addf %5, %7 : vector<64x16xf32>
    %cst_7 = arith.constant 0.000000e+00 : f32
    %9 = vector.broadcast %cst_7 : f32 to vector<64x16xf32>
    %10 = arith.maximumf %8, %9 : vector<64x16xf32>
    %11 = arith.truncf %10 : vector<64x16xf32> to vector<64x16xbf16>
    %c0_8 = arith.constant 0 : index
    %c0_9 = arith.constant 0 : index
    %c0_10 = arith.constant 0 : index
    %12 = vector.load %arg5[%c0_8, %c0_9, %c0_10] : memref<1x64x16xbf16, #tpu.memory_space<vmem>>, vector<1x64x16xbf16>
    %13 = vector.shape_cast %12 : vector<1x64x16xbf16> to vector<64x16xbf16>
    %14 = vector.shape_cast %11 : vector<64x16xbf16> to vector<1x64x16xbf16>
    tpu.vector_store %arg5[%c0_8, %c0_9, %c0_10], %14 {strides = array<i32>} : memref<1x64x16xbf16, #tpu.memory_space<vmem>>, vector<1x64x16xbf16>,
    return
  }
  func.func @transform_0(%arg0: i32, %arg1: i32) -> (i32, i32, i32) {
    %c0_i32 = arith.constant 0 : i32
    %c0_i32_0 = arith.constant 0 : i32
    %c0_i32_1 = arith.constant 0 : i32
    return %arg1, %c0_i32, %c0_i32_0 : i32, i32, i32
  }
  func.func @transform_1(%arg0: i32, %arg1: i32) -> (i32, i32) {
    %c0_i32 = arith.constant 0 : i32
    %c0_i32_0 = arith.constant 0 : i32
    return %c0_i32, %arg0 : i32, i32
  }
  func.func @transform_2(%arg0: i32, %arg1: i32) -> (i32, i32) {
    %c0_i32 = arith.constant 0 : i32
    %c0_i32_0 = arith.constant 0 : i32
    return %c0_i32, %arg0 : i32, i32
  }
  func.func @transform_3(%arg0: i32, %arg1: i32) -> (i32, i32, i32) {
    %c0_i32 = arith.constant 0 : i32
    %c0_i32_0 = arith.constant 0 : i32
    return %arg1, %c0_i32, %arg0 : i32, i32, i32
  }
}

module attributes {stable_mosaic.version = 11 : i64} {
  func.func @_mm_bias_kernel(%arg0: i32, %arg1: i32, %arg2: i32, %arg3: memref<32x256xbf16, #tpu.memory_space<vmem>>, %arg4: memref<256x128xbf16, #tpu.memory_space<vmem>>, %arg5: memref<1x128xf32, #tpu.memory_space<vmem>>, %arg6: memref<32x128xbf16, #tpu.memory_space<vmem>>, %arg7: memref<32x128xf32, #tpu.memory_space<vmem>>) attributes {dimension_semantics = [#tpu.dimension_semantics<parallel>, #tpu.dimension_semantics<parallel>, #tpu.dimension_semantics<arbitrary>], iteration_bounds = array<i64: 1, 1, 1>, scalar_prefetch = 0 : i64, scratch_operands = 1 : i64, tpu.core_type = #tpu.core_type<tc>, window_params = [{transform_indices = @transform_0, window_bounds = array<i64: 32, 256>}, {transform_indices = @transform_1, window_bounds = array<i64: 256, 128>}, {transform_indices = @transform_2, window_bounds = array<i64: 1, 128>}, {transform_indices = @transform_3, window_bounds = array<i64: 32, 128>}]} {
    %c0_i32 = arith.constant 0 : i32
    %0 = arith.cmpi eq, %arg2, %c0_i32 : i32
    %1 = arith.extui %0 : i1 to i32
    %c0_i32_0 = arith.constant 0 : i32
    %2 = arith.cmpi ne, %1, %c0_i32_0 : i32
    scf.if %2 {
      %cst_10 = arith.constant 0.000000e+00 : f32
      %12 = vector.broadcast %cst_10 : f32 to vector<32x128xf32>
      %c0_11 = arith.constant 0 : index
      %c0_12 = arith.constant 0 : index
      %13 = vector.load %arg7[%c0_11, %c0_12] : memref<32x128xf32, #tpu.memory_space<vmem>>, vector<32x128xf32>
      tpu.vector_store %arg7[%c0_11, %c0_12], %12 {strides = array<i32>} : memref<32x128xf32, #tpu.memory_space<vmem>>, vector<32x128xf32>,
    } else {
    }
    %c0 = arith.constant 0 : index
    %c0_1 = arith.constant 0 : index
    %3 = vector.load %arg7[%c0, %c0_1] : memref<32x128xf32, #tpu.memory_space<vmem>>, vector<32x128xf32>
    %c0_2 = arith.constant 0 : index
    %c0_3 = arith.constant 0 : index
    %4 = vector.load %arg3[%c0_2, %c0_3] : memref<32x256xbf16, #tpu.memory_space<vmem>>, vector<32x256xbf16>
    %c0_4 = arith.constant 0 : index
    %c0_5 = arith.constant 0 : index
    %5 = vector.load %arg4[%c0_4, %c0_5] : memref<256x128xbf16, #tpu.memory_space<vmem>>, vector<256x128xbf16>
    %cst = arith.constant dense<0.000000e+00> : vector<32x128xf32>
    %6 = tpu.matmul %4, %5, %cst {dimension_numbers = #tpu.dot_dimension_numbers<[1], [0], [0], [1], [0, 0, 1, 1], [], []>} : vector<32x256xbf16>, vector<256x128xbf16>, vector<32x128xf32> -> vector<32x128xf32>
    %7 = arith.addf %3, %6 : vector<32x128xf32>
    %c0_6 = arith.constant 0 : index
    %c0_7 = arith.constant 0 : index
    %8 = vector.load %arg7[%c0_6, %c0_7] : memref<32x128xf32, #tpu.memory_space<vmem>>, vector<32x128xf32>
    tpu.vector_store %arg7[%c0_6, %c0_7], %7 {strides = array<i32>} : memref<32x128xf32, #tpu.memory_space<vmem>>, vector<32x128xf32>,
    %c0_i32_8 = arith.constant 0 : i32
    %9 = arith.cmpi eq, %arg2, %c0_i32_8 : i32
    %10 = arith.extui %9 : i1 to i32
    %c0_i32_9 = arith.constant 0 : i32
    %11 = arith.cmpi ne, %10, %c0_i32_9 : i32
    scf.if %11 {
      %c0_10 = arith.constant 0 : index
      %c0_11 = arith.constant 0 : index
      %12 = vector.load %arg7[%c0_10, %c0_11] : memref<32x128xf32, #tpu.memory_space<vmem>>, vector<32x128xf32>
      %c0_12 = arith.constant 0 : index
      %c0_13 = arith.constant 0 : index
      %13 = vector.load %arg5[%c0_12, %c0_13] : memref<1x128xf32, #tpu.memory_space<vmem>>, vector<1x128xf32>
      %14 = vector.broadcast %13 : vector<1x128xf32> to vector<32x128xf32>
      %15 = arith.addf %12, %14 : vector<32x128xf32>
      %cst_14 = arith.constant 0.000000e+00 : f32
      %16 = vector.broadcast %cst_14 : f32 to vector<32x128xf32>
      %17 = arith.maximumf %15, %16 : vector<32x128xf32>
      %18 = arith.truncf %17 : vector<32x128xf32> to vector<32x128xbf16>
      %c0_15 = arith.constant 0 : index
      %c0_16 = arith.constant 0 : index
      %19 = vector.load %arg6[%c0_15, %c0_16] : memref<32x128xbf16, #tpu.memory_space<vmem>>, vector<32x128xbf16>
      tpu.vector_store %arg6[%c0_15, %c0_16], %18 {strides = array<i32>} : memref<32x128xbf16, #tpu.memory_space<vmem>>, vector<32x128xbf16>,
    } else {
    }
    return
  }
  func.func @transform_0(%arg0: i32, %arg1: i32, %arg2: i32) -> (i32, i32) {
    %c0_i32 = arith.constant 0 : i32
    return %arg0, %arg2 : i32, i32
  }
  func.func @transform_1(%arg0: i32, %arg1: i32, %arg2: i32) -> (i32, i32) {
    %c0_i32 = arith.constant 0 : i32
    return %arg2, %arg1 : i32, i32
  }
  func.func @transform_2(%arg0: i32, %arg1: i32, %arg2: i32) -> (i32, i32) {
    %c0_i32 = arith.constant 0 : i32
    %c0_i32_0 = arith.constant 0 : i32
    return %c0_i32, %arg1 : i32, i32
  }
  func.func @transform_3(%arg0: i32, %arg1: i32, %arg2: i32) -> (i32, i32) {
    %c0_i32 = arith.constant 0 : i32
    return %arg0, %arg1 : i32, i32
  }
}

module attributes {stable_mosaic.version = 11 : i64} {
  func.func @_direct_conv_kernel(%arg0: i32, %arg1: i32, %arg2: memref<1x16x16xbf16, #tpu.memory_space<vmem>>, %arg3: memref<16x64xbf16, #tpu.memory_space<vmem>>, %arg4: memref<1x64xf32, #tpu.memory_space<vmem>>, %arg5: memref<1x16x64xbf16, #tpu.memory_space<vmem>>, %arg6: memref<1x16x64xbf16, #tpu.memory_space<vmem>>) attributes {dimension_semantics = [#tpu.dimension_semantics<parallel>, #tpu.dimension_semantics<parallel>], iteration_bounds = array<i64: 1, 2>, scalar_prefetch = 0 : i64, scratch_operands = 0 : i64, tpu.core_type = #tpu.core_type<tc>, window_params = [{transform_indices = @transform_0, window_bounds = array<i64: 1, 16, 16>}, {transform_indices = @transform_1, window_bounds = array<i64: 16, 64>}, {transform_indices = @transform_2, window_bounds = array<i64: 1, 64>}, {transform_indices = @transform_3, window_bounds = array<i64: 1, 16, 64>}, {transform_indices = @transform_4, window_bounds = array<i64: 1, 16, 64>}]} {
    %cst = arith.constant 0.000000e+00 : f32
    %0 = vector.broadcast %cst : f32 to vector<16x64xf32>
    %c0 = arith.constant 0 : index
    %c0_0 = arith.constant 0 : index
    %c0_1 = arith.constant 0 : index
    %1 = vector.load %arg2[%c0, %c0_0, %c0_1] : memref<1x16x16xbf16, #tpu.memory_space<vmem>>, vector<1x16x16xbf16>
    %2 = vector.shape_cast %1 : vector<1x16x16xbf16> to vector<16x16xbf16>
    %c0_2 = arith.constant 0 : index
    %c0_3 = arith.constant 0 : index
    %3 = vector.load %arg3[%c0_2, %c0_3] : memref<16x64xbf16, #tpu.memory_space<vmem>>, vector<16x64xbf16>
    %cst_4 = arith.constant dense<0.000000e+00> : vector<16x64xf32>
    %4 = tpu.matmul %2, %3, %cst_4 {dimension_numbers = #tpu.dot_dimension_numbers<[1], [0], [0], [1], [0, 0, 1, 1], [], []>} : vector<16x16xbf16>, vector<16x64xbf16>, vector<16x64xf32> -> vector<16x64xf32>
    %5 = arith.addf %0, %4 : vector<16x64xf32>
    %c0_5 = arith.constant 0 : index
    %c0_6 = arith.constant 0 : index
    %6 = vector.load %arg4[%c0_5, %c0_6] : memref<1x64xf32, #tpu.memory_space<vmem>>, vector<1x64xf32>
    %7 = vector.broadcast %6 : vector<1x64xf32> to vector<16x64xf32>
    %8 = arith.addf %5, %7 : vector<16x64xf32>
    %c0_7 = arith.constant 0 : index
    %c0_8 = arith.constant 0 : index
    %c0_9 = arith.constant 0 : index
    %9 = vector.load %arg5[%c0_7, %c0_8, %c0_9] : memref<1x16x64xbf16, #tpu.memory_space<vmem>>, vector<1x16x64xbf16>
    %10 = vector.shape_cast %9 : vector<1x16x64xbf16> to vector<16x64xbf16>
    %11 = arith.extf %10 : vector<16x64xbf16> to vector<16x64xf32>
    %12 = arith.addf %8, %11 : vector<16x64xf32>
    %cst_10 = arith.constant 0.000000e+00 : f32
    %13 = vector.broadcast %cst_10 : f32 to vector<16x64xf32>
    %14 = arith.maximumf %12, %13 : vector<16x64xf32>
    %15 = arith.truncf %14 : vector<16x64xf32> to vector<16x64xbf16>
    %c0_11 = arith.constant 0 : index
    %c0_12 = arith.constant 0 : index
    %c0_13 = arith.constant 0 : index
    %16 = vector.load %arg6[%c0_11, %c0_12, %c0_13] : memref<1x16x64xbf16, #tpu.memory_space<vmem>>, vector<1x16x64xbf16>
    %17 = vector.shape_cast %16 : vector<1x16x64xbf16> to vector<16x64xbf16>
    %18 = vector.shape_cast %15 : vector<16x64xbf16> to vector<1x16x64xbf16>
    tpu.vector_store %arg6[%c0_11, %c0_12, %c0_13], %18 {strides = array<i32>} : memref<1x16x64xbf16, #tpu.memory_space<vmem>>, vector<1x16x64xbf16>,
    return
  }
  func.func @transform_0(%arg0: i32, %arg1: i32) -> (i32, i32, i32) {
    %c0_i32 = arith.constant 0 : i32
    %c0_i32_0 = arith.constant 0 : i32
    %c0_i32_1 = arith.constant 0 : i32
    return %arg1, %c0_i32, %c0_i32_0 : i32, i32, i32
  }
  func.func @transform_1(%arg0: i32, %arg1: i32) -> (i32, i32) {
    %c0_i32 = arith.constant 0 : i32
    %c0_i32_0 = arith.constant 0 : i32
    return %c0_i32, %arg0 : i32, i32
  }
  func.func @transform_2(%arg0: i32, %arg1: i32) -> (i32, i32) {
    %c0_i32 = arith.constant 0 : i32
    %c0_i32_0 = arith.constant 0 : i32
    return %c0_i32, %arg0 : i32, i32
  }
  func.func @transform_3(%arg0: i32, %arg1: i32) -> (i32, i32, i32) {
    %c0_i32 = arith.constant 0 : i32
    %c0_i32_0 = arith.constant 0 : i32
    return %arg1, %c0_i32, %arg0 : i32, i32, i32
  }
  func.func @transform_4(%arg0: i32, %arg1: i32) -> (i32, i32, i32) {
    %c0_i32 = arith.constant 0 : i32
    %c0_i32_0 = arith.constant 0 : i32
    return %arg1, %c0_i32, %arg0 : i32, i32, i32
  }
}

module attributes {stable_mosaic.version = 11 : i64} {
  func.func @_mm_bias_kernel(%arg0: i32, %arg1: i32, %arg2: i32, %arg3: memref<32x128xbf16, #tpu.memory_space<vmem>>, %arg4: memref<128x128xbf16, #tpu.memory_space<vmem>>, %arg5: memref<1x128xf32, #tpu.memory_space<vmem>>, %arg6: memref<32x128xbf16, #tpu.memory_space<vmem>>, %arg7: memref<32x128xf32, #tpu.memory_space<vmem>>) attributes {dimension_semantics = [#tpu.dimension_semantics<parallel>, #tpu.dimension_semantics<parallel>, #tpu.dimension_semantics<arbitrary>], iteration_bounds = array<i64: 1, 1, 1>, scalar_prefetch = 0 : i64, scratch_operands = 1 : i64, tpu.core_type = #tpu.core_type<tc>, window_params = [{transform_indices = @transform_0, window_bounds = array<i64: 32, 128>}, {transform_indices = @transform_1, window_bounds = array<i64: 128, 128>}, {transform_indices = @transform_2, window_bounds = array<i64: 1, 128>}, {transform_indices = @transform_3, window_bounds = array<i64: 32, 128>}]} {
    %c0_i32 = arith.constant 0 : i32
    %0 = arith.cmpi eq, %arg2, %c0_i32 : i32
    %1 = arith.extui %0 : i1 to i32
    %c0_i32_0 = arith.constant 0 : i32
    %2 = arith.cmpi ne, %1, %c0_i32_0 : i32
    scf.if %2 {
      %cst_10 = arith.constant 0.000000e+00 : f32
      %12 = vector.broadcast %cst_10 : f32 to vector<32x128xf32>
      %c0_11 = arith.constant 0 : index
      %c0_12 = arith.constant 0 : index
      %13 = vector.load %arg7[%c0_11, %c0_12] : memref<32x128xf32, #tpu.memory_space<vmem>>, vector<32x128xf32>
      tpu.vector_store %arg7[%c0_11, %c0_12], %12 {strides = array<i32>} : memref<32x128xf32, #tpu.memory_space<vmem>>, vector<32x128xf32>,
    } else {
    }
    %c0 = arith.constant 0 : index
    %c0_1 = arith.constant 0 : index
    %3 = vector.load %arg7[%c0, %c0_1] : memref<32x128xf32, #tpu.memory_space<vmem>>, vector<32x128xf32>
    %c0_2 = arith.constant 0 : index
    %c0_3 = arith.constant 0 : index
    %4 = vector.load %arg3[%c0_2, %c0_3] : memref<32x128xbf16, #tpu.memory_space<vmem>>, vector<32x128xbf16>
    %c0_4 = arith.constant 0 : index
    %c0_5 = arith.constant 0 : index
    %5 = vector.load %arg4[%c0_4, %c0_5] : memref<128x128xbf16, #tpu.memory_space<vmem>>, vector<128x128xbf16>
    %cst = arith.constant dense<0.000000e+00> : vector<32x128xf32>
    %6 = tpu.matmul %4, %5, %cst {dimension_numbers = #tpu.dot_dimension_numbers<[1], [0], [0], [1], [0, 0, 1, 1], [], []>} : vector<32x128xbf16>, vector<128x128xbf16>, vector<32x128xf32> -> vector<32x128xf32>
    %7 = arith.addf %3, %6 : vector<32x128xf32>
    %c0_6 = arith.constant 0 : index
    %c0_7 = arith.constant 0 : index
    %8 = vector.load %arg7[%c0_6, %c0_7] : memref<32x128xf32, #tpu.memory_space<vmem>>, vector<32x128xf32>
    tpu.vector_store %arg7[%c0_6, %c0_7], %7 {strides = array<i32>} : memref<32x128xf32, #tpu.memory_space<vmem>>, vector<32x128xf32>,
    %c0_i32_8 = arith.constant 0 : i32
    %9 = arith.cmpi eq, %arg2, %c0_i32_8 : i32
    %10 = arith.extui %9 : i1 to i32
    %c0_i32_9 = arith.constant 0 : i32
    %11 = arith.cmpi ne, %10, %c0_i32_9 : i32
    scf.if %11 {
      %c0_10 = arith.constant 0 : index
      %c0_11 = arith.constant 0 : index
      %12 = vector.load %arg7[%c0_10, %c0_11] : memref<32x128xf32, #tpu.memory_space<vmem>>, vector<32x128xf32>
      %c0_12 = arith.constant 0 : index
      %c0_13 = arith.constant 0 : index
      %13 = vector.load %arg5[%c0_12, %c0_13] : memref<1x128xf32, #tpu.memory_space<vmem>>, vector<1x128xf32>
      %14 = vector.broadcast %13 : vector<1x128xf32> to vector<32x128xf32>
      %15 = arith.addf %12, %14 : vector<32x128xf32>
      %16 = arith.truncf %15 : vector<32x128xf32> to vector<32x128xbf16>
      %c0_14 = arith.constant 0 : index
      %c0_15 = arith.constant 0 : index
      %17 = vector.load %arg6[%c0_14, %c0_15] : memref<32x128xbf16, #tpu.memory_space<vmem>>, vector<32x128xbf16>
      tpu.vector_store %arg6[%c0_14, %c0_15], %16 {strides = array<i32>} : memref<32x128xbf16, #tpu.memory_space<vmem>>, vector<32x128xbf16>,
    } else {
    }
    return
  }
  func.func @transform_0(%arg0: i32, %arg1: i32, %arg2: i32) -> (i32, i32) {
    %c0_i32 = arith.constant 0 : i32
    return %arg0, %arg2 : i32, i32
  }
  func.func @transform_1(%arg0: i32, %arg1: i32, %arg2: i32) -> (i32, i32) {
    %c0_i32 = arith.constant 0 : i32
    return %arg2, %arg1 : i32, i32
  }
  func.func @transform_2(%arg0: i32, %arg1: i32, %arg2: i32) -> (i32, i32) {
    %c0_i32 = arith.constant 0 : i32
    %c0_i32_0 = arith.constant 0 : i32
    return %c0_i32, %arg1 : i32, i32
  }
  func.func @transform_3(%arg0: i32, %arg1: i32, %arg2: i32) -> (i32, i32) {
    %c0_i32 = arith.constant 0 : i32
    return %arg0, %arg1 : i32, i32
  }
}

module attributes {stable_mosaic.version = 11 : i64} {
  func.func @_direct_conv_kernel(%arg0: i32, %arg1: i32, %arg2: memref<1x16x64xbf16, #tpu.memory_space<vmem>>, %arg3: memref<64x32xbf16, #tpu.memory_space<vmem>>, %arg4: memref<1x32xf32, #tpu.memory_space<vmem>>, %arg5: memref<1x16x32xbf16, #tpu.memory_space<vmem>>) attributes {dimension_semantics = [#tpu.dimension_semantics<parallel>, #tpu.dimension_semantics<parallel>], iteration_bounds = array<i64: 1, 2>, scalar_prefetch = 0 : i64, scratch_operands = 0 : i64, tpu.core_type = #tpu.core_type<tc>, window_params = [{transform_indices = @transform_0, window_bounds = array<i64: 1, 16, 64>}, {transform_indices = @transform_1, window_bounds = array<i64: 64, 32>}, {transform_indices = @transform_2, window_bounds = array<i64: 1, 32>}, {transform_indices = @transform_3, window_bounds = array<i64: 1, 16, 32>}]} {
    %cst = arith.constant 0.000000e+00 : f32
    %0 = vector.broadcast %cst : f32 to vector<16x32xf32>
    %c0 = arith.constant 0 : index
    %c0_0 = arith.constant 0 : index
    %c0_1 = arith.constant 0 : index
    %1 = vector.load %arg2[%c0, %c0_0, %c0_1] : memref<1x16x64xbf16, #tpu.memory_space<vmem>>, vector<1x16x64xbf16>
    %2 = vector.shape_cast %1 : vector<1x16x64xbf16> to vector<16x64xbf16>
    %c0_2 = arith.constant 0 : index
    %c0_3 = arith.constant 0 : index
    %3 = vector.load %arg3[%c0_2, %c0_3] : memref<64x32xbf16, #tpu.memory_space<vmem>>, vector<64x32xbf16>
    %cst_4 = arith.constant dense<0.000000e+00> : vector<16x32xf32>
    %4 = tpu.matmul %2, %3, %cst_4 {dimension_numbers = #tpu.dot_dimension_numbers<[1], [0], [0], [1], [0, 0, 1, 1], [], []>} : vector<16x64xbf16>, vector<64x32xbf16>, vector<16x32xf32> -> vector<16x32xf32>
    %5 = arith.addf %0, %4 : vector<16x32xf32>
    %c0_5 = arith.constant 0 : index
    %c0_6 = arith.constant 0 : index
    %6 = vector.load %arg4[%c0_5, %c0_6] : memref<1x32xf32, #tpu.memory_space<vmem>>, vector<1x32xf32>
    %7 = vector.broadcast %6 : vector<1x32xf32> to vector<16x32xf32>
    %8 = arith.addf %5, %7 : vector<16x32xf32>
    %cst_7 = arith.constant 0.000000e+00 : f32
    %9 = vector.broadcast %cst_7 : f32 to vector<16x32xf32>
    %10 = arith.maximumf %8, %9 : vector<16x32xf32>
    %11 = arith.truncf %10 : vector<16x32xf32> to vector<16x32xbf16>
    %c0_8 = arith.constant 0 : index
    %c0_9 = arith.constant 0 : index
    %c0_10 = arith.constant 0 : index
    %12 = vector.load %arg5[%c0_8, %c0_9, %c0_10] : memref<1x16x32xbf16, #tpu.memory_space<vmem>>, vector<1x16x32xbf16>
    %13 = vector.shape_cast %12 : vector<1x16x32xbf16> to vector<16x32xbf16>
    %14 = vector.shape_cast %11 : vector<16x32xbf16> to vector<1x16x32xbf16>
    tpu.vector_store %arg5[%c0_8, %c0_9, %c0_10], %14 {strides = array<i32>} : memref<1x16x32xbf16, #tpu.memory_space<vmem>>, vector<1x16x32xbf16>,
    return
  }
  func.func @transform_0(%arg0: i32, %arg1: i32) -> (i32, i32, i32) {
    %c0_i32 = arith.constant 0 : i32
    %c0_i32_0 = arith.constant 0 : i32
    %c0_i32_1 = arith.constant 0 : i32
    return %arg1, %c0_i32, %c0_i32_0 : i32, i32, i32
  }
  func.func @transform_1(%arg0: i32, %arg1: i32) -> (i32, i32) {
    %c0_i32 = arith.constant 0 : i32
    %c0_i32_0 = arith.constant 0 : i32
    return %c0_i32, %arg0 : i32, i32
  }
  func.func @transform_2(%arg0: i32, %arg1: i32) -> (i32, i32) {
    %c0_i32 = arith.constant 0 : i32
    %c0_i32_0 = arith.constant 0 : i32
    return %c0_i32, %arg0 : i32, i32
  }
  func.func @transform_3(%arg0: i32, %arg1: i32) -> (i32, i32, i32) {
    %c0_i32 = arith.constant 0 : i32
    %c0_i32_0 = arith.constant 0 : i32
    return %arg1, %c0_i32, %arg0 : i32, i32, i32
  }
}

module attributes {stable_mosaic.version = 11 : i64} {
  func.func @_mm_bias_kernel(%arg0: i32, %arg1: i32, %arg2: i32, %arg3: memref<16x384xbf16, #tpu.memory_space<vmem>>, %arg4: memref<384x128xbf16, #tpu.memory_space<vmem>>, %arg5: memref<1x128xf32, #tpu.memory_space<vmem>>, %arg6: memref<16x128xbf16, #tpu.memory_space<vmem>>, %arg7: memref<16x128xf32, #tpu.memory_space<vmem>>) attributes {dimension_semantics = [#tpu.dimension_semantics<parallel>, #tpu.dimension_semantics<parallel>, #tpu.dimension_semantics<arbitrary>], iteration_bounds = array<i64: 1, 1, 1>, scalar_prefetch = 0 : i64, scratch_operands = 1 : i64, tpu.core_type = #tpu.core_type<tc>, window_params = [{transform_indices = @transform_0, window_bounds = array<i64: 16, 384>}, {transform_indices = @transform_1, window_bounds = array<i64: 384, 128>}, {transform_indices = @transform_2, window_bounds = array<i64: 1, 128>}, {transform_indices = @transform_3, window_bounds = array<i64: 16, 128>}]} {
    %c0_i32 = arith.constant 0 : i32
    %0 = arith.cmpi eq, %arg2, %c0_i32 : i32
    %1 = arith.extui %0 : i1 to i32
    %c0_i32_0 = arith.constant 0 : i32
    %2 = arith.cmpi ne, %1, %c0_i32_0 : i32
    scf.if %2 {
      %cst_10 = arith.constant 0.000000e+00 : f32
      %12 = vector.broadcast %cst_10 : f32 to vector<16x128xf32>
      %c0_11 = arith.constant 0 : index
      %c0_12 = arith.constant 0 : index
      %13 = vector.load %arg7[%c0_11, %c0_12] : memref<16x128xf32, #tpu.memory_space<vmem>>, vector<16x128xf32>
      tpu.vector_store %arg7[%c0_11, %c0_12], %12 {strides = array<i32>} : memref<16x128xf32, #tpu.memory_space<vmem>>, vector<16x128xf32>,
    } else {
    }
    %c0 = arith.constant 0 : index
    %c0_1 = arith.constant 0 : index
    %3 = vector.load %arg7[%c0, %c0_1] : memref<16x128xf32, #tpu.memory_space<vmem>>, vector<16x128xf32>
    %c0_2 = arith.constant 0 : index
    %c0_3 = arith.constant 0 : index
    %4 = vector.load %arg3[%c0_2, %c0_3] : memref<16x384xbf16, #tpu.memory_space<vmem>>, vector<16x384xbf16>
    %c0_4 = arith.constant 0 : index
    %c0_5 = arith.constant 0 : index
    %5 = vector.load %arg4[%c0_4, %c0_5] : memref<384x128xbf16, #tpu.memory_space<vmem>>, vector<384x128xbf16>
    %cst = arith.constant dense<0.000000e+00> : vector<16x128xf32>
    %6 = tpu.matmul %4, %5, %cst {dimension_numbers = #tpu.dot_dimension_numbers<[1], [0], [0], [1], [0, 0, 1, 1], [], []>} : vector<16x384xbf16>, vector<384x128xbf16>, vector<16x128xf32> -> vector<16x128xf32>
    %7 = arith.addf %3, %6 : vector<16x128xf32>
    %c0_6 = arith.constant 0 : index
    %c0_7 = arith.constant 0 : index
    %8 = vector.load %arg7[%c0_6, %c0_7] : memref<16x128xf32, #tpu.memory_space<vmem>>, vector<16x128xf32>
    tpu.vector_store %arg7[%c0_6, %c0_7], %7 {strides = array<i32>} : memref<16x128xf32, #tpu.memory_space<vmem>>, vector<16x128xf32>,
    %c0_i32_8 = arith.constant 0 : i32
    %9 = arith.cmpi eq, %arg2, %c0_i32_8 : i32
    %10 = arith.extui %9 : i1 to i32
    %c0_i32_9 = arith.constant 0 : i32
    %11 = arith.cmpi ne, %10, %c0_i32_9 : i32
    scf.if %11 {
      %c0_10 = arith.constant 0 : index
      %c0_11 = arith.constant 0 : index
      %12 = vector.load %arg7[%c0_10, %c0_11] : memref<16x128xf32, #tpu.memory_space<vmem>>, vector<16x128xf32>
      %c0_12 = arith.constant 0 : index
      %c0_13 = arith.constant 0 : index
      %13 = vector.load %arg5[%c0_12, %c0_13] : memref<1x128xf32, #tpu.memory_space<vmem>>, vector<1x128xf32>
      %14 = vector.broadcast %13 : vector<1x128xf32> to vector<16x128xf32>
      %15 = arith.addf %12, %14 : vector<16x128xf32>
      %cst_14 = arith.constant 0.000000e+00 : f32
      %16 = vector.broadcast %cst_14 : f32 to vector<16x128xf32>
      %17 = arith.maximumf %15, %16 : vector<16x128xf32>
      %18 = arith.truncf %17 : vector<16x128xf32> to vector<16x128xbf16>
      %c0_15 = arith.constant 0 : index
      %c0_16 = arith.constant 0 : index
      %19 = vector.load %arg6[%c0_15, %c0_16] : memref<16x128xbf16, #tpu.memory_space<vmem>>, vector<16x128xbf16>
      tpu.vector_store %arg6[%c0_15, %c0_16], %18 {strides = array<i32>} : memref<16x128xbf16, #tpu.memory_space<vmem>>, vector<16x128xbf16>,
    } else {
    }
    return
  }
  func.func @transform_0(%arg0: i32, %arg1: i32, %arg2: i32) -> (i32, i32) {
    %c0_i32 = arith.constant 0 : i32
    return %arg0, %arg2 : i32, i32
  }
  func.func @transform_1(%arg0: i32, %arg1: i32, %arg2: i32) -> (i32, i32) {
    %c0_i32 = arith.constant 0 : i32
    return %arg2, %arg1 : i32, i32
  }
  func.func @transform_2(%arg0: i32, %arg1: i32, %arg2: i32) -> (i32, i32) {
    %c0_i32 = arith.constant 0 : i32
    %c0_i32_0 = arith.constant 0 : i32
    return %c0_i32, %arg1 : i32, i32
  }
  func.func @transform_3(%arg0: i32, %arg1: i32, %arg2: i32) -> (i32, i32) {
    %c0_i32 = arith.constant 0 : i32
    return %arg0, %arg1 : i32, i32
  }
}

module attributes {stable_mosaic.version = 11 : i64} {
  func.func @_mm_bias_kernel(%arg0: i32, %arg1: i32, %arg2: i32, %arg3: memref<16x128xbf16, #tpu.memory_space<vmem>>, %arg4: memref<128x128xbf16, #tpu.memory_space<vmem>>, %arg5: memref<1x128xf32, #tpu.memory_space<vmem>>, %arg6: memref<16x128xbf16, #tpu.memory_space<vmem>>, %arg7: memref<16x128xf32, #tpu.memory_space<vmem>>) attributes {dimension_semantics = [#tpu.dimension_semantics<parallel>, #tpu.dimension_semantics<parallel>, #tpu.dimension_semantics<arbitrary>], iteration_bounds = array<i64: 1, 1, 1>, scalar_prefetch = 0 : i64, scratch_operands = 1 : i64, tpu.core_type = #tpu.core_type<tc>, window_params = [{transform_indices = @transform_0, window_bounds = array<i64: 16, 128>}, {transform_indices = @transform_1, window_bounds = array<i64: 128, 128>}, {transform_indices = @transform_2, window_bounds = array<i64: 1, 128>}, {transform_indices = @transform_3, window_bounds = array<i64: 16, 128>}]} {
    %c0_i32 = arith.constant 0 : i32
    %0 = arith.cmpi eq, %arg2, %c0_i32 : i32
    %1 = arith.extui %0 : i1 to i32
    %c0_i32_0 = arith.constant 0 : i32
    %2 = arith.cmpi ne, %1, %c0_i32_0 : i32
    scf.if %2 {
      %cst_10 = arith.constant 0.000000e+00 : f32
      %12 = vector.broadcast %cst_10 : f32 to vector<16x128xf32>
      %c0_11 = arith.constant 0 : index
      %c0_12 = arith.constant 0 : index
      %13 = vector.load %arg7[%c0_11, %c0_12] : memref<16x128xf32, #tpu.memory_space<vmem>>, vector<16x128xf32>
      tpu.vector_store %arg7[%c0_11, %c0_12], %12 {strides = array<i32>} : memref<16x128xf32, #tpu.memory_space<vmem>>, vector<16x128xf32>,
    } else {
    }
    %c0 = arith.constant 0 : index
    %c0_1 = arith.constant 0 : index
    %3 = vector.load %arg7[%c0, %c0_1] : memref<16x128xf32, #tpu.memory_space<vmem>>, vector<16x128xf32>
    %c0_2 = arith.constant 0 : index
    %c0_3 = arith.constant 0 : index
    %4 = vector.load %arg3[%c0_2, %c0_3] : memref<16x128xbf16, #tpu.memory_space<vmem>>, vector<16x128xbf16>
    %c0_4 = arith.constant 0 : index
    %c0_5 = arith.constant 0 : index
    %5 = vector.load %arg4[%c0_4, %c0_5] : memref<128x128xbf16, #tpu.memory_space<vmem>>, vector<128x128xbf16>
    %cst = arith.constant dense<0.000000e+00> : vector<16x128xf32>
    %6 = tpu.matmul %4, %5, %cst {dimension_numbers = #tpu.dot_dimension_numbers<[1], [0], [0], [1], [0, 0, 1, 1], [], []>} : vector<16x128xbf16>, vector<128x128xbf16>, vector<16x128xf32> -> vector<16x128xf32>
    %7 = arith.addf %3, %6 : vector<16x128xf32>
    %c0_6 = arith.constant 0 : index
    %c0_7 = arith.constant 0 : index
    %8 = vector.load %arg7[%c0_6, %c0_7] : memref<16x128xf32, #tpu.memory_space<vmem>>, vector<16x128xf32>
    tpu.vector_store %arg7[%c0_6, %c0_7], %7 {strides = array<i32>} : memref<16x128xf32, #tpu.memory_space<vmem>>, vector<16x128xf32>,
    %c0_i32_8 = arith.constant 0 : i32
    %9 = arith.cmpi eq, %arg2, %c0_i32_8 : i32
    %10 = arith.extui %9 : i1 to i32
    %c0_i32_9 = arith.constant 0 : i32
    %11 = arith.cmpi ne, %10, %c0_i32_9 : i32
    scf.if %11 {
      %c0_10 = arith.constant 0 : index
      %c0_11 = arith.constant 0 : index
      %12 = vector.load %arg7[%c0_10, %c0_11] : memref<16x128xf32, #tpu.memory_space<vmem>>, vector<16x128xf32>
      %c0_12 = arith.constant 0 : index
      %c0_13 = arith.constant 0 : index
      %13 = vector.load %arg5[%c0_12, %c0_13] : memref<1x128xf32, #tpu.memory_space<vmem>>, vector<1x128xf32>
      %14 = vector.broadcast %13 : vector<1x128xf32> to vector<16x128xf32>
      %15 = arith.addf %12, %14 : vector<16x128xf32>
      %16 = arith.truncf %15 : vector<16x128xf32> to vector<16x128xbf16>
      %c0_14 = arith.constant 0 : index
      %c0_15 = arith.constant 0 : index
      %17 = vector.load %arg6[%c0_14, %c0_15] : memref<16x128xbf16, #tpu.memory_space<vmem>>, vector<16x128xbf16>
      tpu.vector_store %arg6[%c0_14, %c0_15], %16 {strides = array<i32>} : memref<16x128xbf16, #tpu.memory_space<vmem>>, vector<16x128xbf16>,
    } else {
    }
    return
  }
  func.func @transform_0(%arg0: i32, %arg1: i32, %arg2: i32) -> (i32, i32) {
    %c0_i32 = arith.constant 0 : i32
    return %arg0, %arg2 : i32, i32
  }
  func.func @transform_1(%arg0: i32, %arg1: i32, %arg2: i32) -> (i32, i32) {
    %c0_i32 = arith.constant 0 : i32
    return %arg2, %arg1 : i32, i32
  }
  func.func @transform_2(%arg0: i32, %arg1: i32, %arg2: i32) -> (i32, i32) {
    %c0_i32 = arith.constant 0 : i32
    %c0_i32_0 = arith.constant 0 : i32
    return %c0_i32, %arg1 : i32, i32
  }
  func.func @transform_3(%arg0: i32, %arg1: i32, %arg2: i32) -> (i32, i32) {
    %c0_i32 = arith.constant 0 : i32
    return %arg0, %arg1 : i32, i32
  }
}

module attributes {stable_mosaic.version = 11 : i64} {
  func.func @_direct_conv_kernel(%arg0: i32, %arg1: i32, %arg2: memref<1x4x32xbf16, #tpu.memory_space<vmem>>, %arg3: memref<32x128xbf16, #tpu.memory_space<vmem>>, %arg4: memref<1x128xf32, #tpu.memory_space<vmem>>, %arg5: memref<1x4x128xbf16, #tpu.memory_space<vmem>>, %arg6: memref<1x4x128xbf16, #tpu.memory_space<vmem>>) attributes {dimension_semantics = [#tpu.dimension_semantics<parallel>, #tpu.dimension_semantics<parallel>], iteration_bounds = array<i64: 1, 2>, scalar_prefetch = 0 : i64, scratch_operands = 0 : i64, tpu.core_type = #tpu.core_type<tc>, window_params = [{transform_indices = @transform_0, window_bounds = array<i64: 1, 4, 32>}, {transform_indices = @transform_1, window_bounds = array<i64: 32, 128>}, {transform_indices = @transform_2, window_bounds = array<i64: 1, 128>}, {transform_indices = @transform_3, window_bounds = array<i64: 1, 4, 128>}, {transform_indices = @transform_4, window_bounds = array<i64: 1, 4, 128>}]} {
    %cst = arith.constant 0.000000e+00 : f32
    %0 = vector.broadcast %cst : f32 to vector<4x128xf32>
    %c0 = arith.constant 0 : index
    %c0_0 = arith.constant 0 : index
    %c0_1 = arith.constant 0 : index
    %1 = vector.load %arg2[%c0, %c0_0, %c0_1] : memref<1x4x32xbf16, #tpu.memory_space<vmem>>, vector<1x4x32xbf16>
    %2 = vector.shape_cast %1 : vector<1x4x32xbf16> to vector<4x32xbf16>
    %c0_2 = arith.constant 0 : index
    %c0_3 = arith.constant 0 : index
    %3 = vector.load %arg3[%c0_2, %c0_3] : memref<32x128xbf16, #tpu.memory_space<vmem>>, vector<32x128xbf16>
    %cst_4 = arith.constant dense<0.000000e+00> : vector<4x128xf32>
    %4 = tpu.matmul %2, %3, %cst_4 {dimension_numbers = #tpu.dot_dimension_numbers<[1], [0], [0], [1], [0, 0, 1, 1], [], []>} : vector<4x32xbf16>, vector<32x128xbf16>, vector<4x128xf32> -> vector<4x128xf32>
    %5 = arith.addf %0, %4 : vector<4x128xf32>
    %c0_5 = arith.constant 0 : index
    %c0_6 = arith.constant 0 : index
    %6 = vector.load %arg4[%c0_5, %c0_6] : memref<1x128xf32, #tpu.memory_space<vmem>>, vector<1x128xf32>
    %7 = vector.broadcast %6 : vector<1x128xf32> to vector<4x128xf32>
    %8 = arith.addf %5, %7 : vector<4x128xf32>
    %c0_7 = arith.constant 0 : index
    %c0_8 = arith.constant 0 : index
    %c0_9 = arith.constant 0 : index
    %9 = vector.load %arg5[%c0_7, %c0_8, %c0_9] : memref<1x4x128xbf16, #tpu.memory_space<vmem>>, vector<1x4x128xbf16>
    %10 = vector.shape_cast %9 : vector<1x4x128xbf16> to vector<4x128xbf16>
    %11 = arith.extf %10 : vector<4x128xbf16> to vector<4x128xf32>
    %12 = arith.addf %8, %11 : vector<4x128xf32>
    %cst_10 = arith.constant 0.000000e+00 : f32
    %13 = vector.broadcast %cst_10 : f32 to vector<4x128xf32>
    %14 = arith.maximumf %12, %13 : vector<4x128xf32>
    %15 = arith.truncf %14 : vector<4x128xf32> to vector<4x128xbf16>
    %c0_11 = arith.constant 0 : index
    %c0_12 = arith.constant 0 : index
    %c0_13 = arith.constant 0 : index
    %16 = vector.load %arg6[%c0_11, %c0_12, %c0_13] : memref<1x4x128xbf16, #tpu.memory_space<vmem>>, vector<1x4x128xbf16>
    %17 = vector.shape_cast %16 : vector<1x4x128xbf16> to vector<4x128xbf16>
    %18 = vector.shape_cast %15 : vector<4x128xbf16> to vector<1x4x128xbf16>
    tpu.vector_store %arg6[%c0_11, %c0_12, %c0_13], %18 {strides = array<i32>} : memref<1x4x128xbf16, #tpu.memory_space<vmem>>, vector<1x4x128xbf16>,
    return
  }
  func.func @transform_0(%arg0: i32, %arg1: i32) -> (i32, i32, i32) {
    %c0_i32 = arith.constant 0 : i32
    %c0_i32_0 = arith.constant 0 : i32
    %c0_i32_1 = arith.constant 0 : i32
    return %arg1, %c0_i32, %c0_i32_0 : i32, i32, i32
  }
  func.func @transform_1(%arg0: i32, %arg1: i32) -> (i32, i32) {
    %c0_i32 = arith.constant 0 : i32
    %c0_i32_0 = arith.constant 0 : i32
    return %c0_i32, %arg0 : i32, i32
  }
  func.func @transform_2(%arg0: i32, %arg1: i32) -> (i32, i32) {
    %c0_i32 = arith.constant 0 : i32
    %c0_i32_0 = arith.constant 0 : i32
    return %c0_i32, %arg0 : i32, i32
  }
  func.func @transform_3(%arg0: i32, %arg1: i32) -> (i32, i32, i32) {
    %c0_i32 = arith.constant 0 : i32
    %c0_i32_0 = arith.constant 0 : i32
    return %arg1, %c0_i32, %arg0 : i32, i32, i32
  }
  func.func @transform_4(%arg0: i32, %arg1: i32) -> (i32, i32, i32) {
    %c0_i32 = arith.constant 0 : i32
    %c0_i32_0 = arith.constant 0 : i32
    return %arg1, %c0_i32, %arg0 : i32, i32, i32
  }
}

module attributes {stable_mosaic.version = 11 : i64} {
  func.func @_direct_conv_kernel(%arg0: i32, %arg1: i32, %arg2: memref<1x4x128xbf16, #tpu.memory_space<vmem>>, %arg3: memref<128x64xbf16, #tpu.memory_space<vmem>>, %arg4: memref<1x64xf32, #tpu.memory_space<vmem>>, %arg5: memref<1x4x64xbf16, #tpu.memory_space<vmem>>) attributes {dimension_semantics = [#tpu.dimension_semantics<parallel>, #tpu.dimension_semantics<parallel>], iteration_bounds = array<i64: 1, 2>, scalar_prefetch = 0 : i64, scratch_operands = 0 : i64, tpu.core_type = #tpu.core_type<tc>, window_params = [{transform_indices = @transform_0, window_bounds = array<i64: 1, 4, 128>}, {transform_indices = @transform_1, window_bounds = array<i64: 128, 64>}, {transform_indices = @transform_2, window_bounds = array<i64: 1, 64>}, {transform_indices = @transform_3, window_bounds = array<i64: 1, 4, 64>}]} {
    %cst = arith.constant 0.000000e+00 : f32
    %0 = vector.broadcast %cst : f32 to vector<4x64xf32>
    %c0 = arith.constant 0 : index
    %c0_0 = arith.constant 0 : index
    %c0_1 = arith.constant 0 : index
    %1 = vector.load %arg2[%c0, %c0_0, %c0_1] : memref<1x4x128xbf16, #tpu.memory_space<vmem>>, vector<1x4x128xbf16>
    %2 = vector.shape_cast %1 : vector<1x4x128xbf16> to vector<4x128xbf16>
    %c0_2 = arith.constant 0 : index
    %c0_3 = arith.constant 0 : index
    %3 = vector.load %arg3[%c0_2, %c0_3] : memref<128x64xbf16, #tpu.memory_space<vmem>>, vector<128x64xbf16>
    %cst_4 = arith.constant dense<0.000000e+00> : vector<4x64xf32>
    %4 = tpu.matmul %2, %3, %cst_4 {dimension_numbers = #tpu.dot_dimension_numbers<[1], [0], [0], [1], [0, 0, 1, 1], [], []>} : vector<4x128xbf16>, vector<128x64xbf16>, vector<4x64xf32> -> vector<4x64xf32>
    %5 = arith.addf %0, %4 : vector<4x64xf32>
    %c0_5 = arith.constant 0 : index
    %c0_6 = arith.constant 0 : index
    %6 = vector.load %arg4[%c0_5, %c0_6] : memref<1x64xf32, #tpu.memory_space<vmem>>, vector<1x64xf32>
    %7 = vector.broadcast %6 : vector<1x64xf32> to vector<4x64xf32>
    %8 = arith.addf %5, %7 : vector<4x64xf32>
    %cst_7 = arith.constant 0.000000e+00 : f32
    %9 = vector.broadcast %cst_7 : f32 to vector<4x64xf32>
    %10 = arith.maximumf %8, %9 : vector<4x64xf32>
    %11 = arith.truncf %10 : vector<4x64xf32> to vector<4x64xbf16>
    %c0_8 = arith.constant 0 : index
    %c0_9 = arith.constant 0 : index
    %c0_10 = arith.constant 0 : index
    %12 = vector.load %arg5[%c0_8, %c0_9, %c0_10] : memref<1x4x64xbf16, #tpu.memory_space<vmem>>, vector<1x4x64xbf16>
    %13 = vector.shape_cast %12 : vector<1x4x64xbf16> to vector<4x64xbf16>
    %14 = vector.shape_cast %11 : vector<4x64xbf16> to vector<1x4x64xbf16>
    tpu.vector_store %arg5[%c0_8, %c0_9, %c0_10], %14 {strides = array<i32>} : memref<1x4x64xbf16, #tpu.memory_space<vmem>>, vector<1x4x64xbf16>,
    return
  }
  func.func @transform_0(%arg0: i32, %arg1: i32) -> (i32, i32, i32) {
    %c0_i32 = arith.constant 0 : i32
    %c0_i32_0 = arith.constant 0 : i32
    %c0_i32_1 = arith.constant 0 : i32
    return %arg1, %c0_i32, %c0_i32_0 : i32, i32, i32
  }
  func.func @transform_1(%arg0: i32, %arg1: i32) -> (i32, i32) {
    %c0_i32 = arith.constant 0 : i32
    %c0_i32_0 = arith.constant 0 : i32
    return %c0_i32, %arg0 : i32, i32
  }
  func.func @transform_2(%arg0: i32, %arg1: i32) -> (i32, i32) {
    %c0_i32 = arith.constant 0 : i32
    %c0_i32_0 = arith.constant 0 : i32
    return %c0_i32, %arg0 : i32, i32
  }
  func.func @transform_3(%arg0: i32, %arg1: i32) -> (i32, i32, i32) {
    %c0_i32 = arith.constant 0 : i32
    %c0_i32_0 = arith.constant 0 : i32
    return %arg1, %c0_i32, %arg0 : i32, i32, i32
  }
}

module attributes {stable_mosaic.version = 11 : i64} {
  func.func @_mm_bias_kernel(%arg0: i32, %arg1: i32, %arg2: i32, %arg3: memref<16x512xbf16, #tpu.memory_space<vmem>>, %arg4: memref<512x128xbf16, #tpu.memory_space<vmem>>, %arg5: memref<1x128xf32, #tpu.memory_space<vmem>>, %arg6: memref<16x128xbf16, #tpu.memory_space<vmem>>, %arg7: memref<16x128xf32, #tpu.memory_space<vmem>>) attributes {dimension_semantics = [#tpu.dimension_semantics<parallel>, #tpu.dimension_semantics<parallel>, #tpu.dimension_semantics<arbitrary>], iteration_bounds = array<i64: 1, 1, 2>, scalar_prefetch = 0 : i64, scratch_operands = 1 : i64, tpu.core_type = #tpu.core_type<tc>, window_params = [{transform_indices = @transform_0, window_bounds = array<i64: 16, 512>}, {transform_indices = @transform_1, window_bounds = array<i64: 512, 128>}, {transform_indices = @transform_2, window_bounds = array<i64: 1, 128>}, {transform_indices = @transform_3, window_bounds = array<i64: 16, 128>}]} {
    %c0_i32 = arith.constant 0 : i32
    %0 = arith.cmpi eq, %arg2, %c0_i32 : i32
    %1 = arith.extui %0 : i1 to i32
    %c0_i32_0 = arith.constant 0 : i32
    %2 = arith.cmpi ne, %1, %c0_i32_0 : i32
    scf.if %2 {
      %cst_9 = arith.constant 0.000000e+00 : f32
      %12 = vector.broadcast %cst_9 : f32 to vector<16x128xf32>
      %c0_10 = arith.constant 0 : index
      %c0_11 = arith.constant 0 : index
      %13 = vector.load %arg7[%c0_10, %c0_11] : memref<16x128xf32, #tpu.memory_space<vmem>>, vector<16x128xf32>
      tpu.vector_store %arg7[%c0_10, %c0_11], %12 {strides = array<i32>} : memref<16x128xf32, #tpu.memory_space<vmem>>, vector<16x128xf32>,
    } else {
    }
    %c0 = arith.constant 0 : index
    %c0_1 = arith.constant 0 : index
    %3 = vector.load %arg7[%c0, %c0_1] : memref<16x128xf32, #tpu.memory_space<vmem>>, vector<16x128xf32>
    %c0_2 = arith.constant 0 : index
    %c0_3 = arith.constant 0 : index
    %4 = vector.load %arg3[%c0_2, %c0_3] : memref<16x512xbf16, #tpu.memory_space<vmem>>, vector<16x512xbf16>
    %c0_4 = arith.constant 0 : index
    %c0_5 = arith.constant 0 : index
    %5 = vector.load %arg4[%c0_4, %c0_5] : memref<512x128xbf16, #tpu.memory_space<vmem>>, vector<512x128xbf16>
    %cst = arith.constant dense<0.000000e+00> : vector<16x128xf32>
    %6 = tpu.matmul %4, %5, %cst {dimension_numbers = #tpu.dot_dimension_numbers<[1], [0], [0], [1], [0, 0, 1, 1], [], []>} : vector<16x512xbf16>, vector<512x128xbf16>, vector<16x128xf32> -> vector<16x128xf32>
    %7 = arith.addf %3, %6 : vector<16x128xf32>
    %c0_6 = arith.constant 0 : index
    %c0_7 = arith.constant 0 : index
    %8 = vector.load %arg7[%c0_6, %c0_7] : memref<16x128xf32, #tpu.memory_space<vmem>>, vector<16x128xf32>
    tpu.vector_store %arg7[%c0_6, %c0_7], %7 {strides = array<i32>} : memref<16x128xf32, #tpu.memory_space<vmem>>, vector<16x128xf32>,
    %c1_i32 = arith.constant 1 : i32
    %9 = arith.cmpi eq, %arg2, %c1_i32 : i32
    %10 = arith.extui %9 : i1 to i32
    %c0_i32_8 = arith.constant 0 : i32
    %11 = arith.cmpi ne, %10, %c0_i32_8 : i32
    scf.if %11 {
      %c0_9 = arith.constant 0 : index
      %c0_10 = arith.constant 0 : index
      %12 = vector.load %arg7[%c0_9, %c0_10] : memref<16x128xf32, #tpu.memory_space<vmem>>, vector<16x128xf32>
      %c0_11 = arith.constant 0 : index
      %c0_12 = arith.constant 0 : index
      %13 = vector.load %arg5[%c0_11, %c0_12] : memref<1x128xf32, #tpu.memory_space<vmem>>, vector<1x128xf32>
      %14 = vector.broadcast %13 : vector<1x128xf32> to vector<16x128xf32>
      %15 = arith.addf %12, %14 : vector<16x128xf32>
      %cst_13 = arith.constant 0.000000e+00 : f32
      %16 = vector.broadcast %cst_13 : f32 to vector<16x128xf32>
      %17 = arith.maximumf %15, %16 : vector<16x128xf32>
      %18 = arith.truncf %17 : vector<16x128xf32> to vector<16x128xbf16>
      %c0_14 = arith.constant 0 : index
      %c0_15 = arith.constant 0 : index
      %19 = vector.load %arg6[%c0_14, %c0_15] : memref<16x128xbf16, #tpu.memory_space<vmem>>, vector<16x128xbf16>
      tpu.vector_store %arg6[%c0_14, %c0_15], %18 {strides = array<i32>} : memref<16x128xbf16, #tpu.memory_space<vmem>>, vector<16x128xbf16>,
    } else {
    }
    return
  }
  func.func @transform_0(%arg0: i32, %arg1: i32, %arg2: i32) -> (i32, i32) {
    %c0_i32 = arith.constant 0 : i32
    return %arg0, %arg2 : i32, i32
  }
  func.func @transform_1(%arg0: i32, %arg1: i32, %arg2: i32) -> (i32, i32) {
    %c0_i32 = arith.constant 0 : i32
    return %arg2, %arg1 : i32, i32
  }
  func.func @transform_2(%arg0: i32, %arg1: i32, %arg2: i32) -> (i32, i32) {
    %c0_i32 = arith.constant 0 : i32
    %c0_i32_0 = arith.constant 0 : i32
    return %c0_i32, %arg1 : i32, i32
  }
  func.func @transform_3(%arg0: i32, %arg1: i32, %arg2: i32) -> (i32, i32) {
    %c0_i32 = arith.constant 0 : i32
    return %arg0, %arg1 : i32, i32
  }
}

module attributes {stable_mosaic.version = 11 : i64} {
  func.func @_mm_bias_kernel(%arg0: i32, %arg1: i32, %arg2: i32, %arg3: memref<16x128xbf16, #tpu.memory_space<vmem>>, %arg4: memref<128x256xbf16, #tpu.memory_space<vmem>>, %arg5: memref<1x256xf32, #tpu.memory_space<vmem>>, %arg6: memref<16x256xbf16, #tpu.memory_space<vmem>>, %arg7: memref<16x256xf32, #tpu.memory_space<vmem>>) attributes {dimension_semantics = [#tpu.dimension_semantics<parallel>, #tpu.dimension_semantics<parallel>, #tpu.dimension_semantics<arbitrary>], iteration_bounds = array<i64: 1, 1, 1>, scalar_prefetch = 0 : i64, scratch_operands = 1 : i64, tpu.core_type = #tpu.core_type<tc>, window_params = [{transform_indices = @transform_0, window_bounds = array<i64: 16, 128>}, {transform_indices = @transform_1, window_bounds = array<i64: 128, 256>}, {transform_indices = @transform_2, window_bounds = array<i64: 1, 256>}, {transform_indices = @transform_3, window_bounds = array<i64: 16, 256>}]} {
    %c0_i32 = arith.constant 0 : i32
    %0 = arith.cmpi eq, %arg2, %c0_i32 : i32
    %1 = arith.extui %0 : i1 to i32
    %c0_i32_0 = arith.constant 0 : i32
    %2 = arith.cmpi ne, %1, %c0_i32_0 : i32
    scf.if %2 {
      %cst_10 = arith.constant 0.000000e+00 : f32
      %12 = vector.broadcast %cst_10 : f32 to vector<16x256xf32>
      %c0_11 = arith.constant 0 : index
      %c0_12 = arith.constant 0 : index
      %13 = vector.load %arg7[%c0_11, %c0_12] : memref<16x256xf32, #tpu.memory_space<vmem>>, vector<16x256xf32>
      tpu.vector_store %arg7[%c0_11, %c0_12], %12 {strides = array<i32>} : memref<16x256xf32, #tpu.memory_space<vmem>>, vector<16x256xf32>,
    } else {
    }
    %c0 = arith.constant 0 : index
    %c0_1 = arith.constant 0 : index
    %3 = vector.load %arg7[%c0, %c0_1] : memref<16x256xf32, #tpu.memory_space<vmem>>, vector<16x256xf32>
    %c0_2 = arith.constant 0 : index
    %c0_3 = arith.constant 0 : index
    %4 = vector.load %arg3[%c0_2, %c0_3] : memref<16x128xbf16, #tpu.memory_space<vmem>>, vector<16x128xbf16>
    %c0_4 = arith.constant 0 : index
    %c0_5 = arith.constant 0 : index
    %5 = vector.load %arg4[%c0_4, %c0_5] : memref<128x256xbf16, #tpu.memory_space<vmem>>, vector<128x256xbf16>
    %cst = arith.constant dense<0.000000e+00> : vector<16x256xf32>
    %6 = tpu.matmul %4, %5, %cst {dimension_numbers = #tpu.dot_dimension_numbers<[1], [0], [0], [1], [0, 0, 1, 1], [], []>} : vector<16x128xbf16>, vector<128x256xbf16>, vector<16x256xf32> -> vector<16x256xf32>
    %7 = arith.addf %3, %6 : vector<16x256xf32>
    %c0_6 = arith.constant 0 : index
    %c0_7 = arith.constant 0 : index
    %8 = vector.load %arg7[%c0_6, %c0_7] : memref<16x256xf32, #tpu.memory_space<vmem>>, vector<16x256xf32>
    tpu.vector_store %arg7[%c0_6, %c0_7], %7 {strides = array<i32>} : memref<16x256xf32, #tpu.memory_space<vmem>>, vector<16x256xf32>,
    %c0_i32_8 = arith.constant 0 : i32
    %9 = arith.cmpi eq, %arg2, %c0_i32_8 : i32
    %10 = arith.extui %9 : i1 to i32
    %c0_i32_9 = arith.constant 0 : i32
    %11 = arith.cmpi ne, %10, %c0_i32_9 : i32
    scf.if %11 {
      %c0_10 = arith.constant 0 : index
      %c0_11 = arith.constant 0 : index
      %12 = vector.load %arg7[%c0_10, %c0_11] : memref<16x256xf32, #tpu.memory_space<vmem>>, vector<16x256xf32>
      %c0_12 = arith.constant 0 : index
      %c0_13 = arith.constant 0 : index
      %13 = vector.load %arg5[%c0_12, %c0_13] : memref<1x256xf32, #tpu.memory_space<vmem>>, vector<1x256xf32>
      %14 = vector.broadcast %13 : vector<1x256xf32> to vector<16x256xf32>
      %15 = arith.addf %12, %14 : vector<16x256xf32>
      %16 = arith.truncf %15 : vector<16x256xf32> to vector<16x256xbf16>
      %c0_14 = arith.constant 0 : index
      %c0_15 = arith.constant 0 : index
      %17 = vector.load %arg6[%c0_14, %c0_15] : memref<16x256xbf16, #tpu.memory_space<vmem>>, vector<16x256xbf16>
      tpu.vector_store %arg6[%c0_14, %c0_15], %16 {strides = array<i32>} : memref<16x256xbf16, #tpu.memory_space<vmem>>, vector<16x256xbf16>,
    } else {
    }
    return
  }
  func.func @transform_0(%arg0: i32, %arg1: i32, %arg2: i32) -> (i32, i32) {
    %c0_i32 = arith.constant 0 : i32
    return %arg0, %arg2 : i32, i32
  }
  func.func @transform_1(%arg0: i32, %arg1: i32, %arg2: i32) -> (i32, i32) {
    %c0_i32 = arith.constant 0 : i32
    return %arg2, %arg1 : i32, i32
  }
  func.func @transform_2(%arg0: i32, %arg1: i32, %arg2: i32) -> (i32, i32) {
    %c0_i32 = arith.constant 0 : i32
    %c0_i32_0 = arith.constant 0 : i32
    return %c0_i32, %arg1 : i32, i32
  }
  func.func @transform_3(%arg0: i32, %arg1: i32, %arg2: i32) -> (i32, i32) {
    %c0_i32 = arith.constant 0 : i32
    return %arg0, %arg1 : i32, i32
  }
}

module attributes {stable_mosaic.version = 11 : i64} {
  func.func @_direct_conv_kernel(%arg0: i32, %arg1: i32, %arg2: memref<1x1x64xbf16, #tpu.memory_space<vmem>>, %arg3: memref<64x256xbf16, #tpu.memory_space<vmem>>, %arg4: memref<1x256xf32, #tpu.memory_space<vmem>>, %arg5: memref<1x1x256xbf16, #tpu.memory_space<vmem>>, %arg6: memref<1x1x256xbf16, #tpu.memory_space<vmem>>) attributes {dimension_semantics = [#tpu.dimension_semantics<parallel>, #tpu.dimension_semantics<parallel>], iteration_bounds = array<i64: 1, 2>, scalar_prefetch = 0 : i64, scratch_operands = 0 : i64, tpu.core_type = #tpu.core_type<tc>, window_params = [{transform_indices = @transform_0, window_bounds = array<i64: 1, 1, 64>}, {transform_indices = @transform_1, window_bounds = array<i64: 64, 256>}, {transform_indices = @transform_2, window_bounds = array<i64: 1, 256>}, {transform_indices = @transform_3, window_bounds = array<i64: 1, 1, 256>}, {transform_indices = @transform_4, window_bounds = array<i64: 1, 1, 256>}]} {
    %cst = arith.constant 0.000000e+00 : f32
    %0 = vector.broadcast %cst : f32 to vector<1x256xf32>
    %c0 = arith.constant 0 : index
    %c0_0 = arith.constant 0 : index
    %c0_1 = arith.constant 0 : index
    %1 = vector.load %arg2[%c0, %c0_0, %c0_1] : memref<1x1x64xbf16, #tpu.memory_space<vmem>>, vector<1x1x64xbf16>
    %2 = vector.shape_cast %1 : vector<1x1x64xbf16> to vector<1x64xbf16>
    %c0_2 = arith.constant 0 : index
    %c0_3 = arith.constant 0 : index
    %3 = vector.load %arg3[%c0_2, %c0_3] : memref<64x256xbf16, #tpu.memory_space<vmem>>, vector<64x256xbf16>
    %cst_4 = arith.constant dense<0.000000e+00> : vector<1x256xf32>
    %4 = tpu.matmul %2, %3, %cst_4 {dimension_numbers = #tpu.dot_dimension_numbers<[1], [0], [0], [1], [0, 0, 1, 1], [], []>} : vector<1x64xbf16>, vector<64x256xbf16>, vector<1x256xf32> -> vector<1x256xf32>
    %5 = arith.addf %0, %4 : vector<1x256xf32>
    %c0_5 = arith.constant 0 : index
    %c0_6 = arith.constant 0 : index
    %6 = vector.load %arg4[%c0_5, %c0_6] : memref<1x256xf32, #tpu.memory_space<vmem>>, vector<1x256xf32>
    %7 = arith.addf %5, %6 : vector<1x256xf32>
    %c0_7 = arith.constant 0 : index
    %c0_8 = arith.constant 0 : index
    %c0_9 = arith.constant 0 : index
    %8 = vector.load %arg5[%c0_7, %c0_8, %c0_9] : memref<1x1x256xbf16, #tpu.memory_space<vmem>>, vector<1x1x256xbf16>
    %9 = vector.shape_cast %8 : vector<1x1x256xbf16> to vector<1x256xbf16>
    %10 = arith.extf %9 : vector<1x256xbf16> to vector<1x256xf32>
    %11 = arith.addf %7, %10 : vector<1x256xf32>
    %cst_10 = arith.constant 0.000000e+00 : f32
    %12 = vector.broadcast %cst_10 : f32 to vector<1x256xf32>
    %13 = arith.maximumf %11, %12 : vector<1x256xf32>
    %14 = arith.truncf %13 : vector<1x256xf32> to vector<1x256xbf16>
    %c0_11 = arith.constant 0 : index
    %c0_12 = arith.constant 0 : index
    %c0_13 = arith.constant 0 : index
    %15 = vector.load %arg6[%c0_11, %c0_12, %c0_13] : memref<1x1x256xbf16, #tpu.memory_space<vmem>>, vector<1x1x256xbf16>
    %16 = vector.shape_cast %15 : vector<1x1x256xbf16> to vector<1x256xbf16>
    %17 = vector.shape_cast %14 : vector<1x256xbf16> to vector<1x1x256xbf16>
    tpu.vector_store %arg6[%c0_11, %c0_12, %c0_13], %17 {strides = array<i32>} : memref<1x1x256xbf16, #tpu.memory_space<vmem>>, vector<1x1x256xbf16>,
    return
  }
  func.func @transform_0(%arg0: i32, %arg1: i32) -> (i32, i32, i32) {
    %c0_i32 = arith.constant 0 : i32
    %c0_i32_0 = arith.constant 0 : i32
    %c0_i32_1 = arith.constant 0 : i32
    return %arg1, %c0_i32, %c0_i32_0 : i32, i32, i32
  }
  func.func @transform_1(%arg0: i32, %arg1: i32) -> (i32, i32) {
    %c0_i32 = arith.constant 0 : i32
    %c0_i32_0 = arith.constant 0 : i32
    return %c0_i32, %arg0 : i32, i32
  }
  func.func @transform_2(%arg0: i32, %arg1: i32) -> (i32, i32) {
    %c0_i32 = arith.constant 0 : i32
    %c0_i32_0 = arith.constant 0 : i32
    return %c0_i32, %arg0 : i32, i32
  }
  func.func @transform_3(%arg0: i32, %arg1: i32) -> (i32, i32, i32) {
    %c0_i32 = arith.constant 0 : i32
    %c0_i32_0 = arith.constant 0 : i32
    return %arg1, %c0_i32, %arg0 : i32, i32, i32
  }
  func.func @transform_4(%arg0: i32, %arg1: i32) -> (i32, i32, i32) {
    %c0_i32 = arith.constant 0 : i32
    %c0_i32_0 = arith.constant 0 : i32
    return %arg1, %c0_i32, %arg0 : i32, i32, i32
  }
}

module attributes {stable_mosaic.version = 11 : i64} {
  func.func @_gap_kernel(%arg0: i32, %arg1: memref<1x1x256xbf16, #tpu.memory_space<vmem>>, %arg2: memref<1x1x256xf32, #tpu.memory_space<vmem>>) attributes {dimension_semantics = [#tpu.dimension_semantics<parallel>], iteration_bounds = array<i64: 2>, scalar_prefetch = 0 : i64, scratch_operands = 0 : i64, tpu.core_type = #tpu.core_type<tc>, window_params = [{transform_indices = @transform_0, window_bounds = array<i64: 1, 1, 256>}, {transform_indices = @transform_1, window_bounds = array<i64: 1, 1, 256>}]} {
    %c0 = arith.constant 0 : index
    %c0_0 = arith.constant 0 : index
    %c0_1 = arith.constant 0 : index
    %0 = vector.load %arg1[%c0, %c0_0, %c0_1] : memref<1x1x256xbf16, #tpu.memory_space<vmem>>, vector<1x1x256xbf16>
    %1 = arith.extf %0 : vector<1x1x256xbf16> to vector<1x1x256xf32>
    %cst = arith.constant dense<0.000000e+00> : vector<1x256xf32>
    %2 = vector.multi_reduction <add>, %1, %cst [1] : vector<1x1x256xf32> to vector<1x256xf32>
    %3 = vector.shape_cast %2 : vector<1x256xf32> to vector<1x1x256xf32>
    %cst_2 = arith.constant 1.000000e+00 : f32
    %4 = vector.broadcast %cst_2 : f32 to vector<1x1x256xf32>
    %5 = arith.divf %3, %4 : vector<1x1x256xf32>
    %c0_3 = arith.constant 0 : index
    %c0_4 = arith.constant 0 : index
    %c0_5 = arith.constant 0 : index
    %6 = vector.load %arg2[%c0_3, %c0_4, %c0_5] : memref<1x1x256xf32, #tpu.memory_space<vmem>>, vector<1x1x256xf32>
    tpu.vector_store %arg2[%c0_3, %c0_4, %c0_5], %5 {strides = array<i32>} : memref<1x1x256xf32, #tpu.memory_space<vmem>>, vector<1x1x256xf32>,
    return
  }
  func.func @transform_0(%arg0: i32) -> (i32, i32, i32) {
    %c0_i32 = arith.constant 0 : i32
    %c0_i32_0 = arith.constant 0 : i32
    %c0_i32_1 = arith.constant 0 : i32
    return %arg0, %c0_i32, %c0_i32_0 : i32, i32, i32
  }
  func.func @transform_1(%arg0: i32) -> (i32, i32, i32) {
    %c0_i32 = arith.constant 0 : i32
    %c0_i32_0 = arith.constant 0 : i32
    %c0_i32_1 = arith.constant 0 : i32
    return %arg0, %c0_i32, %c0_i32_0 : i32, i32, i32
  }
}

module attributes {stable_mosaic.version = 11 : i64} {
  func.func @_mm_bias_kernel(%arg0: i32, %arg1: i32, %arg2: i32, %arg3: memref<16x256xbf16, #tpu.memory_space<vmem>>, %arg4: memref<256x128xbf16, #tpu.memory_space<vmem>>, %arg5: memref<1x128xf32, #tpu.memory_space<vmem>>, %arg6: memref<16x128xf32, #tpu.memory_space<vmem>>, %arg7: memref<16x128xf32, #tpu.memory_space<vmem>>) attributes {dimension_semantics = [#tpu.dimension_semantics<parallel>, #tpu.dimension_semantics<parallel>, #tpu.dimension_semantics<arbitrary>], iteration_bounds = array<i64: 1, 1, 1>, scalar_prefetch = 0 : i64, scratch_operands = 1 : i64, tpu.core_type = #tpu.core_type<tc>, window_params = [{transform_indices = @transform_0, window_bounds = array<i64: 16, 256>}, {transform_indices = @transform_1, window_bounds = array<i64: 256, 128>}, {transform_indices = @transform_2, window_bounds = array<i64: 1, 128>}, {transform_indices = @transform_3, window_bounds = array<i64: 16, 128>}]} {
    %c0_i32 = arith.constant 0 : i32
    %0 = arith.cmpi eq, %arg2, %c0_i32 : i32
    %1 = arith.extui %0 : i1 to i32
    %c0_i32_0 = arith.constant 0 : i32
    %2 = arith.cmpi ne, %1, %c0_i32_0 : i32
    scf.if %2 {
      %cst_10 = arith.constant 0.000000e+00 : f32
      %12 = vector.broadcast %cst_10 : f32 to vector<16x128xf32>
      %c0_11 = arith.constant 0 : index
      %c0_12 = arith.constant 0 : index
      %13 = vector.load %arg7[%c0_11, %c0_12] : memref<16x128xf32, #tpu.memory_space<vmem>>, vector<16x128xf32>
      tpu.vector_store %arg7[%c0_11, %c0_12], %12 {strides = array<i32>} : memref<16x128xf32, #tpu.memory_space<vmem>>, vector<16x128xf32>,
    } else {
    }
    %c0 = arith.constant 0 : index
    %c0_1 = arith.constant 0 : index
    %3 = vector.load %arg7[%c0, %c0_1] : memref<16x128xf32, #tpu.memory_space<vmem>>, vector<16x128xf32>
    %c0_2 = arith.constant 0 : index
    %c0_3 = arith.constant 0 : index
    %4 = vector.load %arg3[%c0_2, %c0_3] : memref<16x256xbf16, #tpu.memory_space<vmem>>, vector<16x256xbf16>
    %c0_4 = arith.constant 0 : index
    %c0_5 = arith.constant 0 : index
    %5 = vector.load %arg4[%c0_4, %c0_5] : memref<256x128xbf16, #tpu.memory_space<vmem>>, vector<256x128xbf16>
    %cst = arith.constant dense<0.000000e+00> : vector<16x128xf32>
    %6 = tpu.matmul %4, %5, %cst {dimension_numbers = #tpu.dot_dimension_numbers<[1], [0], [0], [1], [0, 0, 1, 1], [], []>} : vector<16x256xbf16>, vector<256x128xbf16>, vector<16x128xf32> -> vector<16x128xf32>
    %7 = arith.addf %3, %6 : vector<16x128xf32>
    %c0_6 = arith.constant 0 : index
    %c0_7 = arith.constant 0 : index
    %8 = vector.load %arg7[%c0_6, %c0_7] : memref<16x128xf32, #tpu.memory_space<vmem>>, vector<16x128xf32>
    tpu.vector_store %arg7[%c0_6, %c0_7], %7 {strides = array<i32>} : memref<16x128xf32, #tpu.memory_space<vmem>>, vector<16x128xf32>,
    %c0_i32_8 = arith.constant 0 : i32
    %9 = arith.cmpi eq, %arg2, %c0_i32_8 : i32
    %10 = arith.extui %9 : i1 to i32
    %c0_i32_9 = arith.constant 0 : i32
    %11 = arith.cmpi ne, %10, %c0_i32_9 : i32
    scf.if %11 {
      %c0_10 = arith.constant 0 : index
      %c0_11 = arith.constant 0 : index
      %12 = vector.load %arg7[%c0_10, %c0_11] : memref<16x128xf32, #tpu.memory_space<vmem>>, vector<16x128xf32>
      %c0_12 = arith.constant 0 : index
      %c0_13 = arith.constant 0 : index
      %13 = vector.load %arg5[%c0_12, %c0_13] : memref<1x128xf32, #tpu.memory_space<vmem>>, vector<1x128xf32>
      %14 = vector.broadcast %13 : vector<1x128xf32> to vector<16x128xf32>
      %15 = arith.addf %12, %14 : vector<16x128xf32>
      %c0_14 = arith.constant 0 : index
      %c0_15 = arith.constant 0 : index
      %16 = vector.load %arg6[%c0_14, %c0_15] : memref<16x128xf32, #tpu.memory_space<vmem>>, vector<16x128xf32>
      tpu.vector_store %arg6[%c0_14, %c0_15], %15 {strides = array<i32>} : memref<16x128xf32, #tpu.memory_space<vmem>>, vector<16x128xf32>,
    } else {
    }
    return
  }
  func.func @transform_0(%arg0: i32, %arg1: i32, %arg2: i32) -> (i32, i32) {
    %c0_i32 = arith.constant 0 : i32
    return %arg0, %arg2 : i32, i32
  }
  func.func @transform_1(%arg0: i32, %arg1: i32, %arg2: i32) -> (i32, i32) {
    %c0_i32 = arith.constant 0 : i32
    return %arg2, %arg1 : i32, i32
  }
  func.func @transform_2(%arg0: i32, %arg1: i32, %arg2: i32) -> (i32, i32) {
    %c0_i32 = arith.constant 0 : i32
    %c0_i32_0 = arith.constant 0 : i32
    return %c0_i32, %arg1 : i32, i32
  }
  func.func @transform_3(%arg0: i32, %arg1: i32, %arg2: i32) -> (i32, i32) {
    %c0_i32 = arith.constant 0 : i32
    return %arg0, %arg1 : i32, i32
  }
}

</mosaic_0001>

<bundles_post_ra>
// kernel: repmlp_resnet_forward.26
= control target key start
LH: loop header
LB: loop body
LE: loop exit
PB: predicated region body
PF: predicated region fallthrough
CT: control target
= control target key end

     0   :  { %8 = vsyncpa [#allocation3], 0  ;;  %s1168_s0 = inlined_call_operand.hbm [shape: bf16[2,64,16], index: 0, kind: input, shape index: {}]   ;;  %s1169_s1 = inlined_call_operand.hbm [shape: bf16[16,8], index: 1, kind: input, shape index: {}]   ;;  %s1170_s2 = inlined_call_operand.hbm [shape: f32[1,8], index: 2, kind: input, shape index: {}]   ;;  %s1171_s3 = inlined_call_operand.hbm [shape: bf16[2,64,8], index: 3, kind: output, shape index: {}]  }
   0x1   :  { %10 = vsyncpa [#allocation3 + $0x1], 0 }
   0x2   :  { %11 = vsyncpa [#allocation6], 0 }
   0x3   :  { %12 = vsyncpa [#allocation4], 0 }
   0x4   :  { %14 = vsyncpa [#allocation4 + $0x1], 0  ;;  %s894_s12 = smov 0   ;;  %s896_s13 = smov 0  }
   0x5   :  { %s898_s14 = smov 0   ;;  %s900_s15 = smov 0  }
   0x6   :  { %s902_s16 = smov 0   ;;  %s904_s17 = smov 0  }
   0x7 LB: > { %s536_s18 = sadd.s32 4294967295, %s864_s17   ;;  %s537_s19 = sadd.s32 4294967294, %s864_s17   ;;  %s864_s17 = sphi %s904_s17, %s20_s17   ;;  %s860_s16 = sphi %s902_s16, %s1193_s16   ;;  %s856_s15 = sphi %s900_s15, %s1192_s15   ;;  %s852_s14 = sphi %s898_s14, %s1191_s14   ;;  %s848_s13 = sphi %s896_s13, %s1190_s13   ;;  %s844_s12 = sphi %s894_s12, %s1189_s12  }
   0x8   : > { %p52_p0 = scmp.ne.s32.totalorder %s848_s13, %s844_s12  ;;  %p928_p1 = scmp.eq.s32.totalorder %s536_s18, 0 }
   0x9   : > { %p932_p2 = scmp.eq.s32.totalorder %s536_s18, 1  ;;  %p136_p3 = scmp.eq.s32.totalorder %s537_s19, 1 }
   0xa   : > { %s1176_s20 = scalar_select %p928_p1, 1, 0 }
   0xb   : > { %p938_p4 = por %p928_p1, %p52_p0  ;;  %p538_p5 = scmp.ge.s32.totalorder %s864_s17, 1 }
   0xc   : > { %p943_p6 = por %p136_p3, %p52_p0  ;;  %p143_p7 = scmp.lt.s32.totalorder %s864_s17, 3 }
   0xd   : > { %s1178_s22 = scalar_select %p938_p4, 1, 0 }
   0xe   : > { %s1179_s23 = scalar_select %p943_p6, 1, 0 }
   0xf   : > { %p948_p8 = pnand %p538_p5, %p143_p7  ;;  %s866_s25 = smov [#allocation5]  }
  0x10   : > { %s157_s26 = sshll.u32 %s866_s25, 4  ;;  %s867_s28 = smov [#allocation7]   ;;  %s952_s26 = int_to_ptr.vmem [resolvable:$true] %s157_s26 }
  0x11   : > { %p612_p9 = pneg %p948_p8  ;;  %s173_s29 = sshll.u32 %s867_s28, 4  ;;  %s963_s29 = int_to_ptr.vmem [resolvable:$true] %s173_s29 }
  0x12   : > { %s692_s5 = scalar_lea.hbm %s1169_s1, 128 }
  0x13   : > { %p959_p11 = pnand %p612_p9, %p928_p1  ;;  %p693_p12 = scmp.ne.s32.totalorder %s1169_s1, %s692_s5 }
  0x14   : > { %p699_p5 = scmp.lt.u32.totalorder %s692_s5, %s1169_s1 }
  0x15   : > { %p694_p13 = pneg %p959_p11 }
  0x17   : > { %p695_p0 = pnand %p694_p13, %p693_p12 }
  0x19   : > { %p696_p3 = pneg %p695_p0 }
  0x1b   : > { %p701_p7 = pnand %p699_p5, %p696_p3 }
  0x1d   : > { %704 = shalt.err (!%p701_p7)
}
  0x1e   : > { %s705_s10 = scalar_lea.vmem %s952_s26, 128  ;;  %p713_p1 = scmp.lt.s32.totalorder %s952_s26, %s952_s26 }
  0x1f   : > { %p706_p9 = scmp.ne.s32.totalorder %s952_s26, %s705_s10  ;;  %p714_p12 = scmp.lt.s32.totalorder %s705_s10, %s705_s10 }
  0x21   : > { %p708_p10 = pnand %p706_p9, %p694_p13  ;;  %p715_p0 = por %p714_p12, %p713_p1 }
  0x23   : > { %p709_p6 = pneg %p708_p10 }
  0x25   : > { %p716_p4 = pnand %p715_p0, %p709_p6 }
  0x27   : > { %719 = shalt.err (!%p716_p4)
}
  0x28   : > { %s868_s11 = smov 64   ;;  %s869_s18 = smov 4  }
  0x29   : > { %615 = dma.hbm_to_vmem [thread:$0]  (!%p959_p11), %s1169_s1, 128, %s952_s26, [#allocation6], %s868_s11, %s868_s11, %s869_s18  }
  0x2a   : > { %s720_s4 = scalar_lea.hbm %s1170_s2, 16 }
  0x2b   : > { %p721_p1 = scmp.ne.s32.totalorder %s1170_s2, %s720_s4  ;;  %p727_p10 = scmp.lt.u32.totalorder %s720_s4, %s1170_s2 }
  0x2d   : > { %p723_p4 = pnand %p721_p1, %p694_p13 }
  0x2f   : > { %p724_p6 = pneg %p723_p4 }
  0x31   : > { %p729_p3 = pnand %p727_p10, %p724_p6 }
  0x33   : > { %732 = shalt.err (!%p729_p3)
}
  0x34   : > { %s733_s26 = scalar_lea.vmem %s963_s29, 16  ;;  %s740_s9 = scalar_lea.vmem %s963_s29, 32 }
  0x35   : > { %p734_p5 = scmp.ne.s32.totalorder %s963_s29, %s733_s26  ;;  %p741_p12 = scmp.lt.s32.totalorder %s963_s29, %s963_s29 }
  0x36   : > { %p742_p0 = scmp.lt.s32.totalorder %s740_s9, %s733_s26 }
  0x37   : > { %p736_p7 = pnand %p734_p5, %p694_p13 }
  0x38   : > { %p743_p1 = por %p742_p0, %p741_p12 }
  0x39   : > { %p737_p9 = pneg %p736_p7 }
  0x3b   : > { %p744_p4 = pnand %p743_p1, %p737_p9 }
  0x3d   : > { %747 = shalt.err (!%p744_p4)
}
  0x3e   : > { %618 = dma.hbm_to_vmem [thread:$0]  (!%p959_p11), %s1170_s2, 16, %s963_s29, [#allocation6]  }
  0x3f   : > { %s29_s25 = sadd.s32 1, %s860_s16  ;;  %s39_s28 = sadd.s32 1, %s852_s14 }
  0x40   : > { %p30_p13 = scmp.ge.s32.totalorder %s29_s25, 2  ;;  %p46_p6 = scmp.ne.s32.totalorder %s852_s14, %s848_s13 }
  0x41   : > { %p47_p10 = scmp.eq.s32.totalorder %s864_s17, 0  ;;  %p629_p3 = scmp.lt.s32.totalorder %s864_s17, 2 }
  0x42   : > { %s1195_s25 = smov (%p30_p13, %s29_s25), 0  ;;  %p1031_p7 = por %p932_p2, %p46_p6 }
  0x43   : > { %p48_p5 = por %p47_p10, %p46_p6  ;;  %s36_s30 = ssub.s32 %s860_s16, %s1195_s25 }
  0x44   : > { %s1182_s27 = scalar_select %p1031_p7, 1, 0 }
  0x45   : > { %s184_s4 = sand.u32 1, %s852_s14   ;;  %p37_p9 = scmp.eq.s32.totalorder %s36_s30, 0 }
  0x46   : > { %s542_s29 = sshll.u32 %s184_s4, 5  ;;  %s573_s5 = sshll.u32 %s860_s16, 9 }
  0x47   : > { %s1040_s6 = scalar_select %p37_p9, %s852_s14, %s39_s28  }
  0x48   : > { %s1045_s26 = scalar_lea.hbm %s1168_s0, %s573_s5  ;;  %s188_s21 = scalar_lea.vmem [#allocation2], %s542_s29 }
  0x49   : > { %s195_s9 = sshll.u32 %s188_s21, 4  ;;  %p1049_p2 = pnand %p629_p3, %p48_p5  ;;  %s1053_s9 = int_to_ptr.vmem [resolvable:$true] %s195_s9 }
  0x4a   : > { %s1055_s19 = scalar_lea.sflag [#allocation3], %s184_s4  ;;  %s748_s28 = scalar_lea.hbm %s1045_s26, 512 }
  0x4b   : > { %p749_p11 = scmp.ne.s32.totalorder %s1045_s26, %s748_s28  ;;  %p750_p12 = pneg %p1049_p2 }
  0x4c   : > { %s753_s5 = scalar_lea.hbm %s1168_s0, 1024  ;;  %p754_p4 = scmp.lt.u32.totalorder %s1045_s26, %s1168_s0 }
  0x4d   : > { %p751_p0 = pnand %p750_p12, %p749_p11  ;;  %p755_p13 = scmp.lt.u32.totalorder %s753_s5, %s748_s28 }
  0x4e   : > { %p757_p10 = scmp.lt.u32.totalorder %s748_s28, %s1045_s26 }
  0x4f   : > { %p752_p1 = pneg %p751_p0  ;;  %p756_p6 = por %p755_p13, %p754_p4 }
  0x51   : > { %p758_p3 = por %p757_p10, %p756_p6 }
  0x53   : > { %p759_p5 = pnand %p758_p3, %p752_p1 }
  0x55   : > { %762 = shalt.err (!%p759_p5)
}
  0x56   : > { %s763_s4 = scalar_lea.vmem %s1053_s9, 512  ;;  %s870_s21 = smov [#allocation2]  }
  0x57   : > { %p764_p9 = scmp.ne.s32.totalorder %s1053_s9, %s763_s4  ;;  %s768_s30 = sshll.u32 %s870_s21, 4  ;;  %s769_s30 = int_to_ptr.vmem [resolvable:$false] %s768_s30 }
  0x58   : > { %s770_s29 = scalar_lea.vmem %s769_s30, 1024  ;;  %p771_p7 = scmp.lt.s32.totalorder %s1053_s9, %s769_s30 }
  0x59   : > { %p766_p11 = pnand %p764_p9, %p750_p12  ;;  %p772_p4 = scmp.lt.s32.totalorder %s770_s29, %s763_s4 }
  0x5b   : > { %p767_p0 = pneg %p766_p11  ;;  %p773_p13 = por %p772_p4, %p771_p7 }
  0x5d   : > { %p774_p6 = pnand %p773_p13, %p767_p0 }
  0x5f   : > { %777 = shalt.err (!%p774_p6)
}
  0x60   : > { %622 = dma.hbm_to_vmem [thread:$0]  (!%p1049_p2), %s1045_s26, 512, %s1053_s9, %s1055_s19, %s868_s11, %s868_s11, %s869_s18  }
  0x61   : > { %207 = sbr.rel (%p948_p8) target bundleno = 349 (0x15d), region = 32  ;;  %s1089_s28 = sand.u32 (!%p948_p8), 1, %s848_s13  }
  0x62   : > { %s546_s5 = sshll.u32 (!%p948_p8), %s1089_s28, 5  ;;  %s210_s7 = scalar_lea.sflag (!%p948_p8), [#allocation3], %s1089_s28 }
  0x63   : > { %s213_s10 = scalar_lea.vmem (!%p948_p8), [#allocation2], %s546_s5  ;;  %p1184_p7 = scmp.ne.s32.totalorder (!%p948_p8), %s1178_s22, 0 }
  0x68   : > { %831 = dma.done.wait (%p1184_p7), %s210_s7, 512  }
  0x69   : > { %833 = vsyncadd (%p1184_p7), %s210_s7, 4294966784  ;;  %p1185_p2 = scmp.ne.s32.totalorder %s1176_s20, 0 }
  0x6b   : > { %835 = dma.done.wait (%p1185_p2), [#allocation6], 144  }
  0x6c   : > { %837 = vsyncadd (%p1185_p2), [#allocation6], 4294967152  ;;  %v687_v0 = vld [vmem:[#allocation5] sm:$0xff]   ;;  %vm288_vm0 = vcmask 130048   ;;  %v689_v2 = vld [vmem:[%s213_s10 + $0x10] sm:$0xff]   ;;  %vm406_vm1 = vcmask 60416  }
  0x6d   : > { %v688_v1 = vld [vmem:[%s213_s10] sm:$0xff]   ;;  %588 = vmatprep.subr.bf16.mxu0 %v687_v0  ;;  %598 = vmatprep.subr.bf16.mxu1 %v687_v0  ;;  %v690_v3 = vld [vmem:[%s213_s10 + $0x8] sm:$0xff]   ;;  %v691_v4 = vld [vmem:[%s213_s10 + $0x18] sm:$0xff]   ;;  %s582_s20 = sshll.u32 %s856_s15, 9  ;;  %s243_s22 = scalar_lea.vmem [#allocation8], %s546_s5 }
  0x6e   : > { %589 = vmatpush3.bf16.msra.mxu0 %v687_v0  ;;  %599 = vmatpush3.bf16.msra.mxu1 %v687_v0  ;;  %v550_v5 = vld [vmem:[#allocation7] ss:$0 sm:$0xff]  ;;  %s430_s24 = sshll.u32 %s243_s22, 4  ;;  %s1111_s18 = scalar_lea.hbm %s1171_s3, %s582_s20  ;;  %s1113_s24 = int_to_ptr.vmem [resolvable:$true] %s430_s24 }
  0x6f   : > { %590 = vmatprep.mubr.msk.bf16.mxu0 %vm288_vm0, %v688_v1  ;;  %594 = vmatprep.mubr.msk.bf16.mxu1 %vm288_vm0, %v689_v2  ;;  %s416_s26 = scalar_lea.sflag [#allocation4], %s1089_s28  ;;  %s778_s9 = scalar_lea.vmem %s1113_s24, 512 }
  0x70   : > { %p779_p8 = scmp.ne.s32.totalorder %s1113_s24, %s778_s9  ;;  %p1186_p12 = scmp.ne.s32.totalorder %s1182_s27, 0 }
  0x71   : > { %591 = vmatmul.mubr.msk.bf16.vlgmr.msra.gmra.mrb[0].mxu0 %vm288_vm0, %v690_v3  ;;  %595 = vmatmul.mubr.msk.bf16.vlgmr.msra.gmra.mrb[0].mxu1 %vm288_vm0, %v691_v4  ;;  %s871_s19 = smov [#allocation8]  }
  0x72   : > { %p780_p1 = pnand %p779_p8, %p1186_p12  ;;  %s782_s8 = sshll.u32 %s871_s19, 4  ;;  %s783_s8 = int_to_ptr.vmem [resolvable:$false] %s782_s8 }
  0x73   : > { %s784_s4 = scalar_lea.vmem %s783_s8, 1024  ;;  %p785_p3 = scmp.lt.s32.totalorder %s1113_s24, %s783_s8 }
  0x74   : > { %p781_p10 = pneg %p780_p1  ;;  %p786_p5 = scmp.lt.s32.totalorder %s784_s4, %s778_s9 }
  0x76   : > { %p787_p9 = por %p786_p5, %p785_p3 }
  0x78   : > { %p788_p11 = pnand %p787_p9, %p781_p10 }
 0x144   : > { %v592_v6 = vpop.f32.mrb[0].mxu0  ;;  %v596_v7 = vpop.f32.mrb[0].mxu1 }
 0x145   : > { %v344_v8 = vadd.f32 %v592_v6, %v550_v5  ;;  %v360_v9 = vadd.f32 %v596_v7, %v550_v5  ;;  %v335_v10 = vpop.f32.mrb[1].mxu0  ;;  %v351_v11 = vpop.f32.mrb[1].mxu1 }
 0x146   : > { %v336_v12 = vadd.f32 %v550_v5, %v335_v10  ;;  %v352_v13 = vadd.f32 %v550_v5, %v351_v11  ;;  %v593_v14 = vpop.f32.mrb[2].mxu0  ;;  %v597_v15 = vpop.f32.mrb[2].mxu1 }
 0x147   : > { %v368_v16 = vmax.f32 %v344_v8, 0.0  ;;  %v372_v17 = vmax.f32 %v360_v9, 0.0  ;;  %v347_v18 = vadd.f32 %v593_v14, %v550_v5  ;;  %v363_v19 = vadd.f32 %v597_v15, %v550_v5  ;;  %v338_v20 = vpop.f32.mrb[3].mxu0  ;;  %v354_v21 = vpop.f32.mrb[3].mxu1 }
 0x148   : > { %v366_v22 = vmax.f32 %v336_v12, 0.0  ;;  %v370_v23 = vmax.f32 %v352_v13, 0.0  ;;  %v339_v24 = vadd.f32 %v550_v5, %v338_v20  ;;  %v355_v25 = vadd.f32 %v550_v5, %v354_v21 }
 0x149   : > { %v576_v26 = vpack.c.bf16 %v368_v16, %v368_v16  ;;  %v580_v27 = vpack.c.bf16 %v372_v17, %v372_v17  ;;  %v369_v28 = vmax.f32 %v347_v18, 0.0  ;;  %v373_v29 = vmax.f32 %v363_v19, 0.0 }
 0x14a   : > { %v574_v30 = vpack.c.bf16 %v366_v22, %v366_v22  ;;  %v578_v31 = vpack.c.bf16 %v370_v23, %v370_v23  ;;  %v367_v32 = vmax.f32 %v339_v24, 0.0  ;;  %v371_v33 = vmax.f32 %v355_v25, 0.0 }
 0x14b   : > { %409 = vst.msk [vmem:[%s243_s22 + $0x8] sm:$0xf] %vm406_vm1, %v576_v26  ;;  %413 = vst.msk [vmem:[%s243_s22 + $0x18] sm:$0xf] %vm406_vm1, %v580_v27  ;;  %v577_v34 = vpack.c.bf16 %v369_v28, %v369_v28  ;;  %v581_v35 = vpack.c.bf16 %v373_v29, %v373_v29 }
 0x14c   : > { %407 = vst.msk [vmem:[%s243_s22] sm:$0xf] %vm406_vm1, %v574_v30  ;;  %411 = vst.msk [vmem:[%s243_s22 + $0x10] sm:$0xf] %vm406_vm1, %v578_v31  ;;  %v575_v36 = vpack.c.bf16 %v367_v32, %v367_v32  ;;  %v579_v37 = vpack.c.bf16 %v371_v33, %v371_v33 }
 0x14d   : > { %410 = vst.msk [vmem:[%s243_s22 + $0xc] sm:$0xf] %vm406_vm1, %v577_v34  ;;  %414 = vst.msk [vmem:[%s243_s22 + $0x1c] sm:$0xf] %vm406_vm1, %v581_v35 }
 0x14e   : > { %408 = vst.msk [vmem:[%s243_s22 + $0x4] sm:$0xf] %vm406_vm1, %v575_v36  ;;  %412 = vst.msk [vmem:[%s243_s22 + $0x14] sm:$0xf] %vm406_vm1, %v579_v37 }
 0x14f   : > { %791 = shalt.err (!%p788_p11)
}
 0x150   : > { %s792_s21 = scalar_lea.hbm %s1111_s18, 512  ;;  %s796_s5 = scalar_lea.hbm %s1171_s3, 1024 }
 0x151   : > { %p793_p0 = scmp.ne.s32.totalorder %s1111_s18, %s792_s21  ;;  %p797_p6 = scmp.lt.u32.totalorder %s1111_s18, %s1171_s3 }
 0x152   : > { %p798_p7 = scmp.lt.u32.totalorder %s796_s5, %s792_s21  ;;  %p800_p8 = scmp.lt.u32.totalorder %s792_s21, %s1111_s18 }
 0x153   : > { %p794_p4 = pnand %p793_p0, %p1186_p12 }
 0x154   : > { %p799_p2 = por %p798_p7, %p797_p6 }
 0x155   : > { %p795_p13 = pneg %p794_p4 }
 0x156   : > { %p801_p1 = por %p800_p8, %p799_p2 }
 0x158   : > { %p802_p10 = pnand %p801_p1, %p795_p13 }
 0x15a   : > { %805 = shalt.err (!%p802_p10)
}
 0x15b   : > { %s872_s20 = smov 64   ;;  %s873_s22 = smov 4  }
 0x15c   : > { %610 = dma.vmem_to_hbm [thread:$0]  (%p1186_p12), %s1113_s24, 512, %s1111_s18, %s416_s26, %s872_s20, %s872_s20, %s873_s22  }
 0x15d PF: > { %s445_s15 = sand.u32 1, %s844_s12   ;;  %p1187_p3 = scmp.ne.s32.totalorder %s1179_s23, 0 }
 0x15e   : > { %p1188_p5 = scmp.ge.s32.totalorder %s864_s17, 2  ;;  %s446_s11 = scalar_lea.sflag [#allocation4], %s445_s15 }
 0x160   : > { %p624_p9 = pnand %p1188_p5, %p1187_p3 }
 0x162   : > { %839 = dma.done.wait (!%p624_p9), %s446_s11, 512  }
 0x163   : > { %841 = vsyncadd (!%p624_p9), %s446_s11, 4294966784  ;;  %s20_s17 = sadd.s32 1, %s864_s17   ;;  %s1189_s12 = smov %s848_s13 }
 0x164   : > { %p17_p11 = scmp.ge.s32.totalorder %s20_s17, 4   ;;  %s1190_s13 = smov %s852_s14 }
 0x165   : > { %s1191_s14 = smov %s1040_s6  ;;  %s1192_s15 = smov %s860_s16 }
 0x166   : > { %s1193_s16 = smov %s1195_s25  ;;  %19 = sbr.rel (!%p17_p11) target bundleno = 7 (0x7), region = 87 }
 0x16d   :  { %451 = vsyncpa [#allocation3], 1 }
 0x16e   :  { %453 = vsyncpa [#allocation3 + $0x1], 1 }
 0x16f   :  { %454 = vsyncpa [#allocation6], 1 }
 0x170   :  { %455 = vsyncpa [#allocation4], 1 }
 0x171   :  { %457 = vsyncpa [#allocation4 + $0x1], 1 }

// kernel: repmlp_resnet_forward.24
= control target key start
LH: loop header
LB: loop body
LE: loop exit
PB: predicated region body
PF: predicated region fallthrough
CT: control target
= control target key end

     0   :  { %9 = vsyncpa [#allocation3], 0  ;;  %s1426_s0 = inlined_call_operand.vmem [shape: bf16[2,9,9,16], index: 0, kind: input, shape index: {}]   ;;  %s1427_s1 = inlined_call_operand.vmem [shape: bf16[2,9,9,16], index: 1, kind: input, shape index: {}]   ;;  %s1428_s2 = inlined_call_operand.vmem [shape: bf16[2,9,9,16], index: 2, kind: input, shape index: {}]   ;;  %s1429_s3 = inlined_call_operand.vmem [shape: bf16[2,9,9,16], index: 3, kind: input, shape index: {}]   ;;  %s1430_s4 = inlined_call_operand.hbm [shape: bf16[2,8,8,16], index: 4, kind: output, shape index: {}]  }
   0x1   :  { %11 = vsyncpa [#allocation3 + $0x1], 0  ;;  %s1051_s15 = smov 0   ;;  %s1053_s16 = smov 0  }
   0x2   :  { %s1055_s17 = smov 0   ;;  %s1057_s18 = smov 0  }
   0x3 LB: > { %s1072_s19 = sadd.s32 4294967295, %s1021_s18   ;;  %s878_s20 = sadd.s32 4294967294, %s1021_s18   ;;  %s1021_s18 = sphi %s1057_s18, %s1438_s18   ;;  %s1017_s17 = sphi %s1055_s17, %s1437_s17   ;;  %s1013_s16 = sphi %s1053_s16, %s1436_s16   ;;  %s1009_s15 = sphi %s1051_s15, %s1435_s15  }
   0x4   : > { %s1076_s21 = sadd.s32 1, %s1021_s18   ;;  %s128_s22 = sadd.s32 1, %s1017_s17 }
   0x5   : > { %s125_s23 = ssub.s32 %s1021_s18, %s1076_s21  ;;  %p138_p0 = scmp.ne.s32.totalorder %s1017_s17, %s1013_s16 }
   0x6   : > { %p126_p1 = scmp.eq.s32.totalorder %s125_s23, 0  ;;  %p139_p2 = scmp.eq.s32.totalorder %s1072_s19, 1 }
   0x7   : > { %p144_p3 = scmp.ne.s32.totalorder %s1013_s16, %s1009_s15  ;;  %p145_p4 = scmp.eq.s32.totalorder %s878_s20, 1 }
   0x8   : > { %s1087_s24 = scalar_select %p126_p1, %s1017_s17, %s128_s22  }
   0x9   : > { %p1089_p5 = por %p139_p2, %p138_p0  ;;  %p1093_p6 = por %p145_p4, %p144_p3 }
   0xa   : > { %p881_p7 = scmp.ge.s32.totalorder %s1021_s18, 1  ;;  %p195_p8 = scmp.lt.s32.totalorder %s1021_s18, 3 }
   0xc   : > { %p196_p9 = pnand %p881_p7, %p195_p8 }
   0xd   : > { %p236_p10 = scmp.lt.s32.totalorder (!%p196_p9), %s1072_s19, 1  ;;  %vm288_vm0 = vsmask.f32 (!%p196_p9), 3328  ;;  %vm289_vm1 = vsmask.f32 (!%p196_p9), 7440  ;;  %s233_s20 = sand.u32 (!%p196_p9), 1, %s1013_s16  }
   0xe   : > { %199 = sbr.rel (%p196_p9) target bundleno = 123 (0x7b), region = 36  ;;  %vm1135_vm2 = vmor (!%p196_p9), %vm288_vm0, %vm289_vm1  ;;  %vm757_vm3 = vcmask (!%p196_p9), 125952   ;;  %s1182_s22 = sshll.u32 (!%p196_p9), %s233_s20, 5 }
   0xf   : > { %s1216_s23 = scalar_lea.vmem (!%p196_p9), [#allocation2], %s1182_s22  ;;  %s1385_s6 = scalar_lea.sflag (!%p196_p9), [#allocation3], %s233_s20 }
  0x15   : > { %s237_s27 = scalar_select %p236_p10, %s1072_s19, 1 }
  0x17   : > { %s1101_s28 = smul.u32 72, %s237_s27  ;;  %s780_s27 = sshll.u32 %s1216_s23, 4  ;;  %s1374_s27 = int_to_ptr.vmem [resolvable:$true] %s780_s27 }
  0x18   : > { %s959_s7 = scalar_lea.vmem %s1374_s27, 512 }
  0x19   : > { %s1107_s5 = scalar_lea.vmem %s1426_s0, %s1101_s28  ;;  %s1113_s8 = scalar_lea.vmem %s1427_s1, %s1101_s28 }
  0x1a   : > { %s1119_s11 = scalar_lea.vmem %s1428_s2, %s1101_s28  ;;  %v256_v0 = vld [vmem:[%s1107_s5] sm:$0xf]  ;;  %v280_v1 = vld [vmem:[%s1107_s5 + $0x4] sm:$0x1]  ;;  %v1127_v13 = vld [vmem:[%s1107_s5 + $0x8] sm:$0xf]  ;;  %s1148_s14 = scalar_lea.vmem %s1429_s3, %s1101_s28 }
  0x1b   : > { %v292_v2 = vshrl.u32 %v256_v0, 16  ;;  %v295_v3 = vshll.u32 %v256_v0, 16  ;;  %v301_v4 = vshll.u32 %v280_v1, 16  ;;  %v419_v5 = vld [vmem:[%s1119_s11] sm:$0xf]  ;;  %v630_v19 = vshrl.u32 %v1127_v13, 16  ;;  %p960_p11 = scmp.ne.s32.totalorder %s1374_s27, %s959_s7 }
  0x1c   : > { %v264_v6 = vld [vmem:[%s1113_s8] sm:$0xf]  ;;  %v451_v7 = vld [vmem:[%s1119_s11 + $0x4] sm:$0x1]  ;;  %v460_v8 = vshrl.u32 %v419_v5, 16  ;;  %v463_v9 = vshll.u32 %v419_v5, 16 }
  0x1d   : > { %v294_v10 = vrot.slane %v292_v2, 4  ;;  %v297_v11 = vrot.slane %v295_v3, 5  ;;  %v469_v12 = vshll.u32 %v451_v7, 16  ;;  %v903_v16 = vld [vmem:[%s1107_s5 + $0xc] sm:$0x1]  ;;  %v303_v18 = vrot.slane %v301_v4, 5  ;;  %p961_p12 = pnand %p960_p11, %p1089_p5 }
  0x1e   : > { %v462_v14 = vrot.slane %v460_v8, 4  ;;  %v465_v15 = vrot.slane %v463_v9, 5  ;;  %v633_v20 = vshll.u32 %v1127_v13, 16  ;;  %v257_v21 = vld [vmem:[%s1107_s5 + $0x8] sm:$0xf]  ;;  %v272_v22 = vmax.bf16 %v264_v6, %v256_v0  ;;  %s916_s28 = sshll.u32 %s1072_s19, 9 }
  0x1f   : > { %v298_v17 = vor.u32 %v297_v11, %v294_v10  ;;  %v639_v25 = vshll.u32 %v903_v16, 16  ;;  %v265_v26 = vld [vmem:[%s1113_s8 + $0x8] sm:$0xf]  ;;  %v281_v27 = vld [vmem:[%s1107_s5 + $0xc] sm:$0x1]  ;;  %v306_v28 = vshrl.u32 %v257_v21, 16  ;;  %p962_p13 = pneg %p961_p12 }
  0x20   : > { %v466_v24 = vor.u32 %v465_v15, %v462_v14  ;;  %v471_v30 = vrot.slane %v469_v12, 5  ;;  %v632_v31 = vrot.slane %v630_v19, 4  ;;  %v635_v32 = vrot.slane %v633_v20, 5  ;;  %v1142_v33 = vld [vmem:[%s1119_s11 + $0x8] sm:$0xf]  ;;  %s1023_s19 = smov [#allocation2]  }
  0x21   : > { %v299_v29 = vrot.slane %v298_v17, 4  ;;  %v273_v35 = vmax.bf16 %v265_v26, %v257_v21  ;;  %v308_v36 = vrot.slane %v306_v28, 4  ;;  %v309_v37 = vshll.u32 %v257_v21, 16  ;;  %v452_v41 = vld [vmem:[%s1119_s11 + $0xc] sm:$0x1] }
  0x22   : > { %v467_v34 = vrot.slane %v466_v24, 4  ;;  %v636_v39 = vor.u32 %v635_v32, %v632_v31  ;;  %v315_v40 = vshll.u32 %v281_v27, 16  ;;  %v474_v42 = vshrl.u32 %v1142_v33, 16  ;;  %v1155_v43 = vld [vmem:[%s1107_s5 + $0x10] sm:$0xf] }
  0x23   : > { %v304_v38 = vsel %vm1135_vm2, %v299_v29, %v303_v18  ;;  %v1157_v45 = vrot.slane %v639_v25, 5  ;;  %v311_v46 = vrot.slane %v309_v37, 5  ;;  %v477_v47 = vshll.u32 %v1142_v33, 16  ;;  %v904_v48 = vld [vmem:[%s1107_s5 + $0x14] sm:$0x1] }
  0x24   : > { %v411_v44 = vmax.bf16 %v304_v38, %v272_v22  ;;  %v435_v49 = vld [vmem:[%s1148_s14] sm:$0xf]  ;;  %v637_v50 = vrot.slane %v636_v39, 4  ;;  %v317_v51 = vrot.slane %v315_v40, 5  ;;  %v476_v52 = vrot.slane %v474_v42, 4 }
  0x25   : > { %v483_v53 = vshll.u32 %v452_v41, 16  ;;  %v312_v55 = vor.u32 %v311_v46, %v308_v36  ;;  %v479_v56 = vrot.slane %v477_v47, 5  ;;  %v644_v57 = vshrl.u32 %v1155_v43, 16  ;;  %v1164_v58 = vld [vmem:[%s1107_s5 + $0x10] sm:$0xf] }
  0x26   : > { %v427_v54 = vmax.bf16 %v419_v5, %v411_v44  ;;  %v472_v59 = vsel %vm1135_vm2, %v467_v34, %v471_v30  ;;  %v647_v61 = vshll.u32 %v1155_v43, 16  ;;  %v653_v62 = vshll.u32 %v904_v48, 16  ;;  %v282_v3 = vld [vmem:[%s1107_s5 + $0x14] sm:$0x1]  ;;  %v1178_v8 = vld [vmem:[%s1119_s11 + $0x10] sm:$0xf] }
  0x27   : > { %v485_v60 = vrot.slane %v483_v53, 5  ;;  %v313_v0 = vrot.slane %v312_v55, 4  ;;  %v480_v1 = vor.u32 %v479_v56, %v476_v52  ;;  %v646_v2 = vrot.slane %v644_v57, 4  ;;  %v895_v10 = vld [vmem:[%s1113_s8 + $0x8] sm:$0xf] }
  0x28   : > { %v443_v63 = vmax.bf16 %v435_v49, %v427_v54  ;;  %v642_v4 = vsel %vm1135_vm2, %v637_v50, %v1157_v45  ;;  %v649_v5 = vrot.slane %v647_v61, 5  ;;  %v1174_v6 = vrot.slane %v653_v62, 5  ;;  %v436_v16 = vld [vmem:[%s1148_s14 + $0x8] sm:$0xf]  ;;  %v453_v20 = vld [vmem:[%s1119_s11 + $0x14] sm:$0x1] }
  0x29   : > { %v320_v7 = vshrl.u32 %v1164_v58, 16  ;;  %v318_v11 = vsel %vm1135_vm2, %v313_v0, %v317_v51  ;;  %v481_v12 = vrot.slane %v480_v1, 4  ;;  %v323_v14 = vshll.u32 %v1164_v58, 16  ;;  %v266_v24 = vld [vmem:[%s1113_s8 + $0x10] sm:$0xf] }
  0x2a   : > { %v579_v9 = vmax.bf16 %v472_v59, %v443_v63  ;;  %v412_v15 = vmax.bf16 %v318_v11, %v273_v35  ;;  %v650_v17 = vor.u32 %v649_v5, %v646_v2  ;;  %v329_v19 = vshll.u32 %v282_v3, 16  ;;  %v1196_v27 = vld [vmem:[%s1107_s5 + $0x18] sm:$0xf]  ;;  %v905_v36 = vld [vmem:[%s1107_s5 + $0x1c] sm:$0x1] }
  0x2b   : > { %v322_v18 = vrot.slane %v320_v7, 4  ;;  %v486_v22 = vsel %vm1135_vm2, %v481_v12, %v485_v60  ;;  %v325_v25 = vrot.slane %v323_v14, 5  ;;  %v488_v26 = vshrl.u32 %v1178_v8, 16  ;;  %v1211_v46 = vld [vmem:[%s1113_s8 + $0x18] sm:$0xf] }
  0x2c   : > { %v596_v21 = vmax.bf16 %v1127_v13, %v579_v9  ;;  %v428_v28 = vmax.bf16 %v1142_v33, %v412_v15  ;;  %v651_v29 = vrot.slane %v650_v17, 4  ;;  %v331_v30 = vrot.slane %v329_v19, 5  ;;  %v1204_v33 = vld [vmem:[%s1107_s5 + $0x18] sm:$0xf]  ;;  %v896_v48 = vld [vmem:[%s1113_s8 + $0x10] sm:$0xf] }
  0x2d   : > { %v491_v31 = vshll.u32 %v1178_v8, 16  ;;  %v326_v13 = vor.u32 %v325_v25, %v322_v18  ;;  %v490_v34 = vrot.slane %v488_v26, 4  ;;  %v497_v35 = vshll.u32 %v453_v20, 16  ;;  %v283_v52 = vld [vmem:[%s1107_s5 + $0x1c] sm:$0x1] }
  0x2e   : > { %v613_v32 = vmax.bf16 %v895_v10, %v596_v21  ;;  %v444_v37 = vmax.bf16 %v436_v16, %v428_v28  ;;  %v274_v38 = vmax.bf16 %v266_v24, %v1164_v58  ;;  %v658_v40 = vshrl.u32 %v1196_v27, 16  ;;  %v1224_v57 = vld [vmem:[%s1119_s11 + $0x18] sm:$0xf]  ;;  %v437_v60 = vld [vmem:[%s1148_s14 + $0x10] sm:$0xf] }
  0x2f   : > { %v493_v39 = vrot.slane %v491_v31, 5  ;;  %v656_v42 = vsel %vm1135_vm2, %v651_v29, %v1174_v6  ;;  %v327_v44 = vrot.slane %v326_v13, 4  ;;  %v661_v45 = vshll.u32 %v1196_v27, 16  ;;  %v454_v3 = vld [vmem:[%s1119_s11 + $0x1c] sm:$0x1] }
  0x30   : > { %v749_v41 = vmax.bf16 %v642_v4, %v613_v32  ;;  %v580_v47 = vmax.bf16 %v486_v22, %v444_v37  ;;  %v660_v50 = vrot.slane %v658_v40, 4  ;;  %v667_v51 = vshll.u32 %v905_v36, 16  ;;  %v1235_v7 = vld [vmem:[%s1107_s5 + $0x20] sm:$0xf]  ;;  %v906_v14 = vld [vmem:[%s1107_s5 + $0x24] sm:$0x1] }
  0x31   : > { %v494_v49 = vor.u32 %v493_v39, %v490_v34  ;;  %v332_v53 = vsel %vm1135_vm2, %v327_v44, %v331_v30  ;;  %v499_v54 = vrot.slane %v497_v35, 5  ;;  %v663_v55 = vrot.slane %v661_v45, 5  ;;  %v1243_v22 = vld [vmem:[%s1107_s5 + $0x20] sm:$0xf]  ;;  %v284_v29 = vld [vmem:[%s1107_s5 + $0x24] sm:$0x1] }
  0x32   : > { %758 = vst.msk [vmem:[%s1216_s23] sm:$0xf] %vm757_vm3, %v749_v41  ;;  %v334_v56 = vshrl.u32 %v1204_v33, 16  ;;  %v597_v58 = vmax.bf16 %v1155_v43, %v580_v47  ;;  %v413_v59 = vmax.bf16 %v332_v53, %v274_v38  ;;  %v275_v62 = vmax.bf16 %v1211_v46, %v1204_v33  ;;  %v897_v30 = vld [vmem:[%s1113_s8 + $0x18] sm:$0xf] }
  0x33   : > { %v495_v61 = vrot.slane %v494_v49, 4  ;;  %v664_v63 = vor.u32 %v663_v55, %v660_v50  ;;  %v337_v1 = vshll.u32 %v1204_v33, 16  ;;  %v343_v2 = vshll.u32 %v283_v52, 16  ;;  %v1257_v39 = vld [vmem:[%s1119_s11 + $0x20] sm:$0xf] }
  0x34   : > { %v336_v0 = vrot.slane %v334_v56, 4  ;;  %v614_v4 = vmax.bf16 %v896_v48, %v597_v58  ;;  %v429_v5 = vmax.bf16 %v1178_v8, %v413_v59  ;;  %v669_v6 = vrot.slane %v667_v51, 5  ;;  %v438_v33 = vld [vmem:[%s1148_s14 + $0x18] sm:$0xf]  ;;  %v455_v48 = vld [vmem:[%s1119_s11 + $0x24] sm:$0x1] }
  0x35   : > { %v502_v43 = vshrl.u32 %v1224_v57, 16  ;;  %v500_v9 = vsel %vm1135_vm2, %v495_v61, %v499_v54  ;;  %v665_v10 = vrot.slane %v664_v63, 4  ;;  %v339_v11 = vrot.slane %v337_v1, 5  ;;  %v1265_v49 = vld [vmem:[%s1107_s5 + $0x28] sm:$0xf] }
  0x36   : > { %v505_v12 = vshll.u32 %v1224_v57, 16  ;;  %v750_v15 = vmax.bf16 %v656_v42, %v614_v4  ;;  %v445_v16 = vmax.bf16 %v437_v60, %v429_v5  ;;  %v511_v17 = vshll.u32 %v454_v3, 16  ;;  %v268_v51 = vld [vmem:[%s1113_s8 + $0x20] sm:$0xf]  ;;  %v907_v63 = vld [vmem:[%s1107_s5 + $0x2c] sm:$0x1] }
  0x37   : > { %v504_v8 = vrot.slane %v502_v43, 4  ;;  %v340_v18 = vor.u32 %v339_v11, %v336_v0  ;;  %v345_v19 = vrot.slane %v343_v2, 5  ;;  %v672_v21 = vshrl.u32 %v1235_v7, 16  ;;  %v261_v4 = vld [vmem:[%s1107_s5 + $0x28] sm:$0xf] }
  0x38   : > { %v507_v20 = vrot.slane %v505_v12, 5  ;;  %759 = vst.msk [vmem:[%s1216_s23 + $0x4] sm:$0xf] %vm757_vm3, %v750_v15  ;;  %v581_v24 = vmax.bf16 %v500_v9, %v445_v16  ;;  %v670_v25 = vsel %vm1135_vm2, %v665_v10, %v669_v6  ;;  %v675_v26 = vshll.u32 %v1235_v7, 16  ;;  %v269_v5 = vld [vmem:[%s1113_s8 + $0x28] sm:$0xf] }
  0x39   : > { %v681_v28 = vshll.u32 %v906_v14, 16  ;;  %v341_v31 = vrot.slane %v340_v18, 4  ;;  %v513_v13 = vrot.slane %v511_v17, 5  ;;  %v674_v34 = vrot.slane %v672_v21, 4  ;;  %v285_v16 = vld [vmem:[%s1107_s5 + $0x2c] sm:$0x1] }
  0x3a   : > { %v508_v32 = vor.u32 %v507_v20, %v504_v8  ;;  %v598_v35 = vmax.bf16 %v1196_v27, %v581_v24  ;;  %v677_v36 = vrot.slane %v675_v26, 5  ;;  %v348_v38 = vshrl.u32 %v1243_v22, 16  ;;  %v1286_v8 = vld [vmem:[%s1119_s11 + $0x28] sm:$0xf]  ;;  %v898_v17 = vld [vmem:[%s1113_s8 + $0x20] sm:$0xf] }
  0x3b   : > { %v1253_v37 = vrot.slane %v681_v28, 5  ;;  %v346_v40 = vsel %vm1135_vm2, %v341_v31, %v345_v19  ;;  %v351_v42 = vshll.u32 %v1243_v22, 16  ;;  %v357_v44 = vshll.u32 %v284_v29, 16 }
  0x3c   : > { %v509_v41 = vrot.slane %v508_v32, 4  ;;  %v615_v45 = vmax.bf16 %v897_v30, %v598_v35  ;;  %v414_v46 = vmax.bf16 %v346_v40, %v275_v62  ;;  %v678_v47 = vor.u32 %v677_v36, %v674_v34  ;;  %v456_v32 = vld [vmem:[%s1119_s11 + $0x2c] sm:$0x1] }
  0x3d   : > { %v350_v27 = vrot.slane %v348_v38, 4  ;;  %v353_v52 = vrot.slane %v351_v42, 5  ;;  %v359_v53 = vrot.slane %v357_v44, 5  ;;  %v516_v54 = vshrl.u32 %v1257_v39, 16  ;;  %v908_v42 = vld [vmem:[%s1107_s5 + $0x34] sm:$0x1] }
  0x3e   : > { %v514_v50 = vsel %vm1135_vm2, %v509_v41, %v513_v13  ;;  %v751_v55 = vmax.bf16 %v670_v25, %v615_v45  ;;  %v430_v56 = vmax.bf16 %v1224_v57, %v414_v46  ;;  %v679_v58 = vrot.slane %v678_v47, 4  ;;  %v439_v25 = vld [vmem:[%s1148_s14 + $0x20] sm:$0xf] }
  0x3f   : > { %v519_v59 = vshll.u32 %v1257_v39, 16  ;;  %v354_v60 = vor.u32 %v353_v52, %v350_v27  ;;  %v518_v61 = vrot.slane %v516_v54, 4  ;;  %v525_v62 = vshll.u32 %v455_v48, 16 }
  0x40   : > { %v686_v0 = vshrl.u32 %v1265_v49, 16  ;;  %760 = vst.msk [vmem:[%s1216_s23 + $0x8] sm:$0xf] %vm757_vm3, %v751_v55  ;;  %v446_v1 = vmax.bf16 %v438_v33, %v430_v56  ;;  %v276_v2 = vmax.bf16 %v268_v51, %v1243_v22  ;;  %v689_v57 = vshll.u32 %v1265_v49, 16  ;;  %v1306_v51 = vld [vmem:[%s1107_s5 + $0x30] sm:$0xf] }
  0x41   : > { %v521_v3 = vrot.slane %v519_v59, 5  ;;  %v684_v6 = vsel %vm1135_vm2, %v679_v58, %v1253_v37  ;;  %v355_v43 = vrot.slane %v354_v60, 4  ;;  %v527_v9 = vrot.slane %v525_v62, 5  ;;  %v286_v55 = vld [vmem:[%s1107_s5 + $0x34] sm:$0x1] }
  0x42   : > { %v688_v10 = vrot.slane %v686_v0, 4  ;;  %v582_v11 = vmax.bf16 %v514_v50, %v446_v1  ;;  %v691_v14 = vrot.slane %v689_v57, 5  ;;  %v695_v15 = vshll.u32 %v907_v63, 16  ;;  %v899_v56 = vld [vmem:[%s1113_s8 + $0x28] sm:$0xf] }
  0x43   : > { %v522_v12 = vor.u32 %v521_v3, %v518_v61  ;;  %v360_v18 = vsel %vm1135_vm2, %v355_v43, %v359_v53  ;;  %v277_v19 = vmax.bf16 %v269_v5, %v261_v4  ;;  %v362_v20 = vshrl.u32 %v261_v4, 16  ;;  %v1315_v62 = vld [vmem:[%s1119_s11 + $0x30] sm:$0xf]  ;;  %v440_v3 = vld [vmem:[%s1148_s14 + $0x28] sm:$0xf] }
  0x44   : > { %v365_v21 = vshll.u32 %v261_v4, 16  ;;  %v599_v22 = vmax.bf16 %v1235_v7, %v582_v11  ;;  %v415_v24 = vmax.bf16 %v360_v18, %v276_v2  ;;  %v692_v28 = vor.u32 %v691_v14, %v688_v10  ;;  %v1299_v7 = vld [vmem:[%s1107_s5 + $0x30] sm:$0xf] }
  0x45   : > { %v523_v26 = vrot.slane %v522_v12, 4  ;;  %v364_v29 = vrot.slane %v362_v20, 4  ;;  %v371_v31 = vshll.u32 %v285_v16, 16  ;;  %v530_v13 = vshrl.u32 %v1286_v8, 16  ;;  %v1327_v12 = vld [vmem:[%s1107_s5 + $0x38] sm:$0xf] }
  0x46   : > { %v367_v30 = vrot.slane %v365_v21, 5  ;;  %v616_v34 = vmax.bf16 %v898_v17, %v599_v22  ;;  %v431_v35 = vmax.bf16 %v1257_v39, %v415_v24  ;;  %v697_v37 = vrot.slane %v695_v15, 5  ;;  %v270_v17 = vld [vmem:[%s1113_s8 + $0x30] sm:$0xf]  ;;  %v909_v22 = vld [vmem:[%s1107_s5 + $0x3c] sm:$0x1] }
  0x47   : > { %v528_v36 = vsel %vm1135_vm2, %v523_v26, %v527_v9  ;;  %v373_v40 = vrot.slane %v371_v31, 5  ;;  %v532_v33 = vrot.slane %v530_v13, 4  ;;  %v533_v41 = vshll.u32 %v1286_v8, 16  ;;  %v900_v24 = vld [vmem:[%s1113_s8 + $0x30] sm:$0xf] }
  0x48   : > { %v368_v38 = vor.u32 %v367_v30, %v364_v29  ;;  %v752_v44 = vmax.bf16 %v684_v6, %v616_v34  ;;  %v447_v45 = vmax.bf16 %v439_v25, %v431_v35  ;;  %v693_v46 = vrot.slane %v692_v28, 4  ;;  %v263_v34 = vld [vmem:[%s1107_s5 + $0x38] sm:$0xf]  ;;  %v287_v35 = vld [vmem:[%s1107_s5 + $0x3c] sm:$0x1] }
  0x49   : > { %v539_v39 = vshll.u32 %v456_v32, 16  ;;  %v535_v27 = vrot.slane %v533_v41, 5  ;;  %v700_v48 = vshrl.u32 %v1299_v7, 16  ;;  %v703_v50 = vshll.u32 %v1299_v7, 16 }
  0x4a   : > { %v369_v47 = vrot.slane %v368_v38, 4  ;;  %761 = vst.msk [vmem:[%s1216_s23 + $0xc] sm:$0xf] %vm757_vm3, %v752_v44  ;;  %v583_v52 = vmax.bf16 %v528_v36, %v447_v45  ;;  %v709_v54 = vshll.u32 %v908_v42, 16  ;;  %v698_v0 = vsel %vm1135_vm2, %v693_v46, %v697_v37  ;;  %v426_v46 = vld [vmem:[%s1119_s11 + $0x38] sm:$0xf] }
  0x4b   : > { %v541_v53 = vrot.slane %v539_v39, 5  ;;  %v536_v59 = vor.u32 %v535_v27, %v532_v33  ;;  %v702_v60 = vrot.slane %v700_v48, 4  ;;  %v705_v61 = vrot.slane %v703_v50, 5  ;;  %v271_v33 = vld [vmem:[%s1113_s8 + $0x38] sm:$0xf] }
  0x4c   : > { %v374_v58 = vsel %vm1135_vm2, %v369_v47, %v373_v40  ;;  %v600_v63 = vmax.bf16 %v1265_v49, %v583_v52  ;;  %v376_v2 = vshrl.u32 %v1306_v51, 16  ;;  %v379_v5 = vshll.u32 %v1306_v51, 16  ;;  %v457_v49 = vld [vmem:[%s1119_s11 + $0x34] sm:$0x1]  ;;  %v441_v52 = vld [vmem:[%s1148_s14 + $0x30] sm:$0xf] }
  0x4d   : > { %v416_v1 = vmax.bf16 %v374_v58, %v277_v19  ;;  %v537_v57 = vrot.slane %v536_v59, 4  ;;  %v706_v4 = vor.u32 %v705_v61, %v702_v60  ;;  %v385_v6 = vshll.u32 %v286_v55, 16  ;;  %v458_v55 = vld [vmem:[%s1119_s11 + $0x3c] sm:$0x1]  ;;  %v894_v60 = vld [vmem:[%s1107_s5 + $0x40] sm:$0xf] }
  0x4e   : > { %v617_v43 = vmax.bf16 %v899_v56, %v600_v63  ;;  %v378_v10 = vrot.slane %v376_v2, 4  ;;  %v544_v11 = vshrl.u32 %v1315_v62, 16  ;;  %v711_v16 = vrot.slane %v709_v54, 5  ;;  %v910_v2 = vld [vmem:[%s1107_s5 + $0x44] sm:$0x1]  ;;  %s1379_s5 = scalar_lea.hbm %s1430_s4, %s916_s28 }
  0x4f   : > { %v432_v9 = vmax.bf16 %v1286_v8, %v416_v1  ;;  %v542_v14 = vsel %vm1135_vm2, %v537_v57, %v541_v53  ;;  %v707_v15 = vrot.slane %v706_v4, 4  ;;  %v381_v18 = vrot.slane %v379_v5, 5 }
  0x50   : > { %v753_v19 = vmax.bf16 %v698_v0, %v617_v43  ;;  %v546_v21 = vrot.slane %v544_v11, 4  ;;  %v547_v8 = vshll.u32 %v1315_v62, 16  ;;  %v387_v26 = vrot.slane %v385_v6, 5 }
  0x51   : > { %v448_v20 = vmax.bf16 %v440_v3, %v432_v9  ;;  %v382_v25 = vor.u32 %v381_v18, %v378_v10  ;;  %v553_v28 = vshll.u32 %v457_v49, 16  ;;  %v714_v29 = vshrl.u32 %v1327_v12, 16  ;;  %v901_v18 = vld [vmem:[%s1113_s8 + $0x38] sm:$0xf] }
  0x52   : > { %762 = vst.msk [vmem:[%s1216_s23 + $0x10] sm:$0xf] %vm757_vm3, %v753_v19  ;;  %v278_v31 = vmax.bf16 %v270_v17, %v1306_v51  ;;  %v549_v32 = vrot.slane %v547_v8, 5  ;;  %v717_v13 = vshll.u32 %v1327_v12, 16  ;;  %v712_v36 = vsel %vm1135_vm2, %v707_v15, %v711_v16 }
  0x53   : > { %v584_v30 = vmax.bf16 %v542_v14, %v448_v20  ;;  %v383_v37 = vrot.slane %v382_v25, 4  ;;  %v716_v38 = vrot.slane %v714_v29, 4  ;;  %v723_v40 = vshll.u32 %v909_v22, 16 }
  0x54   : > { %v550_v42 = vor.u32 %v549_v32, %v546_v21  ;;  %v555_v44 = vrot.slane %v553_v28, 5  ;;  %v719_v45 = vrot.slane %v717_v13, 5  ;;  %v390_v47 = vshrl.u32 %v263_v34, 16  ;;  %v442_v28 = vld [vmem:[%s1148_s14 + $0x38] sm:$0xf] }
  0x55   : > { %v601_v41 = vmax.bf16 %v1299_v7, %v584_v30  ;;  %v388_v39 = vsel %vm1135_vm2, %v383_v37, %v387_v26  ;;  %v393_v27 = vshll.u32 %v263_v34, 16  ;;  %v399_v48 = vshll.u32 %v287_v35, 16  ;;  %v902_v37 = vld [vmem:[%s1113_s8 + $0x40] sm:$0xf]  ;;  %s963_s8 = sshll.u32 %s1023_s19, 4  ;;  %s964_s8 = int_to_ptr.vmem [resolvable:$false] %s963_s8 }
  0x56   : > { %v417_v51 = vmax.bf16 %v388_v39, %v278_v31  ;;  %v551_v53 = vrot.slane %v550_v42, 4  ;;  %v279_v54 = vmax.bf16 %v271_v33, %v263_v34  ;;  %v720_v7 = vor.u32 %v719_v45, %v716_v38  ;;  %s965_s9 = scalar_lea.vmem %s964_s8, 1024  ;;  %p966_p0 = scmp.lt.s32.totalorder %s1374_s27, %s964_s8 }
  0x57   : > { %v618_v50 = vmax.bf16 %v900_v24, %v601_v41  ;;  %v392_v56 = vrot.slane %v390_v47, 4  ;;  %v395_v58 = vrot.slane %v393_v27, 5  ;;  %v558_v59 = vshrl.u32 %v426_v46, 16  ;;  %p967_p1 = scmp.lt.s32.totalorder %s965_s9, %s959_s7 }
  0x58   : > { %v433_v63 = vmax.bf16 %v1315_v62, %v417_v51  ;;  %v556_v0 = vsel %vm1135_vm2, %v551_v53, %v555_v44  ;;  %v401_v1 = vrot.slane %v399_v48, 5  ;;  %v561_v4 = vshll.u32 %v426_v46, 16 }
  0x59   : > { %v754_v61 = vmax.bf16 %v712_v36, %v618_v50  ;;  %v396_v3 = vor.u32 %v395_v58, %v392_v56  ;;  %v560_v57 = vrot.slane %v558_v59, 4  ;;  %v567_v5 = vshll.u32 %v458_v55, 16  ;;  %p968_p2 = por %p967_p1, %p966_p0 }
  0x5a   : > { %v449_v6 = vmax.bf16 %v441_v52, %v433_v63  ;;  %v725_v43 = vrot.slane %v723_v40, 5  ;;  %v728_v9 = vshrl.u32 %v894_v60, 16  ;;  %v731_v10 = vshll.u32 %v894_v60, 16 }
  0x5b   : > { %763 = vst.msk [vmem:[%s1216_s23 + $0x14] sm:$0xf] %vm757_vm3, %v754_v61  ;;  %v721_v49 = vrot.slane %v720_v7, 4  ;;  %v397_v11 = vrot.slane %v396_v3, 4  ;;  %v563_v62 = vrot.slane %v561_v4, 5  ;;  %v737_v14 = vshll.u32 %v910_v2, 16  ;;  %p969_p3 = pnand %p968_p2, %p962_p13 }
  0x5c   : > { %v585_v15 = vmax.bf16 %v556_v0, %v449_v6  ;;  %v730_v16 = vrot.slane %v728_v9, 4  ;;  %v733_v17 = vrot.slane %v731_v10, 5  ;;  %v569_v21 = vrot.slane %v567_v5, 5 }
  0x5d   : > { %v402_v19 = vsel %vm1135_vm2, %v397_v11, %v401_v1  ;;  %v564_v20 = vor.u32 %v563_v62, %v560_v57  ;;  %v739_v25 = vrot.slane %v737_v14, 5  ;;  %v726_v26 = vsel %vm1135_vm2, %v721_v49, %v725_v43 }
  0x5e   : > { %v602_v8 = vmax.bf16 %v1327_v12, %v585_v15  ;;  %v418_v22 = vmax.bf16 %v402_v19, %v279_v54  ;;  %v734_v24 = vor.u32 %v733_v17, %v730_v16 }
  0x5f   : > { %v565_v29 = vrot.slane %v564_v20, 4 }
  0x60   : > { %v619_v30 = vmax.bf16 %v901_v18, %v602_v8  ;;  %v434_v31 = vmax.bf16 %v426_v46, %v418_v22  ;;  %v735_v32 = vrot.slane %v734_v24, 4 }
  0x61   : > { %v570_v13 = vsel %vm1135_vm2, %v565_v29, %v569_v21 }
  0x62   : > { %v755_v12 = vmax.bf16 %v726_v26, %v619_v30  ;;  %v450_v34 = vmax.bf16 %v442_v28, %v434_v31  ;;  %v740_v35 = vsel %vm1135_vm2, %v735_v32, %v739_v25 }
  0x64   : > { %764 = vst.msk [vmem:[%s1216_s23 + $0x18] sm:$0xf] %vm757_vm3, %v755_v12  ;;  %v586_v36 = vmax.bf16 %v570_v13, %v450_v34 }
  0x66   : > { %v603_v38 = vmax.bf16 %v894_v60, %v586_v36 }
  0x68   : > { %v620_v40 = vmax.bf16 %v902_v37, %v603_v38 }
  0x6a   : > { %v756_v23 = vmax.bf16 %v740_v35, %v620_v40 }
  0x6c   : > { %765 = vst.msk [vmem:[%s1216_s23 + $0x1c] sm:$0xf] %vm757_vm3, %v756_v23 }
  0x6d   : > { %972 = shalt.err (!%p969_p3)
}
  0x6e   : > { %s973_s10 = scalar_lea.hbm %s1379_s5, 512  ;;  %s977_s13 = scalar_lea.hbm %s1430_s4, 1024 }
  0x6f   : > { %p974_p4 = scmp.ne.s32.totalorder %s1379_s5, %s973_s10  ;;  %p978_p9 = scmp.lt.u32.totalorder %s1379_s5, %s1430_s4 }
  0x70   : > { %p979_p10 = scmp.lt.u32.totalorder %s977_s13, %s973_s10  ;;  %p981_p12 = scmp.lt.u32.totalorder %s973_s10, %s1379_s5 }
  0x71   : > { %p975_p7 = pnand %p974_p4, %p1089_p5 }
  0x72   : > { %p980_p11 = por %p979_p10, %p978_p9 }
  0x73   : > { %p976_p8 = pneg %p975_p7 }
  0x74   : > { %p982_p13 = por %p981_p12, %p980_p11 }
  0x76   : > { %p983_p0 = pnand %p982_p13, %p976_p8 }
  0x78   : > { %986 = shalt.err (!%p983_p0)
}
  0x79   : > { %s1024_s22 = smov 64   ;;  %s1025_s23 = smov 4  }
  0x7a   : > { %918 = dma.vmem_to_hbm [thread:$0]  (%p1089_p5), %s1374_s27, 512, %s1379_s5, %s1385_s6, %s1024_s22, %s1024_s22, %s1025_s23  }
  0x7b PF: > { %p924_p1 = scmp.ge.s32.totalorder %s1021_s18, 2  ;;  %s795_s28 = sand.u32 1, %s1009_s15  }
  0x7c   : > { %s796_s29 = scalar_lea.sflag [#allocation3], %s795_s28 }
  0x7d   : > { %p921_p2 = pnand %p924_p1, %p1093_p6 }
  0x7f   : > { %1004 = dma.done.wait (!%p921_p2), %s796_s29, 512  }
  0x80   : > { %1006 = vsyncadd (!%p921_p2), %s796_s29, 4294966784  ;;  %p14_p3 = scmp.ge.s32.totalorder %s1076_s21, 4   ;;  %s1435_s15 = smov %s1013_s16 }
  0x81   : > { %s1436_s16 = smov %s1017_s17  ;;  %s1437_s17 = smov %s1087_s24 }
  0x82   : > { %s1438_s18 = smov %s1076_s21  ;;  %16 = sbr.rel (!%p14_p3) target bundleno = 3 (0x3), region = 82 }
  0x89   :  { %801 = vsyncpa [#allocation3], 1 }
  0x8a   :  { %803 = vsyncpa [#allocation3 + $0x1], 1 }

// kernel: repmlp_resnet_forward.23
= control target key start
LH: loop header
LB: loop body
LE: loop exit
PB: predicated region body
PF: predicated region fallthrough
CT: control target
= control target key end

     0   :  { %8 = vsyncpa [#allocation4], 0  ;;  %s2484_s0 = inlined_call_operand.hbm [shape: bf16[512,256], index: 0, kind: input, shape index: {}]   ;;  %s2485_s1 = inlined_call_operand.hbm [shape: bf16[256,128], index: 1, kind: input, shape index: {}]   ;;  %s2486_s2 = inlined_call_operand.hbm [shape: f32[1,128], index: 2, kind: input, shape index: {}]   ;;  %s2487_s3 = inlined_call_operand.hbm [shape: bf16[512,128], index: 3, kind: output, shape index: {}]  }
   0x1   :  { %9 = vsyncpa [#allocation7], 0 }
   0x2   :  { %10 = vsyncpa [#allocation5], 0  ;;  %s2303_s12 = smov [#allocation6]   ;;  %s2209_s16 = scalar_lea.hbm %s2485_s1, 2048 }
   0x3   :  { %s28_s13 = sshll.u32 %s2303_s12, 4  ;;  %p2210_p0 = scmp.ne.s32.totalorder %s2485_s1, %s2209_s16  ;;  %s29_s13 = int_to_ptr.vmem [resolvable:$true] %s28_s13 }
   0x4   :  { %p2213_p1 = scmp.lt.u32.totalorder %s2209_s16, %s2485_s1 }
   0x6   :  { %p2215_p2 = pnand %p2213_p1, %p2210_p0 }
   0x8   :  { %2218 = shalt.err (!%p2215_p2)
}
   0x9   :  { %s2219_s21 = scalar_lea.vmem %s29_s13, 2048  ;;  %p2224_p4 = scmp.lt.s32.totalorder %s29_s13, %s29_s13 }
   0xa   :  { %p2220_p3 = scmp.ne.s32.totalorder %s29_s13, %s2219_s21  ;;  %p2225_p5 = scmp.lt.s32.totalorder %s2219_s21, %s2219_s21 }
   0xc   :  { %p2226_p6 = por %p2225_p5, %p2224_p4 }
   0xe   :  { %p2227_p7 = pnand %p2226_p6, %p2220_p3 }
  0x10   :  { %2230 = shalt.err (!%p2227_p7)
}
  0x11   :  { %s2304_s22 = smov 64   ;;  %s2305_s23 = smov 4  }
  0x12   :  { %34 = dma.hbm_to_vmem [thread:$0]  %s2485_s1, 2048, %s29_s13, [#allocation7], %s2304_s22, %s2304_s22, %s2305_s23  }
  0x13   :  { %s2306_s26 = smov [#allocation3]   ;;  %s2231_s30 = scalar_lea.hbm %s2484_s0, 8192 }
  0x14   :  { %s16_s27 = sshll.u32 %s2306_s26, 4  ;;  %p2232_p8 = scmp.ne.s32.totalorder %s2484_s0, %s2231_s30  ;;  %s17_s27 = int_to_ptr.vmem [resolvable:$true] %s16_s27 }
  0x15   :  { %p2235_p9 = scmp.lt.u32.totalorder %s2231_s30, %s2484_s0 }
  0x17   :  { %p2237_p10 = pnand %p2235_p9, %p2232_p8 }
  0x19   :  { %2240 = shalt.err (!%p2237_p10)
}
  0x1a   :  { %s2241_s8 = scalar_lea.vmem %s17_s27, 8192  ;;  %p2246_p12 = scmp.lt.s32.totalorder %s17_s27, %s17_s27 }
  0x1b   :  { %p2242_p11 = scmp.ne.s32.totalorder %s17_s27, %s2241_s8  ;;  %p2247_p13 = scmp.lt.s32.totalorder %s2241_s8, %s2241_s8 }
  0x1d   :  { %p2248_p0 = por %p2247_p13, %p2246_p12 }
  0x1f   :  { %p2249_p1 = pnand %p2248_p0, %p2242_p11 }
  0x21   :  { %2252 = shalt.err (!%p2249_p1)
}
  0x22   :  { %s2307_s1 = smov 128   ;;  %s2308_s9 = smov 8  }
  0x23   :  { %22 = dma.hbm_to_vmem [thread:$0]  %s2484_s0, 8192, %s17_s27, [#allocation4], %s2307_s1, %s2307_s1, %s2308_s9  }
  0x24   :  { %s2309_s12 = smov [#allocation8]   ;;  %s2253_s16 = scalar_lea.hbm %s2486_s2, 16 }
  0x25   :  { %s41_s13 = sshll.u32 %s2309_s12, 4  ;;  %p2254_p2 = scmp.ne.s32.totalorder %s2486_s2, %s2253_s16  ;;  %s42_s13 = int_to_ptr.vmem [resolvable:$true] %s41_s13 }
  0x26   :  { %p2257_p3 = scmp.lt.u32.totalorder %s2253_s16, %s2486_s2 }
  0x28   :  { %p2259_p4 = pnand %p2257_p3, %p2254_p2 }
  0x2a   :  { %2262 = shalt.err (!%p2259_p4)
}
  0x2b   :  { %s2263_s21 = scalar_lea.vmem %s42_s13, 16  ;;  %s2267_s0 = scalar_lea.vmem %s42_s13, 32 }
  0x2c   :  { %p2264_p5 = scmp.ne.s32.totalorder %s42_s13, %s2263_s21  ;;  %p2268_p6 = scmp.lt.s32.totalorder %s42_s13, %s42_s13 }
  0x2d   :  { %p2269_p7 = scmp.lt.s32.totalorder %s2267_s0, %s2263_s21 }
  0x2f   :  { %p2270_p8 = por %p2269_p7, %p2268_p6 }
  0x31   :  { %p2271_p9 = pnand %p2270_p8, %p2264_p5 }
  0x33   :  { %2274 = shalt.err (!%p2271_p9)
}
  0x34   :  { %44 = dma.hbm_to_vmem [thread:$0]  %s2486_s2, 16, %s42_s13, [#allocation7]  }
  0x35   :  { %2297 = dma.done.wait [#allocation4], 8192  }
  0x36   :  { %2298 = vsyncadd [#allocation4], 4294959104 }
  0x37   :  { %2299 = dma.done.wait [#allocation7], 2064  }
  0x38   :  { %2300 = vsyncadd [#allocation7], 4294965232  ;;  %v2310_v0 = vmov 0   ;;  %v2097_v1 = vld [vmem:[#allocation6] sm:$0xff]   ;;  %v2098_v2 = vld [vmem:[#allocation6 + $0x8] sm:$0xff]   ;;  %s2311_s2 = smov [#allocation9]  }
  0x39   :  { %699 = vmatprep.subr.bf16.mxu0 %v2310_v0  ;;  %2056 = vmatprep.subr.bf16.mxu1 %v2310_v0  ;;  %v2099_v3 = vld [vmem:[#allocation6 + $0x10] sm:$0xff]   ;;  %v2100_v4 = vld [vmem:[#allocation6 + $0x18] sm:$0xff]   ;;  %v2101_v5 = vld [vmem:[#allocation6 + $0x20] sm:$0xff]   ;;  %s1643_s26 = sshll.u32 %s2311_s2, 4  ;;  %s1644_s26 = int_to_ptr.vmem [resolvable:$true] %s1643_s26 }
  0x3a   :  { %700 = vmatpush1.bf16.msra.mxu0 %v2097_v1  ;;  %2072 = vmatpush1.bf16.msra.mxu1 %v2097_v1  ;;  %v2115_v6 = vld [vmem:[#allocation3 + $0x4] ss:$8 sps:$4 sm:$0xff]   ;;  %v2103_v9 = vld [vmem:[#allocation6 + $0x30] sm:$0xff]   ;;  %v2104_v10 = vld [vmem:[#allocation6 + $0x38] sm:$0xff]   ;;  %s2275_s27 = scalar_lea.vmem %s1644_s26, 4096  ;;  %p2280_p11 = scmp.lt.s32.totalorder %s1644_s26, %s1644_s26 }
  0x3b   :  { %701 = vmatprep.subr.bf16.mxu0 %v2310_v0  ;;  %2057 = vmatprep.subr.bf16.mxu1 %v2310_v0  ;;  %v2102_v7 = vld [vmem:[#allocation6 + $0x28] sm:$0xff]   ;;  %v2105_v11 = vld [vmem:[#allocation6 + $0x40] sm:$0xff]   ;;  %v2107_v13 = vld [vmem:[#allocation6 + $0x50] sm:$0xff]   ;;  %p2276_p10 = scmp.ne.s32.totalorder %s1644_s26, %s2275_s27  ;;  %p2281_p12 = scmp.lt.s32.totalorder %s2275_s27, %s2275_s27 }
  0x3c   :  { %v2118_v8 = vld [vmem:[#allocation3 + $0x104] ss:$8 sps:$4 sm:$0xff]   ;;  %731 = vmatprep.mubr.bf16.mxu0 %v2115_v6  ;;  %v2108_v14 = vld [vmem:[#allocation6 + $0x58] sm:$0xff]   ;;  %v2111_v17 = vld [vmem:[#allocation6 + $0x70] sm:$0xff]  }
  0x3d   :  { %859 = vmatprep.mubr.bf16.mxu1 %v2118_v8  ;;  %v2106_v12 = vld [vmem:[#allocation6 + $0x48] sm:$0xff]   ;;  %v2109_v15 = vld [vmem:[#allocation6 + $0x60] sm:$0xff]   ;;  %v2112_v18 = vld [vmem:[#allocation6 + $0x78] sm:$0xff]   ;;  %p2282_p13 = por %p2281_p12, %p2280_p11 }
  0x3e   :  { %702 = vmatpush1.bf16.msra.mxu0 %v2098_v2  ;;  %2073 = vmatpush1.bf16.msra.mxu1 %v2098_v2  ;;  %v2110_v16 = vld [vmem:[#allocation6 + $0x68] sm:$0xff]   ;;  %v2119_v21 = vld [vmem:[#allocation3 + $0x14] ss:$8 sps:$4 sm:$0xff]   ;;  %v2123_v23 = vld [vmem:[#allocation3 + $0x10] ss:$8 sps:$4 sm:$0xff]  }
  0x3f   :  { %703 = vmatprep.subr.bf16.mxu0 %v2310_v0  ;;  %2058 = vmatprep.subr.bf16.mxu1 %v2310_v0  ;;  %v2113_v19 = vld [vmem:[#allocation3] ss:$8 sps:$4 sm:$0xff]   ;;  %v2121_v22 = vld [vmem:[#allocation3 + $0x114] ss:$8 sps:$4 sm:$0xff]   ;;  %v2124_v24 = vld [vmem:[#allocation3 + $0x110] ss:$8 sps:$4 sm:$0xff]   ;;  %p2283_p0 = pnand %p2282_p13, %p2276_p10 }
  0x40   :  { %v2116_v20 = vld [vmem:[#allocation3 + $0x100] ss:$8 sps:$4 sm:$0xff]   ;;  %v2125_v25 = vld [vmem:[#allocation3 + $0x24] ss:$8 sps:$4 sm:$0xff]   ;;  %v2131_v29 = vld [vmem:[#allocation3 + $0x34] ss:$8 sps:$4 sm:$0xff]  }
  0x41   :  { %v2127_v26 = vld [vmem:[#allocation3 + $0x124] ss:$8 sps:$4 sm:$0xff]   ;;  %v2129_v27 = vld [vmem:[#allocation3 + $0x20] ss:$8 sps:$4 sm:$0xff]   ;;  %v2133_v30 = vld [vmem:[#allocation3 + $0x134] ss:$8 sps:$4 sm:$0xff]  }
  0x42   :  { %704 = vmatpush1.bf16.msra.mxu0 %v2099_v3  ;;  %2074 = vmatpush1.bf16.msra.mxu1 %v2099_v3  ;;  %v2130_v28 = vld [vmem:[#allocation3 + $0x120] ss:$8 sps:$4 sm:$0xff]   ;;  %v2135_v31 = vld [vmem:[#allocation3 + $0x30] ss:$8 sps:$4 sm:$0xff]   ;;  %v2137_v33 = vld [vmem:[#allocation3 + $0x44] ss:$8 sps:$4 sm:$0xff]  }
  0x43   :  { %705 = vmatprep.subr.bf16.mxu0 %v2310_v0  ;;  %2059 = vmatprep.subr.bf16.mxu1 %v2310_v0  ;;  %v2136_v32 = vld [vmem:[#allocation3 + $0x130] ss:$8 sps:$4 sm:$0xff]   ;;  %v2139_v34 = vld [vmem:[#allocation3 + $0x144] ss:$8 sps:$4 sm:$0xff]   ;;  %v2141_v35 = vld [vmem:[#allocation3 + $0x40] ss:$8 sps:$4 sm:$0xff]  }
  0x44   :  { %v2142_v36 = vld [vmem:[#allocation3 + $0x140] ss:$8 sps:$4 sm:$0xff]   ;;  %v2143_v37 = vld [vmem:[#allocation3 + $0x54] ss:$8 sps:$4 sm:$0xff]   ;;  %v2147_v39 = vld [vmem:[#allocation3 + $0x50] ss:$8 sps:$4 sm:$0xff]  }
  0x45   :  { %v2145_v38 = vld [vmem:[#allocation3 + $0x154] ss:$8 sps:$4 sm:$0xff]   ;;  %v2148_v40 = vld [vmem:[#allocation3 + $0x150] ss:$8 sps:$4 sm:$0xff]   ;;  %v2149_v41 = vld [vmem:[#allocation3 + $0x64] ss:$8 sps:$4 sm:$0xff]  }
  0x46   :  { %706 = vmatpush1.bf16.msra.mxu0 %v2100_v4  ;;  %2075 = vmatpush1.bf16.msra.mxu1 %v2100_v4  ;;  %v2151_v42 = vld [vmem:[#allocation3 + $0x164] ss:$8 sps:$4 sm:$0xff]   ;;  %v2153_v43 = vld [vmem:[#allocation3 + $0x60] ss:$8 sps:$4 sm:$0xff]   ;;  %v2155_v45 = vld [vmem:[#allocation3 + $0x74] ss:$8 sps:$4 sm:$0xff]  }
  0x47   :  { %707 = vmatprep.subr.bf16.mxu0 %v2310_v0  ;;  %2060 = vmatprep.subr.bf16.mxu1 %v2310_v0  ;;  %v2154_v44 = vld [vmem:[#allocation3 + $0x160] ss:$8 sps:$4 sm:$0xff]   ;;  %v2157_v46 = vld [vmem:[#allocation3 + $0x174] ss:$8 sps:$4 sm:$0xff]   ;;  %v2159_v47 = vld [vmem:[#allocation3 + $0x70] ss:$8 sps:$4 sm:$0xff]  }
  0x48   :  { %v2160_v48 = vld [vmem:[#allocation3 + $0x170] ss:$8 sps:$4 sm:$0xff]   ;;  %v2161_v49 = vld [vmem:[#allocation3 + $0x84] ss:$8 sps:$4 sm:$0xff]   ;;  %v2165_v51 = vld [vmem:[#allocation3 + $0x80] ss:$8 sps:$4 sm:$0xff]  }
  0x49   :  { %v2163_v50 = vld [vmem:[#allocation3 + $0x184] ss:$8 sps:$4 sm:$0xff]   ;;  %v2166_v52 = vld [vmem:[#allocation3 + $0x180] ss:$8 sps:$4 sm:$0xff]   ;;  %v2167_v53 = vld [vmem:[#allocation3 + $0x94] ss:$8 sps:$4 sm:$0xff]  }
  0x4a   :  { %708 = vmatpush1.bf16.msra.mxu0 %v2101_v5  ;;  %2076 = vmatpush1.bf16.msra.mxu1 %v2101_v5  ;;  %v2169_v54 = vld [vmem:[#allocation3 + $0x194] ss:$8 sps:$4 sm:$0xff]   ;;  %v2171_v55 = vld [vmem:[#allocation3 + $0x90] ss:$8 sps:$4 sm:$0xff]   ;;  %v2173_v57 = vld [vmem:[#allocation3 + $0xa4] ss:$8 sps:$4 sm:$0xff]  }
  0x4b   :  { %709 = vmatprep.subr.bf16.mxu0 %v2310_v0  ;;  %2061 = vmatprep.subr.bf16.mxu1 %v2310_v0  ;;  %v2172_v56 = vld [vmem:[#allocation3 + $0x190] ss:$8 sps:$4 sm:$0xff]   ;;  %v2175_v58 = vld [vmem:[#allocation3 + $0x1a4] ss:$8 sps:$4 sm:$0xff]   ;;  %v2177_v59 = vld [vmem:[#allocation3 + $0xa0] ss:$8 sps:$4 sm:$0xff]  }
  0x4c   :  { %v2178_v60 = vld [vmem:[#allocation3 + $0x1a0] ss:$8 sps:$4 sm:$0xff]   ;;  %v2179_v61 = vld [vmem:[#allocation3 + $0xb4] ss:$8 sps:$4 sm:$0xff]   ;;  %v2183_v63 = vld [vmem:[#allocation3 + $0xb0] ss:$8 sps:$4 sm:$0xff]  }
  0x4d   :  { %v2181_v62 = vld [vmem:[#allocation3 + $0x1b4] ss:$8 sps:$4 sm:$0xff]   ;;  %v2185_v1 = vld [vmem:[#allocation3 + $0xc4] ss:$8 sps:$4 sm:$0xff]   ;;  %v2189_v3 = vld [vmem:[#allocation3 + $0xc0] ss:$8 sps:$4 sm:$0xff]  }
  0x4e   :  { %710 = vmatpush1.bf16.msra.mxu0 %v2102_v7  ;;  %2077 = vmatpush1.bf16.msra.mxu1 %v2102_v7  ;;  %v2187_v2 = vld [vmem:[#allocation3 + $0x1c4] ss:$8 sps:$4 sm:$0xff]   ;;  %v2190_v4 = vld [vmem:[#allocation3 + $0x1c0] ss:$8 sps:$4 sm:$0xff]   ;;  %v2191_v5 = vld [vmem:[#allocation3 + $0xd4] ss:$8 sps:$4 sm:$0xff]  }
  0x4f   :  { %711 = vmatprep.subr.bf16.mxu0 %v2310_v0  ;;  %2062 = vmatprep.subr.bf16.mxu1 %v2310_v0  ;;  %v2193_v6 = vld [vmem:[#allocation3 + $0x1d4] ss:$8 sps:$4 sm:$0xff]   ;;  %v2195_v7 = vld [vmem:[#allocation3 + $0xd0] ss:$8 sps:$4 sm:$0xff]  }
  0x50   :  { %v2196_v8 = vld [vmem:[#allocation3 + $0x1d0] ss:$8 sps:$4 sm:$0xff]  }
  0x52   :  { %712 = vmatpush1.bf16.msra.mxu0 %v2103_v9  ;;  %2078 = vmatpush1.bf16.msra.mxu1 %v2103_v9  ;;  %v2197_v9 = vld [vmem:[#allocation3 + $0xe4] ss:$8 sps:$4 sm:$0xff]  }
  0x53   :  { %713 = vmatprep.subr.bf16.mxu0 %v2310_v0  ;;  %2063 = vmatprep.subr.bf16.mxu1 %v2310_v0 }
  0x56   :  { %714 = vmatpush1.bf16.msra.mxu0 %v2104_v10  ;;  %2079 = vmatpush1.bf16.msra.mxu1 %v2104_v10  ;;  %v2199_v10 = vld [vmem:[#allocation3 + $0x1e4] ss:$8 sps:$4 sm:$0xff]  }
  0x57   :  { %715 = vmatprep.subr.bf16.mxu0 %v2310_v0  ;;  %2064 = vmatprep.subr.bf16.mxu1 %v2310_v0 }
  0x5a   :  { %716 = vmatpush1.bf16.msra.mxu0 %v2105_v11  ;;  %2080 = vmatpush1.bf16.msra.mxu1 %v2105_v11  ;;  %v2201_v11 = vld [vmem:[#allocation3 + $0xe0] ss:$8 sps:$4 sm:$0xff]  }
  0x5b   :  { %717 = vmatprep.subr.bf16.mxu0 %v2310_v0  ;;  %2065 = vmatprep.subr.bf16.mxu1 %v2310_v0 }
  0x5e   :  { %718 = vmatpush1.bf16.msra.mxu0 %v2106_v12  ;;  %2081 = vmatpush1.bf16.msra.mxu1 %v2106_v12  ;;  %v2202_v12 = vld [vmem:[#allocation3 + $0x1e0] ss:$8 sps:$4 sm:$0xff]  }
  0x5f   :  { %719 = vmatprep.subr.bf16.mxu0 %v2310_v0  ;;  %2066 = vmatprep.subr.bf16.mxu1 %v2310_v0 }
  0x62   :  { %720 = vmatpush1.bf16.msra.mxu0 %v2107_v13  ;;  %2082 = vmatpush1.bf16.msra.mxu1 %v2107_v13  ;;  %v2203_v13 = vld [vmem:[#allocation3 + $0xf4] ss:$8 sps:$4 sm:$0xff]  }
  0x63   :  { %721 = vmatprep.subr.bf16.mxu0 %v2310_v0  ;;  %2067 = vmatprep.subr.bf16.mxu1 %v2310_v0 }
  0x66   :  { %722 = vmatpush1.bf16.msra.mxu0 %v2108_v14  ;;  %2083 = vmatpush1.bf16.msra.mxu1 %v2108_v14  ;;  %v2205_v14 = vld [vmem:[#allocation3 + $0x1f4] ss:$8 sps:$4 sm:$0xff]  }
  0x67   :  { %723 = vmatprep.subr.bf16.mxu0 %v2310_v0  ;;  %2068 = vmatprep.subr.bf16.mxu1 %v2310_v0 }
  0x6a   :  { %724 = vmatpush1.bf16.msra.mxu0 %v2109_v15  ;;  %2084 = vmatpush1.bf16.msra.mxu1 %v2109_v15  ;;  %v2207_v15 = vld [vmem:[#allocation3 + $0xf0] ss:$8 sps:$4 sm:$0xff]  }
  0x6b   :  { %725 = vmatprep.subr.bf16.mxu0 %v2310_v0  ;;  %2069 = vmatprep.subr.bf16.mxu1 %v2310_v0 }
  0x6e   :  { %726 = vmatpush1.bf16.msra.mxu0 %v2110_v16  ;;  %2085 = vmatpush1.bf16.msra.mxu1 %v2110_v16  ;;  %v2208_v16 = vld [vmem:[#allocation3 + $0x1f0] ss:$8 sps:$4 sm:$0xff]  }
  0x6f   :  { %727 = vmatprep.subr.bf16.mxu0 %v2310_v0  ;;  %2070 = vmatprep.subr.bf16.mxu1 %v2310_v0 }
  0x72   :  { %728 = vmatpush1.bf16.msra.mxu0 %v2111_v17  ;;  %2086 = vmatpush1.bf16.msra.mxu1 %v2111_v17  ;;  %v2403_v17 = vld [vmem:[#allocation8] ss:$0 sm:$0xff] }
  0x73   :  { %729 = vmatprep.subr.bf16.mxu0 %v2310_v0  ;;  %2071 = vmatprep.subr.bf16.mxu1 %v2310_v0  ;;  %v2184_v0 = vld [vmem:[#allocation3 + $0x1b0] ss:$8 sps:$4 sm:$0xff]  }
  0x76   :  { %730 = vmatpush1.bf16.msra.mxu0 %v2112_v18  ;;  %2087 = vmatpush1.bf16.msra.mxu1 %v2112_v18 }
  0x79   :  { %732 = vmatmul.mubr.bf16.vlgmr.msra.gmra.mrb[0].mxu0 %v2113_v19  ;;  %860 = vmatmul.mubr.bf16.vlgmr.msra.gmra.mrb[0].mxu1 %v2116_v20 }
  0x7a   :  { %739 = vmatprep.mubr.bf16.mxu0 %v2119_v21  ;;  %867 = vmatprep.mubr.bf16.mxu1 %v2121_v22 }
  0x81   :  { %740 = vmatmul.mubr.bf16.gmra.mrb[4].mxu0 %v2123_v23  ;;  %868 = vmatmul.mubr.bf16.gmra.mrb[4].mxu1 %v2124_v24 }
  0x82   :  { %747 = vmatprep.mubr.bf16.mxu0 %v2125_v25  ;;  %875 = vmatprep.mubr.bf16.mxu1 %v2127_v26 }
  0x89   :  { %748 = vmatmul.mubr.bf16.gmra.mrb[8].mxu0 %v2129_v27  ;;  %876 = vmatmul.mubr.bf16.gmra.mrb[8].mxu1 %v2130_v28 }
  0x8a   :  { %755 = vmatprep.mubr.bf16.mxu0 %v2131_v29  ;;  %883 = vmatprep.mubr.bf16.mxu1 %v2133_v30 }
  0x91   :  { %756 = vmatmul.mubr.bf16.gmra.mrb[12].mxu0 %v2135_v31  ;;  %884 = vmatmul.mubr.bf16.gmra.mrb[12].mxu1 %v2136_v32 }
  0x92   :  { %763 = vmatprep.mubr.bf16.mxu0 %v2137_v33  ;;  %891 = vmatprep.mubr.bf16.mxu1 %v2139_v34 }
  0x99   :  { %764 = vmatmul.mubr.bf16.gmra.mrb[16].mxu0 %v2141_v35  ;;  %892 = vmatmul.mubr.bf16.gmra.mrb[16].mxu1 %v2142_v36 }
  0x9a   :  { %771 = vmatprep.mubr.bf16.mxu0 %v2143_v37  ;;  %899 = vmatprep.mubr.bf16.mxu1 %v2145_v38 }
  0xa1   :  { %772 = vmatmul.mubr.bf16.gmra.mrb[20].mxu0 %v2147_v39  ;;  %900 = vmatmul.mubr.bf16.gmra.mrb[20].mxu1 %v2148_v40 }
  0xa2   :  { %779 = vmatprep.mubr.bf16.mxu0 %v2149_v41  ;;  %907 = vmatprep.mubr.bf16.mxu1 %v2151_v42 }
  0xa9   :  { %780 = vmatmul.mubr.bf16.gmra.mrb[24].mxu0 %v2153_v43  ;;  %908 = vmatmul.mubr.bf16.gmra.mrb[24].mxu1 %v2154_v44 }
  0xaa   :  { %787 = vmatprep.mubr.bf16.mxu0 %v2155_v45  ;;  %915 = vmatprep.mubr.bf16.mxu1 %v2157_v46 }
  0xb1   :  { %788 = vmatmul.mubr.bf16.gmra.mrb[28].mxu0 %v2159_v47  ;;  %916 = vmatmul.mubr.bf16.gmra.mrb[28].mxu1 %v2160_v48 }
  0xb2   :  { %795 = vmatprep.mubr.bf16.mxu0 %v2161_v49  ;;  %923 = vmatprep.mubr.bf16.mxu1 %v2163_v50 }
  0xb9   :  { %796 = vmatmul.mubr.bf16.gmra.mrb[32].mxu0 %v2165_v51  ;;  %924 = vmatmul.mubr.bf16.gmra.mrb[32].mxu1 %v2166_v52 }
  0xba   :  { %803 = vmatprep.mubr.bf16.mxu0 %v2167_v53  ;;  %931 = vmatprep.mubr.bf16.mxu1 %v2169_v54 }
  0xc1   :  { %804 = vmatmul.mubr.bf16.gmra.mrb[36].mxu0 %v2171_v55  ;;  %932 = vmatmul.mubr.bf16.gmra.mrb[36].mxu1 %v2172_v56 }
  0xc2   :  { %811 = vmatprep.mubr.bf16.mxu0 %v2173_v57  ;;  %939 = vmatprep.mubr.bf16.mxu1 %v2175_v58 }
  0xc9   :  { %812 = vmatmul.mubr.bf16.gmra.mrb[40].mxu0 %v2177_v59  ;;  %940 = vmatmul.mubr.bf16.gmra.mrb[40].mxu1 %v2178_v60 }
  0xca   :  { %819 = vmatprep.mubr.bf16.mxu0 %v2179_v61  ;;  %947 = vmatprep.mubr.bf16.mxu1 %v2181_v62 }
  0xd1   :  { %820 = vmatmul.mubr.bf16.gmra.mrb[44].mxu0 %v2183_v63  ;;  %948 = vmatmul.mubr.bf16.gmra.mrb[44].mxu1 %v2184_v0 }
  0xd2   :  { %827 = vmatprep.mubr.bf16.mxu0 %v2185_v1  ;;  %955 = vmatprep.mubr.bf16.mxu1 %v2187_v2 }
  0xd9   :  { %828 = vmatmul.mubr.bf16.gmra.mrb[48].mxu0 %v2189_v3  ;;  %956 = vmatmul.mubr.bf16.gmra.mrb[48].mxu1 %v2190_v4 }
  0xda   :  { %835 = vmatprep.mubr.bf16.mxu0 %v2191_v5  ;;  %963 = vmatprep.mubr.bf16.mxu1 %v2193_v6 }
  0xe1   :  { %836 = vmatmul.mubr.bf16.gmra.mrb[52].mxu0 %v2195_v7  ;;  %964 = vmatmul.mubr.bf16.gmra.mrb[52].mxu1 %v2196_v8 }
  0xe2   :  { %843 = vmatprep.mubr.bf16.mxu0 %v2197_v9  ;;  %971 = vmatprep.mubr.bf16.mxu1 %v2199_v10 }
  0xe9   :  { %844 = vmatmul.mubr.bf16.gmra.mrb[56].mxu0 %v2201_v11  ;;  %972 = vmatmul.mubr.bf16.gmra.mrb[56].mxu1 %v2202_v12 }
  0xea   :  { %851 = vmatprep.mubr.bf16.mxu0 %v2203_v13  ;;  %979 = vmatprep.mubr.bf16.mxu1 %v2205_v14 }
  0xf1   :  { %852 = vmatmul.mubr.bf16.gmra.mrb[60].mxu0 %v2207_v15  ;;  %980 = vmatmul.mubr.bf16.gmra.mrb[60].mxu1 %v2208_v16 }
 0x14c   :  { %v733_v18 = vpop.f32.mrb[0].mxu0  ;;  %v861_v19 = vpop.f32.mrb[0].mxu1 }
 0x14d   :  { %v1190_v20 = vadd.f32 %v2403_v17, %v733_v18  ;;  %v1222_v21 = vadd.f32 %v2403_v17, %v861_v19  ;;  %v735_v22 = vpop.f32.mrb[1].mxu0  ;;  %v863_v23 = vpop.f32.mrb[1].mxu1 }
 0x14e   :  { %v736_v24 = vpop.f32.mrb[2].mxu0  ;;  %v864_v25 = vpop.f32.mrb[2].mxu1 }
 0x14f   :  { %v1191_v26 = vadd.f32 %v2403_v17, %v736_v24  ;;  %v1223_v27 = vadd.f32 %v2403_v17, %v864_v25  ;;  %v738_v28 = vpop.f32.mrb[3].mxu0  ;;  %v866_v29 = vpop.f32.mrb[3].mxu1  ;;  %v1254_v30 = vmax.f32 %v1190_v20, 0.0  ;;  %v1286_v31 = vmax.f32 %v1222_v21, 0.0 }
 0x151   :  { %v1255_v32 = vmax.f32 %v1191_v26, 0.0  ;;  %v1287_v33 = vmax.f32 %v1223_v27, 0.0 }
 0x153   :  { %v1868_v34 = vpack.c.bf16 %v1255_v32, %v1254_v30  ;;  %v1948_v35 = vpack.c.bf16 %v1287_v33, %v1286_v31 }
 0x154   :  { %v741_v36 = vpop.f32.mrb[4].mxu0  ;;  %v869_v37 = vpop.f32.mrb[4].mxu1 }
 0x155   :  { %1869 = vst [vmem:[#allocation9] sm:$0xff] %v1868_v34   ;;  %2040 = vst [vmem:[#allocation9 + $0x80] sm:$0xff] %v1948_v35   ;;  %v1192_v38 = vadd.f32 %v2403_v17, %v741_v36  ;;  %v1224_v39 = vadd.f32 %v2403_v17, %v869_v37  ;;  %v743_v40 = vpop.f32.mrb[5].mxu0  ;;  %v871_v41 = vpop.f32.mrb[5].mxu1 }
 0x156   :  { %v744_v42 = vpop.f32.mrb[6].mxu0  ;;  %v872_v43 = vpop.f32.mrb[6].mxu1 }
 0x157   :  { %v1193_v44 = vadd.f32 %v2403_v17, %v744_v42  ;;  %v1225_v45 = vadd.f32 %v2403_v17, %v872_v43  ;;  %v746_v46 = vpop.f32.mrb[7].mxu0  ;;  %v874_v47 = vpop.f32.mrb[7].mxu1  ;;  %v1256_v48 = vmax.f32 %v1192_v38, 0.0  ;;  %v1288_v49 = vmax.f32 %v1224_v39, 0.0 }
 0x159   :  { %v1257_v50 = vmax.f32 %v1193_v44, 0.0  ;;  %v1289_v51 = vmax.f32 %v1225_v45, 0.0 }
 0x15b   :  { %v1873_v52 = vpack.c.bf16 %v1257_v50, %v1256_v48  ;;  %v1953_v53 = vpack.c.bf16 %v1289_v51, %v1288_v49 }
 0x15c   :  { %v749_v54 = vpop.f32.mrb[8].mxu0  ;;  %v877_v55 = vpop.f32.mrb[8].mxu1 }
 0x15d   :  { %2025 = vst [vmem:[#allocation9 + $0x8] sm:$0xff] %v1873_v52   ;;  %2041 = vst [vmem:[#allocation9 + $0x88] sm:$0xff] %v1953_v53   ;;  %v1194_v56 = vadd.f32 %v2403_v17, %v749_v54  ;;  %v1226_v57 = vadd.f32 %v2403_v17, %v877_v55  ;;  %v751_v58 = vpop.f32.mrb[9].mxu0  ;;  %v879_v59 = vpop.f32.mrb[9].mxu1 }
 0x15e   :  { %v752_v60 = vpop.f32.mrb[10].mxu0  ;;  %v880_v61 = vpop.f32.mrb[10].mxu1 }
 0x15f   :  { %v1195_v62 = vadd.f32 %v2403_v17, %v752_v60  ;;  %v1227_v63 = vadd.f32 %v2403_v17, %v880_v61  ;;  %v754_v0 = vpop.f32.mrb[11].mxu0  ;;  %v882_v1 = vpop.f32.mrb[11].mxu1  ;;  %v1258_v2 = vmax.f32 %v1194_v56, 0.0  ;;  %v1290_v3 = vmax.f32 %v1226_v57, 0.0 }
 0x161   :  { %v1259_v4 = vmax.f32 %v1195_v62, 0.0  ;;  %v1291_v5 = vmax.f32 %v1227_v63, 0.0 }
 0x163   :  { %v1878_v6 = vpack.c.bf16 %v1259_v4, %v1258_v2  ;;  %v1958_v7 = vpack.c.bf16 %v1291_v5, %v1290_v3 }
 0x164   :  { %v757_v8 = vpop.f32.mrb[12].mxu0  ;;  %v885_v9 = vpop.f32.mrb[12].mxu1 }
 0x165   :  { %2026 = vst [vmem:[#allocation9 + $0x10] sm:$0xff] %v1878_v6   ;;  %2042 = vst [vmem:[#allocation9 + $0x90] sm:$0xff] %v1958_v7   ;;  %v1196_v10 = vadd.f32 %v2403_v17, %v757_v8  ;;  %v1228_v11 = vadd.f32 %v2403_v17, %v885_v9  ;;  %v759_v12 = vpop.f32.mrb[13].mxu0  ;;  %v887_v13 = vpop.f32.mrb[13].mxu1 }
 0x166   :  { %v760_v14 = vpop.f32.mrb[14].mxu0  ;;  %v888_v15 = vpop.f32.mrb[14].mxu1 }
 0x167   :  { %v1197_v16 = vadd.f32 %v2403_v17, %v760_v14  ;;  %v1229_v18 = vadd.f32 %v2403_v17, %v888_v15  ;;  %v762_v19 = vpop.f32.mrb[15].mxu0  ;;  %v890_v20 = vpop.f32.mrb[15].mxu1  ;;  %v1260_v21 = vmax.f32 %v1196_v10, 0.0  ;;  %v1292_v22 = vmax.f32 %v1228_v11, 0.0 }
 0x169   :  { %v1261_v23 = vmax.f32 %v1197_v16, 0.0  ;;  %v1293_v24 = vmax.f32 %v1229_v18, 0.0 }
 0x16b   :  { %v1883_v25 = vpack.c.bf16 %v1261_v23, %v1260_v21  ;;  %v1963_v26 = vpack.c.bf16 %v1293_v24, %v1292_v22 }
 0x16c   :  { %v765_v27 = vpop.f32.mrb[16].mxu0  ;;  %v893_v28 = vpop.f32.mrb[16].mxu1 }
 0x16d   :  { %2027 = vst [vmem:[#allocation9 + $0x18] sm:$0xff] %v1883_v25   ;;  %2043 = vst [vmem:[#allocation9 + $0x98] sm:$0xff] %v1963_v26   ;;  %v1198_v29 = vadd.f32 %v2403_v17, %v765_v27  ;;  %v1230_v30 = vadd.f32 %v2403_v17, %v893_v28  ;;  %v767_v31 = vpop.f32.mrb[17].mxu0  ;;  %v895_v32 = vpop.f32.mrb[17].mxu1 }
 0x16e   :  { %v768_v33 = vpop.f32.mrb[18].mxu0  ;;  %v896_v34 = vpop.f32.mrb[18].mxu1 }
 0x16f   :  { %v1199_v35 = vadd.f32 %v2403_v17, %v768_v33  ;;  %v1231_v36 = vadd.f32 %v2403_v17, %v896_v34  ;;  %v770_v37 = vpop.f32.mrb[19].mxu0  ;;  %v898_v38 = vpop.f32.mrb[19].mxu1  ;;  %v1262_v39 = vmax.f32 %v1198_v29, 0.0  ;;  %v1294_v40 = vmax.f32 %v1230_v30, 0.0 }
 0x171   :  { %v1263_v41 = vmax.f32 %v1199_v35, 0.0  ;;  %v1295_v42 = vmax.f32 %v1231_v36, 0.0 }
 0x173   :  { %v1888_v43 = vpack.c.bf16 %v1263_v41, %v1262_v39  ;;  %v1968_v44 = vpack.c.bf16 %v1295_v42, %v1294_v40 }
 0x174   :  { %v773_v45 = vpop.f32.mrb[20].mxu0  ;;  %v901_v46 = vpop.f32.mrb[20].mxu1 }
 0x175   :  { %2028 = vst [vmem:[#allocation9 + $0x20] sm:$0xff] %v1888_v43   ;;  %2044 = vst [vmem:[#allocation9 + $0xa0] sm:$0xff] %v1968_v44   ;;  %v1200_v47 = vadd.f32 %v2403_v17, %v773_v45  ;;  %v1232_v48 = vadd.f32 %v2403_v17, %v901_v46  ;;  %v775_v49 = vpop.f32.mrb[21].mxu0  ;;  %v903_v50 = vpop.f32.mrb[21].mxu1 }
 0x176   :  { %v776_v51 = vpop.f32.mrb[22].mxu0  ;;  %v904_v52 = vpop.f32.mrb[22].mxu1 }
 0x177   :  { %v1201_v53 = vadd.f32 %v2403_v17, %v776_v51  ;;  %v1233_v54 = vadd.f32 %v2403_v17, %v904_v52  ;;  %v778_v55 = vpop.f32.mrb[23].mxu0  ;;  %v906_v56 = vpop.f32.mrb[23].mxu1  ;;  %v1264_v57 = vmax.f32 %v1200_v47, 0.0  ;;  %v1296_v58 = vmax.f32 %v1232_v48, 0.0 }
 0x179   :  { %v1265_v59 = vmax.f32 %v1201_v53, 0.0  ;;  %v1297_v60 = vmax.f32 %v1233_v54, 0.0 }
 0x17b   :  { %v1893_v61 = vpack.c.bf16 %v1265_v59, %v1264_v57  ;;  %v1973_v62 = vpack.c.bf16 %v1297_v60, %v1296_v58 }
 0x17c   :  { %v781_v63 = vpop.f32.mrb[24].mxu0  ;;  %v909_v0 = vpop.f32.mrb[24].mxu1 }
 0x17d   :  { %2029 = vst [vmem:[#allocation9 + $0x28] sm:$0xff] %v1893_v61   ;;  %2045 = vst [vmem:[#allocation9 + $0xa8] sm:$0xff] %v1973_v62   ;;  %v1202_v1 = vadd.f32 %v2403_v17, %v781_v63  ;;  %v1234_v2 = vadd.f32 %v2403_v17, %v909_v0  ;;  %v783_v3 = vpop.f32.mrb[25].mxu0  ;;  %v911_v4 = vpop.f32.mrb[25].mxu1 }
 0x17e   :  { %v784_v5 = vpop.f32.mrb[26].mxu0  ;;  %v912_v6 = vpop.f32.mrb[26].mxu1 }
 0x17f   :  { %v1203_v7 = vadd.f32 %v2403_v17, %v784_v5  ;;  %v1235_v8 = vadd.f32 %v2403_v17, %v912_v6  ;;  %v786_v9 = vpop.f32.mrb[27].mxu0  ;;  %v914_v10 = vpop.f32.mrb[27].mxu1  ;;  %v1266_v11 = vmax.f32 %v1202_v1, 0.0  ;;  %v1298_v12 = vmax.f32 %v1234_v2, 0.0 }
 0x181   :  { %v1267_v13 = vmax.f32 %v1203_v7, 0.0  ;;  %v1299_v14 = vmax.f32 %v1235_v8, 0.0 }
 0x183   :  { %v1898_v15 = vpack.c.bf16 %v1267_v13, %v1266_v11  ;;  %v1978_v16 = vpack.c.bf16 %v1299_v14, %v1298_v12 }
 0x184   :  { %v789_v18 = vpop.f32.mrb[28].mxu0  ;;  %v917_v19 = vpop.f32.mrb[28].mxu1 }
 0x185   :  { %2030 = vst [vmem:[#allocation9 + $0x30] sm:$0xff] %v1898_v15   ;;  %2046 = vst [vmem:[#allocation9 + $0xb0] sm:$0xff] %v1978_v16   ;;  %v1204_v20 = vadd.f32 %v2403_v17, %v789_v18  ;;  %v1236_v21 = vadd.f32 %v2403_v17, %v917_v19  ;;  %v791_v22 = vpop.f32.mrb[29].mxu0  ;;  %v919_v23 = vpop.f32.mrb[29].mxu1 }
 0x186   :  { %v792_v24 = vpop.f32.mrb[30].mxu0  ;;  %v920_v25 = vpop.f32.mrb[30].mxu1 }
 0x187   :  { %v1205_v26 = vadd.f32 %v2403_v17, %v792_v24  ;;  %v1237_v27 = vadd.f32 %v2403_v17, %v920_v25  ;;  %v794_v28 = vpop.f32.mrb[31].mxu0  ;;  %v922_v29 = vpop.f32.mrb[31].mxu1  ;;  %v1268_v30 = vmax.f32 %v1204_v20, 0.0  ;;  %v1300_v31 = vmax.f32 %v1236_v21, 0.0 }
 0x189   :  { %v1269_v32 = vmax.f32 %v1205_v26, 0.0  ;;  %v1301_v33 = vmax.f32 %v1237_v27, 0.0 }
 0x18b   :  { %v1903_v34 = vpack.c.bf16 %v1269_v32, %v1268_v30  ;;  %v1983_v35 = vpack.c.bf16 %v1301_v33, %v1300_v31 }
 0x18c   :  { %v797_v36 = vpop.f32.mrb[32].mxu0  ;;  %v925_v37 = vpop.f32.mrb[32].mxu1 }
 0x18d   :  { %2031 = vst [vmem:[#allocation9 + $0x38] sm:$0xff] %v1903_v34   ;;  %2047 = vst [vmem:[#allocation9 + $0xb8] sm:$0xff] %v1983_v35   ;;  %v1206_v38 = vadd.f32 %v2403_v17, %v797_v36  ;;  %v1238_v39 = vadd.f32 %v2403_v17, %v925_v37  ;;  %v799_v40 = vpop.f32.mrb[33].mxu0  ;;  %v927_v41 = vpop.f32.mrb[33].mxu1 }
 0x18e   :  { %v800_v42 = vpop.f32.mrb[34].mxu0  ;;  %v928_v43 = vpop.f32.mrb[34].mxu1 }
 0x18f   :  { %v1207_v44 = vadd.f32 %v2403_v17, %v800_v42  ;;  %v1239_v45 = vadd.f32 %v2403_v17, %v928_v43  ;;  %v802_v46 = vpop.f32.mrb[35].mxu0  ;;  %v930_v47 = vpop.f32.mrb[35].mxu1  ;;  %v1270_v48 = vmax.f32 %v1206_v38, 0.0  ;;  %v1302_v49 = vmax.f32 %v1238_v39, 0.0 }
 0x191   :  { %v1271_v50 = vmax.f32 %v1207_v44, 0.0  ;;  %v1303_v51 = vmax.f32 %v1239_v45, 0.0 }
 0x193   :  { %v1908_v52 = vpack.c.bf16 %v1271_v50, %v1270_v48  ;;  %v1988_v53 = vpack.c.bf16 %v1303_v51, %v1302_v49 }
 0x194   :  { %v805_v54 = vpop.f32.mrb[36].mxu0  ;;  %v933_v55 = vpop.f32.mrb[36].mxu1 }
 0x195   :  { %2032 = vst [vmem:[#allocation9 + $0x40] sm:$0xff] %v1908_v52   ;;  %2048 = vst [vmem:[#allocation9 + $0xc0] sm:$0xff] %v1988_v53   ;;  %v1208_v56 = vadd.f32 %v2403_v17, %v805_v54  ;;  %v1240_v57 = vadd.f32 %v2403_v17, %v933_v55  ;;  %v807_v58 = vpop.f32.mrb[37].mxu0  ;;  %v935_v59 = vpop.f32.mrb[37].mxu1 }
 0x196   :  { %v808_v60 = vpop.f32.mrb[38].mxu0  ;;  %v936_v61 = vpop.f32.mrb[38].mxu1 }
 0x197   :  { %v1209_v62 = vadd.f32 %v2403_v17, %v808_v60  ;;  %v1241_v63 = vadd.f32 %v2403_v17, %v936_v61  ;;  %v810_v0 = vpop.f32.mrb[39].mxu0  ;;  %v938_v1 = vpop.f32.mrb[39].mxu1  ;;  %v1272_v2 = vmax.f32 %v1208_v56, 0.0  ;;  %v1304_v3 = vmax.f32 %v1240_v57, 0.0 }
 0x199   :  { %v1273_v4 = vmax.f32 %v1209_v62, 0.0  ;;  %v1305_v5 = vmax.f32 %v1241_v63, 0.0 }
 0x19b   :  { %v1913_v6 = vpack.c.bf16 %v1273_v4, %v1272_v2  ;;  %v1993_v7 = vpack.c.bf16 %v1305_v5, %v1304_v3 }
 0x19c   :  { %v813_v8 = vpop.f32.mrb[40].mxu0  ;;  %v941_v9 = vpop.f32.mrb[40].mxu1 }
 0x19d   :  { %2033 = vst [vmem:[#allocation9 + $0x48] sm:$0xff] %v1913_v6   ;;  %2049 = vst [vmem:[#allocation9 + $0xc8] sm:$0xff] %v1993_v7   ;;  %v1210_v10 = vadd.f32 %v2403_v17, %v813_v8  ;;  %v1242_v11 = vadd.f32 %v2403_v17, %v941_v9  ;;  %v815_v12 = vpop.f32.mrb[41].mxu0  ;;  %v943_v13 = vpop.f32.mrb[41].mxu1 }
 0x19e   :  { %v816_v14 = vpop.f32.mrb[42].mxu0  ;;  %v944_v15 = vpop.f32.mrb[42].mxu1 }
 0x19f   :  { %v1211_v16 = vadd.f32 %v2403_v17, %v816_v14  ;;  %v1243_v18 = vadd.f32 %v2403_v17, %v944_v15  ;;  %v818_v19 = vpop.f32.mrb[43].mxu0  ;;  %v946_v20 = vpop.f32.mrb[43].mxu1  ;;  %v1274_v21 = vmax.f32 %v1210_v10, 0.0  ;;  %v1306_v22 = vmax.f32 %v1242_v11, 0.0 }
 0x1a1   :  { %v1275_v23 = vmax.f32 %v1211_v16, 0.0  ;;  %v1307_v24 = vmax.f32 %v1243_v18, 0.0 }
 0x1a3   :  { %v1918_v25 = vpack.c.bf16 %v1275_v23, %v1274_v21  ;;  %v1998_v26 = vpack.c.bf16 %v1307_v24, %v1306_v22 }
 0x1a4   :  { %v821_v27 = vpop.f32.mrb[44].mxu0  ;;  %v949_v28 = vpop.f32.mrb[44].mxu1 }
 0x1a5   :  { %2034 = vst [vmem:[#allocation9 + $0x50] sm:$0xff] %v1918_v25   ;;  %2050 = vst [vmem:[#allocation9 + $0xd0] sm:$0xff] %v1998_v26   ;;  %v1212_v29 = vadd.f32 %v2403_v17, %v821_v27  ;;  %v1244_v30 = vadd.f32 %v2403_v17, %v949_v28  ;;  %v823_v31 = vpop.f32.mrb[45].mxu0  ;;  %v951_v32 = vpop.f32.mrb[45].mxu1 }
 0x1a6   :  { %v824_v33 = vpop.f32.mrb[46].mxu0  ;;  %v952_v34 = vpop.f32.mrb[46].mxu1 }
 0x1a7   :  { %v1213_v35 = vadd.f32 %v2403_v17, %v824_v33  ;;  %v1245_v36 = vadd.f32 %v2403_v17, %v952_v34  ;;  %v826_v37 = vpop.f32.mrb[47].mxu0  ;;  %v954_v38 = vpop.f32.mrb[47].mxu1  ;;  %v1276_v39 = vmax.f32 %v1212_v29, 0.0  ;;  %v1308_v40 = vmax.f32 %v1244_v30, 0.0 }
 0x1a9   :  { %v1277_v41 = vmax.f32 %v1213_v35, 0.0  ;;  %v1309_v42 = vmax.f32 %v1245_v36, 0.0 }
 0x1ab   :  { %v1923_v43 = vpack.c.bf16 %v1277_v41, %v1276_v39  ;;  %v2003_v44 = vpack.c.bf16 %v1309_v42, %v1308_v40 }
 0x1ac   :  { %v829_v45 = vpop.f32.mrb[48].mxu0  ;;  %v957_v46 = vpop.f32.mrb[48].mxu1 }
 0x1ad   :  { %2035 = vst [vmem:[#allocation9 + $0x58] sm:$0xff] %v1923_v43   ;;  %2051 = vst [vmem:[#allocation9 + $0xd8] sm:$0xff] %v2003_v44   ;;  %v1214_v47 = vadd.f32 %v2403_v17, %v829_v45  ;;  %v1246_v48 = vadd.f32 %v2403_v17, %v957_v46  ;;  %v831_v49 = vpop.f32.mrb[49].mxu0  ;;  %v959_v50 = vpop.f32.mrb[49].mxu1 }
 0x1ae   :  { %v832_v51 = vpop.f32.mrb[50].mxu0  ;;  %v960_v52 = vpop.f32.mrb[50].mxu1 }
 0x1af   :  { %v1215_v53 = vadd.f32 %v2403_v17, %v832_v51  ;;  %v1247_v54 = vadd.f32 %v2403_v17, %v960_v52  ;;  %v834_v55 = vpop.f32.mrb[51].mxu0  ;;  %v962_v56 = vpop.f32.mrb[51].mxu1  ;;  %v1278_v57 = vmax.f32 %v1214_v47, 0.0  ;;  %v1310_v58 = vmax.f32 %v1246_v48, 0.0 }
 0x1b1   :  { %v1279_v59 = vmax.f32 %v1215_v53, 0.0  ;;  %v1311_v60 = vmax.f32 %v1247_v54, 0.0 }
 0x1b3   :  { %v1928_v61 = vpack.c.bf16 %v1279_v59, %v1278_v57  ;;  %v2008_v62 = vpack.c.bf16 %v1311_v60, %v1310_v58 }
 0x1b4   :  { %v837_v63 = vpop.f32.mrb[52].mxu0  ;;  %v965_v0 = vpop.f32.mrb[52].mxu1 }
 0x1b5   :  { %2036 = vst [vmem:[#allocation9 + $0x60] sm:$0xff] %v1928_v61   ;;  %2052 = vst [vmem:[#allocation9 + $0xe0] sm:$0xff] %v2008_v62   ;;  %v1216_v1 = vadd.f32 %v2403_v17, %v837_v63  ;;  %v1248_v2 = vadd.f32 %v2403_v17, %v965_v0  ;;  %v839_v3 = vpop.f32.mrb[53].mxu0  ;;  %v967_v4 = vpop.f32.mrb[53].mxu1 }
 0x1b6   :  { %v840_v5 = vpop.f32.mrb[54].mxu0  ;;  %v968_v6 = vpop.f32.mrb[54].mxu1 }
 0x1b7   :  { %v1217_v7 = vadd.f32 %v2403_v17, %v840_v5  ;;  %v1249_v8 = vadd.f32 %v2403_v17, %v968_v6  ;;  %v842_v9 = vpop.f32.mrb[55].mxu0  ;;  %v970_v10 = vpop.f32.mrb[55].mxu1  ;;  %v1280_v11 = vmax.f32 %v1216_v1, 0.0  ;;  %v1312_v12 = vmax.f32 %v1248_v2, 0.0 }
 0x1b9   :  { %v1281_v13 = vmax.f32 %v1217_v7, 0.0  ;;  %v1313_v14 = vmax.f32 %v1249_v8, 0.0 }
 0x1bb   :  { %v1933_v15 = vpack.c.bf16 %v1281_v13, %v1280_v11  ;;  %v2013_v16 = vpack.c.bf16 %v1313_v14, %v1312_v12 }
 0x1bc   :  { %v845_v18 = vpop.f32.mrb[56].mxu0  ;;  %v973_v19 = vpop.f32.mrb[56].mxu1 }
 0x1bd   :  { %2037 = vst [vmem:[#allocation9 + $0x68] sm:$0xff] %v1933_v15   ;;  %2053 = vst [vmem:[#allocation9 + $0xe8] sm:$0xff] %v2013_v16   ;;  %v1218_v20 = vadd.f32 %v2403_v17, %v845_v18  ;;  %v1250_v21 = vadd.f32 %v2403_v17, %v973_v19  ;;  %v847_v22 = vpop.f32.mrb[57].mxu0  ;;  %v975_v23 = vpop.f32.mrb[57].mxu1 }
 0x1be   :  { %v848_v24 = vpop.f32.mrb[58].mxu0  ;;  %v976_v25 = vpop.f32.mrb[58].mxu1 }
 0x1bf   :  { %v1219_v26 = vadd.f32 %v2403_v17, %v848_v24  ;;  %v1251_v27 = vadd.f32 %v2403_v17, %v976_v25  ;;  %v850_v28 = vpop.f32.mrb[59].mxu0  ;;  %v978_v29 = vpop.f32.mrb[59].mxu1  ;;  %v1282_v30 = vmax.f32 %v1218_v20, 0.0  ;;  %v1314_v31 = vmax.f32 %v1250_v21, 0.0 }
 0x1c1   :  { %v1283_v32 = vmax.f32 %v1219_v26, 0.0  ;;  %v1315_v33 = vmax.f32 %v1251_v27, 0.0 }
 0x1c3   :  { %v1938_v34 = vpack.c.bf16 %v1283_v32, %v1282_v30  ;;  %v2018_v35 = vpack.c.bf16 %v1315_v33, %v1314_v31 }
 0x1c4   :  { %v853_v36 = vpop.f32.mrb[60].mxu0  ;;  %v981_v37 = vpop.f32.mrb[60].mxu1 }
 0x1c5   :  { %2038 = vst [vmem:[#allocation9 + $0x70] sm:$0xff] %v1938_v34   ;;  %2054 = vst [vmem:[#allocation9 + $0xf0] sm:$0xff] %v2018_v35   ;;  %v1220_v38 = vadd.f32 %v2403_v17, %v853_v36  ;;  %v1252_v39 = vadd.f32 %v2403_v17, %v981_v37  ;;  %v855_v40 = vpop.f32.mrb[61].mxu0  ;;  %v983_v41 = vpop.f32.mrb[61].mxu1 }
 0x1c6   :  { %v856_v42 = vpop.f32.mrb[62].mxu0  ;;  %v984_v43 = vpop.f32.mrb[62].mxu1 }
 0x1c7   :  { %v1221_v44 = vadd.f32 %v2403_v17, %v856_v42  ;;  %v1253_v45 = vadd.f32 %v2403_v17, %v984_v43  ;;  %v858_v46 = vpop.f32.mrb[63].mxu0  ;;  %v986_v47 = vpop.f32.mrb[63].mxu1  ;;  %v1284_v48 = vmax.f32 %v1220_v38, 0.0  ;;  %v1316_v49 = vmax.f32 %v1252_v39, 0.0 }
 0x1c9   :  { %v1285_v50 = vmax.f32 %v1221_v44, 0.0  ;;  %v1317_v51 = vmax.f32 %v1253_v45, 0.0 }
 0x1cb   :  { %v1943_v52 = vpack.c.bf16 %v1285_v50, %v1284_v48  ;;  %v2023_v53 = vpack.c.bf16 %v1317_v51, %v1316_v49 }
 0x1cd   :  { %2039 = vst [vmem:[#allocation9 + $0x78] sm:$0xff] %v1943_v52   ;;  %2055 = vst [vmem:[#allocation9 + $0xf8] sm:$0xff] %v2023_v53  }
 0x1ce   :  { %2286 = shalt.err (!%p2283_p0)
}
 0x1cf   :  { %s2287_s30 = scalar_lea.hbm %s2487_s3, 4096 }
 0x1d0   :  { %p2288_p1 = scmp.ne.s32.totalorder %s2487_s3, %s2287_s30  ;;  %p2291_p2 = scmp.lt.u32.totalorder %s2287_s30, %s2487_s3 }
 0x1d2   :  { %p2293_p3 = pnand %p2291_p2, %p2288_p1 }
 0x1d4   :  { %2296 = shalt.err (!%p2293_p3)
}
 0x1d5   :  { %1649 = dma.vmem_to_hbm [thread:$0]  %s1644_s26, 4096, %s2487_s3, [#allocation5], %s2304_s22, %s2304_s22, %s2305_s23  }
 0x1d6   :  { %2301 = dma.done.wait [#allocation5], 4096  }
 0x1d7   :  { %2302 = vsyncadd [#allocation5], 4294963200 }
 0x1d8   :  { %1653 = vsyncpa [#allocation4], 1 }
 0x1d9   :  { %1654 = vsyncpa [#allocation7], 1 }
 0x1da   :  { %1655 = vsyncpa [#allocation5], 1 }

// kernel: repmlp_resnet_forward.25
= control target key start
LH: loop header
LB: loop body
LE: loop exit
PB: predicated region body
PF: predicated region fallthrough
CT: control target
= control target key end

     0   :  { %8 = vsyncpa [#allocation3], 0  ;;  %s1160_s0 = inlined_call_operand.hbm [shape: bf16[2,64,16], index: 0, kind: input, shape index: {}]   ;;  %s1161_s1 = inlined_call_operand.hbm [shape: bf16[16,32], index: 1, kind: input, shape index: {}]   ;;  %s1162_s2 = inlined_call_operand.hbm [shape: f32[1,32], index: 2, kind: input, shape index: {}]   ;;  %s1163_s3 = inlined_call_operand.hbm [shape: bf16[2,64,32], index: 3, kind: output, shape index: {}]  }
   0x1   :  { %10 = vsyncpa [#allocation3 + $0x1], 0 }
   0x2   :  { %11 = vsyncpa [#allocation6], 0 }
   0x3   :  { %12 = vsyncpa [#allocation4], 0 }
   0x4   :  { %14 = vsyncpa [#allocation4 + $0x1], 0  ;;  %s886_s12 = smov 0   ;;  %s888_s13 = smov 0  }
   0x5   :  { %s890_s14 = smov 0   ;;  %s892_s15 = smov 0  }
   0x6   :  { %s894_s16 = smov 0   ;;  %s896_s17 = smov 0  }
   0x7 LB: > { %s528_s18 = sadd.s32 4294967295, %s856_s17   ;;  %s529_s19 = sadd.s32 4294967294, %s856_s17   ;;  %s856_s17 = sphi %s896_s17, %s20_s17   ;;  %s852_s16 = sphi %s894_s16, %s1185_s16   ;;  %s848_s15 = sphi %s892_s15, %s1184_s15   ;;  %s844_s14 = sphi %s890_s14, %s1183_s14   ;;  %s840_s13 = sphi %s888_s13, %s1182_s13   ;;  %s836_s12 = sphi %s886_s12, %s1181_s12  }
   0x8   : > { %p52_p0 = scmp.ne.s32.totalorder %s840_s13, %s836_s12  ;;  %p920_p1 = scmp.eq.s32.totalorder %s528_s18, 0 }
   0x9   : > { %p924_p2 = scmp.eq.s32.totalorder %s528_s18, 1  ;;  %p136_p3 = scmp.eq.s32.totalorder %s529_s19, 1 }
   0xa   : > { %s1168_s20 = scalar_select %p920_p1, 1, 0 }
   0xb   : > { %p930_p4 = por %p920_p1, %p52_p0  ;;  %p530_p5 = scmp.ge.s32.totalorder %s856_s17, 1 }
   0xc   : > { %p935_p6 = por %p136_p3, %p52_p0  ;;  %p143_p7 = scmp.lt.s32.totalorder %s856_s17, 3 }
   0xd   : > { %s1170_s22 = scalar_select %p930_p4, 1, 0 }
   0xe   : > { %s1171_s23 = scalar_select %p935_p6, 1, 0 }
   0xf   : > { %p940_p8 = pnand %p530_p5, %p143_p7  ;;  %s858_s25 = smov [#allocation5]  }
  0x10   : > { %s157_s26 = sshll.u32 %s858_s25, 4  ;;  %s859_s28 = smov [#allocation7]   ;;  %s944_s26 = int_to_ptr.vmem [resolvable:$true] %s157_s26 }
  0x11   : > { %p604_p9 = pneg %p940_p8  ;;  %s173_s29 = sshll.u32 %s859_s28, 4  ;;  %s955_s29 = int_to_ptr.vmem [resolvable:$true] %s173_s29 }
  0x12   : > { %s684_s5 = scalar_lea.hbm %s1161_s1, 128 }
  0x13   : > { %p951_p11 = pnand %p604_p9, %p920_p1  ;;  %p685_p12 = scmp.ne.s32.totalorder %s1161_s1, %s684_s5 }
  0x14   : > { %p691_p5 = scmp.lt.u32.totalorder %s684_s5, %s1161_s1 }
  0x15   : > { %p686_p13 = pneg %p951_p11 }
  0x17   : > { %p687_p0 = pnand %p686_p13, %p685_p12 }
  0x19   : > { %p688_p3 = pneg %p687_p0 }
  0x1b   : > { %p693_p7 = pnand %p691_p5, %p688_p3 }
  0x1d   : > { %696 = shalt.err (!%p693_p7)
}
  0x1e   : > { %s697_s10 = scalar_lea.vmem %s944_s26, 128  ;;  %p705_p1 = scmp.lt.s32.totalorder %s944_s26, %s944_s26 }
  0x1f   : > { %p698_p9 = scmp.ne.s32.totalorder %s944_s26, %s697_s10  ;;  %p706_p12 = scmp.lt.s32.totalorder %s697_s10, %s697_s10 }
  0x21   : > { %p700_p10 = pnand %p698_p9, %p686_p13  ;;  %p707_p0 = por %p706_p12, %p705_p1 }
  0x23   : > { %p701_p6 = pneg %p700_p10 }
  0x25   : > { %p708_p4 = pnand %p707_p0, %p701_p6 }
  0x27   : > { %711 = shalt.err (!%p708_p4)
}
  0x28   : > { %s860_s11 = smov 64   ;;  %s861_s18 = smov 4  }
  0x29   : > { %607 = dma.hbm_to_vmem [thread:$0]  (!%p951_p11), %s1161_s1, 128, %s944_s26, [#allocation6], %s860_s11, %s860_s11, %s861_s18  }
  0x2a   : > { %s712_s4 = scalar_lea.hbm %s1162_s2, 16 }
  0x2b   : > { %p713_p1 = scmp.ne.s32.totalorder %s1162_s2, %s712_s4  ;;  %p719_p10 = scmp.lt.u32.totalorder %s712_s4, %s1162_s2 }
  0x2d   : > { %p715_p4 = pnand %p713_p1, %p686_p13 }
  0x2f   : > { %p716_p6 = pneg %p715_p4 }
  0x31   : > { %p721_p3 = pnand %p719_p10, %p716_p6 }
  0x33   : > { %724 = shalt.err (!%p721_p3)
}
  0x34   : > { %s725_s26 = scalar_lea.vmem %s955_s29, 16  ;;  %s732_s9 = scalar_lea.vmem %s955_s29, 32 }
  0x35   : > { %p726_p5 = scmp.ne.s32.totalorder %s955_s29, %s725_s26  ;;  %p733_p12 = scmp.lt.s32.totalorder %s955_s29, %s955_s29 }
  0x36   : > { %p734_p0 = scmp.lt.s32.totalorder %s732_s9, %s725_s26 }
  0x37   : > { %p728_p7 = pnand %p726_p5, %p686_p13 }
  0x38   : > { %p735_p1 = por %p734_p0, %p733_p12 }
  0x39   : > { %p729_p9 = pneg %p728_p7 }
  0x3b   : > { %p736_p4 = pnand %p735_p1, %p729_p9 }
  0x3d   : > { %739 = shalt.err (!%p736_p4)
}
  0x3e   : > { %610 = dma.hbm_to_vmem [thread:$0]  (!%p951_p11), %s1162_s2, 16, %s955_s29, [#allocation6]  }
  0x3f   : > { %s29_s25 = sadd.s32 1, %s852_s16  ;;  %s39_s28 = sadd.s32 1, %s844_s14 }
  0x40   : > { %p30_p13 = scmp.ge.s32.totalorder %s29_s25, 2  ;;  %p46_p6 = scmp.ne.s32.totalorder %s844_s14, %s840_s13 }
  0x41   : > { %p47_p10 = scmp.eq.s32.totalorder %s856_s17, 0  ;;  %p621_p3 = scmp.lt.s32.totalorder %s856_s17, 2 }
  0x42   : > { %s1187_s25 = smov (%p30_p13, %s29_s25), 0  ;;  %p1023_p7 = por %p924_p2, %p46_p6 }
  0x43   : > { %p48_p5 = por %p47_p10, %p46_p6  ;;  %s36_s30 = ssub.s32 %s852_s16, %s1187_s25 }
  0x44   : > { %s1174_s27 = scalar_select %p1023_p7, 1, 0 }
  0x45   : > { %s184_s4 = sand.u32 1, %s844_s14   ;;  %p37_p9 = scmp.eq.s32.totalorder %s36_s30, 0 }
  0x46   : > { %s534_s29 = sshll.u32 %s184_s4, 5  ;;  %s565_s5 = sshll.u32 %s852_s16, 9 }
  0x47   : > { %s1032_s6 = scalar_select %p37_p9, %s844_s14, %s39_s28  }
  0x48   : > { %s1037_s26 = scalar_lea.hbm %s1160_s0, %s565_s5  ;;  %s188_s21 = scalar_lea.vmem [#allocation2], %s534_s29 }
  0x49   : > { %s195_s9 = sshll.u32 %s188_s21, 4  ;;  %p1041_p2 = pnand %p621_p3, %p48_p5  ;;  %s1045_s9 = int_to_ptr.vmem [resolvable:$true] %s195_s9 }
  0x4a   : > { %s1047_s19 = scalar_lea.sflag [#allocation3], %s184_s4  ;;  %s740_s28 = scalar_lea.hbm %s1037_s26, 512 }
  0x4b   : > { %p741_p11 = scmp.ne.s32.totalorder %s1037_s26, %s740_s28  ;;  %p742_p12 = pneg %p1041_p2 }
  0x4c   : > { %s745_s5 = scalar_lea.hbm %s1160_s0, 1024  ;;  %p746_p4 = scmp.lt.u32.totalorder %s1037_s26, %s1160_s0 }
  0x4d   : > { %p743_p0 = pnand %p742_p12, %p741_p11  ;;  %p747_p13 = scmp.lt.u32.totalorder %s745_s5, %s740_s28 }
  0x4e   : > { %p749_p10 = scmp.lt.u32.totalorder %s740_s28, %s1037_s26 }
  0x4f   : > { %p744_p1 = pneg %p743_p0  ;;  %p748_p6 = por %p747_p13, %p746_p4 }
  0x51   : > { %p750_p3 = por %p749_p10, %p748_p6 }
  0x53   : > { %p751_p5 = pnand %p750_p3, %p744_p1 }
  0x55   : > { %754 = shalt.err (!%p751_p5)
}
  0x56   : > { %s755_s4 = scalar_lea.vmem %s1045_s9, 512  ;;  %s862_s21 = smov [#allocation2]  }
  0x57   : > { %p756_p9 = scmp.ne.s32.totalorder %s1045_s9, %s755_s4  ;;  %s760_s30 = sshll.u32 %s862_s21, 4  ;;  %s761_s30 = int_to_ptr.vmem [resolvable:$false] %s760_s30 }
  0x58   : > { %s762_s29 = scalar_lea.vmem %s761_s30, 1024  ;;  %p763_p7 = scmp.lt.s32.totalorder %s1045_s9, %s761_s30 }
  0x59   : > { %p758_p11 = pnand %p756_p9, %p742_p12  ;;  %p764_p4 = scmp.lt.s32.totalorder %s762_s29, %s755_s4 }
  0x5b   : > { %p759_p0 = pneg %p758_p11  ;;  %p765_p13 = por %p764_p4, %p763_p7 }
  0x5d   : > { %p766_p6 = pnand %p765_p13, %p759_p0 }
  0x5f   : > { %769 = shalt.err (!%p766_p6)
}
  0x60   : > { %614 = dma.hbm_to_vmem [thread:$0]  (!%p1041_p2), %s1037_s26, 512, %s1045_s9, %s1047_s19, %s860_s11, %s860_s11, %s861_s18  }
  0x61   : > { %207 = sbr.rel (%p940_p8) target bundleno = 347 (0x15b), region = 32  ;;  %s1081_s28 = sand.u32 (!%p940_p8), 1, %s840_s13  }
  0x62   : > { %s538_s5 = sshll.u32 (!%p940_p8), %s1081_s28, 5  ;;  %s210_s7 = scalar_lea.sflag (!%p940_p8), [#allocation3], %s1081_s28 }
  0x63   : > { %s213_s10 = scalar_lea.vmem (!%p940_p8), [#allocation2], %s538_s5  ;;  %p1176_p7 = scmp.ne.s32.totalorder (!%p940_p8), %s1170_s22, 0 }
  0x68   : > { %823 = dma.done.wait (%p1176_p7), %s210_s7, 512  }
  0x69   : > { %825 = vsyncadd (%p1176_p7), %s210_s7, 4294966784  ;;  %p1177_p2 = scmp.ne.s32.totalorder %s1168_s20, 0 }
  0x6b   : > { %827 = dma.done.wait (%p1177_p2), [#allocation6], 144  }
  0x6c   : > { %829 = vsyncadd (%p1177_p2), [#allocation6], 4294967152  ;;  %v679_v0 = vld [vmem:[#allocation5] sm:$0xff]   ;;  %vm288_vm0 = vcmask 130048   ;;  %v681_v2 = vld [vmem:[%s213_s10 + $0x10] sm:$0xff]   ;;  %vm398_vm1 = vcmask 257024  }
  0x6d   : > { %v680_v1 = vld [vmem:[%s213_s10] sm:$0xff]   ;;  %580 = vmatprep.subr.bf16.mxu0 %v679_v0  ;;  %590 = vmatprep.subr.bf16.mxu1 %v679_v0  ;;  %v682_v3 = vld [vmem:[%s213_s10 + $0x8] sm:$0xff]   ;;  %v683_v4 = vld [vmem:[%s213_s10 + $0x18] sm:$0xff]   ;;  %s574_s20 = sshll.u32 %s848_s15, 9  ;;  %s243_s22 = scalar_lea.vmem [#allocation8], %s538_s5 }
  0x6e   : > { %581 = vmatpush3.bf16.msra.mxu0 %v679_v0  ;;  %591 = vmatpush3.bf16.msra.mxu1 %v679_v0  ;;  %v542_v5 = vld [vmem:[#allocation7] ss:$0 sm:$0xff]  ;;  %s422_s24 = sshll.u32 %s243_s22, 4  ;;  %s1103_s18 = scalar_lea.hbm %s1163_s3, %s574_s20  ;;  %s1105_s24 = int_to_ptr.vmem [resolvable:$true] %s422_s24 }
  0x6f   : > { %582 = vmatprep.mubr.msk.bf16.mxu0 %vm288_vm0, %v680_v1  ;;  %586 = vmatprep.mubr.msk.bf16.mxu1 %vm288_vm0, %v681_v2  ;;  %s408_s26 = scalar_lea.sflag [#allocation4], %s1081_s28  ;;  %s770_s9 = scalar_lea.vmem %s1105_s24, 512 }
  0x70   : > { %p771_p8 = scmp.ne.s32.totalorder %s1105_s24, %s770_s9  ;;  %p1178_p12 = scmp.ne.s32.totalorder %s1174_s27, 0 }
  0x71   : > { %583 = vmatmul.mubr.msk.bf16.vlgmr.msra.gmra.mrb[0].mxu0 %vm288_vm0, %v682_v3  ;;  %587 = vmatmul.mubr.msk.bf16.vlgmr.msra.gmra.mrb[0].mxu1 %vm288_vm0, %v683_v4  ;;  %s863_s19 = smov [#allocation8]  }
  0x72   : > { %p772_p1 = pnand %p771_p8, %p1178_p12  ;;  %s774_s8 = sshll.u32 %s863_s19, 4  ;;  %s775_s8 = int_to_ptr.vmem [resolvable:$false] %s774_s8 }
  0x73   : > { %s776_s4 = scalar_lea.vmem %s775_s8, 1024  ;;  %p777_p3 = scmp.lt.s32.totalorder %s1105_s24, %s775_s8 }
  0x74   : > { %p773_p10 = pneg %p772_p1  ;;  %p778_p5 = scmp.lt.s32.totalorder %s776_s4, %s770_s9 }
  0x76   : > { %p779_p9 = por %p778_p5, %p777_p3 }
  0x78   : > { %p780_p11 = pnand %p779_p9, %p773_p10 }
 0x144   : > { %v584_v6 = vpop.f32.mrb[0].mxu0  ;;  %v588_v7 = vpop.f32.mrb[0].mxu1 }
 0x145   : > { %v344_v8 = vadd.f32 %v584_v6, %v542_v5  ;;  %v360_v9 = vadd.f32 %v588_v7, %v542_v5  ;;  %v335_v10 = vpop.f32.mrb[1].mxu0  ;;  %v351_v11 = vpop.f32.mrb[1].mxu1 }
 0x146   : > { %v336_v12 = vadd.f32 %v542_v5, %v335_v10  ;;  %v352_v13 = vadd.f32 %v542_v5, %v351_v11  ;;  %v585_v14 = vpop.f32.mrb[2].mxu0  ;;  %v589_v15 = vpop.f32.mrb[2].mxu1 }
 0x147   : > { %v568_v16 = vpack.c.bf16 %v344_v8, %v344_v8  ;;  %v572_v17 = vpack.c.bf16 %v360_v9, %v360_v9  ;;  %v347_v18 = vadd.f32 %v585_v14, %v542_v5  ;;  %v363_v19 = vadd.f32 %v589_v15, %v542_v5  ;;  %v338_v20 = vpop.f32.mrb[3].mxu0  ;;  %v354_v21 = vpop.f32.mrb[3].mxu1 }
 0x148   : > { %v566_v22 = vpack.c.bf16 %v336_v12, %v336_v12  ;;  %v570_v23 = vpack.c.bf16 %v352_v13, %v352_v13  ;;  %v339_v24 = vadd.f32 %v542_v5, %v338_v20  ;;  %v355_v25 = vadd.f32 %v542_v5, %v354_v21 }
 0x149   : > { %401 = vst.msk [vmem:[%s243_s22 + $0x8] sm:$0xf] %vm398_vm1, %v568_v16  ;;  %405 = vst.msk [vmem:[%s243_s22 + $0x18] sm:$0xf] %vm398_vm1, %v572_v17  ;;  %v569_v26 = vpack.c.bf16 %v347_v18, %v347_v18  ;;  %v573_v27 = vpack.c.bf16 %v363_v19, %v363_v19 }
 0x14a   : > { %399 = vst.msk [vmem:[%s243_s22] sm:$0xf] %vm398_vm1, %v566_v22  ;;  %403 = vst.msk [vmem:[%s243_s22 + $0x10] sm:$0xf] %vm398_vm1, %v570_v23  ;;  %v567_v28 = vpack.c.bf16 %v339_v24, %v339_v24  ;;  %v571_v29 = vpack.c.bf16 %v355_v25, %v355_v25 }
 0x14b   : > { %402 = vst.msk [vmem:[%s243_s22 + $0xc] sm:$0xf] %vm398_vm1, %v569_v26  ;;  %406 = vst.msk [vmem:[%s243_s22 + $0x1c] sm:$0xf] %vm398_vm1, %v573_v27 }
 0x14c   : > { %400 = vst.msk [vmem:[%s243_s22 + $0x4] sm:$0xf] %vm398_vm1, %v567_v28  ;;  %404 = vst.msk [vmem:[%s243_s22 + $0x14] sm:$0xf] %vm398_vm1, %v571_v29 }
 0x14d   : > { %783 = shalt.err (!%p780_p11)
}
 0x14e   : > { %s784_s21 = scalar_lea.hbm %s1103_s18, 512  ;;  %s788_s5 = scalar_lea.hbm %s1163_s3, 1024 }
 0x14f   : > { %p785_p0 = scmp.ne.s32.totalorder %s1103_s18, %s784_s21  ;;  %p789_p6 = scmp.lt.u32.totalorder %s1103_s18, %s1163_s3 }
 0x150   : > { %p790_p7 = scmp.lt.u32.totalorder %s788_s5, %s784_s21  ;;  %p792_p8 = scmp.lt.u32.totalorder %s784_s21, %s1103_s18 }
 0x151   : > { %p786_p4 = pnand %p785_p0, %p1178_p12 }
 0x152   : > { %p791_p2 = por %p790_p7, %p789_p6 }
 0x153   : > { %p787_p13 = pneg %p786_p4 }
 0x154   : > { %p793_p1 = por %p792_p8, %p791_p2 }
 0x156   : > { %p794_p10 = pnand %p793_p1, %p787_p13 }
 0x158   : > { %797 = shalt.err (!%p794_p10)
}
 0x159   : > { %s864_s20 = smov 64   ;;  %s865_s22 = smov 4  }
 0x15a   : > { %602 = dma.vmem_to_hbm [thread:$0]  (%p1178_p12), %s1105_s24, 512, %s1103_s18, %s408_s26, %s864_s20, %s864_s20, %s865_s22  }
 0x15b PF: > { %s437_s15 = sand.u32 1, %s836_s12   ;;  %p1179_p3 = scmp.ne.s32.totalorder %s1171_s23, 0 }
 0x15c   : > { %p1180_p5 = scmp.ge.s32.totalorder %s856_s17, 2  ;;  %s438_s11 = scalar_lea.sflag [#allocation4], %s437_s15 }
 0x15e   : > { %p616_p9 = pnand %p1180_p5, %p1179_p3 }
 0x160   : > { %831 = dma.done.wait (!%p616_p9), %s438_s11, 512  }
 0x161   : > { %833 = vsyncadd (!%p616_p9), %s438_s11, 4294966784  ;;  %s20_s17 = sadd.s32 1, %s856_s17   ;;  %s1181_s12 = smov %s840_s13 }
 0x162   : > { %p17_p11 = scmp.ge.s32.totalorder %s20_s17, 4   ;;  %s1182_s13 = smov %s844_s14 }
 0x163   : > { %s1183_s14 = smov %s1032_s6  ;;  %s1184_s15 = smov %s852_s16 }
 0x164   : > { %s1185_s16 = smov %s1187_s25  ;;  %19 = sbr.rel (!%p17_p11) target bundleno = 7 (0x7), region = 87 }
 0x16b   :  { %443 = vsyncpa [#allocation3], 1 }
 0x16c   :  { %445 = vsyncpa [#allocation3 + $0x1], 1 }
 0x16d   :  { %446 = vsyncpa [#allocation6], 1 }
 0x16e   :  { %447 = vsyncpa [#allocation4], 1 }
 0x16f   :  { %449 = vsyncpa [#allocation4 + $0x1], 1 }

// kernel: repmlp_resnet_forward.28
= control target key start
LH: loop header
LB: loop body
LE: loop exit
PB: predicated region body
PF: predicated region fallthrough
CT: control target
= control target key end

     0   :  { %s1394_s0 = inlined_call_operand.hbm [shape: bf16[2,64,8], index: 0, kind: input, shape index: {}]   ;;  %s1395_s1 = inlined_call_operand.hbm [shape: bf16[8,32], index: 1, kind: input, shape index: {}]   ;;  %s1396_s2 = inlined_call_operand.hbm [shape: f32[1,32], index: 2, kind: input, shape index: {}]   ;;  %s1397_s3 = inlined_call_operand.hbm [shape: bf16[2,64,32], index: 3, kind: input, shape index: {}]   ;;  %s1398_s4 = inlined_call_operand.hbm [shape: bf16[2,64,32], index: 4, kind: output, shape index: {}]  }
   0x1   :  { %1406 = sst [smem:[#allocation15_spill]] %s1394_s0 }
   0x2   :  { %1407 = sst [smem:[#allocation16_spill]] %s1395_s1 }
   0x3   :  { %1408 = sst [smem:[#allocation17_spill]] %s1396_s2 }
   0x4   :  { %9 = vsyncpa [#allocation3], 0 }
   0x5   :  { %11 = vsyncpa [#allocation3 + $0x1], 0 }
   0x6   :  { %12 = vsyncpa [#allocation6], 0 }
   0x7   :  { %13 = vsyncpa [#allocation9], 0 }
   0x8   :  { %15 = vsyncpa [#allocation9 + $0x1], 0 }
   0x9   :  { %16 = vsyncpa [#allocation4], 0 }
   0xa   :  { %18 = vsyncpa [#allocation4 + $0x1], 0  ;;  %s1077_s15 = smov 0   ;;  %s1079_s16 = smov 0  }
   0xb   :  { %s1081_s17 = smov 0   ;;  %s1083_s18 = smov 0  }
   0xc   :  { %s1085_s19 = smov 0   ;;  %s1087_s20 = smov 0  }
   0xd LB: > { %s650_s21 = sadd.s32 4294967295, %s1041_s20   ;;  %s651_s22 = sadd.s32 4294967294, %s1041_s20   ;;  %s1041_s20 = sphi %s1087_s20, %s24_s20   ;;  %s1037_s19 = sphi %s1085_s19, %s1432_s19   ;;  %s1033_s18 = sphi %s1083_s18, %s1431_s18   ;;  %s1029_s17 = sphi %s1081_s17, %s1430_s17   ;;  %s1025_s16 = sphi %s1079_s16, %s1429_s16   ;;  %s1021_s15 = sphi %s1077_s15, %s1428_s15  }
   0xe   : > { %s43_s23 = sadd.s32 1, %s1029_s17  ;;  %p50_p0 = scmp.ne.s32.totalorder %s1029_s17, %s1025_s16 }
   0xf   : > { %p51_p1 = scmp.eq.s32.totalorder %s1041_s20, 0  ;;  %p56_p2 = scmp.ne.s32.totalorder %s1025_s16, %s1021_s15 }
  0x10   : > { %p1115_p3 = scmp.eq.s32.totalorder %s650_s21, 0  ;;  %p162_p4 = scmp.eq.s32.totalorder %s650_s21, 1 }
  0x11   : > { %p1119_p5 = por %p51_p1, %p50_p0  ;;  %p168_p6 = scmp.eq.s32.totalorder %s651_s22, 1 }
  0x12   : > { %s1409_s24 = scalar_select %p1115_p3, 1, 0 }
  0x13   : > { %p1125_p7 = por %p1115_p3, %p56_p2  ;;  %p1129_p8 = por %p162_p4, %p50_p0 }
  0x14   : > { %p1133_p9 = por %p168_p6, %p56_p2  ;;  %p652_p10 = scmp.ge.s32.totalorder %s1041_s20, 1 }
  0x15   : > { %s1411_s26 = scalar_select %p1125_p7, 1, 0 }
  0x16   : > { %s1412_s27 = scalar_select %p1129_p8, 1, 0 }
  0x17   : > { %s1413_s28 = scalar_select %p1133_p9, 1, 0 }
  0x18   : > { %p175_p11 = scmp.lt.s32.totalorder %s1041_s20, 3  ;;  %s1043_s30 = smov [#allocation5]  }
  0x19   : > { %s190_s5 = sshll.u32 %s1043_s30, 4  ;;  %p773_p1 = scmp.lt.s32.totalorder %s1041_s20, 2  ;;  %s191_s5 = int_to_ptr.vmem [resolvable:$true] %s190_s5 }
  0x1a   : > { %p1140_p13 = pnand %p652_p10, %p175_p11  ;;  %s1044_s7 = smov [#allocation7]  }
  0x1b   : > { %p1149_p4 = pnand %p773_p1, %p1119_p5  ;;  %s203_s8 = sshll.u32 %s1044_s7, 4  ;;  %s1159_s8 = int_to_ptr.vmem [resolvable:$true] %s203_s8 }
  0x1c   : > { %s1414_s29 = scalar_select %p1140_p13, 1, 0 }
  0x1d   : > { %p753_p0 = pneg %p1140_p13  ;;  %s1417_s1 = sld [smem:[#allocation16_spill]] }
  0x1e   : > { %s1415_s6 = scalar_select %p1149_p4, 1, 0 }
  0x1f   : > { %p1155_p2 = pnand %p753_p0, %p1115_p3 }
  0x21   : > { %p837_p6 = pneg %p1155_p2 }
  0x23   : > { %s835_s12 = scalar_lea.hbm %s1417_s1, 64 }
  0x24   : > { %p836_p5 = scmp.ne.s32.totalorder %s1417_s1, %s835_s12  ;;  %p842_p1 = scmp.lt.u32.totalorder %s835_s12, %s1417_s1 }
  0x26   : > { %p838_p10 = pnand %p837_p6, %p836_p5 }
  0x28   : > { %p839_p11 = pneg %p838_p10 }
  0x2a   : > { %p844_p0 = pnand %p842_p1, %p839_p11 }
  0x2c   : > { %847 = shalt.err (!%p844_p0)
}
  0x2d   : > { %s848_s25 = scalar_lea.vmem %s191_s5, 64  ;;  %p856_p3 = scmp.lt.s32.totalorder %s191_s5, %s191_s5 }
  0x2e   : > { %p849_p12 = scmp.ne.s32.totalorder %s191_s5, %s848_s25  ;;  %p857_p7 = scmp.lt.s32.totalorder %s848_s25, %s848_s25 }
  0x30   : > { %p851_p9 = pnand %p849_p12, %p837_p6  ;;  %p858_p13 = por %p857_p7, %p856_p3 }
  0x32   : > { %p852_p8 = pneg %p851_p9 }
  0x34   : > { %p859_p4 = pnand %p858_p13, %p852_p8 }
  0x36   : > { %862 = shalt.err (!%p859_p4)
}
  0x37   : > { %756 = dma.hbm_to_vmem [thread:$0]  (!%p1155_p2), %s1417_s1, 64, %s191_s5, [#allocation6]  }
  0x38   : > { %s1418_s2 = sld [smem:[#allocation17_spill]] }
  0x3e   : > { %s863_s12 = scalar_lea.hbm %s1418_s2, 16 }
  0x3f   : > { %p864_p9 = scmp.ne.s32.totalorder %s1418_s2, %s863_s12  ;;  %p870_p8 = scmp.lt.u32.totalorder %s863_s12, %s1418_s2 }
  0x41   : > { %p866_p3 = pnand %p864_p9, %p837_p6 }
  0x43   : > { %p867_p7 = pneg %p866_p3 }
  0x45   : > { %p872_p12 = pnand %p870_p8, %p867_p7 }
  0x47   : > { %875 = shalt.err (!%p872_p12)
}
  0x48   : > { %s876_s5 = scalar_lea.vmem %s1159_s8, 16  ;;  %s883_s25 = scalar_lea.vmem %s1159_s8, 32 }
  0x49   : > { %p877_p13 = scmp.ne.s32.totalorder %s1159_s8, %s876_s5  ;;  %p884_p10 = scmp.lt.s32.totalorder %s1159_s8, %s1159_s8 }
  0x4a   : > { %p885_p11 = scmp.lt.s32.totalorder %s883_s25, %s876_s5 }
  0x4b   : > { %p879_p4 = pnand %p877_p13, %p837_p6 }
  0x4c   : > { %p886_p1 = por %p885_p11, %p884_p10 }
  0x4d   : > { %p880_p5 = pneg %p879_p4 }
  0x4f   : > { %p887_p0 = pnand %p886_p1, %p880_p5 }
  0x51   : > { %890 = shalt.err (!%p887_p0)
}
  0x52   : > { %759 = dma.hbm_to_vmem [thread:$0]  (!%p1155_p2), %s1418_s2, 16, %s1159_s8, [#allocation6]  }
  0x53   : > { %s33_s10 = sadd.s32 1, %s1037_s19  ;;  %s1211_s11 = sand.u32 1, %s1029_s17  }
  0x54   : > { %p34_p6 = scmp.ge.s32.totalorder %s33_s10, 2  ;;  %s1405_s9 = sshll.u32 %s1211_s11, 5 }
  0x55   : > { %s690_s12 = sshll.u32 %s1037_s19, 9  ;;  %s1419_s0 = sld [smem:[#allocation15_spill]] }
  0x56   : > { %s1434_s10 = smov (%p34_p6, %s33_s10), 0  ;;  %s218_s22 = scalar_lea.vmem [#allocation2], %s1405_s9 }
  0x57   : > { %s40_s8 = ssub.s32 %s1037_s19, %s1434_s10  ;;  %s225_s5 = sshll.u32 %s218_s22, 4  ;;  %s1228_s5 = int_to_ptr.vmem [resolvable:$true] %s225_s5 }
  0x58   : > { %p41_p2 = scmp.eq.s32.totalorder %s40_s8, 0  ;;  %s215_s30 = scalar_lea.sflag [#allocation3], %s1211_s11 }
  0x59   : > { %p1420_p3 = scmp.ne.s32.totalorder %s1415_s6, 0 }
  0x5a   : > { %s1233_s25 = scalar_select %p41_p2, %s1029_s17, %s43_s23  }
  0x5b   : > { %s1222_s21 = scalar_lea.hbm %s1419_s0, %s690_s12  ;;  %p893_p7 = pneg %p1420_p3 }
  0x5c   : > { %s891_s7 = scalar_lea.hbm %s1222_s21, 512  ;;  %s896_s9 = scalar_lea.hbm %s1419_s0, 1024 }
  0x5d   : > { %p892_p9 = scmp.ne.s32.totalorder %s1222_s21, %s891_s7  ;;  %p897_p13 = scmp.lt.u32.totalorder %s1222_s21, %s1419_s0 }
  0x5e   : > { %p898_p4 = scmp.lt.u32.totalorder %s896_s9, %s891_s7  ;;  %p900_p10 = scmp.lt.u32.totalorder %s891_s7, %s1222_s21 }
  0x5f   : > { %p894_p8 = pnand %p893_p7, %p892_p9 }
  0x60   : > { %p899_p5 = por %p898_p4, %p897_p13 }
  0x61   : > { %p895_p12 = pneg %p894_p8 }
  0x62   : > { %p901_p11 = por %p900_p10, %p899_p5 }
  0x64   : > { %p902_p1 = pnand %p901_p11, %p895_p12 }
  0x66   : > { %905 = shalt.err (!%p902_p1)
}
  0x67   : > { %s906_s23 = scalar_lea.vmem %s1228_s5, 512  ;;  %s1045_s13 = smov [#allocation2]  }
  0x68   : > { %p907_p0 = scmp.ne.s32.totalorder %s1228_s5, %s906_s23  ;;  %s911_s14 = sshll.u32 %s1045_s13, 4  ;;  %s912_s14 = int_to_ptr.vmem [resolvable:$false] %s911_s14 }
  0x69   : > { %s913_s22 = scalar_lea.vmem %s912_s14, 1024  ;;  %p914_p9 = scmp.lt.s32.totalorder %s1228_s5, %s912_s14 }
  0x6a   : > { %p909_p6 = pnand %p907_p0, %p893_p7  ;;  %p915_p8 = scmp.lt.s32.totalorder %s913_s22, %s906_s23 }
  0x6c   : > { %p910_p2 = pneg %p909_p6  ;;  %p916_p13 = por %p915_p8, %p914_p9 }
  0x6e   : > { %p917_p4 = pnand %p916_p13, %p910_p2 }
  0x70   : > { %920 = shalt.err (!%p917_p4)
}
  0x71   : > { %s1046_s9 = smov 64   ;;  %s1047_s7 = smov 4  }
  0x72   : > { %763 = dma.hbm_to_vmem [thread:$0]  (!%p1420_p3), %s1222_s21, 512, %s1228_s5, %s215_s30, %s1046_s9, %s1046_s9, %s1047_s7  }
  0x73   : > { %s1271_s13 = scalar_lea.hbm %s1397_s3, %s690_s12  ;;  %s1421_s14 = sshll.u32 %s1211_s11, 5 }
  0x74   : > { %s239_s22 = scalar_lea.vmem [#allocation8], %s1421_s14  ;;  %s236_s1 = scalar_lea.sflag [#allocation9], %s1211_s11 }
  0x75   : > { %s247_s0 = sshll.u32 %s239_s22, 4  ;;  %s921_s2 = scalar_lea.hbm %s1271_s13, 512  ;;  %s1275_s0 = int_to_ptr.vmem [resolvable:$true] %s247_s0 }
  0x76   : > { %p922_p12 = scmp.ne.s32.totalorder %s1271_s13, %s921_s2  ;;  %s926_s12 = scalar_lea.hbm %s1397_s3, 1024 }
  0x77   : > { %p927_p11 = scmp.lt.u32.totalorder %s1271_s13, %s1397_s3  ;;  %p928_p1 = scmp.lt.u32.totalorder %s926_s12, %s921_s2 }
  0x78   : > { %p924_p5 = pnand %p922_p12, %p893_p7  ;;  %p930_p6 = scmp.lt.u32.totalorder %s921_s2, %s1271_s13 }
  0x79   : > { %p929_p0 = por %p928_p1, %p927_p11 }
  0x7a   : > { %p925_p10 = pneg %p924_p5 }
  0x7b   : > { %p931_p2 = por %p930_p6, %p929_p0 }
  0x7d   : > { %p932_p9 = pnand %p931_p2, %p925_p10 }
  0x7f   : > { %935 = shalt.err (!%p932_p9)
}
  0x80   : > { %s936_s23 = scalar_lea.vmem %s1275_s0, 512  ;;  %s1048_s14 = smov [#allocation8]  }
  0x81   : > { %p937_p8 = scmp.ne.s32.totalorder %s1275_s0, %s936_s23  ;;  %s941_s22 = sshll.u32 %s1048_s14, 4  ;;  %s942_s22 = int_to_ptr.vmem [resolvable:$false] %s941_s22 }
  0x82   : > { %s943_s21 = scalar_lea.vmem %s942_s22, 1024  ;;  %p944_p12 = scmp.lt.s32.totalorder %s1275_s0, %s942_s22 }
  0x83   : > { %p939_p13 = pnand %p937_p8, %p893_p7  ;;  %p945_p5 = scmp.lt.s32.totalorder %s943_s21, %s936_s23 }
  0x85   : > { %p940_p4 = pneg %p939_p13  ;;  %p946_p11 = por %p945_p5, %p944_p12 }
  0x87   : > { %p947_p1 = pnand %p946_p11, %p940_p4 }
  0x89   : > { %950 = shalt.err (!%p947_p1)
}
  0x8a   : > { %766 = dma.hbm_to_vmem [thread:$0]  (!%p1420_p3), %s1271_s13, 512, %s1275_s0, %s236_s1, %s1046_s9, %s1046_s9, %s1047_s7  }
  0x8b   : > { %p1422_p7 = scmp.ne.s32.totalorder %s1414_s29, 0 }
  0x8c   : > { %s1309_s2 = sand.u32 (!%p1422_p7), 1, %s1025_s16   ;;  %p1423_p10 = scmp.ne.s32.totalorder (!%p1422_p7), %s1411_s26, 0 }
  0x8d   : > { %259 = sbr.rel (%p1422_p7) target bundleno = 397 (0x18d), region = 36  ;;  %s1312_s5 = sshll.u32 (!%p1422_p7), %s1309_s2, 5 }
  0x8e   : > { %s262_s6 = scalar_lea.sflag (!%p1422_p7), [#allocation3], %s1309_s2  ;;  %s265_s12 = scalar_lea.vmem (!%p1422_p7), [#allocation2], %s1312_s5 }
  0x94   : > { %1004 = dma.done.wait (%p1423_p10), %s262_s6, 512  }
  0x95   : > { %1006 = vsyncadd (%p1423_p10), %s262_s6, 4294966784  ;;  %p1424_p3 = scmp.ne.s32.totalorder %s1409_s24, 0 }
  0x97   : > { %1008 = dma.done.wait (%p1424_p3), [#allocation6], 80  }
  0x98   : > { %1010 = vsyncadd (%p1424_p3), [#allocation6], 4294967216  ;;  %s279_s0 = scalar_lea.sflag [#allocation9], %s1309_s2  ;;  %s282_s1 = scalar_lea.vmem [#allocation8], %s1312_s5 }
  0x99   : > { %1012 = dma.done.wait (%p1423_p10), %s279_s0, 512  }
  0x9a   : > { %1014 = vsyncadd (%p1423_p10), %s279_s0, 4294966784  ;;  %vm362_vm0 = vcmask 1043456   ;;  %vm349_vm1 = vcmask 64512   ;;  %v321_v0 = vld [vmem:[#allocation5] sm:$0xf]  ;;  %v832_v3 = vld [vmem:[%s265_s12 + $0x10] sm:$0xff]  }
  0x9b   : > { %737 = vmatprep.subr.msk.bf16.mxu0 %vm362_vm0, %v321_v0  ;;  %738 = vmatprep.subr.msk.bf16.mxu1 %vm362_vm0, %v321_v0  ;;  %v364_v1 = vsel %vm362_vm0, %v321_v0, 0  ;;  %v831_v2 = vld [vmem:[%s265_s12] sm:$0xff]   ;;  %v833_v4 = vld [vmem:[%s265_s12 + $0x8] sm:$0xff]   ;;  %v834_v5 = vld [vmem:[%s265_s12 + $0x18] sm:$0xff]   ;;  %vm495_vm2 = vcmask 257024   ;;  %s700_s24 = sshll.u32 %s1033_s18, 9 }
  0x9c   : > { %726 = vmatpush3.bf16.msra.mxu0 %v364_v1  ;;  %736 = vmatpush3.bf16.msra.mxu1 %v364_v1  ;;  %v717_v6 = vld [vmem:[%s282_s1 + $0x8] sm:$0xff]   ;;  %v719_v7 = vld [vmem:[%s282_s1 + $0x18] sm:$0xff]   ;;  %v702_v8 = vld [vmem:[%s282_s1] sm:$0xff]   ;;  %s311_s26 = scalar_lea.vmem [#allocation10], %s1312_s5  ;;  %s1338_s9 = scalar_lea.hbm %s1398_s4, %s700_s24 }
  0x9d   : > { %727 = vmatprep.mubr.msk.bf16.mxu0 %vm349_vm1, %v831_v2  ;;  %731 = vmatprep.mubr.msk.bf16.mxu1 %vm349_vm1, %v832_v3  ;;  %v668_v9 = vld [vmem:[#allocation7] ss:$0 sm:$0xff]  ;;  %v718_v10 = vld [vmem:[%s282_s1 + $0x10] sm:$0xff]   ;;  %v707_v11 = vunpack.c.l.bf16 %v717_v6  ;;  %v715_v13 = vunpack.c.l.bf16 %v719_v7  ;;  %v703_v14 = vunpack.c.l.bf16 %v702_v8  ;;  %v708_v19 = vunpack.c.h.bf16 %v717_v6  ;;  %s519_s29 = sshll.u32 %s311_s26, 4  ;;  %s505_s7 = scalar_lea.sflag [#allocation4], %s1309_s2  ;;  %s1340_s29 = int_to_ptr.vmem [resolvable:$true] %s519_s29 }
  0x9e   : > { %v711_v18 = vunpack.c.l.bf16 %v718_v10  ;;  %v716_v20 = vunpack.c.h.bf16 %v719_v7  ;;  %v704_v25 = vunpack.c.h.bf16 %v702_v8  ;;  %v712_v26 = vunpack.c.h.bf16 %v718_v10  ;;  %s951_s13 = scalar_lea.vmem %s1340_s29, 512  ;;  %p1425_p6 = scmp.ne.s32.totalorder %s1412_s27, 0 }
  0x9f   : > { %728 = vmatmul.mubr.msk.bf16.vlgmr.msra.gmra.mrb[0].mxu0 %vm349_vm1, %v833_v4  ;;  %732 = vmatmul.mubr.msk.bf16.vlgmr.msra.gmra.mrb[0].mxu1 %vm349_vm1, %v834_v5  ;;  %p952_p0 = scmp.ne.s32.totalorder %s1340_s29, %s951_s13  ;;  %s1049_s30 = smov [#allocation10]  }
  0xa0   : > { %s955_s8 = sshll.u32 %s1049_s30, 4  ;;  %s956_s8 = int_to_ptr.vmem [resolvable:$false] %s955_s8 }
  0xa1   : > { %p953_p2 = pnand %p952_p0, %p1425_p6  ;;  %s957_s23 = scalar_lea.vmem %s956_s8, 1024 }
  0xa2   : > { %p958_p8 = scmp.lt.s32.totalorder %s1340_s29, %s956_s8  ;;  %p959_p13 = scmp.lt.s32.totalorder %s957_s23, %s951_s13 }
  0xa3   : > { %p954_p9 = pneg %p953_p2 }
  0xa4   : > { %p960_p4 = por %p959_p13, %p958_p8 }
  0xa6   : > { %p961_p12 = pnand %p960_p4, %p954_p9 }
 0x172   : > { %v729_v12 = vpop.f32.mrb[0].mxu0  ;;  %v733_v16 = vpop.f32.mrb[0].mxu1 }
 0x173   : > { %v409_v15 = vadd.f32 %v729_v12, %v668_v9  ;;  %v400_v17 = vpop.f32.mrb[1].mxu0  ;;  %v425_v21 = vadd.f32 %v733_v16, %v668_v9  ;;  %v416_v23 = vpop.f32.mrb[1].mxu1 }
 0x174   : > { %v401_v22 = vadd.f32 %v668_v9, %v400_v17  ;;  %v730_v24 = vpop.f32.mrb[2].mxu0  ;;  %v417_v28 = vadd.f32 %v668_v9, %v416_v23  ;;  %v734_v30 = vpop.f32.mrb[2].mxu1 }
 0x175   : > { %v449_v27 = vadd.f32 %v707_v11, %v409_v15  ;;  %v412_v29 = vadd.f32 %v730_v24, %v668_v9  ;;  %v403_v31 = vpop.f32.mrb[3].mxu0  ;;  %v453_v32 = vadd.f32 %v715_v13, %v425_v21  ;;  %v428_v34 = vadd.f32 %v734_v30, %v668_v9  ;;  %v419_v36 = vpop.f32.mrb[3].mxu1 }
 0x176   : > { %v447_v33 = vadd.f32 %v703_v14, %v401_v22  ;;  %v404_v35 = vadd.f32 %v668_v9, %v403_v31  ;;  %v451_v38 = vadd.f32 %v711_v18, %v417_v28  ;;  %v420_v40 = vadd.f32 %v668_v9, %v419_v36 }
 0x177   : > { %v457_v37 = vmax.f32 %v449_v27, 0.0  ;;  %v450_v39 = vadd.f32 %v708_v19, %v412_v29  ;;  %v461_v41 = vmax.f32 %v453_v32, 0.0  ;;  %v454_v43 = vadd.f32 %v716_v20, %v428_v34 }
 0x178   : > { %v455_v42 = vmax.f32 %v447_v33, 0.0  ;;  %v448_v44 = vadd.f32 %v704_v25, %v404_v35  ;;  %v459_v46 = vmax.f32 %v451_v38, 0.0  ;;  %v452_v48 = vadd.f32 %v712_v26, %v420_v40 }
 0x179   : > { %v694_v45 = vpack.c.bf16 %v457_v37, %v457_v37  ;;  %v458_v47 = vmax.f32 %v450_v39, 0.0  ;;  %v698_v49 = vpack.c.bf16 %v461_v41, %v461_v41  ;;  %v462_v51 = vmax.f32 %v454_v43, 0.0 }
 0x17a   : > { %v692_v50 = vpack.c.bf16 %v455_v42, %v455_v42  ;;  %v456_v52 = vmax.f32 %v448_v44, 0.0  ;;  %v696_v53 = vpack.c.bf16 %v459_v46, %v459_v46  ;;  %v460_v55 = vmax.f32 %v452_v48, 0.0 }
 0x17b   : > { %498 = vst.msk [vmem:[%s311_s26 + $0x8] sm:$0xf] %vm495_vm2, %v694_v45  ;;  %v695_v54 = vpack.c.bf16 %v458_v47, %v458_v47  ;;  %502 = vst.msk [vmem:[%s311_s26 + $0x18] sm:$0xf] %vm495_vm2, %v698_v49  ;;  %v699_v56 = vpack.c.bf16 %v462_v51, %v462_v51 }
 0x17c   : > { %496 = vst.msk [vmem:[%s311_s26] sm:$0xf] %vm495_vm2, %v692_v50  ;;  %v693_v57 = vpack.c.bf16 %v456_v52, %v456_v52  ;;  %500 = vst.msk [vmem:[%s311_s26 + $0x10] sm:$0xf] %vm495_vm2, %v696_v53  ;;  %v697_v58 = vpack.c.bf16 %v460_v55, %v460_v55 }
 0x17d   : > { %499 = vst.msk [vmem:[%s311_s26 + $0xc] sm:$0xf] %vm495_vm2, %v695_v54  ;;  %503 = vst.msk [vmem:[%s311_s26 + $0x1c] sm:$0xf] %vm495_vm2, %v699_v56 }
 0x17e   : > { %497 = vst.msk [vmem:[%s311_s26 + $0x4] sm:$0xf] %vm495_vm2, %v693_v57  ;;  %501 = vst.msk [vmem:[%s311_s26 + $0x14] sm:$0xf] %vm495_vm2, %v697_v58 }
 0x17f   : > { %964 = shalt.err (!%p961_p12)
}
 0x180   : > { %s965_s14 = scalar_lea.hbm %s1338_s9, 512  ;;  %s969_s5 = scalar_lea.hbm %s1398_s4, 1024 }
 0x181   : > { %p966_p5 = scmp.ne.s32.totalorder %s1338_s9, %s965_s14  ;;  %p970_p7 = scmp.lt.u32.totalorder %s1338_s9, %s1398_s4 }
 0x182   : > { %p971_p10 = scmp.lt.u32.totalorder %s969_s5, %s965_s14  ;;  %p973_p0 = scmp.lt.u32.totalorder %s965_s14, %s1338_s9 }
 0x183   : > { %p967_p11 = pnand %p966_p5, %p1425_p6 }
 0x184   : > { %p972_p3 = por %p971_p10, %p970_p7 }
 0x185   : > { %p968_p1 = pneg %p967_p11 }
 0x186   : > { %p974_p2 = por %p973_p0, %p972_p3 }
 0x188   : > { %p975_p9 = pnand %p974_p2, %p968_p1 }
 0x18a   : > { %978 = shalt.err (!%p975_p9)
}
 0x18b   : > { %s1050_s0 = smov 64   ;;  %s1051_s1 = smov 4  }
 0x18c   : > { %751 = dma.vmem_to_hbm [thread:$0]  (%p1425_p6), %s1340_s29, 512, %s1338_s9, %s505_s7, %s1050_s0, %s1050_s0, %s1051_s1  }
 0x18d PF: > { %s534_s24 = sand.u32 1, %s1021_s15   ;;  %p1426_p8 = scmp.ne.s32.totalorder %s1413_s28, 0 }
 0x18e   : > { %p1427_p13 = scmp.ge.s32.totalorder %s1041_s20, 2  ;;  %s535_s26 = scalar_lea.sflag [#allocation4], %s534_s24 }
 0x190   : > { %p768_p4 = pnand %p1427_p13, %p1426_p8 }
 0x192   : > { %1016 = dma.done.wait (!%p768_p4), %s535_s26, 512  }
 0x193   : > { %1018 = vsyncadd (!%p768_p4), %s535_s26, 4294966784  ;;  %s24_s20 = sadd.s32 1, %s1041_s20   ;;  %s1428_s15 = smov %s1025_s16 }
 0x194   : > { %p21_p12 = scmp.ge.s32.totalorder %s24_s20, 4   ;;  %s1429_s16 = smov %s1029_s17 }
 0x195   : > { %s1430_s17 = smov %s1233_s25  ;;  %s1431_s18 = smov %s1037_s19 }
 0x196   : > { %s1432_s19 = smov %s1434_s10  ;;  %23 = sbr.rel (!%p21_p12) target bundleno = 13 (0xd), region = 104 }
 0x19d   :  { %540 = vsyncpa [#allocation3], 1 }
 0x19e   :  { %542 = vsyncpa [#allocation3 + $0x1], 1 }
 0x19f   :  { %543 = vsyncpa [#allocation6], 1 }
 0x1a0   :  { %544 = vsyncpa [#allocation9], 1 }
 0x1a1   :  { %546 = vsyncpa [#allocation9 + $0x1], 1 }
 0x1a2   :  { %547 = vsyncpa [#allocation4], 1 }
 0x1a3   :  { %549 = vsyncpa [#allocation4 + $0x1], 1 }

// kernel: repmlp_resnet_forward.27
= control target key start
LH: loop header
LB: loop body
LE: loop exit
PB: predicated region body
PF: predicated region fallthrough
CT: control target
= control target key end

     0   :  { %8 = vsyncpa [#allocation3], 0  ;;  %s2998_s0 = inlined_call_operand.hbm [shape: bf16[2,110,8], index: 0, kind: input, shape index: {}]   ;;  %s2999_s1 = inlined_call_operand.hbm [shape: bf16[72,8], index: 1, kind: input, shape index: {}]   ;;  %s3000_s2 = inlined_call_operand.hbm [shape: f32[1,8], index: 2, kind: input, shape index: {}]   ;;  %s3001_s3 = inlined_call_operand.hbm [shape: bf16[2,80,8], index: 3, kind: output, shape index: {}]  }
   0x1   :  { %10 = vsyncpa [#allocation3 + $0x1], 0 }
   0x2   :  { %11 = vsyncpa [#allocation6], 0 }
   0x3   :  { %12 = vsyncpa [#allocation4], 0 }
   0x4   :  { %14 = vsyncpa [#allocation4 + $0x1], 0  ;;  %s2364_s12 = smov 0   ;;  %s2366_s13 = smov 0  }
   0x5   :  { %s2368_s14 = smov 0   ;;  %s2370_s15 = smov 0  }
   0x6   :  { %s2372_s16 = smov 0   ;;  %s2374_s17 = smov 0  }
   0x7 LB: > { %s1687_s18 = sadd.s32 4294967295, %s2332_s17   ;;  %s1688_s19 = sadd.s32 4294967294, %s2332_s17   ;;  %s2332_s17 = sphi %s2374_s17, %s20_s17   ;;  %s2328_s16 = sphi %s2372_s16, %s3023_s16   ;;  %s2324_s15 = sphi %s2370_s15, %s3022_s15   ;;  %s2320_s14 = sphi %s2368_s14, %s3021_s14   ;;  %s2316_s13 = sphi %s2366_s13, %s3020_s13   ;;  %s2312_s12 = sphi %s2364_s12, %s3019_s12  }
   0x8   : > { %p52_p0 = scmp.ne.s32.totalorder %s2316_s13, %s2312_s12  ;;  %p2398_p1 = scmp.eq.s32.totalorder %s1687_s18, 0 }
   0x9   : > { %p2402_p2 = scmp.eq.s32.totalorder %s1687_s18, 1  ;;  %p136_p3 = scmp.eq.s32.totalorder %s1688_s19, 1 }
   0xa   : > { %s3006_s20 = scalar_select %p2398_p1, 1, 0 }
   0xb   : > { %p2408_p4 = por %p2398_p1, %p52_p0  ;;  %p1689_p5 = scmp.ge.s32.totalorder %s2332_s17, 1 }
   0xc   : > { %p2413_p6 = por %p136_p3, %p52_p0  ;;  %p143_p7 = scmp.lt.s32.totalorder %s2332_s17, 3 }
   0xd   : > { %s3008_s22 = scalar_select %p2408_p4, 1, 0 }
   0xe   : > { %s3009_s23 = scalar_select %p2413_p6, 1, 0 }
   0xf   : > { %p2418_p8 = pnand %p1689_p5, %p143_p7  ;;  %s2334_s25 = smov [#allocation5]  }
  0x10   : > { %s157_s26 = sshll.u32 %s2334_s25, 4  ;;  %s2335_s28 = smov [#allocation7]   ;;  %s2422_s26 = int_to_ptr.vmem [resolvable:$true] %s157_s26 }
  0x11   : > { %p2060_p9 = pneg %p2418_p8  ;;  %s173_s29 = sshll.u32 %s2335_s28, 4  ;;  %s2433_s29 = int_to_ptr.vmem [resolvable:$true] %s173_s29 }
  0x12   : > { %s2160_s5 = scalar_lea.hbm %s2999_s1, 576 }
  0x13   : > { %p2429_p11 = pnand %p2060_p9, %p2398_p1  ;;  %p2161_p12 = scmp.ne.s32.totalorder %s2999_s1, %s2160_s5 }
  0x14   : > { %p2167_p5 = scmp.lt.u32.totalorder %s2160_s5, %s2999_s1 }
  0x15   : > { %p2162_p13 = pneg %p2429_p11 }
  0x17   : > { %p2163_p0 = pnand %p2162_p13, %p2161_p12 }
  0x19   : > { %p2164_p3 = pneg %p2163_p0 }
  0x1b   : > { %p2169_p7 = pnand %p2167_p5, %p2164_p3 }
  0x1d   : > { %2172 = shalt.err (!%p2169_p7)
}
  0x1e   : > { %s2173_s10 = scalar_lea.vmem %s2422_s26, 576  ;;  %p2181_p1 = scmp.lt.s32.totalorder %s2422_s26, %s2422_s26 }
  0x1f   : > { %p2174_p9 = scmp.ne.s32.totalorder %s2422_s26, %s2173_s10  ;;  %p2182_p12 = scmp.lt.s32.totalorder %s2173_s10, %s2173_s10 }
  0x21   : > { %p2176_p10 = pnand %p2174_p9, %p2162_p13  ;;  %p2183_p0 = por %p2182_p12, %p2181_p1 }
  0x23   : > { %p2177_p6 = pneg %p2176_p10 }
  0x25   : > { %p2184_p4 = pnand %p2183_p0, %p2177_p6 }
  0x27   : > { %2187 = shalt.err (!%p2184_p4)
}
  0x28   : > { %s2336_s11 = smov 64   ;;  %s2337_s18 = smov 4  }
  0x29   : > { %2063 = dma.hbm_to_vmem [thread:$0]  (!%p2429_p11), %s2999_s1, 576, %s2422_s26, [#allocation6], %s2336_s11, %s2336_s11, %s2337_s18  }
  0x2a   : > { %s2188_s4 = scalar_lea.hbm %s3000_s2, 16 }
  0x2b   : > { %p2189_p1 = scmp.ne.s32.totalorder %s3000_s2, %s2188_s4  ;;  %p2195_p10 = scmp.lt.u32.totalorder %s2188_s4, %s3000_s2 }
  0x2d   : > { %p2191_p4 = pnand %p2189_p1, %p2162_p13 }
  0x2f   : > { %p2192_p6 = pneg %p2191_p4 }
  0x31   : > { %p2197_p3 = pnand %p2195_p10, %p2192_p6 }
  0x33   : > { %2200 = shalt.err (!%p2197_p3)
}
  0x34   : > { %s2201_s26 = scalar_lea.vmem %s2433_s29, 16  ;;  %s2208_s9 = scalar_lea.vmem %s2433_s29, 32 }
  0x35   : > { %p2202_p5 = scmp.ne.s32.totalorder %s2433_s29, %s2201_s26  ;;  %p2209_p12 = scmp.lt.s32.totalorder %s2433_s29, %s2433_s29 }
  0x36   : > { %p2210_p0 = scmp.lt.s32.totalorder %s2208_s9, %s2201_s26 }
  0x37   : > { %p2204_p7 = pnand %p2202_p5, %p2162_p13 }
  0x38   : > { %p2211_p1 = por %p2210_p0, %p2209_p12 }
  0x39   : > { %p2205_p9 = pneg %p2204_p7 }
  0x3b   : > { %p2212_p4 = pnand %p2211_p1, %p2205_p9 }
  0x3d   : > { %2215 = shalt.err (!%p2212_p4)
}
  0x3e   : > { %2066 = dma.hbm_to_vmem [thread:$0]  (!%p2429_p11), %s3000_s2, 16, %s2433_s29, [#allocation6]  }
  0x3f   : > { %s29_s25 = sadd.s32 1, %s2328_s16  ;;  %s39_s28 = sadd.s32 1, %s2320_s14 }
  0x40   : > { %p30_p13 = scmp.ge.s32.totalorder %s29_s25, 2  ;;  %p46_p6 = scmp.ne.s32.totalorder %s2320_s14, %s2316_s13 }
  0x41   : > { %p47_p10 = scmp.eq.s32.totalorder %s2332_s17, 0  ;;  %p2077_p3 = scmp.lt.s32.totalorder %s2332_s17, 2 }
  0x42   : > { %s3025_s25 = smov (%p30_p13, %s29_s25), 0  ;;  %p2501_p7 = por %p2402_p2, %p46_p6 }
  0x43   : > { %p48_p5 = por %p47_p10, %p46_p6  ;;  %s36_s30 = ssub.s32 %s2328_s16, %s3025_s25 }
  0x44   : > { %s3012_s27 = scalar_select %p2501_p7, 1, 0 }
  0x45   : > { %s184_s4 = sand.u32 1, %s2320_s14   ;;  %p37_p9 = scmp.eq.s32.totalorder %s36_s30, 0 }
  0x46   : > { %s2043_s29 = smul.u32 56, %s184_s4  ;;  %p2508_p11 = pnand %p2077_p3, %p48_p5 }
  0x47   : > { %s2513_s6 = scalar_select %p37_p9, %s2320_s14, %s39_s28  }
  0x48   : > { %s2044_s7 = smul.u32 896, %s2328_s16  ;;  %s188_s8 = scalar_lea.vmem [#allocation2], %s2043_s29 }
  0x49   : > { %s195_s26 = sshll.u32 %s188_s8, 4  ;;  %s2523_s19 = scalar_lea.sflag [#allocation3], %s184_s4  ;;  %s2521_s26 = int_to_ptr.vmem [resolvable:$true] %s195_s26 }
  0x4a   : > { %s2519_s10 = scalar_lea.hbm %s2998_s0, %s2044_s7  ;;  %p2218_p12 = pneg %p2508_p11 }
  0x4b   : > { %s2216_s30 = scalar_lea.hbm %s2519_s10, 896  ;;  %s2221_s7 = scalar_lea.hbm %s2998_s0, 1792 }
  0x4c   : > { %p2217_p2 = scmp.ne.s32.totalorder %s2519_s10, %s2216_s30  ;;  %p2222_p4 = scmp.lt.u32.totalorder %s2519_s10, %s2998_s0 }
  0x4d   : > { %p2223_p13 = scmp.lt.u32.totalorder %s2221_s7, %s2216_s30  ;;  %p2225_p10 = scmp.lt.u32.totalorder %s2216_s30, %s2519_s10 }
  0x4e   : > { %p2219_p0 = pnand %p2218_p12, %p2217_p2 }
  0x4f   : > { %p2224_p6 = por %p2223_p13, %p2222_p4 }
  0x50   : > { %p2220_p1 = pneg %p2219_p0 }
  0x51   : > { %p2226_p3 = por %p2225_p10, %p2224_p6 }
  0x53   : > { %p2227_p5 = pnand %p2226_p3, %p2220_p1 }
  0x55   : > { %2230 = shalt.err (!%p2227_p5)
}
  0x56   : > { %s2231_s4 = scalar_lea.vmem %s2521_s26, 896  ;;  %s2338_s9 = smov [#allocation2]  }
  0x57   : > { %p2232_p9 = scmp.ne.s32.totalorder %s2521_s26, %s2231_s4  ;;  %s2236_s28 = sshll.u32 %s2338_s9, 4  ;;  %s2237_s28 = int_to_ptr.vmem [resolvable:$false] %s2236_s28 }
  0x58   : > { %s2238_s29 = scalar_lea.vmem %s2237_s28, 1792  ;;  %p2239_p7 = scmp.lt.s32.totalorder %s2521_s26, %s2237_s28 }
  0x59   : > { %p2234_p2 = pnand %p2232_p9, %p2218_p12  ;;  %p2240_p4 = scmp.lt.s32.totalorder %s2238_s29, %s2231_s4 }
  0x5b   : > { %p2235_p0 = pneg %p2234_p2  ;;  %p2241_p13 = por %p2240_p4, %p2239_p7 }
  0x5d   : > { %p2242_p6 = pnand %p2241_p13, %p2235_p0 }
  0x5f   : > { %2245 = shalt.err (!%p2242_p6)
}
  0x60   : > { %2070 = dma.hbm_to_vmem [thread:$0]  (!%p2508_p11), %s2519_s10, 896, %s2521_s26, %s2523_s19, %s2336_s11, %s2336_s11, %s2337_s18  }
  0x61   : > { %207 = sbr.rel (%p2418_p8) target bundleno = 532 (0x214), region = 32  ;;  %s2557_s30 = sand.u32 (!%p2418_p8), 1, %s2316_s13  }
  0x62   : > { %s2045_s7 = smul.u32 (!%p2418_p8), 56, %s2557_s30  ;;  %s210_s8 = scalar_lea.sflag (!%p2418_p8), [#allocation3], %s2557_s30 }
  0x63   : > { %p3014_p7 = scmp.ne.s32.totalorder (!%p2418_p8), %s3008_s22, 0 }
  0x64   : > { %s2561_s21 = scalar_lea.vmem (!%p2418_p8), [#allocation2], %s2045_s7 }
  0x68   : > { %2299 = dma.done.wait (%p3014_p7), %s210_s8, 896  }
  0x69   : > { %2301 = vsyncadd (%p3014_p7), %s210_s8, 4294966400  ;;  %p3015_p11 = scmp.ne.s32.totalorder %s3006_s20, 0 }
  0x6b   : > { %2303 = dma.done.wait (%p3015_p11), [#allocation6], 592  }
  0x6c   : > { %2305 = vsyncadd (%p3015_p11), [#allocation6], 4294966704  ;;  %v2339_v0 = vmov 0.0   ;;  %vm2340_vm0 = vmmov 0   ;;  %vm347_vm1 = vcmask 1043456   ;;  %v2586_v6 = vld [vmem:[%s2561_s21 + $0x8] sm:$0xff]  }
  0x6d   : > { %1843 = vmatprep.subr.bf16.mxu0 %v2339_v0  ;;  %2041 = vmatprep.subr.bf16.mxu1 %v2339_v0  ;;  %v257_v1 = vld [vmem:[#allocation5 + $0x4] sm:$0xf]  ;;  %v245_v2 = vld [vmem:[%s2561_s21] sm:$0xf]  ;;  %v2579_v3 = vld [vmem:[%s2561_s21 + $0x4] sm:$0xf] }
  0x6e   : > { %1845 = vmatprep.mubr.msk.bf16.mxu0 %vm2340_vm0, %v2339_v0  ;;  %1857 = vmatprep.mubr.msk.bf16.mxu1 %vm2340_vm0, %v2339_v0  ;;  %v349_v4 = vsel %vm347_vm1, %v257_v1, 0  ;;  %v2583_v5 = vcombine.low %v245_v2, %v2579_v3  ;;  %v295_v9 = vshll.u32 %v2586_v6, 16  ;;  %v2593_v10 = vld [vmem:[%s2561_s21 + $0x18] sm:$0xff]   ;;  %vm286_vm2 = vsmask.f32 7424  ;;  %v2597_v11 = vld [vmem:[%s2561_s21 + $0x20] sm:$0xff]  }
  0x6f   : > { %1844 = vmatpush3.bf16.msra.mxu0 %v349_v4  ;;  %2042 = vmatpush3.bf16.msra.mxu1 %v349_v4  ;;  %v511_v12 = vld [vmem:[#allocation5 + $0x8] sm:$0xf]  ;;  %v311_v15 = vshll.u32 %v2593_v10, 16  ;;  %v315_v16 = vshrl.u32 %v2593_v10, 16  ;;  %v255_v17 = vld [vmem:[#allocation5] sm:$0xf] }
  0x70   : > { %1887 = vmatprep.subr.bf16.mxu0 %v2339_v0  ;;  %v288_v7 = vshrl.u32 %v2583_v5, 16  ;;  %v290_v8 = vshll.u32 %v2583_v5, 16  ;;  %1865 = vmatprep.subr.bf16.mxu1 %v2339_v0  ;;  %v297_v14 = vrot.slane %v295_v9, 1  ;;  %vm331_vm3 = vcmask 64512   ;;  %v2603_v19 = vld [vmem:[%s2561_s21 + $0x10] sm:$0xff]   ;;  %s2046_s20 = smul.u32 40, %s2557_s30 }
  0x71   : > { %v319_v18 = vshll.u32 %v2597_v11, 16  ;;  %v299_v20 = vshrl.u32 %v2586_v6, 16  ;;  %v313_v22 = vrot.slane %v311_v15, 1  ;;  %v2607_v23 = vld [vmem:[%s2561_s21 + $0x28] ss:$0 sps:$4 sm:$0x11]  }
  0x72   : > { %v292_v13 = vrot.slane %v290_v8, 1  ;;  %v543_v25 = vsel %vm347_vm1, %v511_v12, 0  ;;  %v303_v26 = vshll.u32 %v2603_v19, 16  ;;  %v323_v29 = vshrl.u32 %v2597_v11, 16  ;;  %v510_v41 = vld [vmem:[%s2561_s21] sm:$0xe] }
  0x73   : > { %v321_v24 = vrot.slane %v319_v18, 1  ;;  %v317_v28 = vor.u32 %v315_v16, %v313_v22  ;;  %v327_v30 = vshll.u32 %v2607_v23, 16  ;;  %v435_v31 = vsel %vm347_vm1, %v255_v17, 0  ;;  %v639_v43 = vld [vmem:[#allocation5 + $0xc] sm:$0xf]  ;;  %v2682_v60 = vld [vmem:[%s2561_s21 + $0xc] sm:$0xff]  }
  0x74   : > { %v293_v21 = vor.u32 %v292_v13, %v288_v7  ;;  %v301_v33 = vor.u32 %v299_v20, %v297_v14  ;;  %v305_v34 = vrot.slane %v303_v26, 1  ;;  %v307_v38 = vshrl.u32 %v2603_v19, 16  ;;  %v781_v48 = vld [vmem:[#allocation5 + $0x10] sm:$0xf]  ;;  %v628_v56 = vld [vmem:[%s2561_s21 + $0x4] sm:$0xe] }
  0x75   : > { %v322_v32 = vsel %vm286_vm2, %v317_v28, %v321_v24  ;;  %v325_v35 = vor.u32 %v323_v29, %v321_v24  ;;  %v329_v36 = vrot.slane %v327_v30, 1  ;;  %v1713_v44 = vcombine.low %v510_v41, %v2579_v3  ;;  %v2677_v57 = vld [vmem:[%s2561_s21 + $0x8] sm:$0xf]  ;;  %v2698_v13 = vld [vmem:[%s2561_s21 + $0x14] sm:$0xff]   ;;  %s2906_s22 = scalar_lea.vmem [#allocation8], %s2046_s20  ;;  %s2047_s24 = smul.u32 640, %s2324_s15 }
  0x76   : > { %v298_v27 = vsel %vm286_vm2, %v293_v21, %v297_v14  ;;  %1858 = vmatmul.mubr.msk.bf16.vlgmr.msra.gmra.mrb[0].mxu1 %vm331_vm3, %v322_v32  ;;  %v306_v37 = vsel %vm286_vm2, %v301_v33, %v305_v34  ;;  %v309_v40 = vor.u32 %v307_v38, %v305_v34  ;;  %v695_v45 = vsel %vm347_vm1, %v639_v43, 0  ;;  %v2730_v34 = vld [vmem:[%s2561_s21 + $0x24] sm:$0xff]   ;;  %s1581_s11 = sshll.u32 %s2906_s22, 4  ;;  %s1567_s15 = scalar_lea.sflag [#allocation4], %s2557_s30  ;;  %s2947_s11 = int_to_ptr.vmem [resolvable:$true] %s1581_s11 }
  0x77   : > { %1846 = vmatmul.mubr.msk.bf16.vlgmr.msra.gmra.mrb[0].mxu0 %vm331_vm3, %v298_v27  ;;  %1866 = vmatpush3.bf16.msra.mxu1 %v435_v31  ;;  %v330_v39 = vsel %vm286_vm2, %v325_v35, %v329_v36  ;;  %v516_v46 = vrot.slane %v1713_v44, 1  ;;  %v517_v47 = vrot.slane %v2586_v6, 1  ;;  %vm515_vm4 = vcmask 1046528   ;;  %v2149_v44 = vld [vmem:[%s2561_s21 + $0x2c] ss:$0 sps:$4 sm:$0x11]   ;;  %s2943_s26 = scalar_lea.hbm %s3001_s3, %s2047_s24 }
  0x78   : > { %1888 = vmatpush3.bf16.msra.mxu0 %v543_v25  ;;  %1849 = vmatprep.mubr.msk.bf16.mxu0 %vm2340_vm0, %v2339_v0  ;;  %v314_v42 = vsel %vm286_vm2, %v309_v40, %v313_v22  ;;  %v855_v50 = vsel %vm347_vm1, %v781_v48, 0  ;;  %v519_v51 = vrot.slane %v2603_v19, 1  ;;  %v521_v53 = vrot.slane %v2593_v10, 1  ;;  %v2715_v25 = vld [vmem:[%s2561_s21 + $0x1c] sm:$0xff]   ;;  %s2246_s10 = scalar_lea.vmem %s2947_s11, 640  ;;  %p3016_p12 = scmp.ne.s32.totalorder %s3012_s27, 0 }
  0x79   : > { %1931 = vmatprep.subr.bf16.mxu0 %v2339_v0  ;;  %1861 = vmatprep.mubr.msk.bf16.mxu1 %vm2340_vm0, %v2339_v0  ;;  %v518_v49 = vsel %vm515_vm4, %v516_v46, %v517_v47  ;;  %v523_v55 = vrot.slane %v2597_v11, 1  ;;  %v1719_v59 = vcombine.low %v628_v56, %v2677_v57  ;;  %v525_v61 = vrot.slane %v2607_v23, 1  ;;  %v1058_v56 = vld [vmem:[%s2561_s21 + $0x8] sm:$0xc]  ;;  %p2247_p8 = scmp.ne.s32.totalorder %s2947_s11, %s2246_s10  ;;  %s2341_s19 = smov [#allocation8]  }
  0x7a   : > { %1909 = vmatprep.subr.bf16.mxu1 %v2339_v0  ;;  %v520_v52 = vsel %vm515_vm4, %v517_v47, %v519_v51  ;;  %v522_v54 = vsel %vm515_vm4, %v519_v51, %v521_v53  ;;  %v795_v1 = vshrl.u32 %v2682_v60, 16  ;;  %v798_v2 = vshll.u32 %v2682_v60, 16  ;;  %s2250_s4 = sshll.u32 %s2341_s19, 4  ;;  %s2251_s4 = int_to_ptr.vmem [resolvable:$false] %s2250_s4 }
  0x7b   : > { %v524_v58 = vsel %vm515_vm4, %v521_v53, %v523_v55  ;;  %v787_v62 = vshrl.u32 %v1719_v59, 16  ;;  %v790_v63 = vshll.u32 %v1719_v59, 16  ;;  %v668_v3 = vrot.slane %v1719_v59, 1  ;;  %p2248_p1 = pnand %p2247_p8, %p3016_p12  ;;  %s2252_s9 = scalar_lea.vmem %s2251_s4, 1280 }
  0x7c   : > { %v669_v4 = vrot.slane %v2682_v60, 1  ;;  %v797_v9 = vrot.slane %v795_v1, 1  ;;  %v804_v16 = vshrl.u32 %v2698_v13, 16  ;;  %v807_v17 = vshll.u32 %v2698_v13, 16  ;;  %v2773_v1 = vld [vmem:[%s2561_s21 + $0x10] sm:$0xff]   ;;  %p2253_p3 = scmp.lt.s32.totalorder %s2947_s11, %s2251_s4  ;;  %p2254_p5 = scmp.lt.s32.totalorder %s2252_s9, %s2246_s10 }
  0x7d   : > { %v789_v7 = vrot.slane %v787_v62, 1  ;;  %v792_v8 = vrot.slane %v790_v63, 2  ;;  %vm785_vm5 = vsmask.f32 6400  ;;  %v671_v18 = vrot.slane %v2698_v13, 1  ;;  %p2249_p10 = pneg %p2248_p1 }
  0x7e   : > { %1862 = vmatmul.mubr.msk.bf16.gmra.mrb[4].mxu1 %vm331_vm3, %v330_v39  ;;  %v670_v12 = vsel %vm515_vm4, %v668_v3, %v669_v4  ;;  %v806_v21 = vrot.slane %v804_v16, 1  ;;  %v809_v22 = vrot.slane %v807_v17, 2  ;;  %v813_v27 = vshrl.u32 %v2715_v25, 16  ;;  %v1211_v62 = vld [vmem:[#allocation5 + $0x1c] sm:$0xf]  ;;  %p2255_p9 = por %p2254_p5, %p2253_p3 }
  0x7f   : > { %1850 = vmatmul.mubr.msk.bf16.gmra.mrb[4].mxu0 %vm331_vm3, %v306_v37  ;;  %1867 = vmatprep.mubr.msk.bf16.mxu1 %vm2340_vm0, %v2339_v0  ;;  %v793_v14 = vor.u32 %v792_v8, %v789_v7  ;;  %v672_v24 = vsel %vm515_vm4, %v669_v4, %v671_v18  ;;  %v816_v28 = vshll.u32 %v2715_v25, 16  ;;  %v673_v29 = vrot.slane %v2715_v25, 1  ;;  %v2787_v8 = vld [vmem:[%s2561_s21 + $0x18] sm:$0xff]  }
  0x80   : > { %1853 = vmatprep.mubr.msk.bf16.mxu0 %vm2340_vm0, %v2339_v0  ;;  %v810_v26 = vor.u32 %v809_v22, %v806_v21  ;;  %v815_v31 = vrot.slane %v813_v27, 1  ;;  %v822_v36 = vshrl.u32 %v2730_v34, 16  ;;  %v825_v37 = vshll.u32 %v2730_v34, 16  ;;  %p2256_p2 = pnand %p2255_p9, %p2249_p10 }
  0x81   : > { %v818_v32 = vrot.slane %v816_v28, 2  ;;  %v674_v33 = vsel %vm515_vm4, %v671_v18, %v673_v29  ;;  %v675_v38 = vrot.slane %v2730_v34, 1  ;;  %v677_v48 = vrot.slane %v2149_v44, 1  ;;  %v2157_v28 = vld [vmem:[%s2561_s21 + $0x30] ss:$0 sps:$4 sm:$0x33]  }
  0x82   : > { %v824_v40 = vrot.slane %v822_v36, 1  ;;  %v827_v41 = vrot.slane %v825_v37, 2  ;;  %vm945_vm6 = vcmask 1045504   ;;  %v1285_v3 = vsel %vm347_vm1, %v1211_v62, 0 }
  0x83   : > { %v819_v35 = vor.u32 %v818_v32, %v815_v31  ;;  %v676_v43 = vsel %vm515_vm4, %v673_v29, %v675_v38  ;;  %v678_v53 = vsel %vm515_vm4, %v675_v38, %v677_v48  ;;  %v953_v17 = vrot.slane %v2730_v34, 2 }
  0x84   : > { %v1107_v34 = vrot.slane %v2157_v28, 2  ;;  %v1234_v38 = vshrl.u32 %v2787_v8, 16  ;;  %vm1215_vm7 = vsmask.f32 5376  ;;  %vm1375_vm8 = vcmask 1044480  }
  0x85   : > { %v820_v39 = vsel %vm785_vm5, %v810_v26, %v819_v35  ;;  %vm1555_vm9 = vcmask 60416  }
  0x86   : > { %1868 = vmatmul.mubr.msk.bf16.vlgmr.msra.gmra.mrb[8].mxu1 %vm331_vm3, %v2583_v5  ;;  %v526_v5 = vsel %vm515_vm4, %v523_v55, %v525_v61  ;;  %v947_v61 = vrot.slane %v2682_v60, 2  ;;  %v1099_v60 = vrot.slane %v2773_v1, 2 }
  0x87   : > { %1854 = vmatmul.mubr.msk.bf16.gmra.mrb[8].mxu0 %vm331_vm3, %v314_v42  ;;  %1910 = vmatpush3.bf16.msra.mxu1 %v695_v45  ;;  %v2743_v42 = vld [vmem:[%s2561_s21 + $0x2c] ss:$0 sps:$4 sm:$0x33]   ;;  %v828_v45 = vor.u32 %v827_v41, %v824_v40 }
  0x88   : > { %1889 = vmatprep.mubr.msk.bf16.mxu0 %vm2340_vm0, %v2339_v0  ;;  %1871 = vmatprep.mubr.msk.bf16.mxu1 %vm2340_vm0, %v2339_v0  ;;  %v831_v46 = vshrl.u32 %v2743_v42, 16  ;;  %v834_v47 = vshll.u32 %v2743_v42, 16  ;;  %v955_v22 = vrot.slane %v2743_v42, 2 }
  0x89   : > { %1953 = vmatprep.subr.bf16.mxu1 %v2339_v0 }
  0x8a   : > { %v833_v51 = vrot.slane %v831_v46, 1  ;;  %v956_v29 = vsel %vm945_vm6, %v953_v17, %v955_v22  ;;  %v1377_v46 = vrot.slane %v2773_v1, 3 }
  0x8e   : > { %1872 = vmatmul.mubr.msk.bf16.gmra.mrb[12].mxu1 %vm331_vm3, %v2586_v6  ;;  %v941_v6 = vld [vmem:[#allocation5 + $0x14] sm:$0xf] }
  0x8f   : > { %1890 = vmatmul.mubr.msk.bf16.vlgmr.msra.gmra.mrb[12].mxu0 %vm331_vm3, %v518_v49  ;;  %1875 = vmatprep.mubr.msk.bf16.mxu1 %vm2340_vm0, %v2339_v0  ;;  %v940_v49 = vld [vmem:[%s2561_s21 + $0x4] sm:$0xc] }
  0x90   : > { %1932 = vmatpush3.bf16.msra.mxu0 %v855_v50  ;;  %1893 = vmatprep.mubr.msk.bf16.mxu0 %vm2340_vm0, %v2339_v0  ;;  %v829_v50 = vsel %vm785_vm5, %v819_v35, %v828_v45  ;;  %v1370_v35 = vld [vmem:[%s2561_s21 + $0x8] sm:$0x8] }
  0x91   : > { %1975 = vmatprep.subr.bf16.mxu0 %v2339_v0 }
  0x96   : > { %1876 = vmatmul.mubr.msk.bf16.gmra.mrb[16].mxu1 %vm331_vm3, %v2603_v19  ;;  %v1069_v19 = vld [vmem:[#allocation5 + $0x18] sm:$0xf] }
  0x97   : > { %1894 = vmatmul.mubr.msk.bf16.gmra.mrb[16].mxu0 %vm331_vm3, %v520_v52  ;;  %1879 = vmatprep.mubr.msk.bf16.mxu1 %vm2340_vm0, %v2339_v0  ;;  %v1125_v23 = vsel %vm347_vm1, %v1069_v19, 0  ;;  %v836_v52 = vrot.slane %v834_v47, 2  ;;  %v2814_v19 = vld [vmem:[%s2561_s21 + $0x28] sm:$0xff]  }
  0x98   : > { %1897 = vmatprep.mubr.msk.bf16.mxu0 %vm2340_vm0, %v2339_v0  ;;  %v1105_v21 = vrot.slane %v2814_v19, 2 }
  0x99   : > { %v837_v55 = vor.u32 %v836_v52, %v833_v51 }
  0x9a   : > { %v1108_v40 = vsel %vm945_vm6, %v1105_v21, %v1107_v34 }
  0x9e   : > { %1880 = vmatmul.mubr.msk.bf16.gmra.mrb[20].mxu1 %vm331_vm3, %v2593_v10  ;;  %v800_v10 = vrot.slane %v798_v2, 2 }
  0x9f   : > { %1898 = vmatmul.mubr.msk.bf16.gmra.mrb[20].mxu0 %vm331_vm3, %v522_v54  ;;  %1883 = vmatprep.mubr.msk.bf16.mxu1 %vm2340_vm0, %v2339_v0  ;;  %v1736_v54 = vcombine.low %v940_v49, %v2677_v57  ;;  %v838_v57 = vsel %vm785_vm5, %v828_v45, %v837_v55 }
  0xa0   : > { %1901 = vmatprep.mubr.msk.bf16.mxu0 %vm2340_vm0, %v2339_v0  ;;  %v801_v15 = vor.u32 %v800_v10, %v797_v9 }
  0xa1   : > { %v946_v59 = vrot.slane %v1736_v54, 2  ;;  %v1379_v54 = vrot.slane %v2787_v8, 3 }
  0xa2   : > { %v802_v20 = vsel %vm785_vm5, %v793_v14, %v801_v15  ;;  %v811_v30 = vsel %vm785_vm5, %v801_v15, %v810_v26  ;;  %v2801_v14 = vld [vmem:[%s2561_s21 + $0x20] sm:$0xff]   ;;  %v1228_v26 = vshll.u32 %v2773_v1, 16 }
  0xa3   : > { %v948_v2 = vsel %vm945_vm6, %v946_v59, %v947_v61  ;;  %v1103_v16 = vrot.slane %v2801_v14, 2  ;;  %v1243_v48 = vshrl.u32 %v2801_v14, 16  ;;  %v1246_v49 = vshll.u32 %v2801_v14, 16 }
  0xa4   : > { %v1380_v59 = vsel %vm1375_vm8, %v1377_v46, %v1379_v54 }
  0xa5   : > { %v1106_v27 = vsel %vm945_vm6, %v1103_v16, %v1105_v21  ;;  %v1245_v52 = vrot.slane %v1243_v48, 2 }
  0xa6   : > { %1884 = vmatmul.mubr.msk.bf16.gmra.mrb[24].mxu1 %vm331_vm3, %v2597_v11  ;;  %v973_v11 = vsel %vm347_vm1, %v941_v6, 0  ;;  %v1371_v6 = vld [vmem:[#allocation5 + $0x20] sm:$0xf] }
  0xa7   : > { %1902 = vmatmul.mubr.msk.bf16.gmra.mrb[24].mxu0 %vm331_vm3, %v524_v58  ;;  %1911 = vmatprep.mubr.msk.bf16.mxu1 %vm2340_vm0, %v2339_v0  ;;  %v2765_v58 = vld [vmem:[%s2561_s21 + $0xc] sm:$0xf]  ;;  %v1403_v9 = vsel %vm347_vm1, %v1371_v6, 0 }
  0xa8   : > { %1905 = vmatprep.mubr.msk.bf16.mxu0 %vm2340_vm0, %v2339_v0  ;;  %v1742_v63 = vcombine.low %v1058_v56, %v2765_v58  ;;  %v1759_v41 = vcombine.low %v1370_v35, %v2765_v58  ;;  %v1252_v56 = vshrl.u32 %v2814_v19, 16  ;;  %v1255_v58 = vshll.u32 %v2814_v19, 16 }
  0xaa   : > { %v1098_v4 = vrot.slane %v1742_v63, 2  ;;  %v1376_v45 = vrot.slane %v1759_v41, 3  ;;  %v1257_v62 = vrot.slane %v1255_v58, 3 }
  0xac   : > { %v1100_v7 = vsel %vm945_vm6, %v1098_v4, %v1099_v60 }
  0xae   : > { %1912 = vmatmul.mubr.msk.bf16.vlgmr.msra.gmra.mrb[28].mxu1 %vm331_vm3, %v670_v12  ;;  %v1101_v12 = vrot.slane %v2787_v8, 2 }
  0xaf   : > { %1906 = vmatmul.mubr.msk.bf16.gmra.mrb[28].mxu0 %vm331_vm3, %v526_v5  ;;  %1954 = vmatpush3.bf16.msra.mxu1 %v973_v11  ;;  %v949_v5 = vrot.slane %v2698_v13, 2  ;;  %v951_v13 = vrot.slane %v2715_v25, 2  ;;  %v1225_v25 = vshrl.u32 %v2773_v1, 16  ;;  %v1381_v1 = vrot.slane %v2801_v14, 3 }
  0xb0   : > { %1933 = vmatprep.mubr.msk.bf16.mxu0 %vm2340_vm0, %v2339_v0  ;;  %1915 = vmatprep.mubr.msk.bf16.mxu1 %vm2340_vm0, %v2339_v0  ;;  %v1102_v11 = vsel %vm945_vm6, %v1099_v60, %v1101_v12  ;;  %v1104_v18 = vsel %vm945_vm6, %v1101_v12, %v1103_v16 }
  0xb1   : > { %1997 = vmatprep.subr.bf16.mxu1 %v2339_v0  ;;  %v950_v10 = vsel %vm945_vm6, %v947_v61, %v949_v5  ;;  %v952_v15 = vsel %vm945_vm6, %v949_v5, %v951_v13  ;;  %v1227_v32 = vrot.slane %v1225_v25, 2  ;;  %v1382_v60 = vsel %vm1375_vm8, %v1379_v54, %v1381_v1 }
  0xb6   : > { %1916 = vmatmul.mubr.msk.bf16.gmra.mrb[32].mxu1 %vm331_vm3, %v672_v24  ;;  %v1220_v24 = vshll.u32 %v1742_v63, 16 }
  0xb7   : > { %1934 = vmatmul.mubr.msk.bf16.vlgmr.msra.gmra.mrb[32].mxu0 %vm331_vm3, %v802_v20  ;;  %1919 = vmatprep.mubr.msk.bf16.mxu1 %vm2340_vm0, %v2339_v0  ;;  %v954_v20 = vsel %vm945_vm6, %v951_v13, %v953_v17 }
  0xb8   : > { %1976 = vmatpush3.bf16.msra.mxu0 %v1125_v23  ;;  %1937 = vmatprep.mubr.msk.bf16.mxu0 %vm2340_vm0, %v2339_v0  ;;  %v1217_v23 = vshrl.u32 %v1742_v63, 16  ;;  %v1222_v31 = vrot.slane %v1220_v24, 3  ;;  %v2159_v63 = vld [vmem:[%s2561_s21 + $0x30] ss:$0 sps:$4 sm:$0x77]  }
  0xb9   : > { %2019 = vmatprep.subr.bf16.mxu0 %v2339_v0  ;;  %v1264_v4 = vshll.u32 %v2159_v63, 16  ;;  %v1385_v13 = vrot.slane %v2159_v63, 3 }
  0xbe   : > { %1920 = vmatmul.mubr.msk.bf16.gmra.mrb[36].mxu1 %vm331_vm3, %v674_v33  ;;  %v1230_v33 = vrot.slane %v1228_v26, 3 }
  0xbf   : > { %1938 = vmatmul.mubr.msk.bf16.gmra.mrb[36].mxu0 %vm331_vm3, %v811_v30  ;;  %1923 = vmatprep.mubr.msk.bf16.mxu1 %vm2340_vm0, %v2339_v0  ;;  %v1219_v30 = vrot.slane %v1217_v23, 2 }
  0xc0   : > { %1941 = vmatprep.mubr.msk.bf16.mxu0 %vm2340_vm0, %v2339_v0  ;;  %v1231_v37 = vor.u32 %v1230_v33, %v1227_v32 }
  0xc1   : > { %v1223_v36 = vor.u32 %v1222_v31, %v1219_v30 }
  0xc3   : > { %v1232_v42 = vsel %vm1215_vm7, %v1223_v36, %v1231_v37 }
  0xc6   : > { %1924 = vmatmul.mubr.msk.bf16.gmra.mrb[40].mxu1 %vm331_vm3, %v676_v43  ;;  %v1236_v43 = vrot.slane %v1234_v38, 2 }
  0xc7   : > { %1942 = vmatmul.mubr.msk.bf16.gmra.mrb[40].mxu0 %vm331_vm3, %v820_v39  ;;  %1927 = vmatprep.mubr.msk.bf16.mxu1 %vm2340_vm0, %v2339_v0  ;;  %v1237_v39 = vshll.u32 %v2787_v8, 16  ;;  %v1383_v8 = vrot.slane %v2814_v19, 3 }
  0xc8   : > { %1945 = vmatprep.mubr.msk.bf16.mxu0 %vm2340_vm0, %v2339_v0 }
  0xc9   : > { %v1239_v44 = vrot.slane %v1237_v39, 3 }
  0xcb   : > { %v1240_v47 = vor.u32 %v1239_v44, %v1236_v43 }
  0xcd   : > { %v1241_v51 = vsel %vm1215_vm7, %v1231_v37, %v1240_v47 }
  0xce   : > { %1928 = vmatmul.mubr.msk.bf16.gmra.mrb[44].mxu1 %vm331_vm3, %v678_v53  ;;  %v1248_v53 = vrot.slane %v1246_v49, 3 }
  0xcf   : > { %1946 = vmatmul.mubr.msk.bf16.gmra.mrb[44].mxu0 %vm331_vm3, %v829_v50  ;;  %1955 = vmatprep.mubr.msk.bf16.mxu1 %vm2340_vm0, %v2339_v0  ;;  %v1378_v50 = vsel %vm1375_vm8, %v1376_v45, %v1377_v46 }
  0xd0   : > { %1949 = vmatprep.mubr.msk.bf16.mxu0 %vm2340_vm0, %v2339_v0  ;;  %v1249_v55 = vor.u32 %v1248_v53, %v1245_v52 }
  0xd2   : > { %v1250_v61 = vsel %vm1215_vm7, %v1240_v47, %v1249_v55 }
  0xd6   : > { %1956 = vmatmul.mubr.msk.bf16.vlgmr.msra.gmra.mrb[48].mxu1 %vm331_vm3, %v948_v2 }
  0xd7   : > { %1950 = vmatmul.mubr.msk.bf16.gmra.mrb[48].mxu0 %vm331_vm3, %v838_v57  ;;  %1998 = vmatpush3.bf16.msra.mxu1 %v1285_v3  ;;  %v1254_v57 = vrot.slane %v1252_v56, 2  ;;  %v1261_v3 = vshrl.u32 %v2159_v63, 16 }
  0xd8   : > { %1977 = vmatprep.mubr.msk.bf16.mxu0 %vm2340_vm0, %v2339_v0  ;;  %1959 = vmatprep.mubr.msk.bf16.mxu1 %vm2340_vm0, %v2339_v0 }
  0xd9   : > { %v1258_v2 = vor.u32 %v1257_v62, %v1254_v57  ;;  %v1263_v6 = vrot.slane %v1261_v3, 2 }
  0xdb   : > { %v1259_v5 = vsel %vm1215_vm7, %v1249_v55, %v1258_v2 }
  0xde   : > { %1960 = vmatmul.mubr.msk.bf16.gmra.mrb[52].mxu1 %vm331_vm3, %v950_v10  ;;  %v1384_v10 = vsel %vm1375_vm8, %v1381_v1, %v1383_v8 }
  0xdf   : > { %1978 = vmatmul.mubr.msk.bf16.vlgmr.msra.gmra.mrb[52].mxu0 %vm331_vm3, %v1100_v7  ;;  %1963 = vmatprep.mubr.msk.bf16.mxu1 %vm2340_vm0, %v2339_v0  ;;  %v1266_v7 = vrot.slane %v1264_v4, 3 }
  0xe0   : > { %2020 = vmatpush3.bf16.msra.mxu0 %v1403_v9  ;;  %1981 = vmatprep.mubr.msk.bf16.mxu0 %vm2340_vm0, %v2339_v0 }
  0xe1   : > { %v1267_v9 = vor.u32 %v1266_v7, %v1263_v6 }
  0xe3   : > { %v1268_v12 = vsel %vm1215_vm7, %v1258_v2, %v1267_v9 }
  0xe6   : > { %1964 = vmatmul.mubr.msk.bf16.gmra.mrb[56].mxu1 %vm331_vm3, %v952_v15 }
  0xe7   : > { %1982 = vmatmul.mubr.msk.bf16.gmra.mrb[56].mxu0 %vm331_vm3, %v1102_v11  ;;  %1967 = vmatprep.mubr.msk.bf16.mxu1 %vm2340_vm0, %v2339_v0  ;;  %v1386_v11 = vsel %vm1375_vm8, %v1383_v8, %v1385_v13 }
  0xe8   : > { %1985 = vmatprep.mubr.msk.bf16.mxu0 %vm2340_vm0, %v2339_v0 }
  0xee   : > { %1968 = vmatmul.mubr.msk.bf16.gmra.mrb[60].mxu1 %vm331_vm3, %v954_v20 }
  0xef   : > { %1986 = vmatmul.mubr.msk.bf16.gmra.mrb[60].mxu0 %vm331_vm3, %v1104_v18  ;;  %1971 = vmatprep.mubr.msk.bf16.mxu1 %vm2340_vm0, %v2339_v0 }
  0xf0   : > { %1989 = vmatprep.mubr.msk.bf16.mxu0 %vm2340_vm0, %v2339_v0 }
  0xf6   : > { %1972 = vmatmul.mubr.msk.bf16.gmra.mrb[64].mxu1 %vm331_vm3, %v956_v29 }
  0xf7   : > { %1990 = vmatmul.mubr.msk.bf16.gmra.mrb[64].mxu0 %vm331_vm3, %v1106_v27  ;;  %1999 = vmatprep.mubr.msk.bf16.mxu1 %vm2340_vm0, %v2339_v0 }
  0xf8   : > { %1993 = vmatprep.mubr.msk.bf16.mxu0 %vm2340_vm0, %v2339_v0 }
  0xfe   : > { %2000 = vmatmul.mubr.msk.bf16.vlgmr.msra.gmra.mrb[68].mxu1 %vm331_vm3, %v1232_v42 }
  0xff   : > { %1994 = vmatmul.mubr.msk.bf16.gmra.mrb[68].mxu0 %vm331_vm3, %v1108_v40  ;;  %2003 = vmatprep.mubr.msk.bf16.mxu1 %vm2340_vm0, %v2339_v0 }
 0x100   : > { %2021 = vmatprep.mubr.msk.bf16.mxu0 %vm2340_vm0, %v2339_v0 }
 0x106   : > { %2004 = vmatmul.mubr.msk.bf16.gmra.mrb[72].mxu1 %vm331_vm3, %v1241_v51 }
 0x107   : > { %2022 = vmatmul.mubr.msk.bf16.vlgmr.msra.gmra.mrb[72].mxu0 %vm331_vm3, %v1378_v50  ;;  %2007 = vmatprep.mubr.msk.bf16.mxu1 %vm2340_vm0, %v2339_v0 }
 0x108   : > { %2025 = vmatprep.mubr.msk.bf16.mxu0 %vm2340_vm0, %v2339_v0 }
 0x10e   : > { %2008 = vmatmul.mubr.msk.bf16.gmra.mrb[76].mxu1 %vm331_vm3, %v1250_v61 }
 0x10f   : > { %2026 = vmatmul.mubr.msk.bf16.gmra.mrb[76].mxu0 %vm331_vm3, %v1380_v59  ;;  %2011 = vmatprep.mubr.msk.bf16.mxu1 %vm2340_vm0, %v2339_v0 }
 0x110   : > { %2029 = vmatprep.mubr.msk.bf16.mxu0 %vm2340_vm0, %v2339_v0 }
 0x116   : > { %2012 = vmatmul.mubr.msk.bf16.gmra.mrb[80].mxu1 %vm331_vm3, %v1259_v5 }
 0x117   : > { %2030 = vmatmul.mubr.msk.bf16.gmra.mrb[80].mxu0 %vm331_vm3, %v1382_v60  ;;  %2015 = vmatprep.mubr.msk.bf16.mxu1 %vm2340_vm0, %v2339_v0 }
 0x118   : > { %2033 = vmatprep.mubr.msk.bf16.mxu0 %vm2340_vm0, %v2339_v0 }
 0x11e   : > { %2016 = vmatmul.mubr.msk.bf16.gmra.mrb[84].mxu1 %vm331_vm3, %v1268_v12 }
 0x11f   : > { %2034 = vmatmul.mubr.msk.bf16.gmra.mrb[84].mxu0 %vm331_vm3, %v1384_v10 }
 0x120   : > { %2037 = vmatprep.mubr.msk.bf16.mxu0 %vm2340_vm0, %v2339_v0 }
 0x127   : > { %2038 = vmatmul.mubr.msk.bf16.gmra.mrb[88].mxu0 %vm331_vm3, %v1386_v11 }
 0x149   : > { %v409_v17 = vpop.f32.mrb[0].mxu1 }
 0x14a   : > { %v385_v14 = vpop.f32.mrb[0].mxu0  ;;  %v1859_v19 = vpop.f32.mrb[1].mxu1 }
 0x14b   : > { %v1847_v15 = vpop.f32.mrb[1].mxu0  ;;  %v412_v20 = vpop.f32.mrb[2].mxu1 }
 0x14c   : > { %v388_v16 = vpop.f32.mrb[2].mxu0  ;;  %v1860_v21 = vpop.f32.mrb[3].mxu1 }
 0x14d   : > { %v1848_v18 = vpop.f32.mrb[3].mxu0 }
 0x151   : > { %v417_v25 = vpop.f32.mrb[4].mxu1 }
 0x152   : > { %v393_v22 = vpop.f32.mrb[4].mxu0  ;;  %v1863_v26 = vpop.f32.mrb[5].mxu1 }
 0x153   : > { %v1851_v23 = vpop.f32.mrb[5].mxu0  ;;  %v420_v27 = vpop.f32.mrb[6].mxu1 }
 0x154   : > { %v396_v24 = vpop.f32.mrb[6].mxu0  ;;  %v1864_v28 = vpop.f32.mrb[7].mxu1 }
 0x155   : > { %v1852_v0 = vpop.f32.mrb[7].mxu0 }
 0x159   : > { %v471_v31 = vpop.f32.mrb[8].mxu1 }
 0x15a   : > { %v401_v29 = vpop.f32.mrb[8].mxu0  ;;  %v472_v33 = vadd.f32 %v471_v31, %v385_v14  ;;  %v1869_v34 = vpop.f32.mrb[9].mxu1 }
 0x15b   : > { %v1855_v30 = vpop.f32.mrb[9].mxu0  ;;  %v474_v36 = vpop.f32.mrb[10].mxu1 }
 0x15c   : > { %v404_v32 = vpop.f32.mrb[10].mxu0  ;;  %v475_v37 = vadd.f32 %v474_v36, %v388_v16  ;;  %v1870_v38 = vpop.f32.mrb[11].mxu1 }
 0x15d   : > { %v1856_v35 = vpop.f32.mrb[11].mxu0 }
 0x161   : > { %v479_v42 = vpop.f32.mrb[12].mxu1 }
 0x162   : > { %v579_v39 = vpop.f32.mrb[12].mxu0  ;;  %v480_v44 = vadd.f32 %v479_v42, %v393_v22  ;;  %v1873_v45 = vpop.f32.mrb[13].mxu1 }
 0x163   : > { %v618_v40 = vadd.f32 %v579_v39, %v472_v33  ;;  %v1891_v41 = vpop.f32.mrb[13].mxu0  ;;  %v482_v48 = vpop.f32.mrb[14].mxu1 }
 0x164   : > { %v582_v43 = vpop.f32.mrb[14].mxu0  ;;  %v483_v49 = vadd.f32 %v482_v48, %v396_v24  ;;  %v1874_v50 = vpop.f32.mrb[15].mxu1 }
 0x165   : > { %v619_v46 = vadd.f32 %v582_v43, %v475_v37  ;;  %v1892_v47 = vpop.f32.mrb[15].mxu0 }
 0x169   : > { %v487_v54 = vpop.f32.mrb[16].mxu1 }
 0x16a   : > { %v587_v51 = vpop.f32.mrb[16].mxu0  ;;  %v488_v56 = vadd.f32 %v487_v54, %v401_v29  ;;  %v1877_v58 = vpop.f32.mrb[17].mxu1 }
 0x16b   : > { %v620_v52 = vadd.f32 %v587_v51, %v480_v44  ;;  %v1895_v53 = vpop.f32.mrb[17].mxu0  ;;  %v490_v57 = vpop.f32.mrb[18].mxu1 }
 0x16c   : > { %v590_v55 = vpop.f32.mrb[18].mxu0  ;;  %v491_v62 = vadd.f32 %v490_v57, %v404_v32  ;;  %v1878_v63 = vpop.f32.mrb[19].mxu1 }
 0x16d   : > { %v621_v59 = vadd.f32 %v590_v55, %v483_v49  ;;  %v1896_v61 = vpop.f32.mrb[19].mxu0 }
 0x171   : > { %v495_v4 = vpop.f32.mrb[20].mxu1 }
 0x172   : > { %v595_v1 = vpop.f32.mrb[20].mxu0  ;;  %v496_v5 = vadd.f32 %v495_v4, %v409_v17  ;;  %v1881_v6 = vpop.f32.mrb[21].mxu1 }
 0x173   : > { %v622_v2 = vadd.f32 %v595_v1, %v488_v56  ;;  %v1899_v3 = vpop.f32.mrb[21].mxu0  ;;  %v498_v9 = vpop.f32.mrb[22].mxu1 }
 0x174   : > { %v598_v60 = vpop.f32.mrb[22].mxu0  ;;  %v499_v10 = vadd.f32 %v498_v9, %v412_v20  ;;  %v1882_v12 = vpop.f32.mrb[23].mxu1 }
 0x175   : > { %v623_v7 = vadd.f32 %v598_v60, %v491_v62  ;;  %v1900_v8 = vpop.f32.mrb[23].mxu0 }
 0x179   : > { %v503_v15 = vpop.f32.mrb[24].mxu1 }
 0x17a   : > { %v603_v13 = vpop.f32.mrb[24].mxu0  ;;  %v504_v18 = vadd.f32 %v503_v15, %v417_v25  ;;  %v1885_v19 = vpop.f32.mrb[25].mxu1 }
 0x17b   : > { %v624_v11 = vadd.f32 %v603_v13, %v496_v5  ;;  %v1903_v14 = vpop.f32.mrb[25].mxu0  ;;  %v506_v23 = vpop.f32.mrb[26].mxu1 }
 0x17c   : > { %v606_v16 = vpop.f32.mrb[26].mxu0  ;;  %v507_v24 = vadd.f32 %v506_v23, %v420_v27  ;;  %v1886_v0 = vpop.f32.mrb[27].mxu1 }
 0x17d   : > { %v625_v21 = vadd.f32 %v606_v16, %v499_v10  ;;  %v1904_v22 = vpop.f32.mrb[27].mxu0 }
 0x181   : > { %v731_v29 = vpop.f32.mrb[28].mxu1 }
 0x182   : > { %v611_v26 = vpop.f32.mrb[28].mxu0  ;;  %v770_v31 = vadd.f32 %v731_v29, %v618_v40  ;;  %v1913_v20 = vpop.f32.mrb[29].mxu1 }
 0x183   : > { %v626_v17 = vadd.f32 %v611_v26, %v504_v18  ;;  %v1907_v28 = vpop.f32.mrb[29].mxu0  ;;  %v734_v34 = vpop.f32.mrb[30].mxu1 }
 0x184   : > { %v614_v30 = vpop.f32.mrb[30].mxu0  ;;  %v771_v35 = vadd.f32 %v734_v34, %v619_v46  ;;  %v1914_v36 = vpop.f32.mrb[31].mxu1 }
 0x185   : > { %v627_v32 = vadd.f32 %v614_v30, %v507_v24  ;;  %v1908_v33 = vpop.f32.mrb[31].mxu0 }
 0x189   : > { %v739_v39 = vpop.f32.mrb[32].mxu1 }
 0x18a   : > { %v891_v37 = vpop.f32.mrb[32].mxu0  ;;  %v772_v42 = vadd.f32 %v739_v39, %v620_v52  ;;  %v1917_v27 = vpop.f32.mrb[33].mxu1 }
 0x18b   : > { %v930_v25 = vadd.f32 %v891_v37, %v770_v31  ;;  %v1935_v38 = vpop.f32.mrb[33].mxu0  ;;  %v742_v45 = vpop.f32.mrb[34].mxu1 }
 0x18c   : > { %v894_v41 = vpop.f32.mrb[34].mxu0  ;;  %v773_v47 = vadd.f32 %v742_v45, %v621_v59  ;;  %v1918_v48 = vpop.f32.mrb[35].mxu1 }
 0x18d   : > { %v931_v43 = vadd.f32 %v894_v41, %v771_v35  ;;  %v1936_v44 = vpop.f32.mrb[35].mxu0 }
 0x191   : > { %v747_v51 = vpop.f32.mrb[36].mxu1 }
 0x192   : > { %v899_v49 = vpop.f32.mrb[36].mxu0  ;;  %v774_v54 = vadd.f32 %v747_v51, %v622_v2  ;;  %v1921_v46 = vpop.f32.mrb[37].mxu1 }
 0x193   : > { %v932_v40 = vadd.f32 %v899_v49, %v772_v42  ;;  %v1939_v50 = vpop.f32.mrb[37].mxu0  ;;  %v750_v58 = vpop.f32.mrb[38].mxu1 }
 0x194   : > { %v902_v53 = vpop.f32.mrb[38].mxu0  ;;  %v775_v61 = vadd.f32 %v750_v58, %v623_v7  ;;  %v1922_v57 = vpop.f32.mrb[39].mxu1 }
 0x195   : > { %v933_v55 = vadd.f32 %v902_v53, %v773_v47  ;;  %v1940_v56 = vpop.f32.mrb[39].mxu0 }
 0x199   : > { %v755_v1 = vpop.f32.mrb[40].mxu1 }
 0x19a   : > { %v907_v62 = vpop.f32.mrb[40].mxu0  ;;  %v776_v4 = vadd.f32 %v755_v1, %v624_v11  ;;  %v1925_v59 = vpop.f32.mrb[41].mxu1 }
 0x19b   : > { %v934_v52 = vadd.f32 %v907_v62, %v774_v54  ;;  %v1943_v63 = vpop.f32.mrb[41].mxu0  ;;  %v758_v6 = vpop.f32.mrb[42].mxu1 }
 0x19c   : > { %v910_v3 = vpop.f32.mrb[42].mxu0  ;;  %v777_v8 = vadd.f32 %v758_v6, %v625_v21  ;;  %v1926_v9 = vpop.f32.mrb[43].mxu1 }
 0x19d   : > { %v935_v60 = vadd.f32 %v910_v3, %v775_v61  ;;  %v1944_v5 = vpop.f32.mrb[43].mxu0 }
 0x1a1   : > { %v763_v13 = vpop.f32.mrb[44].mxu1 }
 0x1a2   : > { %v915_v10 = vpop.f32.mrb[44].mxu0  ;;  %v778_v15 = vadd.f32 %v763_v13, %v626_v17  ;;  %v1929_v7 = vpop.f32.mrb[45].mxu1 }
 0x1a3   : > { %v936_v2 = vadd.f32 %v915_v10, %v776_v4  ;;  %v1947_v12 = vpop.f32.mrb[45].mxu0  ;;  %v766_v19 = vpop.f32.mrb[46].mxu1 }
 0x1a4   : > { %v918_v14 = vpop.f32.mrb[46].mxu0  ;;  %v779_v22 = vadd.f32 %v766_v19, %v627_v32  ;;  %v1930_v23 = vpop.f32.mrb[47].mxu1 }
 0x1a5   : > { %v937_v16 = vadd.f32 %v918_v14, %v777_v8  ;;  %v1948_v18 = vpop.f32.mrb[47].mxu0 }
 0x1a9   : > { %v1009_v26 = vpop.f32.mrb[48].mxu1 }
 0x1aa   : > { %v923_v24 = vpop.f32.mrb[48].mxu0  ;;  %v1048_v29 = vadd.f32 %v1009_v26, %v930_v25  ;;  %v1957_v21 = vpop.f32.mrb[49].mxu1 }
 0x1ab   : > { %v938_v11 = vadd.f32 %v923_v24, %v778_v15  ;;  %v1951_v0 = vpop.f32.mrb[49].mxu0  ;;  %v1012_v20 = vpop.f32.mrb[50].mxu1 }
 0x1ac   : > { %v926_v28 = vpop.f32.mrb[50].mxu0  ;;  %v1049_v33 = vadd.f32 %v1012_v20, %v931_v43  ;;  %v1958_v34 = vpop.f32.mrb[51].mxu1 }
 0x1ad   : > { %v939_v30 = vadd.f32 %v926_v28, %v779_v22  ;;  %v1952_v31 = vpop.f32.mrb[51].mxu0 }
 0x1b1   : > { %v1017_v37 = vpop.f32.mrb[52].mxu1 }
 0x1b2   : > { %v1161_v35 = vpop.f32.mrb[52].mxu0  ;;  %v1050_v39 = vadd.f32 %v1017_v37, %v932_v40  ;;  %v1961_v32 = vpop.f32.mrb[53].mxu1 }
 0x1b3   : > { %v1200_v17 = vadd.f32 %v1161_v35, %v1048_v29  ;;  %v1979_v36 = vpop.f32.mrb[53].mxu0  ;;  %v1020_v27 = vpop.f32.mrb[54].mxu1 }
 0x1b4   : > { %v1164_v38 = vpop.f32.mrb[54].mxu0  ;;  %v1051_v44 = vadd.f32 %v1020_v27, %v933_v55  ;;  %v1962_v45 = vpop.f32.mrb[55].mxu1 }
 0x1b5   : > { %v1201_v41 = vadd.f32 %v1164_v38, %v1049_v33  ;;  %v1980_v42 = vpop.f32.mrb[55].mxu0  ;;  %v2901_v33 = vld [vmem:[#allocation7] ss:$0 sm:$0xff] }
 0x1b9   : > { %v1025_v49 = vpop.f32.mrb[56].mxu1 }
 0x1ba   : > { %v1169_v47 = vpop.f32.mrb[56].mxu0  ;;  %v1052_v51 = vadd.f32 %v1025_v49, %v934_v52  ;;  %v1965_v43 = vpop.f32.mrb[57].mxu1 }
 0x1bb   : > { %v1202_v25 = vadd.f32 %v1169_v47, %v1050_v39  ;;  %v1983_v48 = vpop.f32.mrb[57].mxu0  ;;  %v1028_v46 = vpop.f32.mrb[58].mxu1 }
 0x1bc   : > { %v1172_v50 = vpop.f32.mrb[58].mxu0  ;;  %v1053_v56 = vadd.f32 %v1028_v46, %v935_v60  ;;  %v1966_v58 = vpop.f32.mrb[59].mxu1 }
 0x1bd   : > { %v1203_v53 = vadd.f32 %v1172_v50, %v1051_v44  ;;  %v1984_v54 = vpop.f32.mrb[59].mxu0 }
 0x1c1   : > { %v1033_v62 = vpop.f32.mrb[60].mxu1 }
 0x1c2   : > { %v1177_v61 = vpop.f32.mrb[60].mxu0  ;;  %v1054_v55 = vadd.f32 %v1033_v62, %v936_v2  ;;  %v1969_v1 = vpop.f32.mrb[61].mxu1 }
 0x1c3   : > { %v2889_v40 = vadd.f32 %v1177_v61, %v1052_v51  ;;  %v1987_v57 = vpop.f32.mrb[61].mxu0  ;;  %v1036_v59 = vpop.f32.mrb[62].mxu1 }
 0x1c4   : > { %v1180_v63 = vpop.f32.mrb[62].mxu0  ;;  %v1055_v5 = vadd.f32 %v1036_v59, %v937_v16  ;;  %v1970_v52 = vpop.f32.mrb[63].mxu1 }
 0x1c5   : > { %v2891_v3 = vadd.f32 %v1180_v63, %v1053_v56  ;;  %v1988_v4 = vpop.f32.mrb[63].mxu0 }
 0x1c9   : > { %v1041_v60 = vpop.f32.mrb[64].mxu1 }
 0x1ca   : > { %v1185_v6 = vpop.f32.mrb[64].mxu0  ;;  %v1056_v12 = vadd.f32 %v1041_v60, %v938_v11  ;;  %v1973_v13 = vpop.f32.mrb[65].mxu1 }
 0x1cb   : > { %v2893_v8 = vadd.f32 %v1185_v6, %v1054_v55  ;;  %v1991_v9 = vpop.f32.mrb[65].mxu0  ;;  %v1044_v7 = vpop.f32.mrb[66].mxu1 }
 0x1cc   : > { %v1188_v10 = vpop.f32.mrb[66].mxu0  ;;  %v1057_v2 = vadd.f32 %v1044_v7, %v939_v30  ;;  %v1974_v18 = vpop.f32.mrb[67].mxu1 }
 0x1cd   : > { %v2895_v14 = vadd.f32 %v1188_v10, %v1055_v5  ;;  %v1992_v15 = vpop.f32.mrb[67].mxu0 }
 0x1d1   : > { %v1321_v23 = vpop.f32.mrb[68].mxu1 }
 0x1d2   : > { %v1193_v19 = vpop.f32.mrb[68].mxu0  ;;  %v1360_v0 = vadd.f32 %v1321_v23, %v1200_v17  ;;  %v2001_v26 = vpop.f32.mrb[69].mxu1 }
 0x1d3   : > { %v2897_v22 = vadd.f32 %v1193_v19, %v1056_v12  ;;  %v1995_v16 = vpop.f32.mrb[69].mxu0  ;;  %v1324_v11 = vpop.f32.mrb[70].mxu1 }
 0x1d4   : > { %v1196_v24 = vpop.f32.mrb[70].mxu0  ;;  %v1361_v21 = vadd.f32 %v1324_v11, %v1201_v41  ;;  %v2002_v31 = vpop.f32.mrb[71].mxu1 }
 0x1d5   : > { %v2899_v28 = vadd.f32 %v1196_v24, %v1057_v2  ;;  %v1996_v29 = vpop.f32.mrb[71].mxu0 }
 0x1d9   : > { %v1329_v35 = vpop.f32.mrb[72].mxu1 }
 0x1da   : > { %v1439_v20 = vpop.f32.mrb[72].mxu0  ;;  %v1362_v37 = vadd.f32 %v1329_v35, %v1202_v25  ;;  %v2005_v39 = vpop.f32.mrb[73].mxu1 }
 0x1db   : > { %v1478_v30 = vadd.f32 %v1439_v20, %v1360_v0  ;;  %v2023_v34 = vpop.f32.mrb[73].mxu0  ;;  %v1332_v42 = vpop.f32.mrb[74].mxu1 }
 0x1dc   : > { %v1442_v36 = vpop.f32.mrb[74].mxu0  ;;  %v1363_v44 = vadd.f32 %v1332_v42, %v1203_v53  ;;  %v2006_v45 = vpop.f32.mrb[75].mxu1 }
 0x1dd   : > { %v1495_v38 = vadd.f32 %v2901_v33, %v1478_v30  ;;  %v1479_v17 = vadd.f32 %v1442_v36, %v1361_v21  ;;  %v2024_v32 = vpop.f32.mrb[75].mxu0 }
 0x1df   : > { %v1505_v27 = vmax.f32 %v1495_v38, 0.0  ;;  %v1496_v41 = vadd.f32 %v2901_v33, %v1479_v17 }
 0x1e1   : > { %v1779_v47 = vpack.c.bf16 %v1505_v27, %v1505_v27  ;;  %v1506_v48 = vmax.f32 %v1496_v41, 0.0  ;;  %v1337_v43 = vpop.f32.mrb[76].mxu1 }
 0x1e2   : > { %v1447_v49 = vpop.f32.mrb[76].mxu0  ;;  %v1364_v53 = vadd.f32 %v1337_v43, %v2889_v40  ;;  %v2009_v56 = vpop.f32.mrb[77].mxu1 }
 0x1e3   : > { %1556 = vst.msk [vmem:[%s2906_s22] sm:$0xf] %vm1555_vm9, %v1779_v47  ;;  %v1780_v25 = vpack.c.bf16 %v1506_v48, %v1506_v48  ;;  %v1480_v50 = vadd.f32 %v1447_v49, %v1362_v37  ;;  %v2027_v51 = vpop.f32.mrb[77].mxu0  ;;  %v1340_v57 = vpop.f32.mrb[78].mxu1 }
 0x1e4   : > { %v1450_v54 = vpop.f32.mrb[78].mxu0  ;;  %v1365_v63 = vadd.f32 %v1340_v57, %v2891_v3  ;;  %v2010_v1 = vpop.f32.mrb[79].mxu1 }
 0x1e5   : > { %1557 = vst.msk [vmem:[%s2906_s22 + $0x4] sm:$0xf] %vm1555_vm9, %v1780_v25  ;;  %v1497_v46 = vadd.f32 %v2901_v33, %v1480_v50  ;;  %v1481_v58 = vadd.f32 %v1450_v54, %v1363_v44  ;;  %v2028_v61 = vpop.f32.mrb[79].mxu0 }
 0x1e7   : > { %v1507_v62 = vmax.f32 %v1497_v46, 0.0  ;;  %v1498_v55 = vadd.f32 %v2901_v33, %v1481_v58 }
 0x1e9   : > { %v1781_v4 = vpack.c.bf16 %v1507_v62, %v1507_v62  ;;  %v1508_v59 = vmax.f32 %v1498_v55, 0.0  ;;  %v1345_v9 = vpop.f32.mrb[80].mxu1 }
 0x1ea   : > { %v1455_v5 = vpop.f32.mrb[80].mxu0  ;;  %v1366_v10 = vadd.f32 %v1345_v9, %v2893_v8  ;;  %v2013_v12 = vpop.f32.mrb[81].mxu1 }
 0x1eb   : > { %1558 = vst.msk [vmem:[%s2906_s22 + $0x8] sm:$0xf] %vm1555_vm9, %v1781_v4  ;;  %v1782_v52 = vpack.c.bf16 %v1508_v59, %v1508_v59  ;;  %v1482_v40 = vadd.f32 %v1455_v5, %v1364_v53  ;;  %v2031_v6 = vpop.f32.mrb[81].mxu0  ;;  %v1348_v7 = vpop.f32.mrb[82].mxu1 }
 0x1ec   : > { %v1458_v60 = vpop.f32.mrb[82].mxu0  ;;  %v1367_v18 = vadd.f32 %v1348_v7, %v2895_v14  ;;  %v2014_v16 = vpop.f32.mrb[83].mxu1 }
 0x1ed   : > { %1559 = vst.msk [vmem:[%s2906_s22 + $0xc] sm:$0xf] %vm1555_vm9, %v1782_v52  ;;  %v1499_v3 = vadd.f32 %v2901_v33, %v1482_v40  ;;  %v1483_v13 = vadd.f32 %v1458_v60, %v1365_v63  ;;  %v2032_v15 = vpop.f32.mrb[83].mxu0 }
 0x1ef   : > { %v1509_v2 = vmax.f32 %v1499_v3, 0.0  ;;  %v1500_v19 = vadd.f32 %v2901_v33, %v1483_v13 }
 0x1f1   : > { %v1783_v23 = vpack.c.bf16 %v1509_v2, %v1509_v2  ;;  %v1510_v24 = vmax.f32 %v1500_v19, 0.0  ;;  %v1353_v11 = vpop.f32.mrb[84].mxu1 }
 0x1f2   : > { %v1463_v0 = vpop.f32.mrb[84].mxu0  ;;  %v1368_v31 = vadd.f32 %v1353_v11, %v2897_v22  ;;  %v2017_v20 = vpop.f32.mrb[85].mxu1 }
 0x1f3   : > { %1560 = vst.msk [vmem:[%s2906_s22 + $0x10] sm:$0xf] %vm1555_vm9, %v1783_v23  ;;  %v1784_v26 = vpack.c.bf16 %v1510_v24, %v1510_v24  ;;  %v1484_v8 = vadd.f32 %v1463_v0, %v1366_v10  ;;  %v2035_v29 = vpop.f32.mrb[85].mxu0  ;;  %v1356_v35 = vpop.f32.mrb[86].mxu1 }
 0x1f4   : > { %v1466_v21 = vpop.f32.mrb[86].mxu0  ;;  %v1369_v37 = vadd.f32 %v1356_v35, %v2899_v28  ;;  %v2018_v39 = vpop.f32.mrb[87].mxu1 }
 0x1f5   : > { %1561 = vst.msk [vmem:[%s2906_s22 + $0x14] sm:$0xf] %vm1555_vm9, %v1784_v26  ;;  %v1501_v14 = vadd.f32 %v2901_v33, %v1484_v8  ;;  %v1485_v30 = vadd.f32 %v1466_v21, %v1367_v18  ;;  %v2036_v34 = vpop.f32.mrb[87].mxu0 }
 0x1f7   : > { %v1511_v36 = vmax.f32 %v1501_v14, 0.0  ;;  %v1502_v38 = vadd.f32 %v2901_v33, %v1485_v30 }
 0x1f9   : > { %v1785_v17 = vpack.c.bf16 %v1511_v36, %v1511_v36  ;;  %v1512_v32 = vmax.f32 %v1502_v38, 0.0 }
 0x1fa   : > { %v1471_v42 = vpop.f32.mrb[88].mxu0 }
 0x1fb   : > { %1562 = vst.msk [vmem:[%s2906_s22 + $0x18] sm:$0xf] %vm1555_vm9, %v1785_v17  ;;  %v1786_v22 = vpack.c.bf16 %v1512_v32, %v1512_v32  ;;  %v1486_v27 = vadd.f32 %v1471_v42, %v1368_v31  ;;  %v2039_v44 = vpop.f32.mrb[89].mxu0 }
 0x1fc   : > { %v1474_v41 = vpop.f32.mrb[90].mxu0 }
 0x1fd   : > { %1563 = vst.msk [vmem:[%s2906_s22 + $0x1c] sm:$0xf] %vm1555_vm9, %v1786_v22  ;;  %v1503_v28 = vadd.f32 %v2901_v33, %v1486_v27  ;;  %v1487_v45 = vadd.f32 %v1474_v41, %v1369_v37  ;;  %v2040_v47 = vpop.f32.mrb[91].mxu0 }
 0x1ff   : > { %v1513_v48 = vmax.f32 %v1503_v28, 0.0  ;;  %v1504_v49 = vadd.f32 %v2901_v33, %v1487_v45 }
 0x201   : > { %v1787_v25 = vpack.c.bf16 %v1513_v48, %v1513_v48  ;;  %v1514_v50 = vmax.f32 %v1504_v49, 0.0 }
 0x203   : > { %1564 = vst.msk [vmem:[%s2906_s22 + $0x20] sm:$0xf] %vm1555_vm9, %v1787_v25  ;;  %v1788_v51 = vpack.c.bf16 %v1514_v50, %v1514_v50 }
 0x205   : > { %1565 = vst.msk [vmem:[%s2906_s22 + $0x24] sm:$0xf] %vm1555_vm9, %v1788_v51 }
 0x206   : > { %2259 = shalt.err (!%p2256_p2)
}
 0x207   : > { %s2260_s28 = scalar_lea.hbm %s2943_s26, 640  ;;  %s2264_s8 = scalar_lea.hbm %s3001_s3, 1280 }
 0x208   : > { %p2261_p0 = scmp.ne.s32.totalorder %s2943_s26, %s2260_s28  ;;  %p2265_p6 = scmp.lt.u32.totalorder %s2943_s26, %s3001_s3 }
 0x209   : > { %p2266_p7 = scmp.lt.u32.totalorder %s2264_s8, %s2260_s28  ;;  %p2268_p8 = scmp.lt.u32.totalorder %s2260_s28, %s2943_s26 }
 0x20a   : > { %p2262_p4 = pnand %p2261_p0, %p3016_p12 }
 0x20b   : > { %p2267_p11 = por %p2266_p7, %p2265_p6 }
 0x20c   : > { %p2263_p13 = pneg %p2262_p4 }
 0x20d   : > { %p2269_p1 = por %p2268_p8, %p2267_p11 }
 0x20f   : > { %p2270_p10 = pnand %p2269_p1, %p2263_p13 }
 0x211   : > { %2273 = shalt.err (!%p2270_p10)
}
 0x212   : > { %s2342_s22 = smov 64   ;;  %s2343_s24 = smov 4  }
 0x213   : > { %2058 = dma.vmem_to_hbm [thread:$0]  (%p3016_p12), %s2947_s11, 640, %s2943_s26, %s1567_s15, %s2342_s22, %s2342_s22, %s2343_s24  }
 0x214 PF: > { %s1596_s18 = sand.u32 1, %s2312_s12   ;;  %p3017_p3 = scmp.ne.s32.totalorder %s3009_s23, 0 }
 0x215   : > { %p3018_p5 = scmp.ge.s32.totalorder %s2332_s17, 2  ;;  %s1597_s5 = scalar_lea.sflag [#allocation4], %s1596_s18 }
 0x217   : > { %p2072_p9 = pnand %p3018_p5, %p3017_p3 }
 0x219   : > { %2307 = dma.done.wait (!%p2072_p9), %s1597_s5, 640  }
 0x21a   : > { %2309 = vsyncadd (!%p2072_p9), %s1597_s5, 4294966656  ;;  %s20_s17 = sadd.s32 1, %s2332_s17   ;;  %s3019_s12 = smov %s2316_s13 }
 0x21b   : > { %p17_p2 = scmp.ge.s32.totalorder %s20_s17, 4   ;;  %s3020_s13 = smov %s2320_s14 }
 0x21c   : > { %s3021_s14 = smov %s2513_s6  ;;  %s3022_s15 = smov %s2328_s16 }
 0x21d   : > { %s3023_s16 = smov %s3025_s25  ;;  %19 = sbr.rel (!%p17_p2) target bundleno = 7 (0x7), region = 87 }
 0x224   :  { %1602 = vsyncpa [#allocation3], 1 }
 0x225   :  { %1604 = vsyncpa [#allocation3 + $0x1], 1 }
 0x226   :  { %1605 = vsyncpa [#allocation6], 1 }
 0x227   :  { %1606 = vsyncpa [#allocation4], 1 }
 0x228   :  { %1608 = vsyncpa [#allocation4 + $0x1], 1 }

// kernel: repmlp_resnet_forward.29
= control target key start
LH: loop header
LB: loop body
LE: loop exit
PB: predicated region body
PF: predicated region fallthrough
CT: control target
= control target key end

     0   :  { %8 = vsyncpa [#allocation3], 0  ;;  %s1183_s0 = inlined_call_operand.hbm [shape: bf16[2,64,32], index: 0, kind: input, shape index: {}]   ;;  %s1184_s1 = inlined_call_operand.hbm [shape: bf16[32,8], index: 1, kind: input, shape index: {}]   ;;  %s1185_s2 = inlined_call_operand.hbm [shape: f32[1,8], index: 2, kind: input, shape index: {}]   ;;  %s1186_s3 = inlined_call_operand.hbm [shape: bf16[2,64,8], index: 3, kind: output, shape index: {}]  }
   0x1   :  { %10 = vsyncpa [#allocation3 + $0x1], 0 }
   0x2   :  { %11 = vsyncpa [#allocation6], 0 }
   0x3   :  { %12 = vsyncpa [#allocation4], 0 }
   0x4   :  { %14 = vsyncpa [#allocation4 + $0x1], 0  ;;  %s909_s12 = smov 0   ;;  %s911_s13 = smov 0  }
   0x5   :  { %s913_s14 = smov 0   ;;  %s915_s15 = smov 0  }
   0x6   :  { %s917_s16 = smov 0   ;;  %s919_s17 = smov 0  }
   0x7 LB: > { %s544_s18 = sadd.s32 4294967295, %s879_s17   ;;  %s545_s19 = sadd.s32 4294967294, %s879_s17   ;;  %s879_s17 = sphi %s919_s17, %s20_s17   ;;  %s875_s16 = sphi %s917_s16, %s1208_s16   ;;  %s871_s15 = sphi %s915_s15, %s1207_s15   ;;  %s867_s14 = sphi %s913_s14, %s1206_s14   ;;  %s863_s13 = sphi %s911_s13, %s1205_s13   ;;  %s859_s12 = sphi %s909_s12, %s1204_s12  }
   0x8   : > { %p52_p0 = scmp.ne.s32.totalorder %s863_s13, %s859_s12  ;;  %p943_p1 = scmp.eq.s32.totalorder %s544_s18, 0 }
   0x9   : > { %p947_p2 = scmp.eq.s32.totalorder %s544_s18, 1  ;;  %p136_p3 = scmp.eq.s32.totalorder %s545_s19, 1 }
   0xa   : > { %s1191_s20 = scalar_select %p943_p1, 1, 0 }
   0xb   : > { %p953_p4 = por %p943_p1, %p52_p0  ;;  %p546_p5 = scmp.ge.s32.totalorder %s879_s17, 1 }
   0xc   : > { %p958_p6 = por %p136_p3, %p52_p0  ;;  %p143_p7 = scmp.lt.s32.totalorder %s879_s17, 3 }
   0xd   : > { %s1193_s22 = scalar_select %p953_p4, 1, 0 }
   0xe   : > { %s1194_s23 = scalar_select %p958_p6, 1, 0 }
   0xf   : > { %p963_p8 = pnand %p546_p5, %p143_p7  ;;  %s881_s25 = smov [#allocation5]  }
  0x10   : > { %s157_s26 = sshll.u32 %s881_s25, 4  ;;  %s882_s28 = smov [#allocation7]   ;;  %s967_s26 = int_to_ptr.vmem [resolvable:$true] %s157_s26 }
  0x11   : > { %p626_p9 = pneg %p963_p8  ;;  %s173_s29 = sshll.u32 %s882_s28, 4  ;;  %s978_s29 = int_to_ptr.vmem [resolvable:$true] %s173_s29 }
  0x12   : > { %s707_s5 = scalar_lea.hbm %s1184_s1, 256 }
  0x13   : > { %p974_p11 = pnand %p626_p9, %p943_p1  ;;  %p708_p12 = scmp.ne.s32.totalorder %s1184_s1, %s707_s5 }
  0x14   : > { %p714_p5 = scmp.lt.u32.totalorder %s707_s5, %s1184_s1 }
  0x15   : > { %p709_p13 = pneg %p974_p11 }
  0x17   : > { %p710_p0 = pnand %p709_p13, %p708_p12 }
  0x19   : > { %p711_p3 = pneg %p710_p0 }
  0x1b   : > { %p716_p7 = pnand %p714_p5, %p711_p3 }
  0x1d   : > { %719 = shalt.err (!%p716_p7)
}
  0x1e   : > { %s720_s10 = scalar_lea.vmem %s967_s26, 256  ;;  %p728_p1 = scmp.lt.s32.totalorder %s967_s26, %s967_s26 }
  0x1f   : > { %p721_p9 = scmp.ne.s32.totalorder %s967_s26, %s720_s10  ;;  %p729_p12 = scmp.lt.s32.totalorder %s720_s10, %s720_s10 }
  0x21   : > { %p723_p10 = pnand %p721_p9, %p709_p13  ;;  %p730_p0 = por %p729_p12, %p728_p1 }
  0x23   : > { %p724_p6 = pneg %p723_p10 }
  0x25   : > { %p731_p4 = pnand %p730_p0, %p724_p6 }
  0x27   : > { %734 = shalt.err (!%p731_p4)
}
  0x28   : > { %s883_s11 = smov 64   ;;  %s884_s18 = smov 4  }
  0x29   : > { %629 = dma.hbm_to_vmem [thread:$0]  (!%p974_p11), %s1184_s1, 256, %s967_s26, [#allocation6], %s883_s11, %s883_s11, %s884_s18  }
  0x2a   : > { %s735_s4 = scalar_lea.hbm %s1185_s2, 16 }
  0x2b   : > { %p736_p1 = scmp.ne.s32.totalorder %s1185_s2, %s735_s4  ;;  %p742_p10 = scmp.lt.u32.totalorder %s735_s4, %s1185_s2 }
  0x2d   : > { %p738_p4 = pnand %p736_p1, %p709_p13 }
  0x2f   : > { %p739_p6 = pneg %p738_p4 }
  0x31   : > { %p744_p3 = pnand %p742_p10, %p739_p6 }
  0x33   : > { %747 = shalt.err (!%p744_p3)
}
  0x34   : > { %s748_s26 = scalar_lea.vmem %s978_s29, 16  ;;  %s755_s9 = scalar_lea.vmem %s978_s29, 32 }
  0x35   : > { %p749_p5 = scmp.ne.s32.totalorder %s978_s29, %s748_s26  ;;  %p756_p12 = scmp.lt.s32.totalorder %s978_s29, %s978_s29 }
  0x36   : > { %p757_p0 = scmp.lt.s32.totalorder %s755_s9, %s748_s26 }
  0x37   : > { %p751_p7 = pnand %p749_p5, %p709_p13 }
  0x38   : > { %p758_p1 = por %p757_p0, %p756_p12 }
  0x39   : > { %p752_p9 = pneg %p751_p7 }
  0x3b   : > { %p759_p4 = pnand %p758_p1, %p752_p9 }
  0x3d   : > { %762 = shalt.err (!%p759_p4)
}
  0x3e   : > { %632 = dma.hbm_to_vmem [thread:$0]  (!%p974_p11), %s1185_s2, 16, %s978_s29, [#allocation6]  }
  0x3f   : > { %s29_s25 = sadd.s32 1, %s875_s16  ;;  %s39_s28 = sadd.s32 1, %s867_s14 }
  0x40   : > { %p30_p13 = scmp.ge.s32.totalorder %s29_s25, 2  ;;  %p46_p6 = scmp.ne.s32.totalorder %s867_s14, %s863_s13 }
  0x41   : > { %p47_p10 = scmp.eq.s32.totalorder %s879_s17, 0  ;;  %p643_p3 = scmp.lt.s32.totalorder %s879_s17, 2 }
  0x42   : > { %s1210_s25 = smov (%p30_p13, %s29_s25), 0  ;;  %p1046_p7 = por %p947_p2, %p46_p6 }
  0x43   : > { %p48_p5 = por %p47_p10, %p46_p6  ;;  %s36_s30 = ssub.s32 %s875_s16, %s1210_s25 }
  0x44   : > { %s1197_s27 = scalar_select %p1046_p7, 1, 0 }
  0x45   : > { %s184_s4 = sand.u32 1, %s867_s14   ;;  %p37_p9 = scmp.eq.s32.totalorder %s36_s30, 0 }
  0x46   : > { %s550_s29 = sshll.u32 %s184_s4, 5  ;;  %s582_s5 = sshll.u32 %s875_s16, 9 }
  0x47   : > { %s1055_s6 = scalar_select %p37_p9, %s867_s14, %s39_s28  }
  0x48   : > { %s1060_s26 = scalar_lea.hbm %s1183_s0, %s582_s5  ;;  %s188_s21 = scalar_lea.vmem [#allocation2], %s550_s29 }
  0x49   : > { %s195_s9 = sshll.u32 %s188_s21, 4  ;;  %p1064_p2 = pnand %p643_p3, %p48_p5  ;;  %s1068_s9 = int_to_ptr.vmem [resolvable:$true] %s195_s9 }
  0x4a   : > { %s1070_s19 = scalar_lea.sflag [#allocation3], %s184_s4  ;;  %s763_s28 = scalar_lea.hbm %s1060_s26, 512 }
  0x4b   : > { %p764_p11 = scmp.ne.s32.totalorder %s1060_s26, %s763_s28  ;;  %p765_p12 = pneg %p1064_p2 }
  0x4c   : > { %s768_s5 = scalar_lea.hbm %s1183_s0, 1024  ;;  %p769_p4 = scmp.lt.u32.totalorder %s1060_s26, %s1183_s0 }
  0x4d   : > { %p766_p0 = pnand %p765_p12, %p764_p11  ;;  %p770_p13 = scmp.lt.u32.totalorder %s768_s5, %s763_s28 }
  0x4e   : > { %p772_p10 = scmp.lt.u32.totalorder %s763_s28, %s1060_s26 }
  0x4f   : > { %p767_p1 = pneg %p766_p0  ;;  %p771_p6 = por %p770_p13, %p769_p4 }
  0x51   : > { %p773_p3 = por %p772_p10, %p771_p6 }
  0x53   : > { %p774_p5 = pnand %p773_p3, %p767_p1 }
  0x55   : > { %777 = shalt.err (!%p774_p5)
}
  0x56   : > { %s778_s4 = scalar_lea.vmem %s1068_s9, 512  ;;  %s885_s21 = smov [#allocation2]  }
  0x57   : > { %p779_p9 = scmp.ne.s32.totalorder %s1068_s9, %s778_s4  ;;  %s783_s30 = sshll.u32 %s885_s21, 4  ;;  %s784_s30 = int_to_ptr.vmem [resolvable:$false] %s783_s30 }
  0x58   : > { %s785_s29 = scalar_lea.vmem %s784_s30, 1024  ;;  %p786_p7 = scmp.lt.s32.totalorder %s1068_s9, %s784_s30 }
  0x59   : > { %p781_p11 = pnand %p779_p9, %p765_p12  ;;  %p787_p4 = scmp.lt.s32.totalorder %s785_s29, %s778_s4 }
  0x5b   : > { %p782_p0 = pneg %p781_p11  ;;  %p788_p13 = por %p787_p4, %p786_p7 }
  0x5d   : > { %p789_p6 = pnand %p788_p13, %p782_p0 }
  0x5f   : > { %792 = shalt.err (!%p789_p6)
}
  0x60   : > { %636 = dma.hbm_to_vmem [thread:$0]  (!%p1064_p2), %s1060_s26, 512, %s1068_s9, %s1070_s19, %s883_s11, %s883_s11, %s884_s18  }
  0x61   : > { %207 = sbr.rel (%p963_p8) target bundleno = 353 (0x161), region = 32  ;;  %s1104_s28 = sand.u32 (!%p963_p8), 1, %s863_s13  }
  0x62   : > { %s554_s5 = sshll.u32 (!%p963_p8), %s1104_s28, 5  ;;  %s210_s7 = scalar_lea.sflag (!%p963_p8), [#allocation3], %s1104_s28 }
  0x63   : > { %s213_s10 = scalar_lea.vmem (!%p963_p8), [#allocation2], %s554_s5  ;;  %p1199_p7 = scmp.ne.s32.totalorder (!%p963_p8), %s1193_s22, 0 }
  0x68   : > { %846 = dma.done.wait (%p1199_p7), %s210_s7, 512  }
  0x69   : > { %848 = vsyncadd (%p1199_p7), %s210_s7, 4294966784  ;;  %p1200_p2 = scmp.ne.s32.totalorder %s1191_s20, 0 }
  0x6b   : > { %850 = dma.done.wait (%p1200_p2), [#allocation6], 272  }
  0x6c   : > { %852 = vsyncadd (%p1200_p2), [#allocation6], 4294967024  ;;  %v701_v0 = vld [vmem:[#allocation5] sm:$0xff]   ;;  %v702_v1 = vld [vmem:[#allocation5 + $0x8] sm:$0xff]   ;;  %vm296_vm0 = vcmask 261120   ;;  %vm414_vm1 = vcmask 60416  }
  0x6d   : > { %598 = vmatprep.subr.bf16.mxu0 %v701_v0  ;;  %610 = vmatprep.subr.bf16.mxu1 %v701_v0  ;;  %v703_v2 = vld [vmem:[%s213_s10] sm:$0xff]   ;;  %v704_v3 = vld [vmem:[%s213_s10 + $0x10] sm:$0xff]   ;;  %v705_v4 = vld [vmem:[%s213_s10 + $0x8] sm:$0xff]   ;;  %s591_s20 = sshll.u32 %s871_s15, 9  ;;  %s243_s22 = scalar_lea.vmem [#allocation8], %s554_s5 }
  0x6e   : > { %599 = vmatpush3.bf16.msra.mxu0 %v701_v0  ;;  %612 = vmatpush3.bf16.msra.mxu1 %v701_v0  ;;  %v706_v5 = vld [vmem:[%s213_s10 + $0x18] sm:$0xff]   ;;  %v558_v6 = vld [vmem:[#allocation7] ss:$0 sm:$0xff]  ;;  %s438_s24 = sshll.u32 %s243_s22, 4  ;;  %s1126_s18 = scalar_lea.hbm %s1186_s3, %s591_s20  ;;  %s1128_s24 = int_to_ptr.vmem [resolvable:$true] %s438_s24 }
  0x6f   : > { %600 = vmatprep.subr.bf16.mxu0 %v702_v1  ;;  %611 = vmatprep.subr.bf16.mxu1 %v702_v1  ;;  %s424_s26 = scalar_lea.sflag [#allocation4], %s1104_s28  ;;  %s793_s9 = scalar_lea.vmem %s1128_s24, 512 }
  0x70   : > { %602 = vmatprep.mubr.msk.bf16.mxu0 %vm296_vm0, %v703_v2  ;;  %606 = vmatprep.mubr.msk.bf16.mxu1 %vm296_vm0, %v704_v3  ;;  %p794_p8 = scmp.ne.s32.totalorder %s1128_s24, %s793_s9  ;;  %p1201_p12 = scmp.ne.s32.totalorder %s1197_s27, 0 }
  0x71   : > { %s886_s19 = smov [#allocation8]  }
  0x72   : > { %601 = vmatpush3.bf16.msra.mxu0 %v702_v1  ;;  %613 = vmatpush3.bf16.msra.mxu1 %v702_v1  ;;  %p795_p1 = pnand %p794_p8, %p1201_p12  ;;  %s797_s8 = sshll.u32 %s886_s19, 4  ;;  %s798_s8 = int_to_ptr.vmem [resolvable:$false] %s797_s8 }
  0x73   : > { %s799_s4 = scalar_lea.vmem %s798_s8, 1024  ;;  %p800_p3 = scmp.lt.s32.totalorder %s1128_s24, %s798_s8 }
  0x74   : > { %p796_p10 = pneg %p795_p1  ;;  %p801_p5 = scmp.lt.s32.totalorder %s799_s4, %s793_s9 }
  0x75   : > { %603 = vmatmul.mubr.msk.bf16.vlgmr.msra.gmra.mrb[0].mxu0 %vm296_vm0, %v705_v4  ;;  %607 = vmatmul.mubr.msk.bf16.vlgmr.msra.gmra.mrb[0].mxu1 %vm296_vm0, %v706_v5 }
  0x76   : > { %p802_p9 = por %p801_p5, %p800_p3 }
  0x78   : > { %p803_p11 = pnand %p802_p9, %p796_p10 }
 0x148   : > { %v604_v7 = vpop.f32.mrb[0].mxu0  ;;  %v608_v8 = vpop.f32.mrb[0].mxu1 }
 0x149   : > { %v352_v9 = vadd.f32 %v604_v7, %v558_v6  ;;  %v368_v10 = vadd.f32 %v608_v8, %v558_v6  ;;  %v343_v11 = vpop.f32.mrb[1].mxu0  ;;  %v359_v12 = vpop.f32.mrb[1].mxu1 }
 0x14a   : > { %v344_v13 = vadd.f32 %v558_v6, %v343_v11  ;;  %v360_v14 = vadd.f32 %v558_v6, %v359_v12  ;;  %v605_v15 = vpop.f32.mrb[2].mxu0  ;;  %v609_v16 = vpop.f32.mrb[2].mxu1 }
 0x14b   : > { %v376_v17 = vmax.f32 %v352_v9, 0.0  ;;  %v380_v18 = vmax.f32 %v368_v10, 0.0  ;;  %v355_v19 = vadd.f32 %v605_v15, %v558_v6  ;;  %v371_v20 = vadd.f32 %v609_v16, %v558_v6  ;;  %v346_v21 = vpop.f32.mrb[3].mxu0  ;;  %v362_v22 = vpop.f32.mrb[3].mxu1 }
 0x14c   : > { %v374_v23 = vmax.f32 %v344_v13, 0.0  ;;  %v378_v24 = vmax.f32 %v360_v14, 0.0  ;;  %v347_v25 = vadd.f32 %v558_v6, %v346_v21  ;;  %v363_v26 = vadd.f32 %v558_v6, %v362_v22 }
 0x14d   : > { %v585_v27 = vpack.c.bf16 %v376_v17, %v376_v17  ;;  %v589_v28 = vpack.c.bf16 %v380_v18, %v380_v18  ;;  %v377_v29 = vmax.f32 %v355_v19, 0.0  ;;  %v381_v30 = vmax.f32 %v371_v20, 0.0 }
 0x14e   : > { %v583_v31 = vpack.c.bf16 %v374_v23, %v374_v23  ;;  %v587_v32 = vpack.c.bf16 %v378_v24, %v378_v24  ;;  %v375_v33 = vmax.f32 %v347_v25, 0.0  ;;  %v379_v34 = vmax.f32 %v363_v26, 0.0 }
 0x14f   : > { %417 = vst.msk [vmem:[%s243_s22 + $0x8] sm:$0xf] %vm414_vm1, %v585_v27  ;;  %421 = vst.msk [vmem:[%s243_s22 + $0x18] sm:$0xf] %vm414_vm1, %v589_v28  ;;  %v586_v35 = vpack.c.bf16 %v377_v29, %v377_v29  ;;  %v590_v36 = vpack.c.bf16 %v381_v30, %v381_v30 }
 0x150   : > { %415 = vst.msk [vmem:[%s243_s22] sm:$0xf] %vm414_vm1, %v583_v31  ;;  %419 = vst.msk [vmem:[%s243_s22 + $0x10] sm:$0xf] %vm414_vm1, %v587_v32  ;;  %v584_v37 = vpack.c.bf16 %v375_v33, %v375_v33  ;;  %v588_v38 = vpack.c.bf16 %v379_v34, %v379_v34 }
 0x151   : > { %418 = vst.msk [vmem:[%s243_s22 + $0xc] sm:$0xf] %vm414_vm1, %v586_v35  ;;  %422 = vst.msk [vmem:[%s243_s22 + $0x1c] sm:$0xf] %vm414_vm1, %v590_v36 }
 0x152   : > { %416 = vst.msk [vmem:[%s243_s22 + $0x4] sm:$0xf] %vm414_vm1, %v584_v37  ;;  %420 = vst.msk [vmem:[%s243_s22 + $0x14] sm:$0xf] %vm414_vm1, %v588_v38 }
 0x153   : > { %806 = shalt.err (!%p803_p11)
}
 0x154   : > { %s807_s21 = scalar_lea.hbm %s1126_s18, 512  ;;  %s811_s5 = scalar_lea.hbm %s1186_s3, 1024 }
 0x155   : > { %p808_p0 = scmp.ne.s32.totalorder %s1126_s18, %s807_s21  ;;  %p812_p6 = scmp.lt.u32.totalorder %s1126_s18, %s1186_s3 }
 0x156   : > { %p813_p7 = scmp.lt.u32.totalorder %s811_s5, %s807_s21  ;;  %p815_p8 = scmp.lt.u32.totalorder %s807_s21, %s1126_s18 }
 0x157   : > { %p809_p4 = pnand %p808_p0, %p1201_p12 }
 0x158   : > { %p814_p2 = por %p813_p7, %p812_p6 }
 0x159   : > { %p810_p13 = pneg %p809_p4 }
 0x15a   : > { %p816_p1 = por %p815_p8, %p814_p2 }
 0x15c   : > { %p817_p10 = pnand %p816_p1, %p810_p13 }
 0x15e   : > { %820 = shalt.err (!%p817_p10)
}
 0x15f   : > { %s887_s20 = smov 64   ;;  %s888_s22 = smov 4  }
 0x160   : > { %624 = dma.vmem_to_hbm [thread:$0]  (%p1201_p12), %s1128_s24, 512, %s1126_s18, %s424_s26, %s887_s20, %s887_s20, %s888_s22  }
 0x161 PF: > { %s453_s15 = sand.u32 1, %s859_s12   ;;  %p1202_p3 = scmp.ne.s32.totalorder %s1194_s23, 0 }
 0x162   : > { %p1203_p5 = scmp.ge.s32.totalorder %s879_s17, 2  ;;  %s454_s11 = scalar_lea.sflag [#allocation4], %s453_s15 }
 0x164   : > { %p638_p9 = pnand %p1203_p5, %p1202_p3 }
 0x166   : > { %854 = dma.done.wait (!%p638_p9), %s454_s11, 512  }
 0x167   : > { %856 = vsyncadd (!%p638_p9), %s454_s11, 4294966784  ;;  %s20_s17 = sadd.s32 1, %s879_s17   ;;  %s1204_s12 = smov %s863_s13 }
 0x168   : > { %p17_p11 = scmp.ge.s32.totalorder %s20_s17, 4   ;;  %s1205_s13 = smov %s867_s14 }
 0x169   : > { %s1206_s14 = smov %s1055_s6  ;;  %s1207_s15 = smov %s875_s16 }
 0x16a   : > { %s1208_s16 = smov %s1210_s25  ;;  %19 = sbr.rel (!%p17_p11) target bundleno = 7 (0x7), region = 87 }
 0x171   :  { %459 = vsyncpa [#allocation3], 1 }
 0x172   :  { %461 = vsyncpa [#allocation3 + $0x1], 1 }
 0x173   :  { %462 = vsyncpa [#allocation6], 1 }
 0x174   :  { %463 = vsyncpa [#allocation4], 1 }
 0x175   :  { %465 = vsyncpa [#allocation4 + $0x1], 1 }

// kernel: repmlp_resnet_forward.33
= control target key start
LH: loop header
LB: loop body
LE: loop exit
PB: predicated region body
PF: predicated region fallthrough
CT: control target
= control target key end

     0   :  { %8 = vsyncpa [#allocation3], 0  ;;  %s1183_s0 = inlined_call_operand.hbm [shape: bf16[2,64,32], index: 0, kind: input, shape index: {}]   ;;  %s1184_s1 = inlined_call_operand.hbm [shape: bf16[32,16], index: 1, kind: input, shape index: {}]   ;;  %s1185_s2 = inlined_call_operand.hbm [shape: f32[1,16], index: 2, kind: input, shape index: {}]   ;;  %s1186_s3 = inlined_call_operand.hbm [shape: bf16[2,64,16], index: 3, kind: output, shape index: {}]  }
   0x1   :  { %10 = vsyncpa [#allocation3 + $0x1], 0 }
   0x2   :  { %11 = vsyncpa [#allocation6], 0 }
   0x3   :  { %12 = vsyncpa [#allocation4], 0 }
   0x4   :  { %14 = vsyncpa [#allocation4 + $0x1], 0  ;;  %s909_s12 = smov 0   ;;  %s911_s13 = smov 0  }
   0x5   :  { %s913_s14 = smov 0   ;;  %s915_s15 = smov 0  }
   0x6   :  { %s917_s16 = smov 0   ;;  %s919_s17 = smov 0  }
   0x7 LB: > { %s544_s18 = sadd.s32 4294967295, %s879_s17   ;;  %s545_s19 = sadd.s32 4294967294, %s879_s17   ;;  %s879_s17 = sphi %s919_s17, %s20_s17   ;;  %s875_s16 = sphi %s917_s16, %s1208_s16   ;;  %s871_s15 = sphi %s915_s15, %s1207_s15   ;;  %s867_s14 = sphi %s913_s14, %s1206_s14   ;;  %s863_s13 = sphi %s911_s13, %s1205_s13   ;;  %s859_s12 = sphi %s909_s12, %s1204_s12  }
   0x8   : > { %p52_p0 = scmp.ne.s32.totalorder %s863_s13, %s859_s12  ;;  %p943_p1 = scmp.eq.s32.totalorder %s544_s18, 0 }
   0x9   : > { %p947_p2 = scmp.eq.s32.totalorder %s544_s18, 1  ;;  %p136_p3 = scmp.eq.s32.totalorder %s545_s19, 1 }
   0xa   : > { %s1191_s20 = scalar_select %p943_p1, 1, 0 }
   0xb   : > { %p953_p4 = por %p943_p1, %p52_p0  ;;  %p546_p5 = scmp.ge.s32.totalorder %s879_s17, 1 }
   0xc   : > { %p958_p6 = por %p136_p3, %p52_p0  ;;  %p143_p7 = scmp.lt.s32.totalorder %s879_s17, 3 }
   0xd   : > { %s1193_s22 = scalar_select %p953_p4, 1, 0 }
   0xe   : > { %s1194_s23 = scalar_select %p958_p6, 1, 0 }
   0xf   : > { %p963_p8 = pnand %p546_p5, %p143_p7  ;;  %s881_s25 = smov [#allocation5]  }
  0x10   : > { %s157_s26 = sshll.u32 %s881_s25, 4  ;;  %s882_s28 = smov [#allocation7]   ;;  %s967_s26 = int_to_ptr.vmem [resolvable:$true] %s157_s26 }
  0x11   : > { %p626_p9 = pneg %p963_p8  ;;  %s173_s29 = sshll.u32 %s882_s28, 4  ;;  %s978_s29 = int_to_ptr.vmem [resolvable:$true] %s173_s29 }
  0x12   : > { %s707_s5 = scalar_lea.hbm %s1184_s1, 256 }
  0x13   : > { %p974_p11 = pnand %p626_p9, %p943_p1  ;;  %p708_p12 = scmp.ne.s32.totalorder %s1184_s1, %s707_s5 }
  0x14   : > { %p714_p5 = scmp.lt.u32.totalorder %s707_s5, %s1184_s1 }
  0x15   : > { %p709_p13 = pneg %p974_p11 }
  0x17   : > { %p710_p0 = pnand %p709_p13, %p708_p12 }
  0x19   : > { %p711_p3 = pneg %p710_p0 }
  0x1b   : > { %p716_p7 = pnand %p714_p5, %p711_p3 }
  0x1d   : > { %719 = shalt.err (!%p716_p7)
}
  0x1e   : > { %s720_s10 = scalar_lea.vmem %s967_s26, 256  ;;  %p728_p1 = scmp.lt.s32.totalorder %s967_s26, %s967_s26 }
  0x1f   : > { %p721_p9 = scmp.ne.s32.totalorder %s967_s26, %s720_s10  ;;  %p729_p12 = scmp.lt.s32.totalorder %s720_s10, %s720_s10 }
  0x21   : > { %p723_p10 = pnand %p721_p9, %p709_p13  ;;  %p730_p0 = por %p729_p12, %p728_p1 }
  0x23   : > { %p724_p6 = pneg %p723_p10 }
  0x25   : > { %p731_p4 = pnand %p730_p0, %p724_p6 }
  0x27   : > { %734 = shalt.err (!%p731_p4)
}
  0x28   : > { %s883_s11 = smov 64   ;;  %s884_s18 = smov 4  }
  0x29   : > { %629 = dma.hbm_to_vmem [thread:$0]  (!%p974_p11), %s1184_s1, 256, %s967_s26, [#allocation6], %s883_s11, %s883_s11, %s884_s18  }
  0x2a   : > { %s735_s4 = scalar_lea.hbm %s1185_s2, 16 }
  0x2b   : > { %p736_p1 = scmp.ne.s32.totalorder %s1185_s2, %s735_s4  ;;  %p742_p10 = scmp.lt.u32.totalorder %s735_s4, %s1185_s2 }
  0x2d   : > { %p738_p4 = pnand %p736_p1, %p709_p13 }
  0x2f   : > { %p739_p6 = pneg %p738_p4 }
  0x31   : > { %p744_p3 = pnand %p742_p10, %p739_p6 }
  0x33   : > { %747 = shalt.err (!%p744_p3)
}
  0x34   : > { %s748_s26 = scalar_lea.vmem %s978_s29, 16  ;;  %s755_s9 = scalar_lea.vmem %s978_s29, 32 }
  0x35   : > { %p749_p5 = scmp.ne.s32.totalorder %s978_s29, %s748_s26  ;;  %p756_p12 = scmp.lt.s32.totalorder %s978_s29, %s978_s29 }
  0x36   : > { %p757_p0 = scmp.lt.s32.totalorder %s755_s9, %s748_s26 }
  0x37   : > { %p751_p7 = pnand %p749_p5, %p709_p13 }
  0x38   : > { %p758_p1 = por %p757_p0, %p756_p12 }
  0x39   : > { %p752_p9 = pneg %p751_p7 }
  0x3b   : > { %p759_p4 = pnand %p758_p1, %p752_p9 }
  0x3d   : > { %762 = shalt.err (!%p759_p4)
}
  0x3e   : > { %632 = dma.hbm_to_vmem [thread:$0]  (!%p974_p11), %s1185_s2, 16, %s978_s29, [#allocation6]  }
  0x3f   : > { %s29_s25 = sadd.s32 1, %s875_s16  ;;  %s39_s28 = sadd.s32 1, %s867_s14 }
  0x40   : > { %p30_p13 = scmp.ge.s32.totalorder %s29_s25, 2  ;;  %p46_p6 = scmp.ne.s32.totalorder %s867_s14, %s863_s13 }
  0x41   : > { %p47_p10 = scmp.eq.s32.totalorder %s879_s17, 0  ;;  %p643_p3 = scmp.lt.s32.totalorder %s879_s17, 2 }
  0x42   : > { %s1210_s25 = smov (%p30_p13, %s29_s25), 0  ;;  %p1046_p7 = por %p947_p2, %p46_p6 }
  0x43   : > { %p48_p5 = por %p47_p10, %p46_p6  ;;  %s36_s30 = ssub.s32 %s875_s16, %s1210_s25 }
  0x44   : > { %s1197_s27 = scalar_select %p1046_p7, 1, 0 }
  0x45   : > { %s184_s4 = sand.u32 1, %s867_s14   ;;  %p37_p9 = scmp.eq.s32.totalorder %s36_s30, 0 }
  0x46   : > { %s550_s29 = sshll.u32 %s184_s4, 5  ;;  %s582_s5 = sshll.u32 %s875_s16, 9 }
  0x47   : > { %s1055_s6 = scalar_select %p37_p9, %s867_s14, %s39_s28  }
  0x48   : > { %s1060_s26 = scalar_lea.hbm %s1183_s0, %s582_s5  ;;  %s188_s21 = scalar_lea.vmem [#allocation2], %s550_s29 }
  0x49   : > { %s195_s9 = sshll.u32 %s188_s21, 4  ;;  %p1064_p2 = pnand %p643_p3, %p48_p5  ;;  %s1068_s9 = int_to_ptr.vmem [resolvable:$true] %s195_s9 }
  0x4a   : > { %s1070_s19 = scalar_lea.sflag [#allocation3], %s184_s4  ;;  %s763_s28 = scalar_lea.hbm %s1060_s26, 512 }
  0x4b   : > { %p764_p11 = scmp.ne.s32.totalorder %s1060_s26, %s763_s28  ;;  %p765_p12 = pneg %p1064_p2 }
  0x4c   : > { %s768_s5 = scalar_lea.hbm %s1183_s0, 1024  ;;  %p769_p4 = scmp.lt.u32.totalorder %s1060_s26, %s1183_s0 }
  0x4d   : > { %p766_p0 = pnand %p765_p12, %p764_p11  ;;  %p770_p13 = scmp.lt.u32.totalorder %s768_s5, %s763_s28 }
  0x4e   : > { %p772_p10 = scmp.lt.u32.totalorder %s763_s28, %s1060_s26 }
  0x4f   : > { %p767_p1 = pneg %p766_p0  ;;  %p771_p6 = por %p770_p13, %p769_p4 }
  0x51   : > { %p773_p3 = por %p772_p10, %p771_p6 }
  0x53   : > { %p774_p5 = pnand %p773_p3, %p767_p1 }
  0x55   : > { %777 = shalt.err (!%p774_p5)
}
  0x56   : > { %s778_s4 = scalar_lea.vmem %s1068_s9, 512  ;;  %s885_s21 = smov [#allocation2]  }
  0x57   : > { %p779_p9 = scmp.ne.s32.totalorder %s1068_s9, %s778_s4  ;;  %s783_s30 = sshll.u32 %s885_s21, 4  ;;  %s784_s30 = int_to_ptr.vmem [resolvable:$false] %s783_s30 }
  0x58   : > { %s785_s29 = scalar_lea.vmem %s784_s30, 1024  ;;  %p786_p7 = scmp.lt.s32.totalorder %s1068_s9, %s784_s30 }
  0x59   : > { %p781_p11 = pnand %p779_p9, %p765_p12  ;;  %p787_p4 = scmp.lt.s32.totalorder %s785_s29, %s778_s4 }
  0x5b   : > { %p782_p0 = pneg %p781_p11  ;;  %p788_p13 = por %p787_p4, %p786_p7 }
  0x5d   : > { %p789_p6 = pnand %p788_p13, %p782_p0 }
  0x5f   : > { %792 = shalt.err (!%p789_p6)
}
  0x60   : > { %636 = dma.hbm_to_vmem [thread:$0]  (!%p1064_p2), %s1060_s26, 512, %s1068_s9, %s1070_s19, %s883_s11, %s883_s11, %s884_s18  }
  0x61   : > { %207 = sbr.rel (%p963_p8) target bundleno = 353 (0x161), region = 32  ;;  %s1104_s28 = sand.u32 (!%p963_p8), 1, %s863_s13  }
  0x62   : > { %s554_s5 = sshll.u32 (!%p963_p8), %s1104_s28, 5  ;;  %s210_s7 = scalar_lea.sflag (!%p963_p8), [#allocation3], %s1104_s28 }
  0x63   : > { %s213_s10 = scalar_lea.vmem (!%p963_p8), [#allocation2], %s554_s5  ;;  %p1199_p7 = scmp.ne.s32.totalorder (!%p963_p8), %s1193_s22, 0 }
  0x68   : > { %846 = dma.done.wait (%p1199_p7), %s210_s7, 512  }
  0x69   : > { %848 = vsyncadd (%p1199_p7), %s210_s7, 4294966784  ;;  %p1200_p2 = scmp.ne.s32.totalorder %s1191_s20, 0 }
  0x6b   : > { %850 = dma.done.wait (%p1200_p2), [#allocation6], 272  }
  0x6c   : > { %852 = vsyncadd (%p1200_p2), [#allocation6], 4294967024  ;;  %v701_v0 = vld [vmem:[#allocation5] sm:$0xff]   ;;  %v702_v1 = vld [vmem:[#allocation5 + $0x8] sm:$0xff]   ;;  %vm296_vm0 = vcmask 261120   ;;  %vm414_vm1 = vcmask 125952  }
  0x6d   : > { %598 = vmatprep.subr.bf16.mxu0 %v701_v0  ;;  %610 = vmatprep.subr.bf16.mxu1 %v701_v0  ;;  %v703_v2 = vld [vmem:[%s213_s10] sm:$0xff]   ;;  %v704_v3 = vld [vmem:[%s213_s10 + $0x10] sm:$0xff]   ;;  %v705_v4 = vld [vmem:[%s213_s10 + $0x8] sm:$0xff]   ;;  %s591_s20 = sshll.u32 %s871_s15, 9  ;;  %s243_s22 = scalar_lea.vmem [#allocation8], %s554_s5 }
  0x6e   : > { %599 = vmatpush3.bf16.msra.mxu0 %v701_v0  ;;  %612 = vmatpush3.bf16.msra.mxu1 %v701_v0  ;;  %v706_v5 = vld [vmem:[%s213_s10 + $0x18] sm:$0xff]   ;;  %v558_v6 = vld [vmem:[#allocation7] ss:$0 sm:$0xff]  ;;  %s438_s24 = sshll.u32 %s243_s22, 4  ;;  %s1126_s18 = scalar_lea.hbm %s1186_s3, %s591_s20  ;;  %s1128_s24 = int_to_ptr.vmem [resolvable:$true] %s438_s24 }
  0x6f   : > { %600 = vmatprep.subr.bf16.mxu0 %v702_v1  ;;  %611 = vmatprep.subr.bf16.mxu1 %v702_v1  ;;  %s424_s26 = scalar_lea.sflag [#allocation4], %s1104_s28  ;;  %s793_s9 = scalar_lea.vmem %s1128_s24, 512 }
  0x70   : > { %602 = vmatprep.mubr.msk.bf16.mxu0 %vm296_vm0, %v703_v2  ;;  %606 = vmatprep.mubr.msk.bf16.mxu1 %vm296_vm0, %v704_v3  ;;  %p794_p8 = scmp.ne.s32.totalorder %s1128_s24, %s793_s9  ;;  %p1201_p12 = scmp.ne.s32.totalorder %s1197_s27, 0 }
  0x71   : > { %s886_s19 = smov [#allocation8]  }
  0x72   : > { %601 = vmatpush3.bf16.msra.mxu0 %v702_v1  ;;  %613 = vmatpush3.bf16.msra.mxu1 %v702_v1  ;;  %p795_p1 = pnand %p794_p8, %p1201_p12  ;;  %s797_s8 = sshll.u32 %s886_s19, 4  ;;  %s798_s8 = int_to_ptr.vmem [resolvable:$false] %s797_s8 }
  0x73   : > { %s799_s4 = scalar_lea.vmem %s798_s8, 1024  ;;  %p800_p3 = scmp.lt.s32.totalorder %s1128_s24, %s798_s8 }
  0x74   : > { %p796_p10 = pneg %p795_p1  ;;  %p801_p5 = scmp.lt.s32.totalorder %s799_s4, %s793_s9 }
  0x75   : > { %603 = vmatmul.mubr.msk.bf16.vlgmr.msra.gmra.mrb[0].mxu0 %vm296_vm0, %v705_v4  ;;  %607 = vmatmul.mubr.msk.bf16.vlgmr.msra.gmra.mrb[0].mxu1 %vm296_vm0, %v706_v5 }
  0x76   : > { %p802_p9 = por %p801_p5, %p800_p3 }
  0x78   : > { %p803_p11 = pnand %p802_p9, %p796_p10 }
 0x148   : > { %v604_v7 = vpop.f32.mrb[0].mxu0  ;;  %v608_v8 = vpop.f32.mrb[0].mxu1 }
 0x149   : > { %v352_v9 = vadd.f32 %v604_v7, %v558_v6  ;;  %v368_v10 = vadd.f32 %v608_v8, %v558_v6  ;;  %v343_v11 = vpop.f32.mrb[1].mxu0  ;;  %v359_v12 = vpop.f32.mrb[1].mxu1 }
 0x14a   : > { %v344_v13 = vadd.f32 %v558_v6, %v343_v11  ;;  %v360_v14 = vadd.f32 %v558_v6, %v359_v12  ;;  %v605_v15 = vpop.f32.mrb[2].mxu0  ;;  %v609_v16 = vpop.f32.mrb[2].mxu1 }
 0x14b   : > { %v376_v17 = vmax.f32 %v352_v9, 0.0  ;;  %v380_v18 = vmax.f32 %v368_v10, 0.0  ;;  %v355_v19 = vadd.f32 %v605_v15, %v558_v6  ;;  %v371_v20 = vadd.f32 %v609_v16, %v558_v6  ;;  %v346_v21 = vpop.f32.mrb[3].mxu0  ;;  %v362_v22 = vpop.f32.mrb[3].mxu1 }
 0x14c   : > { %v374_v23 = vmax.f32 %v344_v13, 0.0  ;;  %v378_v24 = vmax.f32 %v360_v14, 0.0  ;;  %v347_v25 = vadd.f32 %v558_v6, %v346_v21  ;;  %v363_v26 = vadd.f32 %v558_v6, %v362_v22 }
 0x14d   : > { %v585_v27 = vpack.c.bf16 %v376_v17, %v376_v17  ;;  %v589_v28 = vpack.c.bf16 %v380_v18, %v380_v18  ;;  %v377_v29 = vmax.f32 %v355_v19, 0.0  ;;  %v381_v30 = vmax.f32 %v371_v20, 0.0 }
 0x14e   : > { %v583_v31 = vpack.c.bf16 %v374_v23, %v374_v23  ;;  %v587_v32 = vpack.c.bf16 %v378_v24, %v378_v24  ;;  %v375_v33 = vmax.f32 %v347_v25, 0.0  ;;  %v379_v34 = vmax.f32 %v363_v26, 0.0 }
 0x14f   : > { %417 = vst.msk [vmem:[%s243_s22 + $0x8] sm:$0xf] %vm414_vm1, %v585_v27  ;;  %421 = vst.msk [vmem:[%s243_s22 + $0x18] sm:$0xf] %vm414_vm1, %v589_v28  ;;  %v586_v35 = vpack.c.bf16 %v377_v29, %v377_v29  ;;  %v590_v36 = vpack.c.bf16 %v381_v30, %v381_v30 }
 0x150   : > { %415 = vst.msk [vmem:[%s243_s22] sm:$0xf] %vm414_vm1, %v583_v31  ;;  %419 = vst.msk [vmem:[%s243_s22 + $0x10] sm:$0xf] %vm414_vm1, %v587_v32  ;;  %v584_v37 = vpack.c.bf16 %v375_v33, %v375_v33  ;;  %v588_v38 = vpack.c.bf16 %v379_v34, %v379_v34 }
 0x151   : > { %418 = vst.msk [vmem:[%s243_s22 + $0xc] sm:$0xf] %vm414_vm1, %v586_v35  ;;  %422 = vst.msk [vmem:[%s243_s22 + $0x1c] sm:$0xf] %vm414_vm1, %v590_v36 }
 0x152   : > { %416 = vst.msk [vmem:[%s243_s22 + $0x4] sm:$0xf] %vm414_vm1, %v584_v37  ;;  %420 = vst.msk [vmem:[%s243_s22 + $0x14] sm:$0xf] %vm414_vm1, %v588_v38 }
 0x153   : > { %806 = shalt.err (!%p803_p11)
}
 0x154   : > { %s807_s21 = scalar_lea.hbm %s1126_s18, 512  ;;  %s811_s5 = scalar_lea.hbm %s1186_s3, 1024 }
 0x155   : > { %p808_p0 = scmp.ne.s32.totalorder %s1126_s18, %s807_s21  ;;  %p812_p6 = scmp.lt.u32.totalorder %s1126_s18, %s1186_s3 }
 0x156   : > { %p813_p7 = scmp.lt.u32.totalorder %s811_s5, %s807_s21  ;;  %p815_p8 = scmp.lt.u32.totalorder %s807_s21, %s1126_s18 }
 0x157   : > { %p809_p4 = pnand %p808_p0, %p1201_p12 }
 0x158   : > { %p814_p2 = por %p813_p7, %p812_p6 }
 0x159   : > { %p810_p13 = pneg %p809_p4 }
 0x15a   : > { %p816_p1 = por %p815_p8, %p814_p2 }
 0x15c   : > { %p817_p10 = pnand %p816_p1, %p810_p13 }
 0x15e   : > { %820 = shalt.err (!%p817_p10)
}
 0x15f   : > { %s887_s20 = smov 64   ;;  %s888_s22 = smov 4  }
 0x160   : > { %624 = dma.vmem_to_hbm [thread:$0]  (%p1201_p12), %s1128_s24, 512, %s1126_s18, %s424_s26, %s887_s20, %s887_s20, %s888_s22  }
 0x161 PF: > { %s453_s15 = sand.u32 1, %s859_s12   ;;  %p1202_p3 = scmp.ne.s32.totalorder %s1194_s23, 0 }
 0x162   : > { %p1203_p5 = scmp.ge.s32.totalorder %s879_s17, 2  ;;  %s454_s11 = scalar_lea.sflag [#allocation4], %s453_s15 }
 0x164   : > { %p638_p9 = pnand %p1203_p5, %p1202_p3 }
 0x166   : > { %854 = dma.done.wait (!%p638_p9), %s454_s11, 512  }
 0x167   : > { %856 = vsyncadd (!%p638_p9), %s454_s11, 4294966784  ;;  %s20_s17 = sadd.s32 1, %s879_s17   ;;  %s1204_s12 = smov %s863_s13 }
 0x168   : > { %p17_p11 = scmp.ge.s32.totalorder %s20_s17, 4   ;;  %s1205_s13 = smov %s867_s14 }
 0x169   : > { %s1206_s14 = smov %s1055_s6  ;;  %s1207_s15 = smov %s875_s16 }
 0x16a   : > { %s1208_s16 = smov %s1210_s25  ;;  %19 = sbr.rel (!%p17_p11) target bundleno = 7 (0x7), region = 87 }
 0x171   :  { %459 = vsyncpa [#allocation3], 1 }
 0x172   :  { %461 = vsyncpa [#allocation3 + $0x1], 1 }
 0x173   :  { %462 = vsyncpa [#allocation6], 1 }
 0x174   :  { %463 = vsyncpa [#allocation4], 1 }
 0x175   :  { %465 = vsyncpa [#allocation4 + $0x1], 1 }

// kernel: repmlp_resnet_forward.34
= control target key start
LH: loop header
LB: loop body
LE: loop exit
PB: predicated region body
PF: predicated region fallthrough
CT: control target
= control target key end

     0   :  { %8 = vsyncpa [#allocation4], 0  ;;  %s626_s0 = inlined_call_operand.hbm [shape: bf16[32,256], index: 0, kind: input, shape index: {}]   ;;  %s627_s1 = inlined_call_operand.hbm [shape: bf16[256,128], index: 1, kind: input, shape index: {}]   ;;  %s628_s2 = inlined_call_operand.hbm [shape: f32[1,128], index: 2, kind: input, shape index: {}]   ;;  %s629_s3 = inlined_call_operand.hbm [shape: bf16[32,128], index: 3, kind: output, shape index: {}]  }
   0x1   :  { %9 = vsyncpa [#allocation7], 0 }
   0x2   :  { %10 = vsyncpa [#allocation5], 0  ;;  %s544_s12 = smov [#allocation6]   ;;  %s450_s16 = scalar_lea.hbm %s627_s1, 2048 }
   0x3   :  { %s28_s13 = sshll.u32 %s544_s12, 4  ;;  %p451_p0 = scmp.ne.s32.totalorder %s627_s1, %s450_s16  ;;  %s29_s13 = int_to_ptr.vmem [resolvable:$true] %s28_s13 }
   0x4   :  { %p454_p1 = scmp.lt.u32.totalorder %s450_s16, %s627_s1 }
   0x6   :  { %p456_p2 = pnand %p454_p1, %p451_p0 }
   0x8   :  { %459 = shalt.err (!%p456_p2)
}
   0x9   :  { %s460_s21 = scalar_lea.vmem %s29_s13, 2048  ;;  %p465_p4 = scmp.lt.s32.totalorder %s29_s13, %s29_s13 }
   0xa   :  { %p461_p3 = scmp.ne.s32.totalorder %s29_s13, %s460_s21  ;;  %p466_p5 = scmp.lt.s32.totalorder %s460_s21, %s460_s21 }
   0xc   :  { %p467_p6 = por %p466_p5, %p465_p4 }
   0xe   :  { %p468_p7 = pnand %p467_p6, %p461_p3 }
  0x10   :  { %471 = shalt.err (!%p468_p7)
}
  0x11   :  { %s545_s22 = smov 64   ;;  %s546_s23 = smov 4  }
  0x12   :  { %34 = dma.hbm_to_vmem [thread:$0]  %s627_s1, 2048, %s29_s13, [#allocation7], %s545_s22, %s545_s22, %s546_s23  }
  0x13   :  { %s547_s26 = smov [#allocation3]   ;;  %s472_s30 = scalar_lea.hbm %s626_s0, 512 }
  0x14   :  { %s16_s27 = sshll.u32 %s547_s26, 4  ;;  %p473_p8 = scmp.ne.s32.totalorder %s626_s0, %s472_s30  ;;  %s17_s27 = int_to_ptr.vmem [resolvable:$true] %s16_s27 }
  0x15   :  { %p476_p9 = scmp.lt.u32.totalorder %s472_s30, %s626_s0 }
  0x17   :  { %p478_p10 = pnand %p476_p9, %p473_p8 }
  0x19   :  { %481 = shalt.err (!%p478_p10)
}
  0x1a   :  { %s482_s8 = scalar_lea.vmem %s17_s27, 512  ;;  %p487_p12 = scmp.lt.s32.totalorder %s17_s27, %s17_s27 }
  0x1b   :  { %p483_p11 = scmp.ne.s32.totalorder %s17_s27, %s482_s8  ;;  %p488_p13 = scmp.lt.s32.totalorder %s482_s8, %s482_s8 }
  0x1d   :  { %p489_p0 = por %p488_p13, %p487_p12 }
  0x1f   :  { %p490_p1 = pnand %p489_p0, %p483_p11 }
  0x21   :  { %493 = shalt.err (!%p490_p1)
}
  0x22   :  { %s548_s1 = smov 128   ;;  %s549_s9 = smov 8  }
  0x23   :  { %22 = dma.hbm_to_vmem [thread:$0]  %s626_s0, 512, %s17_s27, [#allocation4], %s548_s1, %s548_s1, %s549_s9  }
  0x24   :  { %s550_s12 = smov [#allocation8]   ;;  %s494_s16 = scalar_lea.hbm %s628_s2, 16 }
  0x25   :  { %s41_s13 = sshll.u32 %s550_s12, 4  ;;  %p495_p2 = scmp.ne.s32.totalorder %s628_s2, %s494_s16  ;;  %s42_s13 = int_to_ptr.vmem [resolvable:$true] %s41_s13 }
  0x26   :  { %p498_p3 = scmp.lt.u32.totalorder %s494_s16, %s628_s2 }
  0x28   :  { %p500_p4 = pnand %p498_p3, %p495_p2 }
  0x2a   :  { %503 = shalt.err (!%p500_p4)
}
  0x2b   :  { %s504_s21 = scalar_lea.vmem %s42_s13, 16  ;;  %s508_s0 = scalar_lea.vmem %s42_s13, 32 }
  0x2c   :  { %p505_p5 = scmp.ne.s32.totalorder %s42_s13, %s504_s21  ;;  %p509_p6 = scmp.lt.s32.totalorder %s42_s13, %s42_s13 }
  0x2d   :  { %p510_p7 = scmp.lt.s32.totalorder %s508_s0, %s504_s21 }
  0x2f   :  { %p511_p8 = por %p510_p7, %p509_p6 }
  0x31   :  { %p512_p9 = pnand %p511_p8, %p505_p5 }
  0x33   :  { %515 = shalt.err (!%p512_p9)
}
  0x34   :  { %44 = dma.hbm_to_vmem [thread:$0]  %s628_s2, 16, %s42_s13, [#allocation7]  }
  0x35   :  { %538 = dma.done.wait [#allocation4], 512  }
  0x36   :  { %539 = vsyncadd [#allocation4], 4294966784 }
  0x37   :  { %540 = dma.done.wait [#allocation7], 2064  }
  0x38   :  { %541 = vsyncadd [#allocation7], 4294965232  ;;  %v428_v0 = vld [vmem:[#allocation6 + $0x40] sm:$0xff]   ;;  %v430_v2 = vld [vmem:[#allocation6 + $0x48] sm:$0xff]   ;;  %s551_s2 = smov [#allocation9]  }
  0x39   :  { %v429_v1 = vld [vmem:[#allocation6] sm:$0xff]   ;;  %376 = vmatprep.subr.bf16.mxu0 %v428_v0  ;;  %404 = vmatprep.subr.bf16.mxu1 %v428_v0  ;;  %v431_v3 = vld [vmem:[#allocation6 + $0x8] sm:$0xff]   ;;  %v432_v4 = vld [vmem:[#allocation6 + $0x50] sm:$0xff]   ;;  %s323_s26 = sshll.u32 %s551_s2, 4  ;;  %s324_s26 = int_to_ptr.vmem [resolvable:$true] %s323_s26 }
  0x3a   :  { %377 = vmatpush3.bf16.msra.mxu0 %v429_v1  ;;  %412 = vmatpush3.bf16.msra.mxu1 %v429_v1  ;;  %v433_v5 = vld [vmem:[#allocation6 + $0x10] sm:$0xff]   ;;  %v434_v6 = vld [vmem:[#allocation6 + $0x58] sm:$0xff]   ;;  %v436_v8 = vld [vmem:[#allocation6 + $0x60] sm:$0xff]   ;;  %s516_s27 = scalar_lea.vmem %s324_s26, 256  ;;  %p521_p11 = scmp.lt.s32.totalorder %s324_s26, %s324_s26 }
  0x3b   :  { %378 = vmatprep.subr.bf16.mxu0 %v430_v2  ;;  %405 = vmatprep.subr.bf16.mxu1 %v430_v2  ;;  %v435_v7 = vld [vmem:[#allocation6 + $0x18] sm:$0xff]   ;;  %v437_v9 = vld [vmem:[#allocation6 + $0x20] sm:$0xff]   ;;  %v438_v10 = vld [vmem:[#allocation6 + $0x68] sm:$0xff]   ;;  %p517_p10 = scmp.ne.s32.totalorder %s324_s26, %s516_s27  ;;  %p522_p12 = scmp.lt.s32.totalorder %s516_s27, %s516_s27 }
  0x3c   :  { %v446_v11 = vld [vmem:[#allocation3 + $0x4] ss:$8 sps:$4 sm:$0xff]   ;;  %v449_v12 = vld [vmem:[#allocation3 + $0x14] ss:$8 sps:$4 sm:$0xff]   ;;  %v444_v18 = vld [vmem:[#allocation3] ss:$8 sps:$4 sm:$0xff]  }
  0x3d   :  { %v439_v13 = vld [vmem:[#allocation6 + $0x28] sm:$0xff]   ;;  %v440_v14 = vld [vmem:[#allocation6 + $0x70] sm:$0xff]   ;;  %251 = vmatprep.mubr.bf16.mxu0 %v446_v11  ;;  %259 = vmatprep.mubr.bf16.mxu1 %v449_v12  ;;  %v442_v16 = vld [vmem:[#allocation6 + $0x78] sm:$0xff]   ;;  %p523_p13 = por %p522_p12, %p521_p11 }
  0x3e   :  { %379 = vmatpush3.bf16.msra.mxu0 %v431_v3  ;;  %413 = vmatpush3.bf16.msra.mxu1 %v431_v3  ;;  %v441_v15 = vld [vmem:[#allocation6 + $0x30] sm:$0xff]   ;;  %v443_v17 = vld [vmem:[#allocation6 + $0x38] sm:$0xff]   ;;  %v356_v23 = vld [vmem:[#allocation8] ss:$0 sm:$0xff] }
  0x3f   :  { %380 = vmatprep.subr.bf16.mxu0 %v432_v4  ;;  %406 = vmatprep.subr.bf16.mxu1 %v432_v4  ;;  %v447_v19 = vld [vmem:[#allocation3 + $0x10] ss:$8 sps:$4 sm:$0xff]   ;;  %p524_p0 = pnand %p523_p13, %p517_p10 }
  0x42   :  { %381 = vmatpush3.bf16.msra.mxu0 %v433_v5  ;;  %414 = vmatpush3.bf16.msra.mxu1 %v433_v5 }
  0x43   :  { %382 = vmatprep.subr.bf16.mxu0 %v434_v6  ;;  %407 = vmatprep.subr.bf16.mxu1 %v434_v6 }
  0x46   :  { %383 = vmatpush3.bf16.msra.mxu0 %v435_v7  ;;  %415 = vmatpush3.bf16.msra.mxu1 %v435_v7 }
  0x47   :  { %384 = vmatprep.subr.bf16.mxu0 %v436_v8  ;;  %408 = vmatprep.subr.bf16.mxu1 %v436_v8 }
  0x4a   :  { %385 = vmatpush3.bf16.msra.mxu0 %v437_v9  ;;  %416 = vmatpush3.bf16.msra.mxu1 %v437_v9 }
  0x4b   :  { %386 = vmatprep.subr.bf16.mxu0 %v438_v10  ;;  %409 = vmatprep.subr.bf16.mxu1 %v438_v10 }
  0x4e   :  { %387 = vmatpush3.bf16.msra.mxu0 %v439_v13  ;;  %417 = vmatpush3.bf16.msra.mxu1 %v439_v13 }
  0x4f   :  { %388 = vmatprep.subr.bf16.mxu0 %v440_v14  ;;  %410 = vmatprep.subr.bf16.mxu1 %v440_v14 }
  0x52   :  { %389 = vmatpush3.bf16.msra.mxu0 %v441_v15  ;;  %418 = vmatpush3.bf16.msra.mxu1 %v441_v15 }
  0x53   :  { %390 = vmatprep.subr.bf16.mxu0 %v442_v16  ;;  %411 = vmatprep.subr.bf16.mxu1 %v442_v16 }
  0x56   :  { %391 = vmatpush3.bf16.msra.mxu0 %v443_v17  ;;  %419 = vmatpush3.bf16.msra.mxu1 %v443_v17 }
  0x59   :  { %252 = vmatmul.mubr.bf16.vlgmr.msra.gmra.mrb[0].mxu0 %v444_v18  ;;  %260 = vmatmul.mubr.bf16.vlgmr.msra.gmra.mrb[0].mxu1 %v447_v19 }
 0x12c   :  { %v392_v20 = vpop.f32.mrb[0].mxu0  ;;  %v398_v21 = vpop.f32.mrb[0].mxu1 }
 0x12d   :  { %v393_v22 = vpop.f32.mrb[1].mxu0  ;;  %v399_v24 = vpop.f32.mrb[1].mxu1 }
 0x12e   :  { %v394_v25 = vadd.f32 %v393_v22, %v392_v20  ;;  %v400_v26 = vadd.f32 %v399_v24, %v398_v21  ;;  %v395_v27 = vpop.f32.mrb[2].mxu0  ;;  %v401_v28 = vpop.f32.mrb[2].mxu1 }
 0x12f   :  { %v396_v29 = vpop.f32.mrb[3].mxu0  ;;  %v402_v30 = vpop.f32.mrb[3].mxu1 }
 0x130   :  { %v290_v31 = vadd.f32 %v394_v25, %v356_v23  ;;  %v292_v32 = vadd.f32 %v400_v26, %v356_v23  ;;  %v397_v33 = vadd.f32 %v396_v29, %v395_v27  ;;  %v403_v34 = vadd.f32 %v402_v30, %v401_v28 }
 0x132   :  { %v291_v35 = vadd.f32 %v397_v33, %v356_v23  ;;  %v293_v36 = vadd.f32 %v403_v34, %v356_v23  ;;  %v294_v37 = vmax.f32 %v290_v31, 0.0  ;;  %v296_v38 = vmax.f32 %v292_v32, 0.0 }
 0x134   :  { %v295_v39 = vmax.f32 %v291_v35, 0.0  ;;  %v297_v40 = vmax.f32 %v293_v36, 0.0 }
 0x136   :  { %v368_v41 = vpack.c.bf16 %v295_v39, %v294_v37  ;;  %v373_v42 = vpack.c.bf16 %v297_v40, %v296_v38 }
 0x138   :  { %369 = vst [vmem:[#allocation9] sm:$0xff] %v368_v41   ;;  %375 = vst [vmem:[#allocation9 + $0x8] sm:$0xff] %v373_v42  }
 0x139   :  { %527 = shalt.err (!%p524_p0)
}
 0x13a   :  { %s528_s30 = scalar_lea.hbm %s629_s3, 256 }
 0x13b   :  { %p529_p1 = scmp.ne.s32.totalorder %s629_s3, %s528_s30  ;;  %p532_p2 = scmp.lt.u32.totalorder %s528_s30, %s629_s3 }
 0x13d   :  { %p534_p3 = pnand %p532_p2, %p529_p1 }
 0x13f   :  { %537 = shalt.err (!%p534_p3)
}
 0x140   :  { %329 = dma.vmem_to_hbm [thread:$0]  %s324_s26, 256, %s629_s3, [#allocation5], %s545_s22, %s545_s22, %s546_s23  }
 0x141   :  { %542 = dma.done.wait [#allocation5], 256  }
 0x142   :  { %543 = vsyncadd [#allocation5], 4294967040 }
 0x143   :  { %333 = vsyncpa [#allocation4], 1 }
 0x144   :  { %334 = vsyncpa [#allocation7], 1 }
 0x145   :  { %335 = vsyncpa [#allocation5], 1 }

// kernel: repmlp_resnet_forward.35
= control target key start
LH: loop header
LB: loop body
LE: loop exit
PB: predicated region body
PF: predicated region fallthrough
CT: control target
= control target key end

     0   :  { %s1252_s0 = inlined_call_operand.hbm [shape: bf16[2,16,16], index: 0, kind: input, shape index: {}]   ;;  %s1253_s1 = inlined_call_operand.hbm [shape: bf16[16,64], index: 1, kind: input, shape index: {}]   ;;  %s1254_s2 = inlined_call_operand.hbm [shape: f32[1,64], index: 2, kind: input, shape index: {}]   ;;  %s1255_s3 = inlined_call_operand.hbm [shape: bf16[2,16,64], index: 3, kind: input, shape index: {}]   ;;  %s1256_s4 = inlined_call_operand.hbm [shape: bf16[2,16,64], index: 4, kind: output, shape index: {}]  }
   0x1   :  { %1263 = sst [smem:[#allocation15_spill]] %s1252_s0 }
   0x2   :  { %1264 = sst [smem:[#allocation16_spill]] %s1253_s1 }
   0x3   :  { %1265 = sst [smem:[#allocation17_spill]] %s1254_s2 }
   0x4   :  { %9 = vsyncpa [#allocation3], 0 }
   0x5   :  { %11 = vsyncpa [#allocation3 + $0x1], 0 }
   0x6   :  { %12 = vsyncpa [#allocation6], 0 }
   0x7   :  { %13 = vsyncpa [#allocation9], 0 }
   0x8   :  { %15 = vsyncpa [#allocation9 + $0x1], 0 }
   0x9   :  { %16 = vsyncpa [#allocation4], 0 }
   0xa   :  { %18 = vsyncpa [#allocation4 + $0x1], 0  ;;  %s933_s15 = smov 0   ;;  %s935_s16 = smov 0  }
   0xb   :  { %s937_s17 = smov 0   ;;  %s939_s18 = smov 0  }
   0xc   :  { %s941_s19 = smov 0   ;;  %s943_s20 = smov 0  }
   0xd LB: > { %s547_s21 = sadd.s32 4294967295, %s895_s20   ;;  %s548_s22 = sadd.s32 4294967294, %s895_s20   ;;  %s895_s20 = sphi %s943_s20, %s24_s20   ;;  %s891_s19 = sphi %s941_s19, %s1289_s19   ;;  %s887_s18 = sphi %s939_s18, %s1288_s18   ;;  %s883_s17 = sphi %s937_s17, %s1287_s17   ;;  %s879_s16 = sphi %s935_s16, %s1286_s16   ;;  %s875_s15 = sphi %s933_s15, %s1285_s15  }
   0xe   : > { %p56_p0 = scmp.ne.s32.totalorder %s879_s16, %s875_s15  ;;  %p967_p1 = scmp.eq.s32.totalorder %s547_s21, 0 }
   0xf   : > { %p971_p2 = scmp.eq.s32.totalorder %s547_s21, 1  ;;  %p168_p3 = scmp.eq.s32.totalorder %s548_s22, 1 }
  0x10   : > { %s1266_s23 = scalar_select %p967_p1, 1, 0 }
  0x11   : > { %p977_p4 = por %p967_p1, %p56_p0  ;;  %p549_p5 = scmp.ge.s32.totalorder %s895_s20, 1 }
  0x12   : > { %p982_p6 = por %p168_p3, %p56_p0  ;;  %p175_p7 = scmp.lt.s32.totalorder %s895_s20, 3 }
  0x13   : > { %s1268_s25 = scalar_select %p977_p4, 1, 0 }
  0x14   : > { %s1269_s26 = scalar_select %p982_p6, 1, 0 }
  0x15   : > { %p987_p8 = pnand %p549_p5, %p175_p7  ;;  %s897_s28 = smov [#allocation5]  }
  0x16   : > { %s189_s29 = sshll.u32 %s897_s28, 4  ;;  %s898_s5 = smov [#allocation7]   ;;  %s991_s29 = int_to_ptr.vmem [resolvable:$true] %s189_s29 }
  0x17   : > { %p607_p9 = pneg %p987_p8  ;;  %s205_s6 = sshll.u32 %s898_s5, 4  ;;  %s1002_s6 = int_to_ptr.vmem [resolvable:$true] %s205_s6 }
  0x18   : > { %s1272_s1 = sld [smem:[#allocation16_spill]] }
  0x19   : > { %p998_p11 = pnand %p607_p9, %p967_p1 }
  0x1b   : > { %p691_p13 = pneg %p998_p11 }
  0x1e   : > { %s689_s9 = scalar_lea.hbm %s1272_s1, 128 }
  0x1f   : > { %p690_p12 = scmp.ne.s32.totalorder %s1272_s1, %s689_s9  ;;  %p696_p5 = scmp.lt.u32.totalorder %s689_s9, %s1272_s1 }
  0x21   : > { %p692_p0 = pnand %p691_p13, %p690_p12 }
  0x23   : > { %p693_p3 = pneg %p692_p0 }
  0x25   : > { %p698_p7 = pnand %p696_p5, %p693_p3 }
  0x27   : > { %701 = shalt.err (!%p698_p7)
}
  0x28   : > { %s702_s14 = scalar_lea.vmem %s991_s29, 128  ;;  %p710_p1 = scmp.lt.s32.totalorder %s991_s29, %s991_s29 }
  0x29   : > { %p703_p9 = scmp.ne.s32.totalorder %s991_s29, %s702_s14  ;;  %p711_p12 = scmp.lt.s32.totalorder %s702_s14, %s702_s14 }
  0x2b   : > { %p705_p10 = pnand %p703_p9, %p691_p13  ;;  %p712_p0 = por %p711_p12, %p710_p1 }
  0x2d   : > { %p706_p6 = pneg %p705_p10 }
  0x2f   : > { %p713_p4 = pnand %p712_p0, %p706_p6 }
  0x31   : > { %716 = shalt.err (!%p713_p4)
}
  0x32   : > { %s899_s21 = smov 64   ;;  %s900_s22 = smov 4  }
  0x33   : > { %610 = dma.hbm_to_vmem [thread:$0]  (!%p998_p11), %s1272_s1, 128, %s991_s29, [#allocation6], %s899_s21, %s899_s21, %s900_s22  }
  0x34   : > { %s1273_s2 = sld [smem:[#allocation17_spill]] }
  0x3a   : > { %s717_s9 = scalar_lea.hbm %s1273_s2, 16 }
  0x3b   : > { %p718_p1 = scmp.ne.s32.totalorder %s1273_s2, %s717_s9  ;;  %p724_p10 = scmp.lt.u32.totalorder %s717_s9, %s1273_s2 }
  0x3d   : > { %p720_p4 = pnand %p718_p1, %p691_p13 }
  0x3f   : > { %p721_p6 = pneg %p720_p4 }
  0x41   : > { %p726_p3 = pnand %p724_p10, %p721_p6 }
  0x43   : > { %729 = shalt.err (!%p726_p3)
}
  0x44   : > { %s730_s29 = scalar_lea.vmem %s1002_s6, 16  ;;  %s737_s14 = scalar_lea.vmem %s1002_s6, 32 }
  0x45   : > { %p731_p5 = scmp.ne.s32.totalorder %s1002_s6, %s730_s29  ;;  %p738_p12 = scmp.lt.s32.totalorder %s1002_s6, %s1002_s6 }
  0x46   : > { %p739_p0 = scmp.lt.s32.totalorder %s737_s14, %s730_s29 }
  0x47   : > { %p733_p7 = pnand %p731_p5, %p691_p13 }
  0x48   : > { %p740_p1 = por %p739_p0, %p738_p12 }
  0x49   : > { %p734_p9 = pneg %p733_p7 }
  0x4b   : > { %p741_p4 = pnand %p740_p1, %p734_p9 }
  0x4d   : > { %744 = shalt.err (!%p741_p4)
}
  0x4e   : > { %613 = dma.hbm_to_vmem [thread:$0]  (!%p998_p11), %s1273_s2, 16, %s1002_s6, [#allocation6]  }
  0x4f   : > { %s33_s7 = sadd.s32 1, %s891_s19  ;;  %s43_s8 = sadd.s32 1, %s883_s17 }
  0x50   : > { %p34_p13 = scmp.ge.s32.totalorder %s33_s7, 2  ;;  %p50_p6 = scmp.ne.s32.totalorder %s883_s17, %s879_s16 }
  0x51   : > { %p51_p10 = scmp.eq.s32.totalorder %s895_s20, 0  ;;  %p627_p3 = scmp.lt.s32.totalorder %s895_s20, 2 }
  0x52   : > { %s1291_s7 = smov (%p34_p13, %s33_s7), 0  ;;  %p1070_p7 = por %p971_p2, %p50_p6 }
  0x53   : > { %p52_p5 = por %p51_p10, %p50_p6  ;;  %s40_s9 = ssub.s32 %s891_s19, %s1291_s7 }
  0x54   : > { %s1274_s30 = scalar_select %p1070_p7, 1, 0 }
  0x55   : > { %s1077_s10 = sand.u32 1, %s883_s17   ;;  %p41_p11 = scmp.eq.s32.totalorder %s40_s9, 0 }
  0x56   : > { %s1260_s6 = sshll.u32 %s1077_s10, 3  ;;  %s1261_s11 = sshll.u32 %s891_s19, 7 }
  0x57   : > { %s1082_s12 = scalar_select %p41_p11, %s883_s17, %s43_s8  }
  0x58   : > { %s1275_s0 = sld [smem:[#allocation15_spill]]  ;;  %s220_s14 = scalar_lea.vmem [#allocation2], %s1260_s6 }
  0x59   : > { %s227_s28 = sshll.u32 %s220_s14, 4  ;;  %p1095_p2 = pnand %p627_p3, %p52_p5  ;;  %s1099_s28 = int_to_ptr.vmem [resolvable:$true] %s227_s28 }
  0x5b   : > { %p747_p12 = pneg %p1095_p2 }
  0x5e   : > { %s1089_s24 = scalar_lea.hbm %s1275_s0, %s1261_s11  ;;  %s750_s14 = scalar_lea.hbm %s1275_s0, 256 }
  0x5f   : > { %s745_s9 = scalar_lea.hbm %s1089_s24, 128  ;;  %p751_p4 = scmp.lt.u32.totalorder %s1089_s24, %s1275_s0 }
  0x60   : > { %p746_p9 = scmp.ne.s32.totalorder %s1089_s24, %s745_s9  ;;  %p752_p13 = scmp.lt.u32.totalorder %s750_s14, %s745_s9 }
  0x61   : > { %p754_p10 = scmp.lt.u32.totalorder %s745_s9, %s1089_s24 }
  0x62   : > { %p748_p0 = pnand %p747_p12, %p746_p9  ;;  %p753_p6 = por %p752_p13, %p751_p4 }
  0x64   : > { %p749_p1 = pneg %p748_p0  ;;  %p755_p3 = por %p754_p10, %p753_p6 }
  0x66   : > { %p756_p5 = pnand %p755_p3, %p749_p1 }
  0x68   : > { %759 = shalt.err (!%p756_p5)
}
  0x69   : > { %s760_s8 = scalar_lea.vmem %s1099_s28, 128  ;;  %s901_s13 = smov [#allocation2]  }
  0x6a   : > { %p761_p11 = scmp.ne.s32.totalorder %s1099_s28, %s760_s8  ;;  %s765_s29 = sshll.u32 %s901_s13, 4  ;;  %s766_s29 = int_to_ptr.vmem [resolvable:$false] %s765_s29 }
  0x6b   : > { %s767_s6 = scalar_lea.vmem %s766_s29, 256  ;;  %p768_p7 = scmp.lt.s32.totalorder %s1099_s28, %s766_s29 }
  0x6c   : > { %p763_p9 = pnand %p761_p11, %p747_p12  ;;  %p769_p4 = scmp.lt.s32.totalorder %s767_s6, %s760_s8 }
  0x6e   : > { %p764_p0 = pneg %p763_p9  ;;  %p770_p13 = por %p769_p4, %p768_p7 }
  0x70   : > { %p771_p6 = pnand %p770_p13, %p764_p0 }
  0x72   : > { %774 = shalt.err (!%p771_p6)
}
  0x73   : > { %s1277_s11 = scalar_lea.sflag [#allocation3], %s1077_s10  ;;  %s1278_s9 = sshll.u32 %s891_s19, 7 }
  0x74   : > { %617 = dma.hbm_to_vmem [thread:$0]  (!%p1095_p2), %s1089_s24, 128, %s1099_s28, %s1277_s11, %s899_s21, %s899_s21, %s900_s22  }
  0x75   : > { %s1137_s13 = scalar_lea.hbm %s1255_s3, %s1278_s9  ;;  %s1279_s29 = sshll.u32 %s1077_s10, 3 }
  0x76   : > { %s241_s6 = scalar_lea.vmem [#allocation8], %s1279_s29  ;;  %s238_s1 = scalar_lea.sflag [#allocation9], %s1077_s10 }
  0x77   : > { %s249_s0 = sshll.u32 %s241_s6, 4  ;;  %s775_s2 = scalar_lea.hbm %s1137_s13, 128  ;;  %s1141_s0 = int_to_ptr.vmem [resolvable:$true] %s249_s0 }
  0x78   : > { %p776_p7 = scmp.ne.s32.totalorder %s1137_s13, %s775_s2  ;;  %s780_s11 = scalar_lea.hbm %s1255_s3, 256 }
  0x79   : > { %p781_p3 = scmp.lt.u32.totalorder %s1137_s13, %s1255_s3  ;;  %p782_p5 = scmp.lt.u32.totalorder %s780_s11, %s775_s2 }
  0x7a   : > { %p778_p1 = pnand %p776_p7, %p747_p12  ;;  %p784_p9 = scmp.lt.u32.totalorder %s775_s2, %s1137_s13 }
  0x7b   : > { %p783_p11 = por %p782_p5, %p781_p3 }
  0x7c   : > { %p779_p10 = pneg %p778_p1 }
  0x7d   : > { %p785_p0 = por %p784_p9, %p783_p11 }
  0x7f   : > { %p786_p4 = pnand %p785_p0, %p779_p10 }
  0x81   : > { %789 = shalt.err (!%p786_p4)
}
  0x82   : > { %s790_s8 = scalar_lea.vmem %s1141_s0, 128  ;;  %s902_s29 = smov [#allocation8]  }
  0x83   : > { %p791_p13 = scmp.ne.s32.totalorder %s1141_s0, %s790_s8  ;;  %s795_s6 = sshll.u32 %s902_s29, 4  ;;  %s796_s6 = int_to_ptr.vmem [resolvable:$false] %s795_s6 }
  0x84   : > { %s797_s24 = scalar_lea.vmem %s796_s6, 256  ;;  %p798_p1 = scmp.lt.s32.totalorder %s1141_s0, %s796_s6 }
  0x85   : > { %p793_p6 = pnand %p791_p13, %p747_p12  ;;  %p799_p3 = scmp.lt.s32.totalorder %s797_s24, %s790_s8 }
  0x87   : > { %p794_p7 = pneg %p793_p6  ;;  %p800_p5 = por %p799_p3, %p798_p1 }
  0x89   : > { %p801_p11 = pnand %p800_p5, %p794_p7 }
  0x8b   : > { %804 = shalt.err (!%p801_p11)
}
  0x8c   : > { %620 = dma.hbm_to_vmem [thread:$0]  (!%p1095_p2), %s1137_s13, 128, %s1141_s0, %s238_s1, %s899_s21, %s899_s21, %s900_s22  }
  0x8d   : > { %261 = sbr.rel (%p987_p8) target bundleno = 396 (0x18c), region = 36  ;;  %s1175_s2 = sand.u32 (!%p987_p8), 1, %s879_s16  }
  0x8e   : > { %s1178_s28 = sshll.u32 (!%p987_p8), %s1175_s2, 3  ;;  %s264_s5 = scalar_lea.sflag (!%p987_p8), [#allocation3], %s1175_s2 }
  0x8f   : > { %s267_s11 = scalar_lea.vmem (!%p987_p8), [#allocation2], %s1178_s28  ;;  %p1280_p12 = scmp.ne.s32.totalorder (!%p987_p8), %s1268_s25, 0 }
  0x94   : > { %858 = dma.done.wait (%p1280_p12), %s264_s5, 128  }
  0x95   : > { %860 = vsyncadd (%p1280_p12), %s264_s5, 4294967168  ;;  %p1281_p2 = scmp.ne.s32.totalorder %s1266_s23, 0 }
  0x97   : > { %862 = dma.done.wait (%p1281_p2), [#allocation6], 144  }
  0x98   : > { %864 = vsyncadd (%p1281_p2), [#allocation6], 4294967152  ;;  %s281_s0 = scalar_lea.sflag [#allocation9], %s1175_s2  ;;  %s284_s1 = scalar_lea.vmem [#allocation8], %s1178_s28 }
  0x99   : > { %866 = dma.done.wait (%p1280_p12), %s281_s0, 128  }
  0x9a   : > { %868 = vsyncadd (%p1280_p12), %s281_s0, 4294967168  ;;  %v903_v0 = vmov 0.0   ;;  %vm904_vm0 = vmmov 0   ;;  %v687_v1 = vld [vmem:[#allocation5] sm:$0xff]   ;;  %v688_v2 = vld [vmem:[%s267_s11] sm:$0xff]   ;;  %vm337_vm1 = vcmask 130048  }
  0x9b   : > { %587 = vmatprep.subr.bf16.mxu0 %v903_v0  ;;  %589 = vmatprep.mubr.msk.bf16.mxu0 %vm904_vm0, %v903_v0  ;;  %v582_v3 = vld [vmem:[%s284_s1] sm:$0xff]   ;;  %v565_v4 = vld [vmem:[#allocation7] ss:$0 sm:$0xff]  ;;  %s580_s23 = sshll.u32 %s887_s18, 7  ;;  %s313_s25 = scalar_lea.vmem [#allocation10], %s1178_s28  ;;  %vm398_vm2 = vcmask 519168  }
  0x9c   : > { %588 = vmatpush3.bf16.msra.mxu0 %v687_v1  ;;  %v583_v5 = vunpack.c.l.bf16 %v582_v3  ;;  %v584_v9 = vunpack.c.h.bf16 %v582_v3  ;;  %s416_s27 = sshll.u32 %s313_s25, 4  ;;  %s1201_s10 = scalar_lea.hbm %s1256_s4, %s580_s23  ;;  %s1203_s27 = int_to_ptr.vmem [resolvable:$true] %s416_s27 }
  0x9d   : > { %s402_s13 = scalar_lea.sflag [#allocation4], %s1175_s2  ;;  %s805_s18 = scalar_lea.vmem %s1203_s27, 128 }
  0x9e   : > { %p806_p8 = scmp.ne.s32.totalorder %s1203_s27, %s805_s18  ;;  %p1282_p10 = scmp.ne.s32.totalorder %s1274_s30, 0 }
  0x9f   : > { %590 = vmatmul.mubr.msk.bf16.vlgmr.msra.gmra.mrb[0].mxu0 %vm337_vm1, %v688_v2  ;;  %s905_s9 = smov [#allocation10]  }
  0xa0   : > { %p807_p9 = pnand %p806_p8, %p1282_p10  ;;  %s809_s14 = sshll.u32 %s905_s9, 4  ;;  %s810_s14 = int_to_ptr.vmem [resolvable:$false] %s809_s14 }
  0xa1   : > { %s811_s8 = scalar_lea.vmem %s810_s14, 256  ;;  %p812_p4 = scmp.lt.s32.totalorder %s1203_s27, %s810_s14 }
  0xa2   : > { %p808_p0 = pneg %p807_p9  ;;  %p813_p13 = scmp.lt.s32.totalorder %s811_s8, %s805_s18 }
  0xa4   : > { %p814_p6 = por %p813_p13, %p812_p4 }
  0xa6   : > { %p815_p7 = pnand %p814_p6, %p808_p0 }
 0x172   : > { %v375_v6 = vpop.f32.mrb[0].mxu0 }
 0x173   : > { %v376_v7 = vadd.f32 %v565_v4, %v375_v6  ;;  %v591_v8 = vpop.f32.mrb[1].mxu0 }
 0x174   : > { %v378_v10 = vpop.f32.mrb[2].mxu0 }
 0x175   : > { %v386_v11 = vadd.f32 %v583_v5, %v376_v7  ;;  %v379_v12 = vadd.f32 %v565_v4, %v378_v10  ;;  %v592_v13 = vpop.f32.mrb[3].mxu0 }
 0x177   : > { %v388_v14 = vmax.f32 %v386_v11, 0.0  ;;  %v387_v15 = vadd.f32 %v584_v9, %v379_v12 }
 0x179   : > { %v578_v16 = vpack.c.bf16 %v388_v14, %v388_v14  ;;  %v389_v17 = vmax.f32 %v387_v15, 0.0 }
 0x17b   : > { %399 = vst.msk [vmem:[%s313_s25] sm:$0xf] %vm398_vm2, %v578_v16  ;;  %v579_v18 = vpack.c.bf16 %v389_v17, %v389_v17 }
 0x17d   : > { %400 = vst.msk [vmem:[%s313_s25 + $0x4] sm:$0xf] %vm398_vm2, %v579_v18 }
 0x17e   : > { %818 = shalt.err (!%p815_p7)
}
 0x17f   : > { %s819_s29 = scalar_lea.hbm %s1201_s10, 128  ;;  %s823_s28 = scalar_lea.hbm %s1256_s4, 256 }
 0x180   : > { %p820_p1 = scmp.ne.s32.totalorder %s1201_s10, %s819_s29  ;;  %p824_p11 = scmp.lt.u32.totalorder %s1201_s10, %s1256_s4 }
 0x181   : > { %p825_p12 = scmp.lt.u32.totalorder %s823_s28, %s819_s29  ;;  %p827_p8 = scmp.lt.u32.totalorder %s819_s29, %s1201_s10 }
 0x182   : > { %p821_p3 = pnand %p820_p1, %p1282_p10 }
 0x183   : > { %p826_p2 = por %p825_p12, %p824_p11 }
 0x184   : > { %p822_p5 = pneg %p821_p3 }
 0x185   : > { %p828_p9 = por %p827_p8, %p826_p2 }
 0x187   : > { %p829_p0 = pnand %p828_p9, %p822_p5 }
 0x189   : > { %832 = shalt.err (!%p829_p0)
}
 0x18a   : > { %s906_s0 = smov 64   ;;  %s907_s1 = smov 4  }
 0x18b   : > { %605 = dma.vmem_to_hbm [thread:$0]  (%p1282_p10), %s1203_s27, 128, %s1201_s10, %s402_s13, %s906_s0, %s906_s0, %s907_s1  }
 0x18c PF: > { %s431_s23 = sand.u32 1, %s875_s15   ;;  %p1283_p4 = scmp.ne.s32.totalorder %s1269_s26, 0 }
 0x18d   : > { %p1284_p13 = scmp.ge.s32.totalorder %s895_s20, 2  ;;  %s432_s25 = scalar_lea.sflag [#allocation4], %s431_s23 }
 0x18f   : > { %p622_p6 = pnand %p1284_p13, %p1283_p4 }
 0x191   : > { %870 = dma.done.wait (!%p622_p6), %s432_s25, 128  }
 0x192   : > { %872 = vsyncadd (!%p622_p6), %s432_s25, 4294967168  ;;  %s24_s20 = sadd.s32 1, %s895_s20   ;;  %s1285_s15 = smov %s879_s16 }
 0x193   : > { %p21_p7 = scmp.ge.s32.totalorder %s24_s20, 4   ;;  %s1286_s16 = smov %s883_s17 }
 0x194   : > { %s1287_s17 = smov %s1082_s12  ;;  %s1288_s18 = smov %s891_s19 }
 0x195   : > { %s1289_s19 = smov %s1291_s7  ;;  %23 = sbr.rel (!%p21_p7) target bundleno = 13 (0xd), region = 104 }
 0x19c   :  { %437 = vsyncpa [#allocation3], 1 }
 0x19d   :  { %439 = vsyncpa [#allocation3 + $0x1], 1 }
 0x19e   :  { %440 = vsyncpa [#allocation6], 1 }
 0x19f   :  { %441 = vsyncpa [#allocation9], 1 }
 0x1a0   :  { %443 = vsyncpa [#allocation9 + $0x1], 1 }
 0x1a1   :  { %444 = vsyncpa [#allocation4], 1 }
 0x1a2   :  { %446 = vsyncpa [#allocation4 + $0x1], 1 }

// kernel: repmlp_resnet_forward.32
= control target key start
LH: loop header
LB: loop body
LE: loop exit
PB: predicated region body
PF: predicated region fallthrough
CT: control target
= control target key end

     0   :  { %8 = vsyncpa [#allocation4], 0  ;;  %s520_s0 = inlined_call_operand.hbm [shape: bf16[32,128], index: 0, kind: input, shape index: {}]   ;;  %s521_s1 = inlined_call_operand.hbm [shape: bf16[128,128], index: 1, kind: input, shape index: {}]   ;;  %s522_s2 = inlined_call_operand.hbm [shape: f32[1,128], index: 2, kind: input, shape index: {}]   ;;  %s523_s3 = inlined_call_operand.hbm [shape: bf16[32,128], index: 3, kind: output, shape index: {}]  }
   0x1   :  { %9 = vsyncpa [#allocation7], 0 }
   0x2   :  { %10 = vsyncpa [#allocation5], 0  ;;  %s430_s12 = smov [#allocation6]   ;;  %s431_s14 = smov [#allocation3]  }
   0x3   :  { %s28_s13 = sshll.u32 %s430_s12, 4  ;;  %s16_s15 = sshll.u32 %s431_s14, 4  ;;  %s29_s13 = int_to_ptr.vmem [resolvable:$true] %s28_s13  ;;  %s456_s15 = int_to_ptr.vmem [resolvable:$true] %s16_s15 }
   0x4   :  { %s336_s18 = scalar_lea.hbm %s521_s1, 1024 }
   0x5   :  { %p337_p0 = scmp.ne.s32.totalorder %s521_s1, %s336_s18  ;;  %p340_p1 = scmp.lt.u32.totalorder %s336_s18, %s521_s1 }
   0x7   :  { %p342_p2 = pnand %p340_p1, %p337_p0 }
   0x9   :  { %345 = shalt.err (!%p342_p2)
}
   0xa   :  { %s346_s23 = scalar_lea.vmem %s29_s13, 1024  ;;  %p351_p4 = scmp.lt.s32.totalorder %s29_s13, %s29_s13 }
   0xb   :  { %p347_p3 = scmp.ne.s32.totalorder %s29_s13, %s346_s23  ;;  %p352_p5 = scmp.lt.s32.totalorder %s346_s23, %s346_s23 }
   0xd   :  { %p353_p6 = por %p352_p5, %p351_p4 }
   0xf   :  { %p354_p7 = pnand %p353_p6, %p347_p3 }
  0x11   :  { %357 = shalt.err (!%p354_p7)
}
  0x12   :  { %s432_s24 = smov 64   ;;  %s433_s25 = smov 4  }
  0x13   :  { %34 = dma.hbm_to_vmem [thread:$0]  %s521_s1, 1024, %s29_s13, [#allocation7], %s432_s24, %s432_s24, %s433_s25  }
  0x14   :  { %s358_s30 = scalar_lea.hbm %s520_s0, 256 }
  0x15   :  { %p359_p8 = scmp.ne.s32.totalorder %s520_s0, %s358_s30  ;;  %p362_p9 = scmp.lt.u32.totalorder %s358_s30, %s520_s0 }
  0x17   :  { %p364_p10 = pnand %p362_p9, %p359_p8 }
  0x19   :  { %367 = shalt.err (!%p364_p10)
}
  0x1a   :  { %s368_s8 = scalar_lea.vmem %s456_s15, 256  ;;  %p373_p12 = scmp.lt.s32.totalorder %s456_s15, %s456_s15 }
  0x1b   :  { %p369_p11 = scmp.ne.s32.totalorder %s456_s15, %s368_s8  ;;  %p374_p13 = scmp.lt.s32.totalorder %s368_s8, %s368_s8 }
  0x1d   :  { %p375_p0 = por %p374_p13, %p373_p12 }
  0x1f   :  { %p376_p1 = pnand %p375_p0, %p369_p11 }
  0x21   :  { %379 = shalt.err (!%p376_p1)
}
  0x22   :  { %22 = dma.hbm_to_vmem [thread:$0]  %s520_s0, 256, %s456_s15, [#allocation4], %s432_s24, %s432_s24, %s433_s25  }
  0x23   :  { %s434_s10 = smov [#allocation8]   ;;  %s380_s14 = scalar_lea.hbm %s522_s2, 16 }
  0x24   :  { %s41_s11 = sshll.u32 %s434_s10, 4  ;;  %p381_p2 = scmp.ne.s32.totalorder %s522_s2, %s380_s14  ;;  %s42_s11 = int_to_ptr.vmem [resolvable:$true] %s41_s11 }
  0x25   :  { %p384_p3 = scmp.lt.u32.totalorder %s380_s14, %s522_s2 }
  0x27   :  { %p386_p4 = pnand %p384_p3, %p381_p2 }
  0x29   :  { %389 = shalt.err (!%p386_p4)
}
  0x2a   :  { %s390_s20 = scalar_lea.vmem %s42_s11, 16  ;;  %s394_s0 = scalar_lea.vmem %s42_s11, 32 }
  0x2b   :  { %p391_p5 = scmp.ne.s32.totalorder %s42_s11, %s390_s20  ;;  %p395_p6 = scmp.lt.s32.totalorder %s42_s11, %s42_s11 }
  0x2c   :  { %p396_p7 = scmp.lt.s32.totalorder %s394_s0, %s390_s20 }
  0x2e   :  { %p397_p8 = por %p396_p7, %p395_p6 }
  0x30   :  { %p398_p9 = pnand %p397_p8, %p391_p5 }
  0x32   :  { %401 = shalt.err (!%p398_p9)
}
  0x33   :  { %44 = dma.hbm_to_vmem [thread:$0]  %s522_s2, 16, %s42_s11, [#allocation7]  }
  0x34   :  { %424 = dma.done.wait [#allocation4], 256  }
  0x35   :  { %425 = vsyncadd [#allocation4], 4294967040 }
  0x36   :  { %426 = dma.done.wait [#allocation7], 1040  }
  0x37   :  { %427 = vsyncadd [#allocation7], 4294966256  ;;  %v326_v0 = vld [vmem:[#allocation6] sm:$0xff]   ;;  %v327_v1 = vld [vmem:[#allocation6 + $0x8] sm:$0xff]   ;;  %s435_s2 = smov [#allocation9]  }
  0x38   :  { %300 = vmatprep.subr.bf16.mxu0 %v326_v0  ;;  %v328_v2 = vld [vmem:[#allocation6 + $0x10] sm:$0xff]   ;;  %v329_v3 = vld [vmem:[#allocation6 + $0x18] sm:$0xff]   ;;  %v330_v5 = vld [vmem:[#allocation6 + $0x20] sm:$0xff]   ;;  %s247_s22 = sshll.u32 %s435_s2, 4  ;;  %s248_s22 = int_to_ptr.vmem [resolvable:$true] %s247_s22 }
  0x39   :  { %301 = vmatpush3.bf16.msra.mxu0 %v326_v0  ;;  %v334_v4 = vld [vmem:[#allocation3] sm:$0xff]   ;;  %v331_v6 = vld [vmem:[#allocation6 + $0x28] sm:$0xff]   ;;  %v333_v8 = vld [vmem:[#allocation6 + $0x38] sm:$0xff]   ;;  %s402_s23 = scalar_lea.vmem %s248_s22, 256  ;;  %p407_p11 = scmp.lt.s32.totalorder %s248_s22, %s248_s22 }
  0x3a   :  { %302 = vmatprep.subr.bf16.mxu0 %v327_v1  ;;  %316 = vmatprep.mubr.bf16.mxu0 %v334_v4  ;;  %v332_v7 = vld [vmem:[#allocation6 + $0x30] sm:$0xff]   ;;  %v335_v9 = vld [vmem:[#allocation3 + $0x8] sm:$0xff]   ;;  %v270_v11 = vld [vmem:[#allocation8] ss:$0 sm:$0xff]  ;;  %p403_p10 = scmp.ne.s32.totalorder %s248_s22, %s402_s23  ;;  %p408_p12 = scmp.lt.s32.totalorder %s402_s23, %s402_s23 }
  0x3c   :  { %p409_p13 = por %p408_p12, %p407_p11 }
  0x3d   :  { %303 = vmatpush3.bf16.msra.mxu0 %v327_v1 }
  0x3e   :  { %304 = vmatprep.subr.bf16.mxu0 %v328_v2  ;;  %p410_p0 = pnand %p409_p13, %p403_p10 }
  0x41   :  { %305 = vmatpush3.bf16.msra.mxu0 %v328_v2 }
  0x42   :  { %306 = vmatprep.subr.bf16.mxu0 %v329_v3 }
  0x45   :  { %307 = vmatpush3.bf16.msra.mxu0 %v329_v3 }
  0x46   :  { %308 = vmatprep.subr.bf16.mxu0 %v330_v5 }
  0x49   :  { %309 = vmatpush3.bf16.msra.mxu0 %v330_v5 }
  0x4a   :  { %310 = vmatprep.subr.bf16.mxu0 %v331_v6 }
  0x4d   :  { %311 = vmatpush3.bf16.msra.mxu0 %v331_v6 }
  0x4e   :  { %312 = vmatprep.subr.bf16.mxu0 %v332_v7 }
  0x51   :  { %313 = vmatpush3.bf16.msra.mxu0 %v332_v7 }
  0x52   :  { %314 = vmatprep.subr.bf16.mxu0 %v333_v8 }
  0x55   :  { %315 = vmatpush3.bf16.msra.mxu0 %v333_v8 }
  0x58   :  { %317 = vmatmul.mubr.bf16.vlgmr.msra.gmra.mrb[0].mxu0 %v335_v9 }
 0x12b   :  { %v318_v10 = vpop.f32.mrb[0].mxu0 }
 0x12c   :  { %v181_v12 = vpop.f32.mrb[1].mxu0  ;;  %v220_v14 = vadd.f32 %v318_v10, %v270_v11 }
 0x12d   :  { %v319_v13 = vpop.f32.mrb[2].mxu0  ;;  %v218_v17 = vadd.f32 %v270_v11, %v181_v12 }
 0x12e   :  { %v221_v15 = vadd.f32 %v319_v13, %v270_v11  ;;  %v184_v16 = vpop.f32.mrb[3].mxu0 }
 0x12f   :  { %v219_v18 = vadd.f32 %v270_v11, %v184_v16 }
 0x130   :  { %v287_v19 = vpack.c.bf16 %v221_v15, %v220_v14 }
 0x131   :  { %v282_v20 = vpack.c.bf16 %v219_v18, %v218_v17 }
 0x132   :  { %289 = vst [vmem:[#allocation9 + $0x8] sm:$0xff] %v287_v19  }
 0x133   :  { %283 = vst [vmem:[#allocation9] sm:$0xff] %v282_v20  }
 0x134   :  { %413 = shalt.err (!%p410_p0)
}
 0x135   :  { %s414_s28 = scalar_lea.hbm %s523_s3, 256 }
 0x136   :  { %p415_p1 = scmp.ne.s32.totalorder %s523_s3, %s414_s28  ;;  %p418_p2 = scmp.lt.u32.totalorder %s414_s28, %s523_s3 }
 0x138   :  { %p420_p3 = pnand %p418_p2, %p415_p1 }
 0x13a   :  { %423 = shalt.err (!%p420_p3)
}
 0x13b   :  { %253 = dma.vmem_to_hbm [thread:$0]  %s248_s22, 256, %s523_s3, [#allocation5], %s432_s24, %s432_s24, %s433_s25  }
 0x13c   :  { %428 = dma.done.wait [#allocation5], 256  }
 0x13d   :  { %429 = vsyncadd [#allocation5], 4294967040 }
 0x13e   :  { %257 = vsyncpa [#allocation4], 1 }
 0x13f   :  { %258 = vsyncpa [#allocation7], 1 }
 0x140   :  { %259 = vsyncpa [#allocation5], 1 }

// kernel: repmlp_resnet_forward.37
= control target key start
LH: loop header
LB: loop body
LE: loop exit
PB: predicated region body
PF: predicated region fallthrough
CT: control target
= control target key end

     0   :  { %8 = vsyncpa [#allocation3], 0  ;;  %s1083_s0 = inlined_call_operand.hbm [shape: bf16[2,16,64], index: 0, kind: input, shape index: {}]   ;;  %s1084_s1 = inlined_call_operand.hbm [shape: bf16[64,32], index: 1, kind: input, shape index: {}]   ;;  %s1085_s2 = inlined_call_operand.hbm [shape: f32[1,32], index: 2, kind: input, shape index: {}]   ;;  %s1086_s3 = inlined_call_operand.hbm [shape: bf16[2,16,32], index: 3, kind: output, shape index: {}]  }
   0x1   :  { %10 = vsyncpa [#allocation3 + $0x1], 0 }
   0x2   :  { %11 = vsyncpa [#allocation6], 0 }
   0x3   :  { %12 = vsyncpa [#allocation4], 0 }
   0x4   :  { %14 = vsyncpa [#allocation4 + $0x1], 0  ;;  %s817_s12 = smov 0   ;;  %s819_s13 = smov 0  }
   0x5   :  { %s821_s14 = smov 0   ;;  %s823_s15 = smov 0  }
   0x6   :  { %s825_s16 = smov 0   ;;  %s827_s17 = smov 0  }
   0x7 LB: > { %s470_s18 = sadd.s32 4294967295, %s785_s17   ;;  %s471_s19 = sadd.s32 4294967294, %s785_s17   ;;  %s785_s17 = sphi %s827_s17, %s20_s17   ;;  %s781_s16 = sphi %s825_s16, %s1108_s16   ;;  %s777_s15 = sphi %s823_s15, %s1107_s15   ;;  %s773_s14 = sphi %s821_s14, %s1106_s14   ;;  %s769_s13 = sphi %s819_s13, %s1105_s13   ;;  %s765_s12 = sphi %s817_s12, %s1104_s12  }
   0x8   : > { %p52_p0 = scmp.ne.s32.totalorder %s769_s13, %s765_s12  ;;  %p851_p1 = scmp.eq.s32.totalorder %s470_s18, 0 }
   0x9   : > { %p855_p2 = scmp.eq.s32.totalorder %s470_s18, 1  ;;  %p136_p3 = scmp.eq.s32.totalorder %s471_s19, 1 }
   0xa   : > { %s1091_s20 = scalar_select %p851_p1, 1, 0 }
   0xb   : > { %p861_p4 = por %p851_p1, %p52_p0  ;;  %p472_p5 = scmp.ge.s32.totalorder %s785_s17, 1 }
   0xc   : > { %p866_p6 = por %p136_p3, %p52_p0  ;;  %p143_p7 = scmp.lt.s32.totalorder %s785_s17, 3 }
   0xd   : > { %s1093_s22 = scalar_select %p861_p4, 1, 0 }
   0xe   : > { %s1094_s23 = scalar_select %p866_p6, 1, 0 }
   0xf   : > { %p871_p8 = pnand %p472_p5, %p143_p7  ;;  %s787_s25 = smov [#allocation5]  }
  0x10   : > { %s157_s26 = sshll.u32 %s787_s25, 4  ;;  %s788_s28 = smov [#allocation7]   ;;  %s875_s26 = int_to_ptr.vmem [resolvable:$true] %s157_s26 }
  0x11   : > { %p531_p9 = pneg %p871_p8  ;;  %s173_s29 = sshll.u32 %s788_s28, 4  ;;  %s886_s29 = int_to_ptr.vmem [resolvable:$true] %s173_s29 }
  0x12   : > { %s613_s5 = scalar_lea.hbm %s1084_s1, 512 }
  0x13   : > { %p882_p11 = pnand %p531_p9, %p851_p1  ;;  %p614_p12 = scmp.ne.s32.totalorder %s1084_s1, %s613_s5 }
  0x14   : > { %p620_p5 = scmp.lt.u32.totalorder %s613_s5, %s1084_s1 }
  0x15   : > { %p615_p13 = pneg %p882_p11 }
  0x17   : > { %p616_p0 = pnand %p615_p13, %p614_p12 }
  0x19   : > { %p617_p3 = pneg %p616_p0 }
  0x1b   : > { %p622_p7 = pnand %p620_p5, %p617_p3 }
  0x1d   : > { %625 = shalt.err (!%p622_p7)
}
  0x1e   : > { %s626_s10 = scalar_lea.vmem %s875_s26, 512  ;;  %p634_p1 = scmp.lt.s32.totalorder %s875_s26, %s875_s26 }
  0x1f   : > { %p627_p9 = scmp.ne.s32.totalorder %s875_s26, %s626_s10  ;;  %p635_p12 = scmp.lt.s32.totalorder %s626_s10, %s626_s10 }
  0x21   : > { %p629_p10 = pnand %p627_p9, %p615_p13  ;;  %p636_p0 = por %p635_p12, %p634_p1 }
  0x23   : > { %p630_p6 = pneg %p629_p10 }
  0x25   : > { %p637_p4 = pnand %p636_p0, %p630_p6 }
  0x27   : > { %640 = shalt.err (!%p637_p4)
}
  0x28   : > { %s789_s11 = smov 64   ;;  %s790_s18 = smov 4  }
  0x29   : > { %534 = dma.hbm_to_vmem [thread:$0]  (!%p882_p11), %s1084_s1, 512, %s875_s26, [#allocation6], %s789_s11, %s789_s11, %s790_s18  }
  0x2a   : > { %s641_s4 = scalar_lea.hbm %s1085_s2, 16 }
  0x2b   : > { %p642_p1 = scmp.ne.s32.totalorder %s1085_s2, %s641_s4  ;;  %p648_p10 = scmp.lt.u32.totalorder %s641_s4, %s1085_s2 }
  0x2d   : > { %p644_p4 = pnand %p642_p1, %p615_p13 }
  0x2f   : > { %p645_p6 = pneg %p644_p4 }
  0x31   : > { %p650_p3 = pnand %p648_p10, %p645_p6 }
  0x33   : > { %653 = shalt.err (!%p650_p3)
}
  0x34   : > { %s654_s26 = scalar_lea.vmem %s886_s29, 16  ;;  %s661_s9 = scalar_lea.vmem %s886_s29, 32 }
  0x35   : > { %p655_p5 = scmp.ne.s32.totalorder %s886_s29, %s654_s26  ;;  %p662_p12 = scmp.lt.s32.totalorder %s886_s29, %s886_s29 }
  0x36   : > { %p663_p0 = scmp.lt.s32.totalorder %s661_s9, %s654_s26 }
  0x37   : > { %p657_p7 = pnand %p655_p5, %p615_p13 }
  0x38   : > { %p664_p1 = por %p663_p0, %p662_p12 }
  0x39   : > { %p658_p9 = pneg %p657_p7 }
  0x3b   : > { %p665_p4 = pnand %p664_p1, %p658_p9 }
  0x3d   : > { %668 = shalt.err (!%p665_p4)
}
  0x3e   : > { %537 = dma.hbm_to_vmem [thread:$0]  (!%p882_p11), %s1085_s2, 16, %s886_s29, [#allocation6]  }
  0x3f   : > { %s29_s25 = sadd.s32 1, %s781_s16  ;;  %s39_s28 = sadd.s32 1, %s773_s14 }
  0x40   : > { %p30_p13 = scmp.ge.s32.totalorder %s29_s25, 2  ;;  %p46_p6 = scmp.ne.s32.totalorder %s773_s14, %s769_s13 }
  0x41   : > { %p47_p10 = scmp.eq.s32.totalorder %s785_s17, 0  ;;  %p548_p3 = scmp.lt.s32.totalorder %s785_s17, 2 }
  0x42   : > { %s1110_s25 = smov (%p30_p13, %s29_s25), 0  ;;  %p954_p7 = por %p855_p2, %p46_p6 }
  0x43   : > { %p48_p5 = por %p47_p10, %p46_p6  ;;  %s36_s30 = ssub.s32 %s781_s16, %s1110_s25 }
  0x44   : > { %s1097_s27 = scalar_select %p954_p7, 1, 0 }
  0x45   : > { %s184_s4 = sand.u32 1, %s773_s14   ;;  %p37_p9 = scmp.eq.s32.totalorder %s36_s30, 0 }
  0x46   : > { %s476_s29 = sshll.u32 %s184_s4, 3  ;;  %s498_s5 = sshll.u32 %s781_s16, 7 }
  0x47   : > { %s963_s6 = scalar_select %p37_p9, %s773_s14, %s39_s28  }
  0x48   : > { %s968_s26 = scalar_lea.hbm %s1083_s0, %s498_s5  ;;  %s188_s21 = scalar_lea.vmem [#allocation2], %s476_s29 }
  0x49   : > { %s195_s9 = sshll.u32 %s188_s21, 4  ;;  %p972_p2 = pnand %p548_p3, %p48_p5  ;;  %s976_s9 = int_to_ptr.vmem [resolvable:$true] %s195_s9 }
  0x4a   : > { %s978_s19 = scalar_lea.sflag [#allocation3], %s184_s4  ;;  %s669_s28 = scalar_lea.hbm %s968_s26, 128 }
  0x4b   : > { %p670_p11 = scmp.ne.s32.totalorder %s968_s26, %s669_s28  ;;  %p671_p12 = pneg %p972_p2 }
  0x4c   : > { %s674_s5 = scalar_lea.hbm %s1083_s0, 256  ;;  %p675_p4 = scmp.lt.u32.totalorder %s968_s26, %s1083_s0 }
  0x4d   : > { %p672_p0 = pnand %p671_p12, %p670_p11  ;;  %p676_p13 = scmp.lt.u32.totalorder %s674_s5, %s669_s28 }
  0x4e   : > { %p678_p10 = scmp.lt.u32.totalorder %s669_s28, %s968_s26 }
  0x4f   : > { %p673_p1 = pneg %p672_p0  ;;  %p677_p6 = por %p676_p13, %p675_p4 }
  0x51   : > { %p679_p3 = por %p678_p10, %p677_p6 }
  0x53   : > { %p680_p5 = pnand %p679_p3, %p673_p1 }
  0x55   : > { %683 = shalt.err (!%p680_p5)
}
  0x56   : > { %s684_s4 = scalar_lea.vmem %s976_s9, 128  ;;  %s791_s21 = smov [#allocation2]  }
  0x57   : > { %p685_p9 = scmp.ne.s32.totalorder %s976_s9, %s684_s4  ;;  %s689_s30 = sshll.u32 %s791_s21, 4  ;;  %s690_s30 = int_to_ptr.vmem [resolvable:$false] %s689_s30 }
  0x58   : > { %s691_s29 = scalar_lea.vmem %s690_s30, 256  ;;  %p692_p7 = scmp.lt.s32.totalorder %s976_s9, %s690_s30 }
  0x59   : > { %p687_p11 = pnand %p685_p9, %p671_p12  ;;  %p693_p4 = scmp.lt.s32.totalorder %s691_s29, %s684_s4 }
  0x5b   : > { %p688_p0 = pneg %p687_p11  ;;  %p694_p13 = por %p693_p4, %p692_p7 }
  0x5d   : > { %p695_p6 = pnand %p694_p13, %p688_p0 }
  0x5f   : > { %698 = shalt.err (!%p695_p6)
}
  0x60   : > { %541 = dma.hbm_to_vmem [thread:$0]  (!%p972_p2), %s968_s26, 128, %s976_s9, %s978_s19, %s789_s11, %s789_s11, %s790_s18  }
  0x61   : > { %207 = sbr.rel (%p871_p8) target bundleno = 360 (0x168), region = 32  ;;  %s1012_s28 = sand.u32 (!%p871_p8), 1, %s769_s13  }
  0x62   : > { %s480_s5 = sshll.u32 (!%p871_p8), %s1012_s28, 3  ;;  %s210_s7 = scalar_lea.sflag (!%p871_p8), [#allocation3], %s1012_s28 }
  0x63   : > { %s213_s10 = scalar_lea.vmem (!%p871_p8), [#allocation2], %s480_s5  ;;  %p1099_p7 = scmp.ne.s32.totalorder (!%p871_p8), %s1093_s22, 0 }
  0x68   : > { %752 = dma.done.wait (%p1099_p7), %s210_s7, 128  }
  0x69   : > { %754 = vsyncadd (%p1099_p7), %s210_s7, 4294967168  ;;  %p1100_p2 = scmp.ne.s32.totalorder %s1091_s20, 0 }
  0x6b   : > { %756 = dma.done.wait (%p1100_p2), [#allocation6], 528  }
  0x6c   : > { %758 = vsyncadd (%p1100_p2), [#allocation6], 4294966768  ;;  %v792_v0 = vmov 0.0   ;;  %vm793_vm0 = vmmov 0   ;;  %v608_v1 = vld [vmem:[#allocation5] sm:$0xff]   ;;  %v609_v2 = vld [vmem:[#allocation5 + $0x8] sm:$0xff]  }
  0x6d   : > { %507 = vmatprep.subr.bf16.mxu0 %v792_v0  ;;  %515 = vmatprep.mubr.msk.bf16.mxu0 %vm793_vm0, %v792_v0  ;;  %v610_v3 = vld [vmem:[#allocation5 + $0x10] sm:$0xff]   ;;  %v611_v4 = vld [vmem:[#allocation5 + $0x18] sm:$0xff]   ;;  %vm291_vm1 = vcmask 523264   ;;  %v484_v6 = vld [vmem:[#allocation7] ss:$0 sm:$0xff]  ;;  %s501_s20 = sshll.u32 %s777_s15, 7 }
  0x6e   : > { %508 = vmatpush3.bf16.msra.mxu0 %v608_v1  ;;  %v612_v5 = vld [vmem:[%s213_s10] sm:$0xff]   ;;  %s243_s22 = scalar_lea.vmem [#allocation8], %s480_s5  ;;  %vm346_vm2 = vcmask 257024   ;;  %s1032_s26 = scalar_lea.hbm %s1086_s3, %s501_s20 }
  0x6f   : > { %509 = vmatprep.subr.bf16.mxu0 %v792_v0  ;;  %s364_s24 = sshll.u32 %s243_s22, 4  ;;  %s350_s15 = scalar_lea.sflag [#allocation4], %s1012_s28  ;;  %s1034_s24 = int_to_ptr.vmem [resolvable:$true] %s364_s24 }
  0x70   : > { %s699_s9 = scalar_lea.vmem %s1034_s24, 128  ;;  %p1101_p12 = scmp.ne.s32.totalorder %s1097_s27, 0 }
  0x71   : > { %p700_p8 = scmp.ne.s32.totalorder %s1034_s24, %s699_s9  ;;  %s794_s19 = smov [#allocation8]  }
  0x72   : > { %510 = vmatpush3.bf16.msra.mxu0 %v609_v2  ;;  %s703_s8 = sshll.u32 %s794_s19, 4  ;;  %s704_s8 = int_to_ptr.vmem [resolvable:$false] %s703_s8 }
  0x73   : > { %511 = vmatprep.subr.bf16.mxu0 %v792_v0  ;;  %p701_p1 = pnand %p700_p8, %p1101_p12  ;;  %s705_s4 = scalar_lea.vmem %s704_s8, 256 }
  0x74   : > { %p706_p3 = scmp.lt.s32.totalorder %s1034_s24, %s704_s8  ;;  %p707_p5 = scmp.lt.s32.totalorder %s705_s4, %s699_s9 }
  0x75   : > { %p702_p10 = pneg %p701_p1 }
  0x76   : > { %512 = vmatpush3.bf16.msra.mxu0 %v610_v3  ;;  %p708_p9 = por %p707_p5, %p706_p3 }
  0x77   : > { %513 = vmatprep.subr.bf16.mxu0 %v792_v0 }
  0x78   : > { %p709_p11 = pnand %p708_p9, %p702_p10 }
  0x7a   : > { %514 = vmatpush3.bf16.msra.mxu0 %v611_v4 }
  0x7d   : > { %516 = vmatmul.mubr.msk.bf16.vlgmr.msra.gmra.mrb[0].mxu0 %vm291_vm1, %v612_v5 }
 0x150   : > { %v329_v7 = vpop.f32.mrb[0].mxu0 }
 0x151   : > { %v330_v8 = vadd.f32 %v484_v6, %v329_v7  ;;  %v517_v9 = vpop.f32.mrb[1].mxu0 }
 0x152   : > { %v332_v10 = vpop.f32.mrb[2].mxu0 }
 0x153   : > { %v336_v11 = vmax.f32 %v330_v8, 0.0  ;;  %v333_v12 = vadd.f32 %v484_v6, %v332_v10  ;;  %v518_v13 = vpop.f32.mrb[3].mxu0 }
 0x155   : > { %v499_v14 = vpack.c.bf16 %v336_v11, %v336_v11  ;;  %v337_v15 = vmax.f32 %v333_v12, 0.0 }
 0x157   : > { %347 = vst.msk [vmem:[%s243_s22] sm:$0xf] %vm346_vm2, %v499_v14  ;;  %v500_v16 = vpack.c.bf16 %v337_v15, %v337_v15 }
 0x159   : > { %348 = vst.msk [vmem:[%s243_s22 + $0x4] sm:$0xf] %vm346_vm2, %v500_v16 }
 0x15a   : > { %712 = shalt.err (!%p709_p11)
}
 0x15b   : > { %s713_s21 = scalar_lea.hbm %s1032_s26, 128  ;;  %s717_s5 = scalar_lea.hbm %s1086_s3, 256 }
 0x15c   : > { %p714_p0 = scmp.ne.s32.totalorder %s1032_s26, %s713_s21  ;;  %p718_p6 = scmp.lt.u32.totalorder %s1032_s26, %s1086_s3 }
 0x15d   : > { %p719_p7 = scmp.lt.u32.totalorder %s717_s5, %s713_s21  ;;  %p721_p8 = scmp.lt.u32.totalorder %s713_s21, %s1032_s26 }
 0x15e   : > { %p715_p4 = pnand %p714_p0, %p1101_p12 }
 0x15f   : > { %p720_p2 = por %p719_p7, %p718_p6 }
 0x160   : > { %p716_p13 = pneg %p715_p4 }
 0x161   : > { %p722_p1 = por %p721_p8, %p720_p2 }
 0x163   : > { %p723_p10 = pnand %p722_p1, %p716_p13 }
 0x165   : > { %726 = shalt.err (!%p723_p10)
}
 0x166   : > { %s795_s20 = smov 64   ;;  %s796_s22 = smov 4  }
 0x167   : > { %529 = dma.vmem_to_hbm [thread:$0]  (%p1101_p12), %s1034_s24, 128, %s1032_s26, %s350_s15, %s795_s20, %s795_s20, %s796_s22  }
 0x168 PF: > { %s379_s11 = sand.u32 1, %s765_s12   ;;  %p1102_p3 = scmp.ne.s32.totalorder %s1094_s23, 0 }
 0x169   : > { %p1103_p5 = scmp.ge.s32.totalorder %s785_s17, 2  ;;  %s380_s18 = scalar_lea.sflag [#allocation4], %s379_s11 }
 0x16b   : > { %p543_p9 = pnand %p1103_p5, %p1102_p3 }
 0x16d   : > { %760 = dma.done.wait (!%p543_p9), %s380_s18, 128  }
 0x16e   : > { %762 = vsyncadd (!%p543_p9), %s380_s18, 4294967168  ;;  %s20_s17 = sadd.s32 1, %s785_s17   ;;  %s1104_s12 = smov %s769_s13 }
 0x16f   : > { %p17_p11 = scmp.ge.s32.totalorder %s20_s17, 4   ;;  %s1105_s13 = smov %s773_s14 }
 0x170   : > { %s1106_s14 = smov %s963_s6  ;;  %s1107_s15 = smov %s781_s16 }
 0x171   : > { %s1108_s16 = smov %s1110_s25  ;;  %19 = sbr.rel (!%p17_p11) target bundleno = 7 (0x7), region = 87 }
 0x178   :  { %385 = vsyncpa [#allocation3], 1 }
 0x179   :  { %387 = vsyncpa [#allocation3 + $0x1], 1 }
 0x17a   :  { %388 = vsyncpa [#allocation6], 1 }
 0x17b   :  { %389 = vsyncpa [#allocation4], 1 }
 0x17c   :  { %391 = vsyncpa [#allocation4 + $0x1], 1 }

// kernel: repmlp_resnet_forward.39
= control target key start
LH: loop header
LB: loop body
LE: loop exit
PB: predicated region body
PF: predicated region fallthrough
CT: control target
= control target key end

     0   :  { %s1193_s0 = inlined_call_operand.hbm [shape: bf16[2,4,32], index: 0, kind: input, shape index: {}]   ;;  %s1194_s1 = inlined_call_operand.hbm [shape: bf16[32,128], index: 1, kind: input, shape index: {}]   ;;  %s1195_s2 = inlined_call_operand.hbm [shape: f32[1,128], index: 2, kind: input, shape index: {}]   ;;  %s1196_s3 = inlined_call_operand.hbm [shape: bf16[2,4,128], index: 3, kind: input, shape index: {}]   ;;  %s1197_s4 = inlined_call_operand.hbm [shape: bf16[2,4,128], index: 4, kind: output, shape index: {}]  }
   0x1   :  { %1204 = sst [smem:[#allocation15_spill]] %s1193_s0 }
   0x2   :  { %9 = vsyncpa [#allocation3], 0 }
   0x3   :  { %11 = vsyncpa [#allocation3 + $0x1], 0 }
   0x4   :  { %12 = vsyncpa [#allocation6], 0 }
   0x5   :  { %13 = vsyncpa [#allocation9], 0 }
   0x6   :  { %15 = vsyncpa [#allocation9 + $0x1], 0 }
   0x7   :  { %16 = vsyncpa [#allocation4], 0 }
   0x8   :  { %18 = vsyncpa [#allocation4 + $0x1], 0  ;;  %s895_s15 = smov 0   ;;  %s897_s16 = smov 0  }
   0x9   :  { %s899_s17 = smov 0   ;;  %s901_s18 = smov 0  }
   0xa   :  { %s903_s19 = smov 0   ;;  %s905_s20 = smov 0  }
   0xb LB: > { %s524_s21 = sadd.s32 4294967295, %s859_s20   ;;  %s525_s22 = sadd.s32 4294967294, %s859_s20   ;;  %s859_s20 = sphi %s905_s20, %s24_s20   ;;  %s855_s19 = sphi %s903_s19, %s1225_s19   ;;  %s851_s18 = sphi %s901_s18, %s1224_s18   ;;  %s847_s17 = sphi %s899_s17, %s1223_s17   ;;  %s843_s16 = sphi %s897_s16, %s1222_s16   ;;  %s839_s15 = sphi %s895_s15, %s1221_s15  }
   0xc   : > { %p56_p0 = scmp.ne.s32.totalorder %s843_s16, %s839_s15  ;;  %p929_p1 = scmp.eq.s32.totalorder %s524_s21, 0 }
   0xd   : > { %p933_p2 = scmp.eq.s32.totalorder %s524_s21, 1  ;;  %p168_p3 = scmp.eq.s32.totalorder %s525_s22, 1 }
   0xe   : > { %s1205_s23 = scalar_select %p929_p1, 1, 0 }
   0xf   : > { %p939_p4 = por %p929_p1, %p56_p0  ;;  %p526_p5 = scmp.ge.s32.totalorder %s859_s20, 1 }
  0x10   : > { %p944_p6 = por %p168_p3, %p56_p0  ;;  %p175_p7 = scmp.lt.s32.totalorder %s859_s20, 3 }
  0x11   : > { %s1207_s25 = scalar_select %p939_p4, 1, 0 }
  0x12   : > { %s1208_s26 = scalar_select %p944_p6, 1, 0 }
  0x13   : > { %p949_p8 = pnand %p526_p5, %p175_p7  ;;  %s861_s28 = smov [#allocation5]  }
  0x14   : > { %s189_s29 = sshll.u32 %s861_s28, 4  ;;  %s862_s5 = smov [#allocation7]   ;;  %s953_s29 = int_to_ptr.vmem [resolvable:$true] %s189_s29 }
  0x15   : > { %s1209_s27 = scalar_select %p949_p8, 1, 0 }
  0x16   : > { %p573_p9 = pneg %p949_p8  ;;  %s205_s6 = sshll.u32 %s862_s5, 4  ;;  %s964_s6 = int_to_ptr.vmem [resolvable:$true] %s205_s6 }
  0x17   : > { %s653_s9 = scalar_lea.hbm %s1194_s1, 256 }
  0x18   : > { %p960_p11 = pnand %p573_p9, %p929_p1  ;;  %p654_p12 = scmp.ne.s32.totalorder %s1194_s1, %s653_s9 }
  0x19   : > { %p660_p5 = scmp.lt.u32.totalorder %s653_s9, %s1194_s1 }
  0x1a   : > { %p655_p13 = pneg %p960_p11 }
  0x1c   : > { %p656_p0 = pnand %p655_p13, %p654_p12 }
  0x1e   : > { %p657_p3 = pneg %p656_p0 }
  0x20   : > { %p662_p7 = pnand %p660_p5, %p657_p3 }
  0x22   : > { %665 = shalt.err (!%p662_p7)
}
  0x23   : > { %s666_s14 = scalar_lea.vmem %s953_s29, 256  ;;  %p674_p1 = scmp.lt.s32.totalorder %s953_s29, %s953_s29 }
  0x24   : > { %p667_p9 = scmp.ne.s32.totalorder %s953_s29, %s666_s14  ;;  %p675_p12 = scmp.lt.s32.totalorder %s666_s14, %s666_s14 }
  0x26   : > { %p669_p10 = pnand %p667_p9, %p655_p13  ;;  %p676_p0 = por %p675_p12, %p674_p1 }
  0x28   : > { %p670_p6 = pneg %p669_p10 }
  0x2a   : > { %p677_p4 = pnand %p676_p0, %p670_p6 }
  0x2c   : > { %680 = shalt.err (!%p677_p4)
}
  0x2d   : > { %s863_s21 = smov 64   ;;  %s864_s22 = smov 4  }
  0x2e   : > { %576 = dma.hbm_to_vmem [thread:$0]  (!%p960_p11), %s1194_s1, 256, %s953_s29, [#allocation6], %s863_s21, %s863_s21, %s864_s22  }
  0x2f   : > { %s681_s9 = scalar_lea.hbm %s1195_s2, 16 }
  0x30   : > { %p682_p1 = scmp.ne.s32.totalorder %s1195_s2, %s681_s9  ;;  %p688_p10 = scmp.lt.u32.totalorder %s681_s9, %s1195_s2 }
  0x32   : > { %p684_p4 = pnand %p682_p1, %p655_p13 }
  0x34   : > { %p685_p6 = pneg %p684_p4 }
  0x36   : > { %p690_p3 = pnand %p688_p10, %p685_p6 }
  0x38   : > { %693 = shalt.err (!%p690_p3)
}
  0x39   : > { %s694_s29 = scalar_lea.vmem %s964_s6, 16  ;;  %s701_s14 = scalar_lea.vmem %s964_s6, 32 }
  0x3a   : > { %p695_p5 = scmp.ne.s32.totalorder %s964_s6, %s694_s29  ;;  %p702_p12 = scmp.lt.s32.totalorder %s964_s6, %s964_s6 }
  0x3b   : > { %p703_p0 = scmp.lt.s32.totalorder %s701_s14, %s694_s29 }
  0x3c   : > { %p697_p7 = pnand %p695_p5, %p655_p13 }
  0x3d   : > { %p704_p1 = por %p703_p0, %p702_p12 }
  0x3e   : > { %p698_p9 = pneg %p697_p7 }
  0x40   : > { %p705_p4 = pnand %p704_p1, %p698_p9 }
  0x42   : > { %708 = shalt.err (!%p705_p4)
}
  0x43   : > { %579 = dma.hbm_to_vmem [thread:$0]  (!%p960_p11), %s1195_s2, 16, %s964_s6, [#allocation6]  }
  0x44   : > { %s33_s28 = sadd.s32 1, %s855_s19  ;;  %s43_s5 = sadd.s32 1, %s847_s17 }
  0x45   : > { %p34_p13 = scmp.ge.s32.totalorder %s33_s28, 2  ;;  %p50_p6 = scmp.ne.s32.totalorder %s847_s17, %s843_s16 }
  0x46   : > { %p51_p10 = scmp.eq.s32.totalorder %s859_s20, 0  ;;  %p593_p3 = scmp.lt.s32.totalorder %s859_s20, 2 }
  0x47   : > { %s1227_s28 = smov (%p34_p13, %s33_s28), 0  ;;  %p1029_p7 = por %p933_p2, %p50_p6 }
  0x48   : > { %p52_p5 = por %p51_p10, %p50_p6  ;;  %s40_s7 = ssub.s32 %s855_s19, %s1227_s28 }
  0x49   : > { %s1211_s30 = scalar_select %p1029_p7, 1, 0 }
  0x4a   : > { %s1036_s8 = sand.u32 1, %s847_s17   ;;  %p41_p11 = scmp.eq.s32.totalorder %s40_s7, 0 }
  0x4b   : > { %s1201_s6 = sshll.u32 %s1036_s8, 1  ;;  %s531_s9 = sshll.u32 %s855_s19, 5 }
  0x4c   : > { %s1041_s10 = scalar_select %p41_p11, %s847_s17, %s43_s5  }
  0x4d   : > { %s1212_s0 = sld [smem:[#allocation15_spill]]  ;;  %s220_s13 = scalar_lea.vmem [#allocation2], %s1201_s6 }
  0x4e   : > { %s227_s29 = sshll.u32 %s220_s13, 4  ;;  %p1054_p2 = pnand %p593_p3, %p52_p5  ;;  %s1058_s29 = int_to_ptr.vmem [resolvable:$true] %s227_s29 }
  0x4f   : > { %s217_s21 = scalar_lea.sflag [#allocation3], %s1036_s8 }
  0x50   : > { %p711_p12 = pneg %p1054_p2 }
  0x53   : > { %s1048_s24 = scalar_lea.hbm %s1212_s0, %s531_s9  ;;  %s714_s11 = scalar_lea.hbm %s1212_s0, 64 }
  0x54   : > { %s709_s22 = scalar_lea.hbm %s1048_s24, 32  ;;  %p715_p4 = scmp.lt.u32.totalorder %s1048_s24, %s1212_s0 }
  0x55   : > { %p710_p9 = scmp.ne.s32.totalorder %s1048_s24, %s709_s22  ;;  %p716_p13 = scmp.lt.u32.totalorder %s714_s11, %s709_s22 }
  0x56   : > { %p718_p10 = scmp.lt.u32.totalorder %s709_s22, %s1048_s24 }
  0x57   : > { %p712_p0 = pnand %p711_p12, %p710_p9  ;;  %p717_p6 = por %p716_p13, %p715_p4 }
  0x59   : > { %p713_p1 = pneg %p712_p0  ;;  %p719_p3 = por %p718_p10, %p717_p6 }
  0x5b   : > { %p720_p5 = pnand %p719_p3, %p713_p1 }
  0x5d   : > { %723 = shalt.err (!%p720_p5)
}
  0x5e   : > { %s724_s6 = scalar_lea.vmem %s1058_s29, 32  ;;  %s865_s5 = smov [#allocation2]  }
  0x5f   : > { %p725_p11 = scmp.ne.s32.totalorder %s1058_s29, %s724_s6  ;;  %s729_s7 = sshll.u32 %s865_s5, 4  ;;  %s730_s7 = int_to_ptr.vmem [resolvable:$false] %s729_s7 }
  0x60   : > { %s731_s12 = scalar_lea.vmem %s730_s7, 64  ;;  %p732_p7 = scmp.lt.s32.totalorder %s1058_s29, %s730_s7 }
  0x61   : > { %p727_p9 = pnand %p725_p11, %p711_p12  ;;  %p733_p4 = scmp.lt.s32.totalorder %s731_s12, %s724_s6 }
  0x63   : > { %p728_p0 = pneg %p727_p9  ;;  %p734_p13 = por %p733_p4, %p732_p7 }
  0x65   : > { %p735_p6 = pnand %p734_p13, %p728_p0 }
  0x67   : > { %738 = shalt.err (!%p735_p6)
}
  0x68   : > { %583 = dma.hbm_to_vmem [thread:$0]  (!%p1054_p2), %s1048_s24, 32, %s1058_s29, %s217_s21  }
  0x69   : > { %s1091_s13 = scalar_lea.hbm %s1196_s3, %s531_s9  ;;  %s1214_s5 = sshll.u32 %s1036_s8, 1 }
  0x6a   : > { %s238_s6 = scalar_lea.vmem [#allocation8], %s1214_s5  ;;  %s235_s12 = scalar_lea.sflag [#allocation9], %s1036_s8 }
  0x6b   : > { %s246_s7 = sshll.u32 %s238_s6, 4  ;;  %s739_s0 = scalar_lea.hbm %s1091_s13, 32  ;;  %s247_s7 = int_to_ptr.vmem [resolvable:$true] %s246_s7 }
  0x6c   : > { %p740_p7 = scmp.ne.s32.totalorder %s1091_s13, %s739_s0  ;;  %s744_s9 = scalar_lea.hbm %s1196_s3, 64 }
  0x6d   : > { %p745_p3 = scmp.lt.u32.totalorder %s1091_s13, %s1196_s3  ;;  %p746_p5 = scmp.lt.u32.totalorder %s744_s9, %s739_s0 }
  0x6e   : > { %p742_p1 = pnand %p740_p7, %p711_p12  ;;  %p748_p9 = scmp.lt.u32.totalorder %s739_s0, %s1091_s13 }
  0x6f   : > { %p747_p11 = por %p746_p5, %p745_p3 }
  0x70   : > { %p743_p10 = pneg %p742_p1 }
  0x71   : > { %p749_p0 = por %p748_p9, %p747_p11 }
  0x73   : > { %p750_p4 = pnand %p749_p0, %p743_p10 }
  0x75   : > { %753 = shalt.err (!%p750_p4)
}
  0x76   : > { %s754_s8 = scalar_lea.vmem %s247_s7, 32  ;;  %s866_s11 = smov [#allocation8]  }
  0x77   : > { %p755_p13 = scmp.ne.s32.totalorder %s247_s7, %s754_s8  ;;  %s759_s5 = sshll.u32 %s866_s11, 4  ;;  %s760_s5 = int_to_ptr.vmem [resolvable:$false] %s759_s5 }
  0x78   : > { %s761_s6 = scalar_lea.vmem %s760_s5, 64  ;;  %p762_p1 = scmp.lt.s32.totalorder %s247_s7, %s760_s5 }
  0x79   : > { %p757_p6 = pnand %p755_p13, %p711_p12  ;;  %p763_p8 = scmp.lt.s32.totalorder %s761_s6, %s754_s8 }
  0x7b   : > { %p758_p7 = pneg %p757_p6  ;;  %p764_p3 = por %p763_p8, %p762_p1 }
  0x7d   : > { %p765_p5 = pnand %p764_p3, %p758_p7 }
  0x7f   : > { %768 = shalt.err (!%p765_p5)
}
  0x80   : > { %586 = dma.hbm_to_vmem [thread:$0]  (!%p1054_p2), %s1091_s13, 32, %s247_s7, %s235_s12  }
  0x81   : > { %p1215_p10 = scmp.ne.s32.totalorder %s1209_s27, 0 }
  0x82   : > { %s1118_s0 = sand.u32 (!%p1215_p10), 1, %s843_s16   ;;  %p1216_p8 = scmp.ne.s32.totalorder (!%p1215_p10), %s1207_s25, 0 }
  0x83   : > { %255 = sbr.rel (%p1215_p10) target bundleno = 387 (0x183), region = 36  ;;  %s1121_s24 = sshll.u32 (!%p1215_p10), %s1118_s0, 1 }
  0x84   : > { %s258_s29 = scalar_lea.sflag (!%p1215_p10), [#allocation3], %s1118_s0  ;;  %s261_s9 = scalar_lea.vmem (!%p1215_p10), [#allocation2], %s1121_s24 }
  0x8a   : > { %822 = dma.done.wait (%p1216_p8), %s258_s29, 32  }
  0x8b   : > { %824 = vsyncadd (%p1216_p8), %s258_s29, 4294967264  ;;  %p1217_p2 = scmp.ne.s32.totalorder %s1205_s23, 0 }
  0x8d   : > { %826 = dma.done.wait (%p1217_p2), [#allocation6], 272  }
  0x8e   : > { %828 = vsyncadd (%p1217_p2), [#allocation6], 4294967024  ;;  %s275_s27 = scalar_lea.sflag [#allocation9], %s1118_s0  ;;  %s278_s14 = scalar_lea.vmem [#allocation8], %s1121_s24 }
  0x8f   : > { %830 = dma.done.wait (%p1216_p8), %s275_s27, 32  }
  0x90   : > { %832 = vsyncadd (%p1216_p8), %s275_s27, 4294967264  ;;  %v867_v0 = vmov 0.0   ;;  %vm868_vm0 = vmmov 0   ;;  %v651_v1 = vld [vmem:[#allocation5] sm:$0xff]   ;;  %v652_v2 = vld [vmem:[#allocation5 + $0x8] sm:$0xff]   ;;  %vm333_vm1 = vcmask 261120  }
  0x91   : > { %551 = vmatprep.subr.bf16.mxu0 %v867_v0  ;;  %555 = vmatprep.mubr.msk.bf16.mxu0 %vm868_vm0, %v867_v0  ;;  %v309_v3 = vld [vmem:[%s261_s9] sm:$0x3]  ;;  %v377_v4 = vld [vmem:[%s278_s14] sm:$0x3]  ;;  %v540_v5 = vld [vmem:[#allocation7] ss:$0 sm:$0xff] }
  0x92   : > { %552 = vmatpush3.bf16.msra.mxu0 %v651_v1  ;;  %v378_v6 = vunpack.c.l.bf16 %v377_v4  ;;  %s545_s23 = sshll.u32 %s851_s18, 5  ;;  %s307_s25 = scalar_lea.vmem [#allocation10], %s1121_s24 }
  0x93   : > { %553 = vmatprep.subr.bf16.mxu0 %v867_v0  ;;  %s398_s13 = sshll.u32 %s307_s25, 4  ;;  %s1144_s21 = scalar_lea.hbm %s1197_s4, %s545_s23  ;;  %s1146_s13 = int_to_ptr.vmem [resolvable:$true] %s398_s13 }
  0x94   : > { %s384_s22 = scalar_lea.sflag [#allocation4], %s1118_s0  ;;  %s769_s8 = scalar_lea.vmem %s1146_s13, 32 }
  0x95   : > { %p770_p12 = scmp.ne.s32.totalorder %s1146_s13, %s769_s8  ;;  %p1218_p11 = scmp.ne.s32.totalorder %s1211_s30, 0 }
  0x96   : > { %554 = vmatpush3.bf16.msra.mxu0 %v652_v2  ;;  %s869_s18 = smov [#allocation10]  }
  0x97   : > { %p771_p9 = pnand %p770_p12, %p1218_p11  ;;  %s773_s11 = sshll.u32 %s869_s18, 4  ;;  %s774_s11 = int_to_ptr.vmem [resolvable:$false] %s773_s11 }
  0x98   : > { %s775_s5 = scalar_lea.vmem %s774_s11, 64  ;;  %p776_p4 = scmp.lt.s32.totalorder %s1146_s13, %s774_s11 }
  0x99   : > { %556 = vmatmul.mubr.msk.bf16.vlgmr.msra.gmra.mrb[0].mxu0 %vm333_vm1, %v309_v3  ;;  %p772_p0 = pneg %p771_p9  ;;  %p777_p13 = scmp.lt.s32.totalorder %s775_s5, %s769_s8 }
  0x9b   : > { %p778_p6 = por %p777_p13, %p776_p4 }
  0x9d   : > { %p779_p7 = pnand %p778_p6, %p772_p0 }
 0x16c   : > { %v371_v7 = vpop.f32.mrb[0].mxu0 }
 0x16d   : > { %v372_v8 = vadd.f32 %v540_v5, %v371_v7  ;;  %v557_v9 = vpop.f32.mrb[1].mxu0 }
 0x16e   : > { %v374_v10 = vpop.f32.mrb[2].mxu0 }
 0x16f   : > { %v379_v11 = vadd.f32 %v378_v6, %v372_v8  ;;  %v558_v12 = vpop.f32.mrb[3].mxu0 }
 0x171   : > { %v380_v13 = vmax.f32 %v379_v11, 0.0 }
 0x173   : > { %v381_v14 = vpack.c.bf16 %v380_v13, %v380_v13 }
 0x175   : > { %382 = vst [vmem:[%s307_s25] sm:$0x3] %v381_v14 }
 0x176   : > { %782 = shalt.err (!%p779_p7)
}
 0x177   : > { %s783_s6 = scalar_lea.hbm %s1144_s21, 32  ;;  %s787_s29 = scalar_lea.hbm %s1197_s4, 64 }
 0x178   : > { %p784_p1 = scmp.ne.s32.totalorder %s1144_s21, %s783_s6  ;;  %p788_p10 = scmp.lt.u32.totalorder %s1144_s21, %s1197_s4 }
 0x179   : > { %p789_p8 = scmp.lt.u32.totalorder %s787_s29, %s783_s6  ;;  %p791_p12 = scmp.lt.u32.totalorder %s783_s6, %s1144_s21 }
 0x17a   : > { %p785_p3 = pnand %p784_p1, %p1218_p11 }
 0x17b   : > { %p790_p2 = por %p789_p8, %p788_p10 }
 0x17c   : > { %p786_p5 = pneg %p785_p3 }
 0x17d   : > { %p792_p9 = por %p791_p12, %p790_p2 }
 0x17f   : > { %p793_p0 = pnand %p792_p9, %p786_p5 }
 0x181   : > { %796 = shalt.err (!%p793_p0)
}
 0x182   : > { %571 = dma.vmem_to_hbm [thread:$0]  (%p1218_p11), %s1146_s13, 32, %s1144_s21, %s384_s22  }
 0x183 PF: > { %s410_s14 = sand.u32 1, %s839_s15   ;;  %p1219_p4 = scmp.ne.s32.totalorder %s1208_s26, 0 }
 0x184   : > { %p1220_p13 = scmp.ge.s32.totalorder %s859_s20, 2  ;;  %s411_s23 = scalar_lea.sflag [#allocation4], %s410_s14 }
 0x186   : > { %p588_p6 = pnand %p1220_p13, %p1219_p4 }
 0x188   : > { %834 = dma.done.wait (!%p588_p6), %s411_s23, 32  }
 0x189   : > { %836 = vsyncadd (!%p588_p6), %s411_s23, 4294967264  ;;  %s24_s20 = sadd.s32 1, %s859_s20   ;;  %s1221_s15 = smov %s843_s16 }
 0x18a   : > { %p21_p7 = scmp.ge.s32.totalorder %s24_s20, 4   ;;  %s1222_s16 = smov %s847_s17 }
 0x18b   : > { %s1223_s17 = smov %s1041_s10  ;;  %s1224_s18 = smov %s855_s19 }
 0x18c   : > { %s1225_s19 = smov %s1227_s28  ;;  %23 = sbr.rel (!%p21_p7) target bundleno = 11 (0xb), region = 104 }
 0x193   :  { %416 = vsyncpa [#allocation3], 1 }
 0x194   :  { %418 = vsyncpa [#allocation3 + $0x1], 1 }
 0x195   :  { %419 = vsyncpa [#allocation6], 1 }
 0x196   :  { %420 = vsyncpa [#allocation9], 1 }
 0x197   :  { %422 = vsyncpa [#allocation9 + $0x1], 1 }
 0x198   :  { %423 = vsyncpa [#allocation4], 1 }
 0x199   :  { %425 = vsyncpa [#allocation4 + $0x1], 1 }

// kernel: repmlp_resnet_forward.36
= control target key start
LH: loop header
LB: loop body
LE: loop exit
PB: predicated region body
PF: predicated region fallthrough
CT: control target
= control target key end

     0   :  { %8 = vsyncpa [#allocation4], 0  ;;  %s473_s0 = inlined_call_operand.hbm [shape: bf16[16,128], index: 0, kind: input, shape index: {}]   ;;  %s474_s1 = inlined_call_operand.hbm [shape: bf16[128,128], index: 1, kind: input, shape index: {}]   ;;  %s475_s2 = inlined_call_operand.hbm [shape: f32[1,128], index: 2, kind: input, shape index: {}]   ;;  %s476_s3 = inlined_call_operand.hbm [shape: bf16[16,128], index: 3, kind: output, shape index: {}]  }
   0x1   :  { %9 = vsyncpa [#allocation7], 0 }
   0x2   :  { %10 = vsyncpa [#allocation5], 0  ;;  %s381_s12 = smov [#allocation6]   ;;  %s382_s14 = smov [#allocation3]  }
   0x3   :  { %s28_s13 = sshll.u32 %s381_s12, 4  ;;  %s16_s15 = sshll.u32 %s382_s14, 4  ;;  %s29_s13 = int_to_ptr.vmem [resolvable:$true] %s28_s13  ;;  %s409_s15 = int_to_ptr.vmem [resolvable:$true] %s16_s15 }
   0x4   :  { %s287_s18 = scalar_lea.hbm %s474_s1, 1024 }
   0x5   :  { %p288_p0 = scmp.ne.s32.totalorder %s474_s1, %s287_s18  ;;  %p291_p1 = scmp.lt.u32.totalorder %s287_s18, %s474_s1 }
   0x7   :  { %p293_p2 = pnand %p291_p1, %p288_p0 }
   0x9   :  { %296 = shalt.err (!%p293_p2)
}
   0xa   :  { %s297_s23 = scalar_lea.vmem %s29_s13, 1024  ;;  %p302_p4 = scmp.lt.s32.totalorder %s29_s13, %s29_s13 }
   0xb   :  { %p298_p3 = scmp.ne.s32.totalorder %s29_s13, %s297_s23  ;;  %p303_p5 = scmp.lt.s32.totalorder %s297_s23, %s297_s23 }
   0xd   :  { %p304_p6 = por %p303_p5, %p302_p4 }
   0xf   :  { %p305_p7 = pnand %p304_p6, %p298_p3 }
  0x11   :  { %308 = shalt.err (!%p305_p7)
}
  0x12   :  { %s383_s24 = smov 64   ;;  %s384_s25 = smov 4  }
  0x13   :  { %34 = dma.hbm_to_vmem [thread:$0]  %s474_s1, 1024, %s29_s13, [#allocation7], %s383_s24, %s383_s24, %s384_s25  }
  0x14   :  { %s309_s30 = scalar_lea.hbm %s473_s0, 128 }
  0x15   :  { %p310_p8 = scmp.ne.s32.totalorder %s473_s0, %s309_s30  ;;  %p313_p9 = scmp.lt.u32.totalorder %s309_s30, %s473_s0 }
  0x17   :  { %p315_p10 = pnand %p313_p9, %p310_p8 }
  0x19   :  { %318 = shalt.err (!%p315_p10)
}
  0x1a   :  { %s319_s8 = scalar_lea.vmem %s409_s15, 128  ;;  %p324_p12 = scmp.lt.s32.totalorder %s409_s15, %s409_s15 }
  0x1b   :  { %p320_p11 = scmp.ne.s32.totalorder %s409_s15, %s319_s8  ;;  %p325_p13 = scmp.lt.s32.totalorder %s319_s8, %s319_s8 }
  0x1d   :  { %p326_p0 = por %p325_p13, %p324_p12 }
  0x1f   :  { %p327_p1 = pnand %p326_p0, %p320_p11 }
  0x21   :  { %330 = shalt.err (!%p327_p1)
}
  0x22   :  { %22 = dma.hbm_to_vmem [thread:$0]  %s473_s0, 128, %s409_s15, [#allocation4], %s383_s24, %s383_s24, %s384_s25  }
  0x23   :  { %s385_s10 = smov [#allocation8]   ;;  %s331_s14 = scalar_lea.hbm %s475_s2, 16 }
  0x24   :  { %s41_s11 = sshll.u32 %s385_s10, 4  ;;  %p332_p2 = scmp.ne.s32.totalorder %s475_s2, %s331_s14  ;;  %s42_s11 = int_to_ptr.vmem [resolvable:$true] %s41_s11 }
  0x25   :  { %p335_p3 = scmp.lt.u32.totalorder %s331_s14, %s475_s2 }
  0x27   :  { %p337_p4 = pnand %p335_p3, %p332_p2 }
  0x29   :  { %340 = shalt.err (!%p337_p4)
}
  0x2a   :  { %s341_s20 = scalar_lea.vmem %s42_s11, 16  ;;  %s345_s0 = scalar_lea.vmem %s42_s11, 32 }
  0x2b   :  { %p342_p5 = scmp.ne.s32.totalorder %s42_s11, %s341_s20  ;;  %p346_p6 = scmp.lt.s32.totalorder %s42_s11, %s42_s11 }
  0x2c   :  { %p347_p7 = scmp.lt.s32.totalorder %s345_s0, %s341_s20 }
  0x2e   :  { %p348_p8 = por %p347_p7, %p346_p6 }
  0x30   :  { %p349_p9 = pnand %p348_p8, %p342_p5 }
  0x32   :  { %352 = shalt.err (!%p349_p9)
}
  0x33   :  { %44 = dma.hbm_to_vmem [thread:$0]  %s475_s2, 16, %s42_s11, [#allocation7]  }
  0x34   :  { %375 = dma.done.wait [#allocation4], 128  }
  0x35   :  { %376 = vsyncadd [#allocation4], 4294967168 }
  0x36   :  { %377 = dma.done.wait [#allocation7], 1040  }
  0x37   :  { %378 = vsyncadd [#allocation7], 4294966256  ;;  %v386_v0 = vmov 0.0   ;;  %vm387_vm0 = vmmov 0   ;;  %v278_v1 = vld [vmem:[#allocation6] sm:$0xff]   ;;  %v279_v2 = vld [vmem:[#allocation6 + $0x8] sm:$0xff]  }
  0x38   :  { %250 = vmatprep.subr.bf16.mxu0 %v386_v0  ;;  %266 = vmatprep.mubr.msk.bf16.mxu0 %vm387_vm0, %v386_v0  ;;  %v280_v3 = vld [vmem:[#allocation6 + $0x10] sm:$0xff]   ;;  %v281_v4 = vld [vmem:[#allocation6 + $0x18] sm:$0xff]   ;;  %v282_v5 = vld [vmem:[#allocation6 + $0x20] sm:$0xff]   ;;  %s388_s2 = smov [#allocation9]  }
  0x39   :  { %251 = vmatpush3.bf16.msra.mxu0 %v278_v1  ;;  %v283_v6 = vld [vmem:[#allocation6 + $0x28] sm:$0xff]   ;;  %v284_v7 = vld [vmem:[#allocation6 + $0x30] sm:$0xff]   ;;  %v285_v8 = vld [vmem:[#allocation6 + $0x38] sm:$0xff]   ;;  %s209_s22 = sshll.u32 %s388_s2, 4  ;;  %s210_s22 = int_to_ptr.vmem [resolvable:$true] %s209_s22 }
  0x3a   :  { %252 = vmatprep.subr.bf16.mxu0 %v386_v0  ;;  %v286_v9 = vld [vmem:[#allocation3] sm:$0xff]   ;;  %v231_v11 = vld [vmem:[#allocation8] ss:$0 sm:$0xff]  ;;  %s353_s23 = scalar_lea.vmem %s210_s22, 128  ;;  %p358_p11 = scmp.lt.s32.totalorder %s210_s22, %s210_s22 }
  0x3b   :  { %p354_p10 = scmp.ne.s32.totalorder %s210_s22, %s353_s23  ;;  %p359_p12 = scmp.lt.s32.totalorder %s353_s23, %s353_s23 }
  0x3d   :  { %253 = vmatpush3.bf16.msra.mxu0 %v279_v2  ;;  %p360_p13 = por %p359_p12, %p358_p11 }
  0x3e   :  { %254 = vmatprep.subr.bf16.mxu0 %v386_v0 }
  0x3f   :  { %p361_p0 = pnand %p360_p13, %p354_p10 }
  0x41   :  { %255 = vmatpush3.bf16.msra.mxu0 %v280_v3 }
  0x42   :  { %256 = vmatprep.subr.bf16.mxu0 %v386_v0 }
  0x45   :  { %257 = vmatpush3.bf16.msra.mxu0 %v281_v4 }
  0x46   :  { %258 = vmatprep.subr.bf16.mxu0 %v386_v0 }
  0x49   :  { %259 = vmatpush3.bf16.msra.mxu0 %v282_v5 }
  0x4a   :  { %260 = vmatprep.subr.bf16.mxu0 %v386_v0 }
  0x4d   :  { %261 = vmatpush3.bf16.msra.mxu0 %v283_v6 }
  0x4e   :  { %262 = vmatprep.subr.bf16.mxu0 %v386_v0 }
  0x51   :  { %263 = vmatpush3.bf16.msra.mxu0 %v284_v7 }
  0x52   :  { %264 = vmatprep.subr.bf16.mxu0 %v386_v0 }
  0x55   :  { %265 = vmatpush3.bf16.msra.mxu0 %v285_v8 }
  0x58   :  { %267 = vmatmul.mubr.bf16.vlgmr.msra.gmra.mrb[0].mxu0 %v286_v9 }
 0x12b   :  { %v169_v10 = vpop.f32.mrb[0].mxu0 }
 0x12c   :  { %v268_v12 = vpop.f32.mrb[1].mxu0  ;;  %v192_v14 = vadd.f32 %v231_v11, %v169_v10 }
 0x12d   :  { %v172_v13 = vpop.f32.mrb[2].mxu0 }
 0x12e   :  { %v193_v15 = vadd.f32 %v231_v11, %v172_v13  ;;  %v269_v16 = vpop.f32.mrb[3].mxu0 }
 0x130   :  { %v239_v17 = vpack.c.bf16 %v193_v15, %v192_v14 }
 0x132   :  { %240 = vst [vmem:[#allocation9] sm:$0xff] %v239_v17  }
 0x133   :  { %364 = shalt.err (!%p361_p0)
}
 0x134   :  { %s365_s28 = scalar_lea.hbm %s476_s3, 128 }
 0x135   :  { %p366_p1 = scmp.ne.s32.totalorder %s476_s3, %s365_s28  ;;  %p369_p2 = scmp.lt.u32.totalorder %s365_s28, %s476_s3 }
 0x137   :  { %p371_p3 = pnand %p369_p2, %p366_p1 }
 0x139   :  { %374 = shalt.err (!%p371_p3)
}
 0x13a   :  { %215 = dma.vmem_to_hbm [thread:$0]  %s210_s22, 128, %s476_s3, [#allocation5], %s383_s24, %s383_s24, %s384_s25  }
 0x13b   :  { %379 = dma.done.wait [#allocation5], 128  }
 0x13c   :  { %380 = vsyncadd [#allocation5], 4294967168 }
 0x13d   :  { %219 = vsyncpa [#allocation4], 1 }
 0x13e   :  { %220 = vsyncpa [#allocation7], 1 }
 0x13f   :  { %221 = vsyncpa [#allocation5], 1 }

// kernel: repmlp_resnet_forward.38
= control target key start
LH: loop header
LB: loop body
LE: loop exit
PB: predicated region body
PF: predicated region fallthrough
CT: control target
= control target key end

     0   :  { %8 = vsyncpa [#allocation4], 0  ;;  %s709_s0 = inlined_call_operand.hbm [shape: bf16[16,384], index: 0, kind: input, shape index: {}]   ;;  %s710_s1 = inlined_call_operand.hbm [shape: bf16[384,128], index: 1, kind: input, shape index: {}]   ;;  %s711_s2 = inlined_call_operand.hbm [shape: f32[1,128], index: 2, kind: input, shape index: {}]   ;;  %s712_s3 = inlined_call_operand.hbm [shape: bf16[16,128], index: 3, kind: output, shape index: {}]  }
   0x1   :  { %9 = vsyncpa [#allocation7], 0 }
   0x2   :  { %10 = vsyncpa [#allocation5], 0  ;;  %s625_s12 = smov [#allocation6]   ;;  %s531_s16 = scalar_lea.hbm %s710_s1, 3072 }
   0x3   :  { %s28_s13 = sshll.u32 %s625_s12, 4  ;;  %p532_p0 = scmp.ne.s32.totalorder %s710_s1, %s531_s16  ;;  %s29_s13 = int_to_ptr.vmem [resolvable:$true] %s28_s13 }
   0x4   :  { %p535_p1 = scmp.lt.u32.totalorder %s531_s16, %s710_s1 }
   0x6   :  { %p537_p2 = pnand %p535_p1, %p532_p0 }
   0x8   :  { %540 = shalt.err (!%p537_p2)
}
   0x9   :  { %s541_s21 = scalar_lea.vmem %s29_s13, 3072  ;;  %p546_p4 = scmp.lt.s32.totalorder %s29_s13, %s29_s13 }
   0xa   :  { %p542_p3 = scmp.ne.s32.totalorder %s29_s13, %s541_s21  ;;  %p547_p5 = scmp.lt.s32.totalorder %s541_s21, %s541_s21 }
   0xc   :  { %p548_p6 = por %p547_p5, %p546_p4 }
   0xe   :  { %p549_p7 = pnand %p548_p6, %p542_p3 }
  0x10   :  { %552 = shalt.err (!%p549_p7)
}
  0x11   :  { %s626_s22 = smov 64   ;;  %s627_s23 = smov 4  }
  0x12   :  { %34 = dma.hbm_to_vmem [thread:$0]  %s710_s1, 3072, %s29_s13, [#allocation7], %s626_s22, %s626_s22, %s627_s23  }
  0x13   :  { %s628_s26 = smov [#allocation3]   ;;  %s553_s30 = scalar_lea.hbm %s709_s0, 384 }
  0x14   :  { %s16_s27 = sshll.u32 %s628_s26, 4  ;;  %p554_p8 = scmp.ne.s32.totalorder %s709_s0, %s553_s30  ;;  %s17_s27 = int_to_ptr.vmem [resolvable:$true] %s16_s27 }
  0x15   :  { %p557_p9 = scmp.lt.u32.totalorder %s553_s30, %s709_s0 }
  0x17   :  { %p559_p10 = pnand %p557_p9, %p554_p8 }
  0x19   :  { %562 = shalt.err (!%p559_p10)
}
  0x1a   :  { %s563_s8 = scalar_lea.vmem %s17_s27, 384  ;;  %p568_p12 = scmp.lt.s32.totalorder %s17_s27, %s17_s27 }
  0x1b   :  { %p564_p11 = scmp.ne.s32.totalorder %s17_s27, %s563_s8  ;;  %p569_p13 = scmp.lt.s32.totalorder %s563_s8, %s563_s8 }
  0x1d   :  { %p570_p0 = por %p569_p13, %p568_p12 }
  0x1f   :  { %p571_p1 = pnand %p570_p0, %p564_p11 }
  0x21   :  { %574 = shalt.err (!%p571_p1)
}
  0x22   :  { %s629_s1 = smov 192   ;;  %s630_s9 = smov 12  }
  0x23   :  { %22 = dma.hbm_to_vmem [thread:$0]  %s709_s0, 384, %s17_s27, [#allocation4], %s629_s1, %s629_s1, %s630_s9  }
  0x24   :  { %s631_s12 = smov [#allocation8]   ;;  %s575_s16 = scalar_lea.hbm %s711_s2, 16 }
  0x25   :  { %s41_s13 = sshll.u32 %s631_s12, 4  ;;  %p576_p2 = scmp.ne.s32.totalorder %s711_s2, %s575_s16  ;;  %s42_s13 = int_to_ptr.vmem [resolvable:$true] %s41_s13 }
  0x26   :  { %p579_p3 = scmp.lt.u32.totalorder %s575_s16, %s711_s2 }
  0x28   :  { %p581_p4 = pnand %p579_p3, %p576_p2 }
  0x2a   :  { %584 = shalt.err (!%p581_p4)
}
  0x2b   :  { %s585_s21 = scalar_lea.vmem %s42_s13, 16  ;;  %s589_s0 = scalar_lea.vmem %s42_s13, 32 }
  0x2c   :  { %p586_p5 = scmp.ne.s32.totalorder %s42_s13, %s585_s21  ;;  %p590_p6 = scmp.lt.s32.totalorder %s42_s13, %s42_s13 }
  0x2d   :  { %p591_p7 = scmp.lt.s32.totalorder %s589_s0, %s585_s21 }
  0x2f   :  { %p592_p8 = por %p591_p7, %p590_p6 }
  0x31   :  { %p593_p9 = pnand %p592_p8, %p586_p5 }
  0x33   :  { %596 = shalt.err (!%p593_p9)
}
  0x34   :  { %44 = dma.hbm_to_vmem [thread:$0]  %s711_s2, 16, %s42_s13, [#allocation7]  }
  0x35   :  { %619 = dma.done.wait [#allocation4], 384  }
  0x36   :  { %620 = vsyncadd [#allocation4], 4294966912 }
  0x37   :  { %621 = dma.done.wait [#allocation7], 3088  }
  0x38   :  { %622 = vsyncadd [#allocation7], 4294964208  ;;  %v632_v0 = vmov 0.0   ;;  %vm633_vm0 = vmmov 0   ;;  %v503_v1 = vld [vmem:[#allocation6 + $0x40] sm:$0xff]   ;;  %v506_v4 = vld [vmem:[#allocation6 + $0x48] sm:$0xff]  }
  0x39   :  { %473 = vmatprep.subr.bf16.mxu1 %v632_v0  ;;  %489 = vmatprep.mubr.msk.bf16.mxu1 %vm633_vm0, %v632_v0  ;;  %v504_v2 = vld [vmem:[#allocation6] sm:$0xff]   ;;  %v507_v5 = vld [vmem:[#allocation6 + $0x8] sm:$0xff]   ;;  %v509_v7 = vld [vmem:[#allocation6 + $0x50] sm:$0xff]   ;;  %s634_s2 = smov [#allocation9]  }
  0x3a   :  { %442 = vmatprep.subr.bf16.mxu0 %v503_v1  ;;  %v505_v3 = vld [vmem:[#allocation6 + $0x80] sm:$0xff]   ;;  %v508_v6 = vld [vmem:[#allocation6 + $0x88] sm:$0xff]   ;;  %v510_v8 = vld [vmem:[#allocation6 + $0x10] sm:$0xff]   ;;  %s392_s26 = sshll.u32 %s634_s2, 4  ;;  %s393_s26 = int_to_ptr.vmem [resolvable:$true] %s392_s26 }
  0x3b   :  { %443 = vmatpush3.bf16.msra.mxu0 %v504_v2  ;;  %474 = vmatpush3.bf16.msra.mxu1 %v505_v3  ;;  %v511_v9 = vld [vmem:[#allocation6 + $0x90] sm:$0xff]   ;;  %v512_v10 = vld [vmem:[#allocation6 + $0x58] sm:$0xff]   ;;  %v515_v13 = vld [vmem:[#allocation6 + $0x60] sm:$0xff]   ;;  %s597_s27 = scalar_lea.vmem %s393_s26, 128  ;;  %p602_p11 = scmp.lt.s32.totalorder %s393_s26, %s393_s26 }
  0x3c   :  { %444 = vmatprep.subr.bf16.mxu0 %v506_v4  ;;  %475 = vmatprep.subr.bf16.mxu1 %v632_v0  ;;  %v513_v11 = vld [vmem:[#allocation6 + $0x18] sm:$0xff]   ;;  %v516_v14 = vld [vmem:[#allocation6 + $0x20] sm:$0xff]   ;;  %v518_v16 = vld [vmem:[#allocation6 + $0x68] sm:$0xff]   ;;  %p598_p10 = scmp.ne.s32.totalorder %s393_s26, %s597_s27  ;;  %p603_p12 = scmp.lt.s32.totalorder %s597_s27, %s597_s27 }
  0x3d   :  { %v514_v12 = vld [vmem:[#allocation6 + $0x98] sm:$0xff]   ;;  %v517_v15 = vld [vmem:[#allocation6 + $0xa0] sm:$0xff]   ;;  %v519_v17 = vld [vmem:[#allocation6 + $0x28] sm:$0xff]  }
  0x3e   :  { %v520_v18 = vld [vmem:[#allocation6 + $0xa8] sm:$0xff]   ;;  %v521_v19 = vld [vmem:[#allocation6 + $0x70] sm:$0xff]   ;;  %v524_v22 = vld [vmem:[#allocation6 + $0x78] sm:$0xff]   ;;  %p604_p13 = por %p603_p12, %p602_p11 }
  0x3f   :  { %445 = vmatpush3.bf16.msra.mxu0 %v507_v5  ;;  %476 = vmatpush3.bf16.msra.mxu1 %v508_v6  ;;  %v522_v20 = vld [vmem:[#allocation6 + $0x30] sm:$0xff]   ;;  %v529_v23 = vld [vmem:[#allocation3 + $0x4] ss:$12 sps:$4 sm:$0xff]   ;;  %v432_v34 = vld [vmem:[#allocation8] ss:$0 sm:$0xff] }
  0x40   :  { %446 = vmatprep.subr.bf16.mxu0 %v509_v7  ;;  %477 = vmatprep.subr.bf16.mxu1 %v632_v0  ;;  %v523_v21 = vld [vmem:[#allocation6 + $0xb0] sm:$0xff]   ;;  %v525_v24 = vld [vmem:[#allocation6 + $0x38] sm:$0xff]   ;;  %p605_p0 = pnand %p604_p13, %p598_p10 }
  0x41   :  { %307 = vmatprep.mubr.bf16.mxu0 %v529_v23  ;;  %v526_v25 = vld [vmem:[#allocation6 + $0xb8] sm:$0xff]   ;;  %v527_v26 = vld [vmem:[#allocation3] ss:$12 sps:$4 sm:$0xff]  }
  0x42   :  { %v530_v27 = vld [vmem:[#allocation3 + $0x8] ss:$12 sps:$4 sm:$0xff]  }
  0x43   :  { %447 = vmatpush3.bf16.msra.mxu0 %v510_v8  ;;  %478 = vmatpush3.bf16.msra.mxu1 %v511_v9 }
  0x44   :  { %448 = vmatprep.subr.bf16.mxu0 %v512_v10  ;;  %479 = vmatprep.subr.bf16.mxu1 %v632_v0 }
  0x47   :  { %449 = vmatpush3.bf16.msra.mxu0 %v513_v11  ;;  %480 = vmatpush3.bf16.msra.mxu1 %v514_v12 }
  0x48   :  { %450 = vmatprep.subr.bf16.mxu0 %v515_v13  ;;  %481 = vmatprep.subr.bf16.mxu1 %v632_v0 }
  0x4b   :  { %451 = vmatpush3.bf16.msra.mxu0 %v516_v14  ;;  %482 = vmatpush3.bf16.msra.mxu1 %v517_v15 }
  0x4c   :  { %452 = vmatprep.subr.bf16.mxu0 %v518_v16  ;;  %483 = vmatprep.subr.bf16.mxu1 %v632_v0 }
  0x4f   :  { %453 = vmatpush3.bf16.msra.mxu0 %v519_v17  ;;  %484 = vmatpush3.bf16.msra.mxu1 %v520_v18 }
  0x50   :  { %454 = vmatprep.subr.bf16.mxu0 %v521_v19  ;;  %485 = vmatprep.subr.bf16.mxu1 %v632_v0 }
  0x53   :  { %455 = vmatpush3.bf16.msra.mxu0 %v522_v20  ;;  %486 = vmatpush3.bf16.msra.mxu1 %v523_v21 }
  0x54   :  { %456 = vmatprep.subr.bf16.mxu0 %v524_v22  ;;  %487 = vmatprep.subr.bf16.mxu1 %v632_v0 }
  0x57   :  { %457 = vmatpush3.bf16.msra.mxu0 %v525_v24  ;;  %488 = vmatpush3.bf16.msra.mxu1 %v526_v25 }
  0x5a   :  { %308 = vmatmul.mubr.bf16.vlgmr.msra.gmra.mrb[0].mxu0 %v527_v26  ;;  %490 = vmatmul.mubr.bf16.vlgmr.msra.gmra.mrb[0].mxu1 %v530_v27 }
 0x12d   :  { %v458_v28 = vpop.f32.mrb[0].mxu0  ;;  %v350_v29 = vpop.f32.mrb[0].mxu1 }
 0x12e   :  { %v459_v30 = vpop.f32.mrb[1].mxu0  ;;  %v491_v32 = vpop.f32.mrb[1].mxu1 }
 0x12f   :  { %v460_v31 = vadd.f32 %v459_v30, %v458_v28  ;;  %v461_v33 = vpop.f32.mrb[2].mxu0  ;;  %v353_v35 = vpop.f32.mrb[2].mxu1 }
 0x130   :  { %v462_v36 = vpop.f32.mrb[3].mxu0  ;;  %v492_v39 = vpop.f32.mrb[3].mxu1 }
 0x131   :  { %v351_v37 = vadd.f32 %v460_v31, %v350_v29  ;;  %v463_v38 = vadd.f32 %v462_v36, %v461_v33 }
 0x133   :  { %v373_v40 = vadd.f32 %v432_v34, %v351_v37  ;;  %v354_v41 = vadd.f32 %v463_v38, %v353_v35 }
 0x135   :  { %v374_v42 = vadd.f32 %v432_v34, %v354_v41  ;;  %v375_v43 = vmax.f32 %v373_v40, 0.0 }
 0x137   :  { %v376_v44 = vmax.f32 %v374_v42, 0.0 }
 0x139   :  { %v440_v45 = vpack.c.bf16 %v376_v44, %v375_v43 }
 0x13b   :  { %441 = vst [vmem:[#allocation9] sm:$0xff] %v440_v45  }
 0x13c   :  { %608 = shalt.err (!%p605_p0)
}
 0x13d   :  { %s609_s30 = scalar_lea.hbm %s712_s3, 128 }
 0x13e   :  { %p610_p1 = scmp.ne.s32.totalorder %s712_s3, %s609_s30  ;;  %p613_p2 = scmp.lt.u32.totalorder %s609_s30, %s712_s3 }
 0x140   :  { %p615_p3 = pnand %p613_p2, %p610_p1 }
 0x142   :  { %618 = shalt.err (!%p615_p3)
}
 0x143   :  { %398 = dma.vmem_to_hbm [thread:$0]  %s393_s26, 128, %s712_s3, [#allocation5], %s626_s22, %s626_s22, %s627_s23  }
 0x144   :  { %623 = dma.done.wait [#allocation5], 128  }
 0x145   :  { %624 = vsyncadd [#allocation5], 4294967168 }
 0x146   :  { %402 = vsyncpa [#allocation4], 1 }
 0x147   :  { %403 = vsyncpa [#allocation7], 1 }
 0x148   :  { %404 = vsyncpa [#allocation5], 1 }

// kernel: repmlp_resnet_forward.41
= control target key start
LH: loop header
LB: loop body
LE: loop exit
PB: predicated region body
PF: predicated region fallthrough
CT: control target
= control target key end

     0   :  { %8 = vsyncpa [#allocation3], 0  ;;  %s1085_s0 = inlined_call_operand.hbm [shape: bf16[2,4,128], index: 0, kind: input, shape index: {}]   ;;  %s1086_s1 = inlined_call_operand.hbm [shape: bf16[128,64], index: 1, kind: input, shape index: {}]   ;;  %s1087_s2 = inlined_call_operand.hbm [shape: f32[1,64], index: 2, kind: input, shape index: {}]   ;;  %s1088_s3 = inlined_call_operand.hbm [shape: bf16[2,4,64], index: 3, kind: output, shape index: {}]  }
   0x1   :  { %10 = vsyncpa [#allocation3 + $0x1], 0 }
   0x2   :  { %11 = vsyncpa [#allocation6], 0 }
   0x3   :  { %12 = vsyncpa [#allocation4], 0 }
   0x4   :  { %14 = vsyncpa [#allocation4 + $0x1], 0  ;;  %s827_s12 = smov 0   ;;  %s829_s13 = smov 0  }
   0x5   :  { %s831_s14 = smov 0   ;;  %s833_s15 = smov 0  }
   0x6   :  { %s835_s16 = smov 0   ;;  %s837_s17 = smov 0  }
   0x7 LB: > { %s475_s18 = sadd.s32 4294967295, %s797_s17   ;;  %s476_s19 = sadd.s32 4294967294, %s797_s17   ;;  %s797_s17 = sphi %s837_s17, %s20_s17   ;;  %s793_s16 = sphi %s835_s16, %s1110_s16   ;;  %s789_s15 = sphi %s833_s15, %s1109_s15   ;;  %s785_s14 = sphi %s831_s14, %s1108_s14   ;;  %s781_s13 = sphi %s829_s13, %s1107_s13   ;;  %s777_s12 = sphi %s827_s12, %s1106_s12  }
   0x8   : > { %p52_p0 = scmp.ne.s32.totalorder %s781_s13, %s777_s12  ;;  %p861_p1 = scmp.eq.s32.totalorder %s475_s18, 0 }
   0x9   : > { %p865_p2 = scmp.eq.s32.totalorder %s475_s18, 1  ;;  %p136_p3 = scmp.eq.s32.totalorder %s476_s19, 1 }
   0xa   : > { %s1093_s20 = scalar_select %p861_p1, 1, 0 }
   0xb   : > { %p871_p4 = por %p861_p1, %p52_p0  ;;  %p477_p5 = scmp.ge.s32.totalorder %s797_s17, 1 }
   0xc   : > { %p876_p6 = por %p136_p3, %p52_p0  ;;  %p143_p7 = scmp.lt.s32.totalorder %s797_s17, 3 }
   0xd   : > { %s1095_s22 = scalar_select %p871_p4, 1, 0 }
   0xe   : > { %s1096_s23 = scalar_select %p876_p6, 1, 0 }
   0xf   : > { %p881_p8 = pnand %p477_p5, %p143_p7  ;;  %s799_s25 = smov [#allocation5]  }
  0x10   : > { %s157_s26 = sshll.u32 %s799_s25, 4  ;;  %s800_s28 = smov [#allocation7]   ;;  %s885_s26 = int_to_ptr.vmem [resolvable:$true] %s157_s26 }
  0x11   : > { %p542_p9 = pneg %p881_p8  ;;  %s173_s29 = sshll.u32 %s800_s28, 4  ;;  %s896_s29 = int_to_ptr.vmem [resolvable:$true] %s173_s29 }
  0x12   : > { %s625_s5 = scalar_lea.hbm %s1086_s1, 1024 }
  0x13   : > { %p892_p11 = pnand %p542_p9, %p861_p1  ;;  %p626_p12 = scmp.ne.s32.totalorder %s1086_s1, %s625_s5 }
  0x14   : > { %p632_p5 = scmp.lt.u32.totalorder %s625_s5, %s1086_s1 }
  0x15   : > { %p627_p13 = pneg %p892_p11 }
  0x17   : > { %p628_p0 = pnand %p627_p13, %p626_p12 }
  0x19   : > { %p629_p3 = pneg %p628_p0 }
  0x1b   : > { %p634_p7 = pnand %p632_p5, %p629_p3 }
  0x1d   : > { %637 = shalt.err (!%p634_p7)
}
  0x1e   : > { %s638_s10 = scalar_lea.vmem %s885_s26, 1024  ;;  %p646_p1 = scmp.lt.s32.totalorder %s885_s26, %s885_s26 }
  0x1f   : > { %p639_p9 = scmp.ne.s32.totalorder %s885_s26, %s638_s10  ;;  %p647_p12 = scmp.lt.s32.totalorder %s638_s10, %s638_s10 }
  0x21   : > { %p641_p10 = pnand %p639_p9, %p627_p13  ;;  %p648_p0 = por %p647_p12, %p646_p1 }
  0x23   : > { %p642_p6 = pneg %p641_p10 }
  0x25   : > { %p649_p4 = pnand %p648_p0, %p642_p6 }
  0x27   : > { %652 = shalt.err (!%p649_p4)
}
  0x28   : > { %s801_s11 = smov 64   ;;  %s802_s18 = smov 4  }
  0x29   : > { %545 = dma.hbm_to_vmem [thread:$0]  (!%p892_p11), %s1086_s1, 1024, %s885_s26, [#allocation6], %s801_s11, %s801_s11, %s802_s18  }
  0x2a   : > { %s653_s4 = scalar_lea.hbm %s1087_s2, 16 }
  0x2b   : > { %p654_p1 = scmp.ne.s32.totalorder %s1087_s2, %s653_s4  ;;  %p660_p10 = scmp.lt.u32.totalorder %s653_s4, %s1087_s2 }
  0x2d   : > { %p656_p4 = pnand %p654_p1, %p627_p13 }
  0x2f   : > { %p657_p6 = pneg %p656_p4 }
  0x31   : > { %p662_p3 = pnand %p660_p10, %p657_p6 }
  0x33   : > { %665 = shalt.err (!%p662_p3)
}
  0x34   : > { %s666_s26 = scalar_lea.vmem %s896_s29, 16  ;;  %s673_s9 = scalar_lea.vmem %s896_s29, 32 }
  0x35   : > { %p667_p5 = scmp.ne.s32.totalorder %s896_s29, %s666_s26  ;;  %p674_p12 = scmp.lt.s32.totalorder %s896_s29, %s896_s29 }
  0x36   : > { %p675_p0 = scmp.lt.s32.totalorder %s673_s9, %s666_s26 }
  0x37   : > { %p669_p7 = pnand %p667_p5, %p627_p13 }
  0x38   : > { %p676_p1 = por %p675_p0, %p674_p12 }
  0x39   : > { %p670_p9 = pneg %p669_p7 }
  0x3b   : > { %p677_p4 = pnand %p676_p1, %p670_p9 }
  0x3d   : > { %680 = shalt.err (!%p677_p4)
}
  0x3e   : > { %548 = dma.hbm_to_vmem [thread:$0]  (!%p892_p11), %s1087_s2, 16, %s896_s29, [#allocation6]  }
  0x3f   : > { %s29_s18 = sadd.s32 1, %s793_s16  ;;  %s39_s19 = sadd.s32 1, %s785_s14 }
  0x40   : > { %p30_p13 = scmp.ge.s32.totalorder %s29_s18, 2  ;;  %p46_p6 = scmp.ne.s32.totalorder %s785_s14, %s781_s13 }
  0x41   : > { %p47_p10 = scmp.eq.s32.totalorder %s797_s17, 0  ;;  %p559_p3 = scmp.lt.s32.totalorder %s797_s17, 2 }
  0x42   : > { %s1112_s18 = smov (%p30_p13, %s29_s18), 0  ;;  %p961_p7 = por %p865_p2, %p46_p6 }
  0x43   : > { %p48_p5 = por %p47_p10, %p46_p6  ;;  %s36_s25 = ssub.s32 %s793_s16, %s1112_s18 }
  0x44   : > { %s1099_s27 = scalar_select %p961_p7, 1, 0 }
  0x45   : > { %s184_s28 = sand.u32 1, %s785_s14   ;;  %p37_p9 = scmp.eq.s32.totalorder %s36_s25, 0 }
  0x46   : > { %s481_s29 = sshll.u32 %s184_s28, 1  ;;  %s482_s30 = sshll.u32 %s793_s16, 5 }
  0x47   : > { %s970_s4 = scalar_select %p37_p9, %s785_s14, %s39_s19  }
  0x48   : > { %s975_s7 = scalar_lea.hbm %s1085_s0, %s482_s30  ;;  %s188_s21 = scalar_lea.vmem [#allocation2], %s481_s29 }
  0x49   : > { %s195_s8 = sshll.u32 %s188_s21, 4  ;;  %p979_p2 = pnand %p559_p3, %p48_p5  ;;  %s983_s8 = int_to_ptr.vmem [resolvable:$true] %s195_s8 }
  0x4a   : > { %s185_s9 = scalar_lea.sflag [#allocation3], %s184_s28  ;;  %s681_s10 = scalar_lea.hbm %s975_s7, 32 }
  0x4b   : > { %p682_p11 = scmp.ne.s32.totalorder %s975_s7, %s681_s10  ;;  %p683_p12 = pneg %p979_p2 }
  0x4c   : > { %s686_s25 = scalar_lea.hbm %s1085_s0, 64  ;;  %p687_p4 = scmp.lt.u32.totalorder %s975_s7, %s1085_s0 }
  0x4d   : > { %p684_p0 = pnand %p683_p12, %p682_p11  ;;  %p688_p13 = scmp.lt.u32.totalorder %s686_s25, %s681_s10 }
  0x4e   : > { %p690_p10 = scmp.lt.u32.totalorder %s681_s10, %s975_s7 }
  0x4f   : > { %p685_p1 = pneg %p684_p0  ;;  %p689_p6 = por %p688_p13, %p687_p4 }
  0x51   : > { %p691_p3 = por %p690_p10, %p689_p6 }
  0x53   : > { %p692_p5 = pnand %p691_p3, %p685_p1 }
  0x55   : > { %695 = shalt.err (!%p692_p5)
}
  0x56   : > { %s696_s28 = scalar_lea.vmem %s983_s8, 32  ;;  %s803_s5 = smov [#allocation2]  }
  0x57   : > { %p697_p9 = scmp.ne.s32.totalorder %s983_s8, %s696_s28  ;;  %s701_s6 = sshll.u32 %s803_s5, 4  ;;  %s702_s6 = int_to_ptr.vmem [resolvable:$false] %s701_s6 }
  0x58   : > { %s703_s21 = scalar_lea.vmem %s702_s6, 64  ;;  %p704_p7 = scmp.lt.s32.totalorder %s983_s8, %s702_s6 }
  0x59   : > { %p699_p11 = pnand %p697_p9, %p683_p12  ;;  %p705_p4 = scmp.lt.s32.totalorder %s703_s21, %s696_s28 }
  0x5b   : > { %p700_p0 = pneg %p699_p11  ;;  %p706_p13 = por %p705_p4, %p704_p7 }
  0x5d   : > { %p707_p6 = pnand %p706_p13, %p700_p0 }
  0x5f   : > { %710 = shalt.err (!%p707_p6)
}
  0x60   : > { %552 = dma.hbm_to_vmem [thread:$0]  (!%p979_p2), %s975_s7, 32, %s983_s8, %s185_s9  }
  0x61   : > { %204 = sbr.rel (%p881_p8) target bundleno = 373 (0x175), region = 32  ;;  %s1013_s10 = sand.u32 (!%p881_p8), 1, %s781_s13  }
  0x62   : > { %s484_s11 = sshll.u32 (!%p881_p8), %s1013_s10, 1  ;;  %s207_s19 = scalar_lea.sflag (!%p881_p8), [#allocation3], %s1013_s10 }
  0x63   : > { %s1019_s25 = scalar_lea.vmem (!%p881_p8), [#allocation2], %s484_s11  ;;  %p1101_p7 = scmp.ne.s32.totalorder (!%p881_p8), %s1095_s22, 0 }
  0x68   : > { %764 = dma.done.wait (%p1101_p7), %s207_s19, 32  }
  0x69   : > { %766 = vsyncadd (%p1101_p7), %s207_s19, 4294967264  ;;  %p1102_p2 = scmp.ne.s32.totalorder %s1093_s20, 0 }
  0x6b   : > { %768 = dma.done.wait (%p1102_p2), [#allocation6], 1040  }
  0x6c   : > { %770 = vsyncadd (%p1102_p2), [#allocation6], 4294966256  ;;  %v804_v0 = vmov 0.0   ;;  %vm805_vm0 = vmmov 0   ;;  %v617_v1 = vld [vmem:[#allocation5] sm:$0xff]   ;;  %v618_v2 = vld [vmem:[#allocation5 + $0x8] sm:$0xff]  }
  0x6d   : > { %510 = vmatprep.subr.bf16.mxu0 %v804_v0  ;;  %526 = vmatprep.mubr.msk.bf16.mxu0 %vm805_vm0, %v804_v0  ;;  %v619_v3 = vld [vmem:[#allocation5 + $0x10] sm:$0xff]   ;;  %v620_v4 = vld [vmem:[#allocation5 + $0x18] sm:$0xff]   ;;  %v621_v5 = vld [vmem:[#allocation5 + $0x20] sm:$0xff]   ;;  %s498_s20 = sshll.u32 %s789_s15, 5  ;;  %s240_s22 = scalar_lea.vmem [#allocation8], %s484_s11  ;;  %vm356_vm1 = vcmask 517120  }
  0x6e   : > { %511 = vmatpush3.bf16.msra.mxu0 %v617_v1  ;;  %v622_v6 = vld [vmem:[#allocation5 + $0x28] sm:$0xff]   ;;  %v623_v7 = vld [vmem:[#allocation5 + $0x30] sm:$0xff]   ;;  %v624_v8 = vld [vmem:[#allocation5 + $0x38] sm:$0xff]   ;;  %s373_s24 = sshll.u32 %s240_s22, 4  ;;  %s1036_s26 = scalar_lea.hbm %s1088_s3, %s498_s20  ;;  %s1038_s24 = int_to_ptr.vmem [resolvable:$true] %s373_s24 }
  0x6f   : > { %512 = vmatprep.subr.bf16.mxu0 %v804_v0  ;;  %v242_v9 = vld [vmem:[%s1019_s25] sm:$0x3]  ;;  %v488_v10 = vld [vmem:[#allocation7] ss:$0 sm:$0xff]  ;;  %s359_s9 = scalar_lea.sflag [#allocation4], %s1013_s10  ;;  %s711_s15 = scalar_lea.vmem %s1038_s24, 32 }
  0x70   : > { %p712_p8 = scmp.ne.s32.totalorder %s1038_s24, %s711_s15  ;;  %p1103_p12 = scmp.ne.s32.totalorder %s1099_s27, 0 }
  0x71   : > { %s806_s29 = smov [#allocation8]  }
  0x72   : > { %513 = vmatpush3.bf16.msra.mxu0 %v618_v2  ;;  %p713_p1 = pnand %p712_p8, %p1103_p12  ;;  %s715_s30 = sshll.u32 %s806_s29, 4  ;;  %s716_s30 = int_to_ptr.vmem [resolvable:$false] %s715_s30 }
  0x73   : > { %514 = vmatprep.subr.bf16.mxu0 %v804_v0  ;;  %s717_s28 = scalar_lea.vmem %s716_s30, 64  ;;  %p718_p3 = scmp.lt.s32.totalorder %s1038_s24, %s716_s30 }
  0x74   : > { %p714_p10 = pneg %p713_p1  ;;  %p719_p5 = scmp.lt.s32.totalorder %s717_s28, %s711_s15 }
  0x76   : > { %515 = vmatpush3.bf16.msra.mxu0 %v619_v3  ;;  %p720_p9 = por %p719_p5, %p718_p3 }
  0x77   : > { %516 = vmatprep.subr.bf16.mxu0 %v804_v0 }
  0x78   : > { %p721_p11 = pnand %p720_p9, %p714_p10 }
  0x7a   : > { %517 = vmatpush3.bf16.msra.mxu0 %v620_v4 }
  0x7b   : > { %518 = vmatprep.subr.bf16.mxu0 %v804_v0 }
  0x7e   : > { %519 = vmatpush3.bf16.msra.mxu0 %v621_v5 }
  0x7f   : > { %520 = vmatprep.subr.bf16.mxu0 %v804_v0 }
  0x82   : > { %521 = vmatpush3.bf16.msra.mxu0 %v622_v6 }
  0x83   : > { %522 = vmatprep.subr.bf16.mxu0 %v804_v0 }
  0x86   : > { %523 = vmatpush3.bf16.msra.mxu0 %v623_v7 }
  0x87   : > { %524 = vmatprep.subr.bf16.mxu0 %v804_v0 }
  0x8a   : > { %525 = vmatpush3.bf16.msra.mxu0 %v624_v8 }
  0x8d   : > { %527 = vmatmul.mubr.bf16.vlgmr.msra.gmra.mrb[0].mxu0 %v242_v9 }
 0x160   : > { %v348_v11 = vpop.f32.mrb[0].mxu0 }
 0x161   : > { %v349_v12 = vadd.f32 %v488_v10, %v348_v11  ;;  %v528_v13 = vpop.f32.mrb[1].mxu0 }
 0x162   : > { %v351_v14 = vpop.f32.mrb[2].mxu0 }
 0x163   : > { %v354_v15 = vmax.f32 %v349_v12, 0.0  ;;  %v529_v16 = vpop.f32.mrb[3].mxu0 }
 0x165   : > { %v355_v17 = vpack.c.bf16 %v354_v15, %v354_v15 }
 0x167   : > { %357 = vst.msk [vmem:[%s240_s22] sm:$0x3] %vm356_vm1, %v355_v17 }
 0x168   : > { %724 = shalt.err (!%p721_p11)
}
 0x169   : > { %s725_s5 = scalar_lea.hbm %s1036_s26, 32  ;;  %s729_s10 = scalar_lea.hbm %s1088_s3, 64 }
 0x16a   : > { %p726_p0 = scmp.ne.s32.totalorder %s1036_s26, %s725_s5  ;;  %p730_p6 = scmp.lt.u32.totalorder %s1036_s26, %s1088_s3 }
 0x16b   : > { %p731_p7 = scmp.lt.u32.totalorder %s729_s10, %s725_s5  ;;  %p733_p8 = scmp.lt.u32.totalorder %s725_s5, %s1036_s26 }
 0x16c   : > { %p727_p4 = pnand %p726_p0, %p1103_p12 }
 0x16d   : > { %p732_p2 = por %p731_p7, %p730_p6 }
 0x16e   : > { %p728_p13 = pneg %p727_p4 }
 0x16f   : > { %p734_p1 = por %p733_p8, %p732_p2 }
 0x171   : > { %p735_p10 = pnand %p734_p1, %p728_p13 }
 0x173   : > { %738 = shalt.err (!%p735_p10)
}
 0x174   : > { %540 = dma.vmem_to_hbm [thread:$0]  (%p1103_p12), %s1038_s24, 32, %s1036_s26, %s359_s9  }
 0x175 PF: > { %s385_s25 = sand.u32 1, %s777_s12   ;;  %p1104_p3 = scmp.ne.s32.totalorder %s1096_s23, 0 }
 0x176   : > { %p1105_p5 = scmp.ge.s32.totalorder %s797_s17, 2  ;;  %s386_s20 = scalar_lea.sflag [#allocation4], %s385_s25 }
 0x178   : > { %p554_p9 = pnand %p1105_p5, %p1104_p3 }
 0x17a   : > { %772 = dma.done.wait (!%p554_p9), %s386_s20, 32  }
 0x17b   : > { %774 = vsyncadd (!%p554_p9), %s386_s20, 4294967264  ;;  %s20_s17 = sadd.s32 1, %s797_s17   ;;  %s1106_s12 = smov %s781_s13 }
 0x17c   : > { %p17_p11 = scmp.ge.s32.totalorder %s20_s17, 4   ;;  %s1107_s13 = smov %s785_s14 }
 0x17d   : > { %s1108_s14 = smov %s970_s4  ;;  %s1109_s15 = smov %s793_s16 }
 0x17e   : > { %s1110_s16 = smov %s1112_s18  ;;  %19 = sbr.rel (!%p17_p11) target bundleno = 7 (0x7), region = 87 }
 0x185   :  { %391 = vsyncpa [#allocation3], 1 }
 0x186   :  { %393 = vsyncpa [#allocation3 + $0x1], 1 }
 0x187   :  { %394 = vsyncpa [#allocation6], 1 }
 0x188   :  { %395 = vsyncpa [#allocation4], 1 }
 0x189   :  { %397 = vsyncpa [#allocation4 + $0x1], 1 }

// kernel: repmlp_resnet_forward.42
= control target key start
LH: loop header
LB: loop body
LE: loop exit
PB: predicated region body
PF: predicated region fallthrough
CT: control target
= control target key end

     0   :  { %s1505_s0 = inlined_call_operand.hbm [shape: bf16[16,1024], index: 0, kind: input, shape index: {}]   ;;  %s1506_s1 = inlined_call_operand.hbm [shape: bf16[1024,128], index: 1, kind: input, shape index: {}]   ;;  %s1507_s2 = inlined_call_operand.hbm [shape: f32[1,128], index: 2, kind: input, shape index: {}]   ;;  %s1508_s3 = inlined_call_operand.hbm [shape: bf16[16,128], index: 3, kind: output, shape index: {}]  }
   0x1   :  { %1513 = sst [smem:[#allocation14_spill]] %s1505_s0 }
   0x2   :  { %8 = vsyncpa [#allocation4], 0 }
   0x3   :  { %10 = vsyncpa [#allocation4 + $0x1], 0 }
   0x4   :  { %11 = vsyncpa [#allocation7], 0 }
   0x5   :  { %13 = vsyncpa [#allocation7 + $0x1], 0 }
   0x6   :  { %14 = vsyncpa [#allocation5], 0  ;;  %s1240_s12 = smov 0   ;;  %s1242_s13 = smov 0  }
   0x7   :  { %s1244_s14 = smov 0   ;;  %s1246_s15 = smov 0  }
   0x8   :  { %s1248_s16 = smov 0   ;;  %s1250_s17 = smov 0  }
   0x9 LB: > { %s1269_s18 = sadd.s32 4294967295, %s1206_s17   ;;  %s48_s19 = sadd.s32 1, %s1194_s14  ;;  %s1206_s17 = sphi %s1250_s17, %s20_s17   ;;  %s1202_s16 = sphi %s1248_s16, %s1528_s16   ;;  %s1198_s15 = sphi %s1246_s15, %s1527_s15   ;;  %s1194_s14 = sphi %s1244_s14, %s1526_s14   ;;  %s1190_s13 = sphi %s1242_s13, %s1525_s13   ;;  %s1186_s12 = sphi %s1240_s12, %s1524_s12  }
   0xa   : > { %p55_p0 = scmp.ne.s32.totalorder %s1194_s14, %s1190_s13  ;;  %p56_p1 = scmp.eq.s32.totalorder %s1206_s17, 0 }
   0xb   : > { %p61_p2 = scmp.ne.s32.totalorder %s1190_s13, %s1186_s12  ;;  %p1509_p3 = scmp.eq.s32.totalorder %s1269_s18, 0 }
   0xc   : > { %p57_p4 = por %p56_p1, %p55_p0  ;;  %p795_p5 = scmp.ge.s32.totalorder %s1206_s17, 1 }
   0xd   : > { %p1280_p6 = por %p1509_p3, %p61_p2  ;;  %p154_p7 = scmp.lt.s32.totalorder %s1206_s17, 3 }
   0xe   : > { %s1208_s22 = smov [#allocation8]   ;;  %p930_p10 = scmp.lt.s32.totalorder %s1206_s17, 2 }
   0xf   : > { %s1514_s20 = scalar_select %p1280_p6, 1, 0 }
  0x10   : > { %p1285_p8 = pnand %p795_p5, %p154_p7  ;;  %s169_s23 = sshll.u32 %s1208_s22, 4  ;;  %s170_s23 = int_to_ptr.vmem [resolvable:$true] %s169_s23 }
  0x11   : > { %s1293_s24 = sand.u32 1, %s1194_s14   ;;  %p1301_p12 = pnand %p930_p10, %p57_p4 }
  0x12   : > { %s1515_s21 = scalar_select %p1285_p8, 1, 0 }
  0x13   : > { %p918_p9 = pneg %p1285_p8  ;;  %s1030_s29 = scalar_lea.hbm %s1507_s2, 16 }
  0x14   : > { %s1517_s26 = scalar_select %p1301_p12, 1, 0 }
  0x15   : > { %p1297_p11 = pnand %p918_p9, %p1509_p3  ;;  %p1031_p13 = scmp.ne.s32.totalorder %s1507_s2, %s1030_s29 }
  0x16   : > { %p1037_p5 = scmp.lt.u32.totalorder %s1030_s29, %s1507_s2 }
  0x17   : > { %p1032_p0 = pneg %p1297_p11 }
  0x19   : > { %p1033_p1 = pnand %p1032_p0, %p1031_p13 }
  0x1b   : > { %p1034_p2 = pneg %p1033_p1 }
  0x1d   : > { %p1039_p4 = pnand %p1037_p5, %p1034_p2 }
  0x1f   : > { %1042 = shalt.err (!%p1039_p4)
}
  0x20   : > { %s1043_s7 = scalar_lea.vmem %s170_s23, 16  ;;  %s1050_s8 = scalar_lea.vmem %s170_s23, 32 }
  0x21   : > { %p1044_p7 = scmp.ne.s32.totalorder %s170_s23, %s1043_s7  ;;  %p1051_p3 = scmp.lt.s32.totalorder %s170_s23, %s170_s23 }
  0x22   : > { %p1052_p6 = scmp.lt.s32.totalorder %s1050_s8, %s1043_s7 }
  0x23   : > { %p1046_p9 = pnand %p1044_p7, %p1032_p0 }
  0x24   : > { %p1053_p8 = por %p1052_p6, %p1051_p3 }
  0x25   : > { %p1047_p10 = pneg %p1046_p9 }
  0x27   : > { %p1054_p12 = pnand %p1053_p8, %p1047_p10 }
  0x29   : > { %1057 = shalt.err (!%p1054_p12)
}
  0x2a   : > { %921 = dma.hbm_to_vmem [thread:$0]  (!%p1297_p11), %s1507_s2, 16, %s170_s23, [#allocation7]  }
  0x2b   : > { %s32_s11 = sadd.s32 1, %s1202_s16  ;;  %s798_s12 = sshll.u32 %s1293_s24, 5 }
  0x2c   : > { %p33_p3 = scmp.ge.s32.totalorder %s32_s11, 2  ;;  %s853_s22 = sshll.u32 %s1202_s16, 8 }
  0x2d   : > { %s184_s27 = scalar_lea.vmem [#allocation3], %s798_s12  ;;  %s1518_s0 = sld [smem:[#allocation14_spill]] }
  0x2e   : > { %s194_s25 = sshll.u32 %s184_s27, 4  ;;  %s1530_s11 = smov (%p33_p3, %s32_s11), 0  ;;  %s1331_s25 = int_to_ptr.vmem [resolvable:$true] %s194_s25 }
  0x2f   : > { %s44_s23 = ssub.s32 %s1202_s16, %s1530_s11  ;;  %s204_s4 = sand.u32 1, %s1206_s17  }
  0x30   : > { %p46_p6 = scmp.eq.s32.totalorder %s44_s23, 0  ;;  %s181_s6 = scalar_lea.sflag [#allocation4], %s1293_s24 }
  0x31   : > { %p1519_p11 = scmp.ne.s32.totalorder %s1517_s26, 0 }
  0x32   : > { %s1339_s5 = scalar_select %p46_p6, %s1194_s14, %s48_s19  }
  0x33   : > { %s1329_s30 = scalar_lea.hbm %s1518_s0, %s853_s22  ;;  %p1060_p12 = pneg %p1519_p11 }
  0x34   : > { %s1058_s7 = scalar_lea.hbm %s1329_s30, 512  ;;  %s1063_s10 = scalar_lea.hbm %s1518_s0, 1024 }
  0x35   : > { %p1059_p8 = scmp.ne.s32.totalorder %s1329_s30, %s1058_s7  ;;  %p1064_p1 = scmp.lt.u32.totalorder %s1329_s30, %s1518_s0 }
  0x36   : > { %p1065_p2 = scmp.lt.u32.totalorder %s1063_s10, %s1058_s7  ;;  %p1067_p4 = scmp.lt.u32.totalorder %s1058_s7, %s1329_s30 }
  0x37   : > { %p1061_p13 = pnand %p1060_p12, %p1059_p8 }
  0x38   : > { %p1066_p5 = por %p1065_p2, %p1064_p1 }
  0x39   : > { %p1062_p0 = pneg %p1061_p13 }
  0x3a   : > { %p1068_p7 = por %p1067_p4, %p1066_p5 }
  0x3c   : > { %p1069_p9 = pnand %p1068_p7, %p1062_p0 }
  0x3e   : > { %1072 = shalt.err (!%p1069_p9)
}
  0x3f   : > { %s1073_s19 = scalar_lea.vmem %s1331_s25, 512  ;;  %s1209_s27 = smov [#allocation3]  }
  0x40   : > { %p1074_p10 = scmp.ne.s32.totalorder %s1331_s25, %s1073_s19  ;;  %s1078_s28 = sshll.u32 %s1209_s27, 4  ;;  %s1079_s28 = int_to_ptr.vmem [resolvable:$false] %s1078_s28 }
  0x41   : > { %s1080_s29 = scalar_lea.vmem %s1079_s28, 1024  ;;  %p1081_p8 = scmp.lt.s32.totalorder %s1331_s25, %s1079_s28 }
  0x42   : > { %p1076_p3 = pnand %p1074_p10, %p1060_p12  ;;  %p1082_p13 = scmp.lt.s32.totalorder %s1080_s29, %s1073_s19 }
  0x44   : > { %p1077_p6 = pneg %p1076_p3  ;;  %p1083_p1 = por %p1082_p13, %p1081_p8 }
  0x46   : > { %p1084_p2 = pnand %p1083_p1, %p1077_p6 }
  0x48   : > { %1087 = shalt.err (!%p1084_p2)
}
  0x49   : > { %s1210_s23 = smov 512   ;;  %s1211_s7 = smov 256  }
  0x4a   : > { %s1212_s8 = smov 16   ;;  %s801_s9 = sshll.u32 %s1293_s24, 8 }
  0x4b   : > { %925 = dma.hbm_to_vmem [thread:$0]  (!%p1519_p11), %s1329_s30, 512, %s1331_s25, %s181_s6, %s1210_s23, %s1211_s7, %s1212_s8  }
  0x4c   : > { %s854_s10 = sshll.u32 %s1202_s16, 12  ;;  %s208_s27 = scalar_lea.vmem [#allocation6], %s801_s9 }
  0x4d   : > { %s1374_s19 = scalar_lea.hbm %s1506_s1, %s854_s10  ;;  %s216_s28 = sshll.u32 %s208_s27, 4  ;;  %s1376_s28 = int_to_ptr.vmem [resolvable:$true] %s216_s28 }
  0x4e   : > { %s1380_s29 = scalar_lea.sflag [#allocation7], %s204_s4  ;;  %s1088_s0 = scalar_lea.hbm %s1374_s19, 4096 }
  0x4f   : > { %p1089_p0 = scmp.ne.s32.totalorder %s1374_s19, %s1088_s0  ;;  %s1093_s30 = scalar_lea.hbm %s1506_s1, 8192 }
  0x50   : > { %p1094_p7 = scmp.lt.u32.totalorder %s1374_s19, %s1506_s1  ;;  %p1095_p9 = scmp.lt.u32.totalorder %s1093_s30, %s1088_s0 }
  0x51   : > { %p1091_p5 = pnand %p1089_p0, %p1060_p12  ;;  %p1097_p3 = scmp.lt.u32.totalorder %s1088_s0, %s1374_s19 }
  0x52   : > { %p1096_p10 = por %p1095_p9, %p1094_p7 }
  0x53   : > { %p1092_p4 = pneg %p1091_p5 }
  0x54   : > { %p1098_p6 = por %p1097_p3, %p1096_p10 }
  0x56   : > { %p1099_p8 = pnand %p1098_p6, %p1092_p4 }
  0x58   : > { %1102 = shalt.err (!%p1099_p8)
}
  0x59   : > { %s1103_s4 = scalar_lea.vmem %s1376_s28, 4096  ;;  %s1213_s7 = smov [#allocation6]  }
  0x5a   : > { %p1104_p13 = scmp.ne.s32.totalorder %s1376_s28, %s1103_s4  ;;  %s1108_s8 = sshll.u32 %s1213_s7, 4  ;;  %s1109_s8 = int_to_ptr.vmem [resolvable:$false] %s1108_s8 }
  0x5b   : > { %s1110_s9 = scalar_lea.vmem %s1109_s8, 8192  ;;  %p1111_p0 = scmp.lt.s32.totalorder %s1376_s28, %s1109_s8 }
  0x5c   : > { %p1106_p1 = pnand %p1104_p13, %p1060_p12  ;;  %p1112_p5 = scmp.lt.s32.totalorder %s1110_s9, %s1103_s4 }
  0x5e   : > { %p1107_p2 = pneg %p1106_p1  ;;  %p1113_p7 = por %p1112_p5, %p1111_p0 }
  0x60   : > { %p1114_p9 = pnand %p1113_p7, %p1107_p2 }
  0x62   : > { %1117 = shalt.err (!%p1114_p9)
}
  0x63   : > { %s1214_s0 = smov 64   ;;  %s1215_s10 = smov 4  }
  0x64   : > { %928 = dma.hbm_to_vmem [thread:$0]  (!%p1519_p11), %s1374_s19, 4096, %s1376_s28, %s1380_s29, %s1214_s0, %s1214_s0, %s1215_s10  }
  0x65   : > { %p1520_p12 = scmp.ne.s32.totalorder %s1515_s21, 0 }
  0x66   : > { %s230_s12 = sand.u32 (!%p1520_p12), 1, %s1190_s13   ;;  %p1521_p4 = scmp.ne.s32.totalorder (!%p1520_p12), %s1514_s20, 0 }
  0x67   : > { %228 = sbr.rel (%p1520_p12) target bundleno = 423 (0x1a7), region = 32  ;;  %s805_s22 = sshll.u32 (!%p1520_p12), %s230_s12, 5 }
  0x68   : > { %s231_s27 = scalar_lea.sflag (!%p1520_p12), [#allocation4], %s230_s12  ;;  %s1409_s24 = scalar_lea.vmem (!%p1520_p12), [#allocation3], %s805_s22 }
  0x6e   : > { %1169 = dma.done.wait (%p1521_p4), %s231_s27, 512  }
  0x6f   : > { %1171 = vsyncadd (%p1521_p4), %s231_s27, 4294966784  ;;  %s239_s25 = sand.u32 1, %s1269_s18   ;;  %s806_s26 = sshll.u32 %s230_s12, 8 }
  0x70   : > { %s240_s19 = scalar_lea.sflag [#allocation7], %s239_s25  ;;  %s1416_s28 = scalar_lea.vmem [#allocation6], %s806_s26 }
  0x71   : > { %1173 = dma.done.wait (%p1521_p4), %s240_s19, 4096  }
  0x72   : > { %1175 = vsyncadd (%p1521_p4), %s240_s19, 4294963200  ;;  %p1522_p11 = scmp.eq.s32.totalorder %s1269_s18, 0 }
  0x74   : > { %1177 = dma.done.wait (%p1522_p11), [#allocation7], 16   ;;  %p1523_p10 = pmov %p1522_p11 }
  0x75   : > { %p808_p3 = scmp.ne.s32.totalorder %s1198_s15, 0 }
  0x76   : > { %1179 = vsyncadd (%p1523_p10), [#allocation7], 4294967280  ;;  %v1216_v0 = vmov (!%p808_p3), 0.0  }
  0x77   : > { %278 = sbr.rel (%p808_p3) target bundleno = 126 (0x7e), region = 48  ;;  %279 = vst [vmem:[#allocation2] sm:$0xff] (!%p808_p3), %v1216_v0  ;;  %280 = vst [vmem:[#allocation2 + $0x8] sm:$0xff] (!%p808_p3), %v1216_v0 }
  0x7e PF: > { %v992_v1 = vld [vmem:[%s1416_s28 + $0x40] sm:$0xff]   ;;  %v996_v5 = vld [vmem:[%s1416_s28 + $0x48] sm:$0xff]   ;;  %v1000_v9 = vld [vmem:[%s1416_s28 + $0x50] sm:$0xff]   ;;  %p845_p6 = scmp.ne.s32.totalorder %s1198_s15, 1 }
  0x7f   : > { %v993_v2 = vld [vmem:[%s1416_s28 + $0xc0] sm:$0xff]   ;;  %862 = vmatprep.subr.bf16.mxu0 %v992_v1  ;;  %v997_v6 = vld [vmem:[%s1416_s28 + $0xc8] sm:$0xff]   ;;  %v1001_v10 = vld [vmem:[%s1416_s28 + $0xd0] sm:$0xff]  }
  0x80   : > { %v994_v3 = vld [vmem:[%s1416_s28] sm:$0xff]   ;;  %884 = vmatprep.subr.bf16.mxu1 %v993_v2  ;;  %v998_v7 = vld [vmem:[%s1416_s28 + $0x8] sm:$0xff]   ;;  %v1002_v11 = vld [vmem:[%s1416_s28 + $0x10] sm:$0xff]  }
  0x81   : > { %v995_v4 = vld [vmem:[%s1416_s28 + $0x80] sm:$0xff]   ;;  %863 = vmatpush3.bf16.msra.mxu0 %v994_v3  ;;  %v999_v8 = vld [vmem:[%s1416_s28 + $0x88] sm:$0xff]   ;;  %v1003_v12 = vld [vmem:[%s1416_s28 + $0x90] sm:$0xff]  }
  0x82   : > { %885 = vmatpush3.bf16.msra.mxu1 %v995_v4  ;;  %864 = vmatprep.subr.bf16.mxu0 %v996_v5  ;;  %v1004_v13 = vld [vmem:[%s1416_s28 + $0x58] sm:$0xff]   ;;  %v1008_v17 = vld [vmem:[%s1416_s28 + $0x60] sm:$0xff]   ;;  %v1012_v21 = vld [vmem:[%s1416_s28 + $0x68] sm:$0xff]  }
  0x83   : > { %886 = vmatprep.subr.bf16.mxu1 %v997_v6  ;;  %v1005_v14 = vld [vmem:[%s1416_s28 + $0xd8] sm:$0xff]   ;;  %v1009_v18 = vld [vmem:[%s1416_s28 + $0xe0] sm:$0xff]   ;;  %v1013_v22 = vld [vmem:[%s1416_s28 + $0xe8] sm:$0xff]  }
  0x84   : > { %v1006_v15 = vld [vmem:[%s1416_s28 + $0x18] sm:$0xff]   ;;  %v1010_v19 = vld [vmem:[%s1416_s28 + $0x20] sm:$0xff]   ;;  %v1014_v23 = vld [vmem:[%s1416_s28 + $0x28] sm:$0xff]  }
  0x85   : > { %865 = vmatpush3.bf16.msra.mxu0 %v998_v7  ;;  %v1007_v16 = vld [vmem:[%s1416_s28 + $0x98] sm:$0xff]   ;;  %v1011_v20 = vld [vmem:[%s1416_s28 + $0xa0] sm:$0xff]   ;;  %v1015_v24 = vld [vmem:[%s1416_s28 + $0xa8] sm:$0xff]  }
  0x86   : > { %887 = vmatpush3.bf16.msra.mxu1 %v999_v8  ;;  %866 = vmatprep.subr.bf16.mxu0 %v1000_v9  ;;  %v1016_v25 = vld [vmem:[%s1416_s28 + $0x70] sm:$0xff]   ;;  %v1020_v29 = vld [vmem:[%s1416_s28 + $0x78] sm:$0xff]   ;;  %v846_v57 = vld [vmem:[#allocation8] ss:$0 sm:$0xff] (!%p845_p6) }
  0x87   : > { %888 = vmatprep.subr.bf16.mxu1 %v1001_v10  ;;  %v1017_v26 = vld [vmem:[%s1416_s28 + $0xf0] sm:$0xff]   ;;  %v1021_v30 = vld [vmem:[%s1416_s28 + $0xf8] sm:$0xff]  }
  0x88   : > { %v1018_v27 = vld [vmem:[%s1416_s28 + $0x30] sm:$0xff]   ;;  %v1022_v31 = vld [vmem:[%s1416_s28 + $0x38] sm:$0xff]  }
  0x89   : > { %867 = vmatpush3.bf16.msra.mxu0 %v1002_v11  ;;  %v1019_v28 = vld [vmem:[%s1416_s28 + $0xb0] sm:$0xff]   ;;  %v1023_v32 = vld [vmem:[%s1416_s28 + $0xb8] sm:$0xff]  }
  0x8a   : > { %889 = vmatpush3.bf16.msra.mxu1 %v1003_v12  ;;  %868 = vmatprep.subr.bf16.mxu0 %v1004_v13  ;;  %v1024_v33 = vld [vmem:[%s1409_s24] ss:$16 sps:$4 sm:$0xff]   ;;  %v1026_v34 = vld [vmem:[%s1409_s24 + $0x4] ss:$16 sps:$4 sm:$0xff]   ;;  %v1027_v35 = vld [vmem:[%s1409_s24 + $0x8] ss:$16 sps:$4 sm:$0xff]  }
  0x8b   : > { %890 = vmatprep.subr.bf16.mxu1 %v1005_v14  ;;  %v1029_v36 = vld [vmem:[%s1409_s24 + $0xc] ss:$16 sps:$4 sm:$0xff]   ;;  %595 = vmatprep.mubr.bf16.mxu0 %v1026_v34  ;;  %v281_v46 = vld [vmem:[#allocation2] sm:$0xff] }
  0x8c   : > { %636 = vmatprep.mubr.bf16.mxu1 %v1029_v36  ;;  %v282_v51 = vld [vmem:[#allocation2 + $0x8] sm:$0xff] }
  0x8d   : > { %869 = vmatpush3.bf16.msra.mxu0 %v1006_v15 }
  0x8e   : > { %891 = vmatpush3.bf16.msra.mxu1 %v1007_v16  ;;  %870 = vmatprep.subr.bf16.mxu0 %v1008_v17 }
  0x8f   : > { %892 = vmatprep.subr.bf16.mxu1 %v1009_v18 }
  0x91   : > { %871 = vmatpush3.bf16.msra.mxu0 %v1010_v19 }
  0x92   : > { %893 = vmatpush3.bf16.msra.mxu1 %v1011_v20  ;;  %872 = vmatprep.subr.bf16.mxu0 %v1012_v21 }
  0x93   : > { %894 = vmatprep.subr.bf16.mxu1 %v1013_v22 }
  0x95   : > { %873 = vmatpush3.bf16.msra.mxu0 %v1014_v23 }
  0x96   : > { %895 = vmatpush3.bf16.msra.mxu1 %v1015_v24  ;;  %874 = vmatprep.subr.bf16.mxu0 %v1016_v25 }
  0x97   : > { %896 = vmatprep.subr.bf16.mxu1 %v1017_v26 }
  0x99   : > { %875 = vmatpush3.bf16.msra.mxu0 %v1018_v27 }
  0x9a   : > { %897 = vmatpush3.bf16.msra.mxu1 %v1019_v28  ;;  %876 = vmatprep.subr.bf16.mxu0 %v1020_v29 }
  0x9b   : > { %898 = vmatprep.subr.bf16.mxu1 %v1021_v30 }
  0x9d   : > { %877 = vmatpush3.bf16.msra.mxu0 %v1022_v31 }
  0x9e   : > { %899 = vmatpush3.bf16.msra.mxu1 %v1023_v32 }
  0xa0   : > { %596 = vmatmul.mubr.bf16.vlgmr.msra.gmra.mrb[0].mxu0 %v1024_v33 }
  0xa1   : > { %637 = vmatmul.mubr.bf16.vlgmr.msra.gmra.mrb[0].mxu1 %v1027_v35 }
 0x173   : > { %v878_v37 = vpop.f32.mrb[0].mxu0 }
 0x174   : > { %v900_v38 = vpop.f32.mrb[0].mxu1  ;;  %v879_v39 = vpop.f32.mrb[1].mxu0 }
 0x175   : > { %v880_v40 = vadd.f32 %v879_v39, %v878_v37  ;;  %v901_v41 = vpop.f32.mrb[1].mxu1  ;;  %v881_v42 = vpop.f32.mrb[2].mxu0 }
 0x176   : > { %v902_v43 = vadd.f32 %v901_v41, %v900_v38  ;;  %v903_v44 = vpop.f32.mrb[2].mxu1  ;;  %v882_v45 = vpop.f32.mrb[3].mxu0 }
 0x177   : > { %v883_v47 = vadd.f32 %v882_v45, %v881_v42  ;;  %v904_v48 = vpop.f32.mrb[3].mxu1 }
 0x178   : > { %v639_v49 = vadd.f32 %v902_v43, %v880_v40  ;;  %v905_v50 = vadd.f32 %v904_v48, %v903_v44  ;;  %652 = sbr.rel (%p845_p6) target bundleno = 397 (0x18d), region = 52 }
 0x17a   : > { %v645_v52 = vadd.f32 %v639_v49, %v281_v46  ;;  %v642_v53 = vadd.f32 %v905_v50, %v883_v47 }
 0x17c   : > { %647 = vst [vmem:[#allocation2] sm:$0xff] %v645_v52  ;;  %v646_v54 = vadd.f32 %v642_v53, %v282_v51 }
 0x17e   : > { %648 = vst [vmem:[#allocation2 + $0x8] sm:$0xff] %v646_v54 }
 0x183   : > { %v653_v55 = vld [vmem:[#allocation2] sm:$0xff] }
 0x184   : > { %v662_v58 = vadd.f32 %v846_v57, %v653_v55 }
 0x185   : > { %v654_v56 = vld [vmem:[#allocation2 + $0x8] sm:$0xff] }
 0x186   : > { %v663_v59 = vadd.f32 %v846_v57, %v654_v56  ;;  %v664_v60 = vmax.f32 %v662_v58, 0.0 }
 0x188   : > { %v665_v61 = vmax.f32 %v663_v59, 0.0 }
 0x18a   : > { %v860_v62 = vpack.c.bf16 %v665_v61, %v664_v60 }
 0x18c   : > { %861 = vst [vmem:[#allocation9] sm:$0xff] %v860_v62  }
 0x18d PF: > { %p932_p8 = scmp.eq.s32.totalorder %s1269_s18, 1  ;;  %s1217_s20 = smov [#allocation9]  }
 0x18e   : > { %s686_s21 = sshll.u32 %s1217_s20, 4  ;;  %s687_s21 = int_to_ptr.vmem [resolvable:$true] %s686_s21 }
 0x18f   : > { %s1118_s29 = scalar_lea.vmem %s687_s21, 128  ;;  %p1125_p0 = scmp.lt.s32.totalorder %s687_s21, %s687_s21 }
 0x190   : > { %p1119_p13 = scmp.ne.s32.totalorder %s687_s21, %s1118_s29  ;;  %p1126_p5 = scmp.lt.s32.totalorder %s1118_s29, %s1118_s29 }
 0x192   : > { %p1120_p1 = pnand %p1119_p13, %p932_p8  ;;  %p1127_p7 = por %p1126_p5, %p1125_p0 }
 0x194   : > { %p1121_p2 = pneg %p1120_p1 }
 0x196   : > { %p1128_p9 = pnand %p1127_p7, %p1121_p2 }
 0x198   : > { %1131 = shalt.err (!%p1128_p9)
}
 0x199   : > { %s1132_s6 = scalar_lea.hbm %s1508_s3, 128 }
 0x19a   : > { %p1133_p12 = scmp.ne.s32.totalorder %s1508_s3, %s1132_s6  ;;  %p1138_p10 = scmp.lt.u32.totalorder %s1132_s6, %s1508_s3 }
 0x19c   : > { %p1134_p4 = pnand %p1133_p12, %p932_p8 }
 0x19e   : > { %p1135_p11 = pneg %p1134_p4 }
 0x1a0   : > { %p1140_p3 = pnand %p1138_p10, %p1135_p11 }
 0x1a2   : > { %1143 = shalt.err (!%p1140_p3)
}
 0x1a3   : > { %s1218_s9 = smov 64   ;;  %s1219_s0 = smov 4  }
 0x1a4   : > { %915 = dma.vmem_to_hbm [thread:$0]  (%p932_p8), %s687_s21, 128, %s1508_s3, [#allocation5], %s1218_s9, %s1218_s9, %s1219_s0  }
 0x1a5   : > { %1181 = dma.done.wait (%p932_p8), [#allocation5], 128  }
 0x1a6   : > { %1183 = vsyncadd (%p932_p8), [#allocation5], 4294967168 }
 0x1a7 PF: > { %s20_s17 = sadd.s32 1, %s1206_s17   ;;  %s1524_s12 = smov %s1190_s13 }
 0x1a8   : > { %p17_p6 = scmp.ge.s32.totalorder %s20_s17, 4   ;;  %s1525_s13 = smov %s1194_s14 }
 0x1a9   : > { %s1526_s14 = smov %s1339_s5  ;;  %s1527_s15 = smov %s1202_s16 }
 0x1aa   : > { %s1528_s16 = smov %s1530_s11  ;;  %19 = sbr.rel (!%p17_p6) target bundleno = 9 (0x9), region = 96 }
 0x1b1   :  { %702 = vsyncpa [#allocation4], 1 }
 0x1b2   :  { %704 = vsyncpa [#allocation4 + $0x1], 1 }
 0x1b3   :  { %705 = vsyncpa [#allocation7], 1 }
 0x1b4   :  { %707 = vsyncpa [#allocation7 + $0x1], 1 }
 0x1b5   :  { %708 = vsyncpa [#allocation5], 1 }
 0x1b6   :  { %710 = vsyncpa [#allocation5 + $0x1], 1 }

// kernel: repmlp_resnet_forward.40
= control target key start
LH: loop header
LB: loop body
LE: loop exit
PB: predicated region body
PF: predicated region fallthrough
CT: control target
= control target key end

     0   :  { %8 = vsyncpa [#allocation4], 0  ;;  %s509_s0 = inlined_call_operand.hbm [shape: bf16[16,128], index: 0, kind: input, shape index: {}]   ;;  %s510_s1 = inlined_call_operand.hbm [shape: bf16[128,256], index: 1, kind: input, shape index: {}]   ;;  %s511_s2 = inlined_call_operand.hbm [shape: f32[1,256], index: 2, kind: input, shape index: {}]   ;;  %s512_s3 = inlined_call_operand.hbm [shape: bf16[16,256], index: 3, kind: output, shape index: {}]  }
   0x1   :  { %9 = vsyncpa [#allocation7], 0 }
   0x2   :  { %10 = vsyncpa [#allocation5], 0  ;;  %s426_s12 = smov [#allocation6]   ;;  %s332_s16 = scalar_lea.hbm %s510_s1, 2048 }
   0x3   :  { %s28_s13 = sshll.u32 %s426_s12, 4  ;;  %p333_p0 = scmp.ne.s32.totalorder %s510_s1, %s332_s16  ;;  %s29_s13 = int_to_ptr.vmem [resolvable:$true] %s28_s13 }
   0x4   :  { %p336_p1 = scmp.lt.u32.totalorder %s332_s16, %s510_s1 }
   0x6   :  { %p338_p2 = pnand %p336_p1, %p333_p0 }
   0x8   :  { %341 = shalt.err (!%p338_p2)
}
   0x9   :  { %s342_s21 = scalar_lea.vmem %s29_s13, 2048  ;;  %p347_p4 = scmp.lt.s32.totalorder %s29_s13, %s29_s13 }
   0xa   :  { %p343_p3 = scmp.ne.s32.totalorder %s29_s13, %s342_s21  ;;  %p348_p5 = scmp.lt.s32.totalorder %s342_s21, %s342_s21 }
   0xc   :  { %p349_p6 = por %p348_p5, %p347_p4 }
   0xe   :  { %p350_p7 = pnand %p349_p6, %p343_p3 }
  0x10   :  { %353 = shalt.err (!%p350_p7)
}
  0x11   :  { %s427_s22 = smov 128   ;;  %s428_s23 = smov 8  }
  0x12   :  { %34 = dma.hbm_to_vmem [thread:$0]  %s510_s1, 2048, %s29_s13, [#allocation7], %s427_s22, %s427_s22, %s428_s23  }
  0x13   :  { %s429_s26 = smov [#allocation3]   ;;  %s354_s30 = scalar_lea.hbm %s509_s0, 128 }
  0x14   :  { %s16_s27 = sshll.u32 %s429_s26, 4  ;;  %p355_p8 = scmp.ne.s32.totalorder %s509_s0, %s354_s30  ;;  %s17_s27 = int_to_ptr.vmem [resolvable:$true] %s16_s27 }
  0x15   :  { %p358_p9 = scmp.lt.u32.totalorder %s354_s30, %s509_s0 }
  0x17   :  { %p360_p10 = pnand %p358_p9, %p355_p8 }
  0x19   :  { %363 = shalt.err (!%p360_p10)
}
  0x1a   :  { %s364_s8 = scalar_lea.vmem %s17_s27, 128  ;;  %p369_p12 = scmp.lt.s32.totalorder %s17_s27, %s17_s27 }
  0x1b   :  { %p365_p11 = scmp.ne.s32.totalorder %s17_s27, %s364_s8  ;;  %p370_p13 = scmp.lt.s32.totalorder %s364_s8, %s364_s8 }
  0x1d   :  { %p371_p0 = por %p370_p13, %p369_p12 }
  0x1f   :  { %p372_p1 = pnand %p371_p0, %p365_p11 }
  0x21   :  { %375 = shalt.err (!%p372_p1)
}
  0x22   :  { %s430_s1 = smov 64   ;;  %s431_s9 = smov 4  }
  0x23   :  { %22 = dma.hbm_to_vmem [thread:$0]  %s509_s0, 128, %s17_s27, [#allocation4], %s430_s1, %s430_s1, %s431_s9  }
  0x24   :  { %s432_s12 = smov [#allocation8]   ;;  %s376_s16 = scalar_lea.hbm %s511_s2, 32 }
  0x25   :  { %s41_s13 = sshll.u32 %s432_s12, 4  ;;  %p377_p2 = scmp.ne.s32.totalorder %s511_s2, %s376_s16  ;;  %s42_s13 = int_to_ptr.vmem [resolvable:$true] %s41_s13 }
  0x26   :  { %p380_p3 = scmp.lt.u32.totalorder %s376_s16, %s511_s2 }
  0x28   :  { %p382_p4 = pnand %p380_p3, %p377_p2 }
  0x2a   :  { %385 = shalt.err (!%p382_p4)
}
  0x2b   :  { %s386_s21 = scalar_lea.vmem %s42_s13, 32  ;;  %p391_p6 = scmp.lt.s32.totalorder %s42_s13, %s42_s13 }
  0x2c   :  { %p387_p5 = scmp.ne.s32.totalorder %s42_s13, %s386_s21  ;;  %p392_p7 = scmp.lt.s32.totalorder %s386_s21, %s386_s21 }
  0x2e   :  { %p393_p8 = por %p392_p7, %p391_p6 }
  0x30   :  { %p394_p9 = pnand %p393_p8, %p387_p5 }
  0x32   :  { %397 = shalt.err (!%p394_p9)
}
  0x33   :  { %44 = dma.hbm_to_vmem [thread:$0]  %s511_s2, 32, %s42_s13, [#allocation7]  }
  0x34   :  { %420 = dma.done.wait [#allocation4], 128  }
  0x35   :  { %421 = vsyncadd [#allocation4], 4294967168 }
  0x36   :  { %422 = dma.done.wait [#allocation7], 2080  }
  0x37   :  { %423 = vsyncadd [#allocation7], 4294965216  ;;  %v433_v0 = vmov 0   ;;  %v307_v1 = vld [vmem:[#allocation6 + $0x4] ss:$8 sps:$4 sm:$0xff]   ;;  %v331_v17 = vld [vmem:[#allocation3] sm:$0xff]   ;;  %v231_v18 = vlaneseq }
  0x38   :  { %203 = vmatprep.mubr.bf16.mxu0 %v433_v0  ;;  %v309_v2 = vld [vmem:[#allocation6] ss:$8 sps:$4 sm:$0xff]   ;;  %171 = vmatprep.subr.bf16.mxu0 %v307_v1  ;;  %v310_v3 = vld [vmem:[#allocation6 + $0x14] ss:$8 sps:$4 sm:$0xff]   ;;  %v312_v4 = vld [vmem:[#allocation6 + $0x10] ss:$8 sps:$4 sm:$0xff]  }
  0x39   :  { %172 = vmatpush1.bf16.msra.mxu0 %v309_v2  ;;  %v313_v5 = vld [vmem:[#allocation6 + $0x24] ss:$8 sps:$4 sm:$0xff]   ;;  %v315_v6 = vld [vmem:[#allocation6 + $0x20] ss:$8 sps:$4 sm:$0xff]   ;;  %v316_v7 = vld [vmem:[#allocation6 + $0x34] ss:$8 sps:$4 sm:$0xff]  }
  0x3a   :  { %173 = vmatprep.subr.bf16.mxu0 %v310_v3  ;;  %v318_v8 = vld [vmem:[#allocation6 + $0x30] ss:$8 sps:$4 sm:$0xff]   ;;  %v319_v9 = vld [vmem:[#allocation6 + $0x44] ss:$8 sps:$4 sm:$0xff]   ;;  %v321_v10 = vld [vmem:[#allocation6 + $0x40] ss:$8 sps:$4 sm:$0xff]  }
  0x3b   :  { %v322_v11 = vld [vmem:[#allocation6 + $0x54] ss:$8 sps:$4 sm:$0xff]   ;;  %v324_v12 = vld [vmem:[#allocation6 + $0x50] ss:$8 sps:$4 sm:$0xff]   ;;  %v325_v13 = vld [vmem:[#allocation6 + $0x64] ss:$8 sps:$4 sm:$0xff]  }
  0x3c   :  { %v327_v14 = vld [vmem:[#allocation6 + $0x60] ss:$8 sps:$4 sm:$0xff]   ;;  %v328_v15 = vld [vmem:[#allocation6 + $0x74] ss:$8 sps:$4 sm:$0xff]   ;;  %v330_v16 = vld [vmem:[#allocation6 + $0x70] ss:$8 sps:$4 sm:$0xff]  }
  0x3d   :  { %174 = vmatpush1.bf16.msra.mxu0 %v312_v4  ;;  %v232_v19 = vshrl.u32 %v231_v18, 7  ;;  %v229_v21 = vld [vmem:[#allocation8] sm:$0x3]  ;;  %s434_s2 = smov [#allocation9]  }
  0x3e   :  { %175 = vmatprep.subr.bf16.mxu0 %v313_v5  ;;  %s264_s25 = sshll.u32 %s434_s2, 4  ;;  %s265_s25 = int_to_ptr.vmem [resolvable:$true] %s264_s25 }
  0x3f   :  { %v233_v20 = vsub.s32 0, %v232_v19  ;;  %v237_v22 = vsub.s32 1, %v232_v19  ;;  %s398_s26 = scalar_lea.vmem %s265_s25, 256  ;;  %p403_p11 = scmp.lt.s32.totalorder %s265_s25, %s265_s25 }
  0x40   :  { %p399_p10 = scmp.ne.s32.totalorder %s265_s25, %s398_s26  ;;  %p404_p12 = scmp.lt.s32.totalorder %s398_s26, %s398_s26 }
  0x41   :  { %176 = vmatpush1.bf16.msra.mxu0 %v315_v6  ;;  %v234_v23 = vrot.slane %v229_v21, %v233_v20  ;;  %v238_v24 = vrot.slane %v229_v21, %v237_v22 }
  0x42   :  { %177 = vmatprep.subr.bf16.mxu0 %v316_v7  ;;  %p405_p13 = por %p404_p12, %p403_p11 }
  0x44   :  { %p406_p0 = pnand %p405_p13, %p399_p10 }
  0x45   :  { %178 = vmatpush1.bf16.msra.mxu0 %v318_v8 }
  0x46   :  { %179 = vmatprep.subr.bf16.mxu0 %v319_v9 }
  0x49   :  { %180 = vmatpush1.bf16.msra.mxu0 %v321_v10 }
  0x4a   :  { %181 = vmatprep.subr.bf16.mxu0 %v322_v11 }
  0x4d   :  { %182 = vmatpush1.bf16.msra.mxu0 %v324_v12 }
  0x4e   :  { %183 = vmatprep.subr.bf16.mxu0 %v325_v13 }
  0x51   :  { %184 = vmatpush1.bf16.msra.mxu0 %v327_v14 }
  0x52   :  { %185 = vmatprep.subr.bf16.mxu0 %v328_v15 }
  0x55   :  { %186 = vmatpush1.bf16.msra.mxu0 %v330_v16 }
  0x58   :  { %204 = vmatmul.mubr.bf16.vlgmr.msra.gmra.mrb[0].mxu0 %v331_v17 }
 0x12b   :  { %v205_v25 = vpop.f32.mrb[0].mxu0 }
 0x12c   :  { %v241_v26 = vadd.f32 %v234_v23, %v205_v25  ;;  %v207_v27 = vpop.f32.mrb[1].mxu0 }
 0x12d   :  { %v242_v28 = vadd.f32 %v238_v24, %v207_v27  ;;  %v209_v29 = vpop.f32.mrb[2].mxu0 }
 0x12e   :  { %v243_v30 = vadd.f32 %v234_v23, %v209_v29  ;;  %v211_v31 = vpop.f32.mrb[3].mxu0 }
 0x12f   :  { %v296_v32 = vpack.c.bf16 %v242_v28, %v241_v26  ;;  %v244_v33 = vadd.f32 %v238_v24, %v211_v31 }
 0x131   :  { %257 = vst [vmem:[#allocation9] sm:$0xff] %v296_v32  ;;  %v297_v34 = vpack.c.bf16 %v244_v33, %v243_v30 }
 0x133   :  { %258 = vst [vmem:[#allocation9 + $0x8] sm:$0xff] %v297_v34 }
 0x134   :  { %409 = shalt.err (!%p406_p0)
}
 0x135   :  { %s410_s29 = scalar_lea.hbm %s512_s3, 256 }
 0x136   :  { %p411_p1 = scmp.ne.s32.totalorder %s512_s3, %s410_s29  ;;  %p414_p2 = scmp.lt.u32.totalorder %s410_s29, %s512_s3 }
 0x138   :  { %p416_p3 = pnand %p414_p2, %p411_p1 }
 0x13a   :  { %419 = shalt.err (!%p416_p3)
}
 0x13b   :  { %270 = dma.vmem_to_hbm [thread:$0]  %s265_s25, 256, %s512_s3, [#allocation5], %s427_s22, %s427_s22, %s428_s23  }
 0x13c   :  { %424 = dma.done.wait [#allocation5], 256  }
 0x13d   :  { %425 = vsyncadd [#allocation5], 4294967040 }
 0x13e   :  { %274 = vsyncpa [#allocation4], 1 }
 0x13f   :  { %275 = vsyncpa [#allocation7], 1 }
 0x140   :  { %276 = vsyncpa [#allocation5], 1 }

// kernel: repmlp_resnet_forward.44
= control target key start
LH: loop header
LB: loop body
LE: loop exit
PB: predicated region body
PF: predicated region fallthrough
CT: control target
= control target key end

     0   :  { %6 = vsyncpa [#allocation3], 0  ;;  %s452_s0 = inlined_call_operand.hbm [shape: bf16[2,1,256], index: 0, kind: input, shape index: {}]   ;;  %s453_s1 = inlined_call_operand.vmem [shape: f32[2,1,256], index: 1, kind: output, shape index: {}]  }
   0x1   :  { %8 = vsyncpa [#allocation3 + $0x1], 0  ;;  %s345_s6 = smov 0   ;;  %s347_s7 = smov 0  }
   0x2   :  { %s349_s8 = smov 0   ;;  %s351_s9 = smov 0  }
   0x3 LB: > { %s364_s10 = sadd.s32 4294967295, %s331_s9   ;;  %s367_s11 = sadd.s32 1, %s331_s9   ;;  %s331_s9 = sphi %s351_s9, %s461_s9   ;;  %s327_s8 = sphi %s349_s8, %s460_s8   ;;  %s323_s7 = sphi %s347_s7, %s459_s7   ;;  %s319_s6 = sphi %s345_s6, %s458_s6  }
   0x4   : > { %s18_s12 = ssub.s32 %s331_s9, %s367_s11  ;;  %s21_s13 = sadd.s32 1, %s327_s8 }
   0x5   : > { %p19_p0 = scmp.eq.s32.totalorder %s18_s12, 0  ;;  %p28_p1 = scmp.ne.s32.totalorder %s327_s8, %s323_s7 }
   0x6   : > { %p29_p2 = scmp.eq.s32.totalorder %s331_s9, 0  ;;  %p34_p3 = scmp.ne.s32.totalorder %s323_s7, %s319_s6 }
   0x7   : > { %s377_s14 = scalar_select %p19_p0, %s327_s8, %s21_s13  }
   0x8   : > { %p30_p4 = por %p29_p2, %p28_p1  ;;  %p35_p5 = scmp.eq.s32.totalorder %s364_s10, 0 }
   0x9   : > { %p233_p6 = scmp.lt.s32.totalorder %s331_s9, 2  ;;  %s84_s16 = sand.u32 1, %s327_s8  }
   0xa   : > { %p381_p7 = por %p35_p5, %p34_p3  ;;  %s218_s17 = sshll.u32 %s84_s16, 1 }
   0xb   : > { %s226_s18 = sshll.u32 %s331_s9, 5  ;;  %s88_s22 = scalar_lea.vmem [#allocation2], %s218_s17 }
   0xc   : > { %s390_s21 = scalar_lea.hbm %s452_s0, %s226_s18  ;;  %s96_s23 = sshll.u32 %s88_s22, 4  ;;  %s392_s23 = int_to_ptr.vmem [resolvable:$true] %s96_s23 }
   0xd   : > { %p394_p8 = pnand %p233_p6, %p30_p4  ;;  %s85_s25 = scalar_lea.sflag [#allocation3], %s84_s16 }
   0xe   : > { %s267_s26 = scalar_lea.hbm %s390_s21, 32  ;;  %s272_s29 = scalar_lea.hbm %s452_s0, 64 }
   0xf   : > { %p268_p11 = scmp.ne.s32.totalorder %s390_s21, %s267_s26  ;;  %p269_p12 = pneg %p394_p8 }
  0x10   : > { %p273_p1 = scmp.lt.u32.totalorder %s390_s21, %s452_s0  ;;  %p274_p2 = scmp.lt.u32.totalorder %s272_s29, %s267_s26 }
  0x11   : > { %p270_p13 = pnand %p269_p12, %p268_p11  ;;  %p276_p4 = scmp.lt.u32.totalorder %s267_s26, %s390_s21 }
  0x12   : > { %p275_p3 = por %p274_p2, %p273_p1 }
  0x13   : > { %p271_p0 = pneg %p270_p13 }
  0x14   : > { %p277_p5 = por %p276_p4, %p275_p3 }
  0x16   : > { %p278_p6 = pnand %p277_p5, %p271_p0 }
  0x18   : > { %281 = shalt.err (!%p278_p6)
}
  0x19   : > { %s282_s3 = scalar_lea.vmem %s392_s23, 32  ;;  %s333_s4 = smov [#allocation2]  }
  0x1a   : > { %p283_p11 = scmp.ne.s32.totalorder %s392_s23, %s282_s3  ;;  %s287_s5 = sshll.u32 %s333_s4, 4  ;;  %s288_s5 = int_to_ptr.vmem [resolvable:$false] %s287_s5 }
  0x1b   : > { %s289_s6 = scalar_lea.vmem %s288_s5, 64  ;;  %p290_p10 = scmp.lt.s32.totalorder %s392_s23, %s288_s5 }
  0x1c   : > { %p285_p13 = pnand %p283_p11, %p269_p12  ;;  %p291_p1 = scmp.lt.s32.totalorder %s289_s6, %s282_s3 }
  0x1e   : > { %p286_p9 = pneg %p285_p13  ;;  %p292_p2 = por %p291_p1, %p290_p10 }
  0x20   : > { %p293_p3 = pnand %p292_p2, %p286_p9 }
  0x22   : > { %296 = shalt.err (!%p293_p3)
}
  0x23   : > { %232 = dma.hbm_to_vmem [thread:$0]  (!%p394_p8), %s390_s21, 32, %s392_s23, %s85_s25  }
  0x24   : > { %p456_p0 = scmp.lt.s32.totalorder %s331_s9, 3  ;;  %p457_p4 = scmp.ge.s32.totalorder %s331_s9, 1 }
  0x26   : > { %p102_p12 = pnand %p457_p4, %p456_p0 }
  0x27   : > { %s107_s12 = sand.u32 (!%p102_p12), 1, %s323_s7  }
  0x28   : > { %105 = sbr.rel (%p102_p12) target bundleno = 58 (0x3a), region = 24  ;;  %s222_s13 = sshll.u32 (!%p102_p12), %s107_s12, 1 }
  0x29   : > { %s108_s16 = scalar_lea.sflag (!%p102_p12), [#allocation3], %s107_s12  ;;  %s111_s17 = scalar_lea.vmem (!%p102_p12), [#allocation2], %s222_s13 }
  0x2f   : > { %314 = dma.done.wait (%p381_p7), %s108_s16, 32  }
  0x30   : > { %316 = vsyncadd (%p381_p7), %s108_s16, 4294967264  ;;  %p129_p9 = scmp.lt.s32.totalorder %s364_s10, 1  ;;  %v140_v0 = vlaneseq  ;;  %v334_v1 = vmov 1966171168   ;;  %v133_v6 = vld [vmem:[%s111_s17] sm:$0x3] }
  0x31   : > { %v138_v2 = vunpack.c.l.s4 %v334_v1  ;;  %v134_v7 = vunpack.c.l.bf16 %v133_v6 }
  0x32   : > { %s463_s10 = smov (!%p129_p9, %s364_s10), 1  ;;  %v141_v3 = vshrl.u32 %v140_v0, 7  ;;  %vm147_vm0 = vcmp.lt.s32.totalorder %v140_v0, 256 }
  0x33   : > { %v139_v4 = vunpack.c.0.s8 %v138_v2  ;;  %s223_s9 = sshll.u32 %s463_s10, 1 }
  0x34   : > { %s132_s20 = scalar_lea.vmem %s453_s1, %s223_s9 }
  0x35   : > { %v142_v5 = vsub.s32 %v139_v4, %v141_v3 }
  0x37   : > { %v143_v8 = vrot.slane %v134_v7, %v142_v5 }
  0x39   : > { %149 = vst.msk [vmem:[%s132_s20] sm:$0x3] %vm147_vm0, %v143_v8 }
  0x3a PF: > { %p11_p7 = scmp.ge.s32.totalorder %s367_s11, 4   ;;  %s458_s6 = smov %s323_s7 }
  0x3b   : > { %s459_s7 = smov %s327_s8  ;;  %s460_s8 = smov %s377_s14 }
  0x3c   : > { %s461_s9 = smov %s367_s11  ;;  %13 = sbr.rel (!%p11_p7) target bundleno = 3 (0x3), region = 64 }
  0x43   :  { %169 = vsyncpa [#allocation3], 1 }
  0x44   :  { %171 = vsyncpa [#allocation3 + $0x1], 1 }

// kernel: repmlp_resnet_forward.43
= control target key start
LH: loop header
LB: loop body
LE: loop exit
PB: predicated region body
PF: predicated region fallthrough
CT: control target
= control target key end

     0   :  { %s1282_s0 = inlined_call_operand.hbm [shape: bf16[2,1,64], index: 0, kind: input, shape index: {}]   ;;  %s1283_s1 = inlined_call_operand.hbm [shape: bf16[64,256], index: 1, kind: input, shape index: {}]   ;;  %s1284_s2 = inlined_call_operand.hbm [shape: f32[1,256], index: 2, kind: input, shape index: {}]   ;;  %s1285_s3 = inlined_call_operand.hbm [shape: bf16[2,1,256], index: 3, kind: input, shape index: {}]   ;;  %s1286_s4 = inlined_call_operand.hbm [shape: bf16[2,1,256], index: 4, kind: output, shape index: {}]  }
   0x1   :  { %1292 = sst [smem:[#allocation15_spill]] %s1282_s0 }
   0x2   :  { %9 = vsyncpa [#allocation3], 0 }
   0x3   :  { %11 = vsyncpa [#allocation3 + $0x1], 0 }
   0x4   :  { %12 = vsyncpa [#allocation6], 0 }
   0x5   :  { %13 = vsyncpa [#allocation9], 0 }
   0x6   :  { %15 = vsyncpa [#allocation9 + $0x1], 0 }
   0x7   :  { %16 = vsyncpa [#allocation4], 0 }
   0x8   :  { %18 = vsyncpa [#allocation4 + $0x1], 0  ;;  %s989_s15 = smov 0   ;;  %s991_s16 = smov 0  }
   0x9   :  { %s993_s17 = smov 0   ;;  %s995_s18 = smov 0  }
   0xa   :  { %s997_s19 = smov 0   ;;  %s999_s20 = smov 0  }
   0xb LB: > { %s611_s21 = sadd.s32 4294967295, %s953_s20   ;;  %s612_s22 = sadd.s32 4294967294, %s953_s20   ;;  %s953_s20 = sphi %s999_s20, %s24_s20   ;;  %s949_s19 = sphi %s997_s19, %s1312_s19   ;;  %s945_s18 = sphi %s995_s18, %s1311_s18   ;;  %s941_s17 = sphi %s993_s17, %s1310_s17   ;;  %s937_s16 = sphi %s991_s16, %s1309_s16   ;;  %s933_s15 = sphi %s989_s15, %s1308_s15  }
   0xc   : > { %p56_p0 = scmp.ne.s32.totalorder %s937_s16, %s933_s15  ;;  %p1023_p1 = scmp.eq.s32.totalorder %s611_s21, 0 }
   0xd   : > { %p1027_p2 = scmp.eq.s32.totalorder %s611_s21, 1  ;;  %p168_p3 = scmp.eq.s32.totalorder %s612_s22, 1 }
   0xe   : > { %s1293_s23 = scalar_select %p1023_p1, 1, 0 }
   0xf   : > { %p1033_p4 = por %p1023_p1, %p56_p0  ;;  %p613_p5 = scmp.ge.s32.totalorder %s953_s20, 1 }
  0x10   : > { %p1038_p6 = por %p168_p3, %p56_p0  ;;  %p175_p7 = scmp.lt.s32.totalorder %s953_s20, 3 }
  0x11   : > { %s1295_s25 = scalar_select %p1033_p4, 1, 0 }
  0x12   : > { %s1296_s26 = scalar_select %p1038_p6, 1, 0 }
  0x13   : > { %p1043_p8 = pnand %p613_p5, %p175_p7  ;;  %s955_s28 = smov [#allocation5]  }
  0x14   : > { %s190_s29 = sshll.u32 %s955_s28, 4  ;;  %s956_s5 = smov [#allocation7]   ;;  %s1047_s29 = int_to_ptr.vmem [resolvable:$true] %s190_s29 }
  0x15   : > { %s1297_s27 = scalar_select %p1043_p8, 1, 0 }
  0x16   : > { %p657_p9 = pneg %p1043_p8  ;;  %s207_s6 = sshll.u32 %s956_s5, 4  ;;  %s1058_s6 = int_to_ptr.vmem [resolvable:$true] %s207_s6 }
  0x17   : > { %s747_s9 = scalar_lea.hbm %s1283_s1, 1024 }
  0x18   : > { %p1054_p11 = pnand %p657_p9, %p1023_p1  ;;  %p748_p12 = scmp.ne.s32.totalorder %s1283_s1, %s747_s9 }
  0x19   : > { %p754_p5 = scmp.lt.u32.totalorder %s747_s9, %s1283_s1 }
  0x1a   : > { %p749_p13 = pneg %p1054_p11 }
  0x1c   : > { %p750_p0 = pnand %p749_p13, %p748_p12 }
  0x1e   : > { %p751_p3 = pneg %p750_p0 }
  0x20   : > { %p756_p7 = pnand %p754_p5, %p751_p3 }
  0x22   : > { %759 = shalt.err (!%p756_p7)
}
  0x23   : > { %s760_s14 = scalar_lea.vmem %s1047_s29, 1024  ;;  %p768_p1 = scmp.lt.s32.totalorder %s1047_s29, %s1047_s29 }
  0x24   : > { %p761_p9 = scmp.ne.s32.totalorder %s1047_s29, %s760_s14  ;;  %p769_p12 = scmp.lt.s32.totalorder %s760_s14, %s760_s14 }
  0x26   : > { %p763_p10 = pnand %p761_p9, %p749_p13  ;;  %p770_p0 = por %p769_p12, %p768_p1 }
  0x28   : > { %p764_p6 = pneg %p763_p10 }
  0x2a   : > { %p771_p4 = pnand %p770_p0, %p764_p6 }
  0x2c   : > { %774 = shalt.err (!%p771_p4)
}
  0x2d   : > { %s957_s21 = smov 128   ;;  %s958_s22 = smov 8  }
  0x2e   : > { %660 = dma.hbm_to_vmem [thread:$0]  (!%p1054_p11), %s1283_s1, 1024, %s1047_s29, [#allocation6], %s957_s21, %s957_s21, %s958_s22  }
  0x2f   : > { %s775_s9 = scalar_lea.hbm %s1284_s2, 32 }
  0x30   : > { %p776_p1 = scmp.ne.s32.totalorder %s1284_s2, %s775_s9  ;;  %p782_p10 = scmp.lt.u32.totalorder %s775_s9, %s1284_s2 }
  0x32   : > { %p778_p4 = pnand %p776_p1, %p749_p13 }
  0x34   : > { %p779_p6 = pneg %p778_p4 }
  0x36   : > { %p784_p3 = pnand %p782_p10, %p779_p6 }
  0x38   : > { %787 = shalt.err (!%p784_p3)
}
  0x39   : > { %s788_s29 = scalar_lea.vmem %s1058_s6, 32  ;;  %p796_p12 = scmp.lt.s32.totalorder %s1058_s6, %s1058_s6 }
  0x3a   : > { %p789_p5 = scmp.ne.s32.totalorder %s1058_s6, %s788_s29  ;;  %p797_p0 = scmp.lt.s32.totalorder %s788_s29, %s788_s29 }
  0x3c   : > { %p791_p7 = pnand %p789_p5, %p749_p13  ;;  %p798_p1 = por %p797_p0, %p796_p12 }
  0x3e   : > { %p792_p9 = pneg %p791_p7 }
  0x40   : > { %p799_p4 = pnand %p798_p1, %p792_p9 }
  0x42   : > { %802 = shalt.err (!%p799_p4)
}
  0x43   : > { %663 = dma.hbm_to_vmem [thread:$0]  (!%p1054_p11), %s1284_s2, 32, %s1058_s6, [#allocation6]  }
  0x44   : > { %s33_s22 = sadd.s32 1, %s949_s19  ;;  %s43_s28 = sadd.s32 1, %s941_s17 }
  0x45   : > { %p34_p13 = scmp.ge.s32.totalorder %s33_s22, 2  ;;  %p50_p6 = scmp.ne.s32.totalorder %s941_s17, %s937_s16 }
  0x46   : > { %p51_p10 = scmp.eq.s32.totalorder %s953_s20, 0  ;;  %p677_p3 = scmp.lt.s32.totalorder %s953_s20, 2 }
  0x47   : > { %s1314_s22 = smov (%p34_p13, %s33_s22), 0  ;;  %p1122_p7 = por %p1027_p2, %p50_p6 }
  0x48   : > { %p52_p5 = por %p51_p10, %p50_p6  ;;  %s40_s5 = ssub.s32 %s949_s19, %s1314_s22 }
  0x49   : > { %s1299_s30 = scalar_select %p1122_p7, 1, 0 }
  0x4a   : > { %s1129_s7 = sand.u32 1, %s941_s17   ;;  %p41_p11 = scmp.eq.s32.totalorder %s40_s5, 0 }
  0x4b   : > { %s617_s6 = sshll.u32 %s949_s19, 4  ;;  %s1300_s0 = sld [smem:[#allocation15_spill]] }
  0x4c   : > { %s1133_s8 = scalar_select %p41_p11, %s941_s17, %s43_s28  }
  0x4d   : > { %s221_s24 = scalar_lea.vmem [#allocation2], %s1129_s7  ;;  %p1145_p2 = pnand %p677_p3, %p52_p5 }
  0x4e   : > { %s228_s12 = sshll.u32 %s221_s24, 4  ;;  %s618_s29 = sshll.u32 %s1129_s7, 1  ;;  %s1141_s12 = int_to_ptr.vmem [resolvable:$true] %s228_s12 }
  0x4f   : > { %s219_s14 = scalar_lea.sflag [#allocation3], %s1129_s7  ;;  %p805_p12 = pneg %p1145_p2 }
  0x51   : > { %s1138_s11 = scalar_lea.hbm %s1300_s0, %s617_s6  ;;  %s808_s6 = scalar_lea.hbm %s1300_s0, 32 }
  0x52   : > { %s803_s21 = scalar_lea.hbm %s1138_s11, 16  ;;  %p809_p4 = scmp.lt.u32.totalorder %s1138_s11, %s1300_s0 }
  0x53   : > { %p804_p9 = scmp.ne.s32.totalorder %s1138_s11, %s803_s21  ;;  %p810_p13 = scmp.lt.u32.totalorder %s808_s6, %s803_s21 }
  0x54   : > { %p812_p10 = scmp.lt.u32.totalorder %s803_s21, %s1138_s11 }
  0x55   : > { %p806_p0 = pnand %p805_p12, %p804_p9  ;;  %p811_p6 = por %p810_p13, %p809_p4 }
  0x57   : > { %p807_p1 = pneg %p806_p0  ;;  %p813_p3 = por %p812_p10, %p811_p6 }
  0x59   : > { %p814_p5 = pnand %p813_p3, %p807_p1 }
  0x5b   : > { %817 = shalt.err (!%p814_p5)
}
  0x5c   : > { %s818_s24 = scalar_lea.vmem %s1141_s12, 16  ;;  %s959_s28 = smov [#allocation2]  }
  0x5d   : > { %p819_p11 = scmp.ne.s32.totalorder %s1141_s12, %s818_s24  ;;  %s823_s5 = sshll.u32 %s959_s28, 4  ;;  %s824_s5 = int_to_ptr.vmem [resolvable:$false] %s823_s5 }
  0x5e   : > { %s825_s9 = scalar_lea.vmem %s824_s5, 32  ;;  %p826_p7 = scmp.lt.s32.totalorder %s1141_s12, %s824_s5 }
  0x5f   : > { %p821_p9 = pnand %p819_p11, %p805_p12  ;;  %p827_p4 = scmp.lt.s32.totalorder %s825_s9, %s818_s24 }
  0x61   : > { %p822_p0 = pneg %p821_p9  ;;  %p828_p13 = por %p827_p4, %p826_p7 }
  0x63   : > { %p829_p6 = pnand %p828_p13, %p822_p0 }
  0x65   : > { %832 = shalt.err (!%p829_p6)
}
  0x66   : > { %667 = dma.hbm_to_vmem [thread:$0]  (!%p1145_p2), %s1138_s11, 16, %s1141_s12, %s219_s14  }
  0x67   : > { %s641_s21 = sshll.u32 %s949_s19, 5  ;;  %s239_s6 = scalar_lea.vmem [#allocation8], %s618_s29 }
  0x68   : > { %s249_s10 = sshll.u32 %s239_s6, 4  ;;  %s1182_s24 = scalar_lea.hbm %s1285_s3, %s641_s21  ;;  %s250_s10 = int_to_ptr.vmem [resolvable:$true] %s249_s10 }
  0x69   : > { %s236_s5 = scalar_lea.sflag [#allocation9], %s1129_s7  ;;  %s833_s9 = scalar_lea.hbm %s1182_s24, 32 }
  0x6a   : > { %p834_p7 = scmp.ne.s32.totalorder %s1182_s24, %s833_s9  ;;  %s838_s29 = scalar_lea.hbm %s1285_s3, 64 }
  0x6b   : > { %p839_p3 = scmp.lt.u32.totalorder %s1182_s24, %s1285_s3  ;;  %p840_p5 = scmp.lt.u32.totalorder %s838_s29, %s833_s9 }
  0x6c   : > { %p836_p1 = pnand %p834_p7, %p805_p12  ;;  %p842_p9 = scmp.lt.u32.totalorder %s833_s9, %s1182_s24 }
  0x6d   : > { %p841_p11 = por %p840_p5, %p839_p3 }
  0x6e   : > { %p837_p10 = pneg %p836_p1 }
  0x6f   : > { %p843_p0 = por %p842_p9, %p841_p11 }
  0x71   : > { %p844_p4 = pnand %p843_p0, %p837_p10 }
  0x73   : > { %847 = shalt.err (!%p844_p4)
}
  0x74   : > { %s848_s7 = scalar_lea.vmem %s250_s10, 32  ;;  %s960_s21 = smov [#allocation8]  }
  0x75   : > { %p849_p13 = scmp.ne.s32.totalorder %s250_s10, %s848_s7  ;;  %s853_s6 = sshll.u32 %s960_s21, 4  ;;  %s854_s6 = int_to_ptr.vmem [resolvable:$false] %s853_s6 }
  0x76   : > { %s855_s28 = scalar_lea.vmem %s854_s6, 64  ;;  %p856_p1 = scmp.lt.s32.totalorder %s250_s10, %s854_s6 }
  0x77   : > { %p851_p6 = pnand %p849_p13, %p805_p12  ;;  %p857_p8 = scmp.lt.s32.totalorder %s855_s28, %s848_s7 }
  0x79   : > { %p852_p7 = pneg %p851_p6  ;;  %p858_p3 = por %p857_p8, %p856_p1 }
  0x7b   : > { %p859_p5 = pnand %p858_p3, %p852_p7 }
  0x7d   : > { %862 = shalt.err (!%p859_p5)
}
  0x7e   : > { %670 = dma.hbm_to_vmem [thread:$0]  (!%p1145_p2), %s1182_s24, 32, %s250_s10, %s236_s5  }
  0x7f   : > { %p1302_p10 = scmp.ne.s32.totalorder %s1297_s27, 0 }
  0x80   : > { %s1207_s9 = sand.u32 (!%p1302_p10), 1, %s937_s16   ;;  %p1303_p12 = scmp.ne.s32.totalorder (!%p1302_p10), %s1295_s25, 0 }
  0x81   : > { %258 = sbr.rel (%p1302_p10) target bundleno = 400 (0x190), region = 36  ;;  %s261_s11 = scalar_lea.sflag (!%p1302_p10), [#allocation3], %s1207_s9 }
  0x82   : > { %s263_s12 = scalar_lea.vmem (!%p1302_p10), [#allocation2], %s1207_s9 }
  0x88   : > { %916 = dma.done.wait (%p1303_p12), %s261_s11, 16  }
  0x89   : > { %918 = vsyncadd (%p1303_p12), %s261_s11, 4294967280  ;;  %p1304_p8 = scmp.ne.s32.totalorder %s1293_s23, 0 }
  0x8b   : > { %920 = dma.done.wait (%p1304_p8), [#allocation6], 1056  }
  0x8c   : > { %922 = vsyncadd (%p1304_p8), [#allocation6], 4294966240  ;;  %s624_s27 = sshll.u32 %s1207_s9, 1  ;;  %s277_s13 = scalar_lea.sflag [#allocation9], %s1207_s9 }
  0x8d   : > { %s280_s10 = scalar_lea.vmem [#allocation8], %s624_s27 }
  0x8e   : > { %924 = dma.done.wait (%p1303_p12), %s277_s13, 32  }
  0x8f   : > { %926 = vsyncadd (%p1303_p12), %s277_s13, 4294967264  ;;  %v961_v0 = vmov 0   ;;  %v735_v1 = vld [vmem:[#allocation5 + $0x4] ss:$8 sps:$4 sm:$0xff]   ;;  %v737_v2 = vld [vmem:[#allocation5] ss:$8 sps:$4 sm:$0xff]   ;;  %v365_v10 = vlaneseq }
  0x90   : > { %411 = vmatprep.mubr.bf16.mxu0 %v961_v0  ;;  %379 = vmatprep.subr.bf16.mxu0 %v735_v1  ;;  %v738_v3 = vld [vmem:[#allocation5 + $0x14] ss:$8 sps:$4 sm:$0xff]   ;;  %v740_v4 = vld [vmem:[#allocation5 + $0x10] ss:$8 sps:$4 sm:$0xff]   ;;  %v741_v5 = vld [vmem:[#allocation5 + $0x24] ss:$8 sps:$4 sm:$0xff]  }
  0x91   : > { %380 = vmatpush1.bf16.msra.mxu0 %v737_v2  ;;  %v743_v6 = vld [vmem:[#allocation5 + $0x20] ss:$8 sps:$4 sm:$0xff]   ;;  %v744_v7 = vld [vmem:[#allocation5 + $0x34] ss:$8 sps:$4 sm:$0xff]   ;;  %v746_v8 = vld [vmem:[#allocation5 + $0x30] ss:$8 sps:$4 sm:$0xff]  }
  0x92   : > { %381 = vmatprep.subr.bf16.mxu0 %v738_v3  ;;  %v314_v9 = vld [vmem:[%s263_s12] sm:$0x1]  ;;  %vm375_vm0 = vcmask 523264   ;;  %v366_v11 = vshrl.u32 %v365_v10, 7  ;;  %v420_v12 = vld [vmem:[%s280_s10] sm:$0x3] }
  0x93   : > { %v323_v14 = vld [vmem:[#allocation7] sm:$0x3]  ;;  %v421_v16 = vunpack.c.l.bf16 %v420_v12  ;;  %v962_v20 = vmov 1966171168   ;;  %vm457_vm1 = vcmask 1040384   ;;  %vm460_vm3 = vcmask 1041409  }
  0x94   : > { %v367_v13 = vsub.s32 0, %v366_v11  ;;  %v371_v15 = vsub.s32 1, %v366_v11  ;;  %v429_v17 = vsub.s32 2, %v366_v11  ;;  %v443_v21 = vunpack.c.l.s4 %v962_v20  ;;  %s642_s23 = sshll.u32 %s945_s18, 5  ;;  %s308_s25 = scalar_lea.vmem [#allocation10], %s624_s27 }
  0x95   : > { %382 = vmatpush1.bf16.msra.mxu0 %v740_v4  ;;  %vm458_vm2 = vsmask.f32 256  ;;  %vm461_vm4 = vsmask.f32 1280  ;;  %s484_s24 = sshll.u32 %s308_s25, 4  ;;  %s1233_s14 = scalar_lea.hbm %s1286_s4, %s642_s23  ;;  %s1235_s24 = int_to_ptr.vmem [resolvable:$true] %s484_s24 }
  0x96   : > { %383 = vmatprep.subr.bf16.mxu0 %v741_v5  ;;  %v368_v18 = vrot.slane %v323_v14, %v367_v13  ;;  %v372_v19 = vrot.slane %v323_v14, %v371_v15  ;;  %v426_v22 = vrot.slane %v421_v16, %v367_v13  ;;  %v430_v24 = vrot.slane %v421_v16, %v429_v17  ;;  %vm459_vm5 = vmand %vm457_vm1, %vm458_vm2  ;;  %v464_v38 = vld [vmem:[%s308_s25] sm:$0x3]  ;;  %s468_s0 = scalar_lea.sflag [#allocation4], %s1207_s9  ;;  %s863_s18 = scalar_lea.vmem %s1235_s24, 32 }
  0x97   : > { %v444_v28 = vunpack.c.0.s8 %v443_v21  ;;  %vm462_vm6 = vmand %vm460_vm3, %vm461_vm4  ;;  %p864_p2 = scmp.ne.s32.totalorder %s1235_s24, %s863_s18  ;;  %p1305_p11 = scmp.ne.s32.totalorder %s1299_s30, 0 }
  0x98   : > { %vm463_vm7 = vmor %vm462_vm6, %vm459_vm5  ;;  %s963_s7 = smov [#allocation10]  }
  0x99   : > { %384 = vmatpush1.bf16.msra.mxu0 %v743_v6  ;;  %v447_v35 = vsub.s32 %v444_v28, %v366_v11  ;;  %p865_p9 = pnand %p864_p2, %p1305_p11  ;;  %s867_s21 = sshll.u32 %s963_s7, 4  ;;  %s868_s21 = int_to_ptr.vmem [resolvable:$false] %s867_s21 }
  0x9a   : > { %385 = vmatprep.subr.bf16.mxu0 %v744_v7  ;;  %s869_s6 = scalar_lea.vmem %s868_s21, 64  ;;  %p870_p4 = scmp.lt.s32.totalorder %s1235_s24, %s868_s21 }
  0x9b   : > { %p866_p0 = pneg %p865_p9  ;;  %p871_p13 = scmp.lt.s32.totalorder %s869_s6, %s863_s18 }
  0x9d   : > { %386 = vmatpush1.bf16.msra.mxu0 %v746_v8  ;;  %p872_p6 = por %p871_p13, %p870_p4 }
  0x9f   : > { %p873_p7 = pnand %p872_p6, %p866_p0 }
  0xa0   : > { %634 = vmatmul.mubr.msk.bf16.vlgmr.msra.gmra.mrb[0].mxu0 %vm375_vm0, %v314_v9 }
 0x173   : > { %v413_v23 = vpop.f32.mrb[0].mxu0 }
 0x174   : > { %v414_v25 = vadd.f32 %v413_v23, %v368_v18  ;;  %v415_v26 = vpop.f32.mrb[1].mxu0 }
 0x175   : > { %v416_v27 = vadd.f32 %v415_v26, %v372_v19  ;;  %v417_v29 = vpop.f32.mrb[2].mxu0 }
 0x176   : > { %v433_v30 = vadd.f32 %v426_v22, %v414_v25  ;;  %v418_v31 = vpop.f32.mrb[3].mxu0 }
 0x177   : > { %v434_v32 = vadd.f32 %v430_v24, %v416_v27 }
 0x178   : > { %v435_v33 = vmax.f32 %v433_v30, 0.0 }
 0x179   : > { %v436_v34 = vmax.f32 %v434_v32, 0.0 }
 0x17b   : > { %v635_v36 = vpack.c.bf16 %v436_v34, %v435_v33 }
 0x17d   : > { %v448_v37 = vrot.slane %v635_v36, %v447_v35 }
 0x17f   : > { %v455_v39 = vrot.slane %v448_v37, %v447_v35 }
 0x181   : > { %v465_v40 = vsel %vm463_vm7, %v455_v39, %v464_v38 }
 0x182   : > { %466 = vst [vmem:[%s308_s25] sm:$0x3] %v465_v40 }
 0x183   : > { %876 = shalt.err (!%p873_p7)
}
 0x184   : > { %s877_s28 = scalar_lea.hbm %s1233_s14, 32  ;;  %s881_s12 = scalar_lea.hbm %s1286_s4, 64 }
 0x185   : > { %p878_p1 = scmp.ne.s32.totalorder %s1233_s14, %s877_s28  ;;  %p882_p10 = scmp.lt.u32.totalorder %s1233_s14, %s1286_s4 }
 0x186   : > { %p883_p12 = scmp.lt.u32.totalorder %s881_s12, %s877_s28  ;;  %p885_p2 = scmp.lt.u32.totalorder %s877_s28, %s1233_s14 }
 0x187   : > { %p879_p3 = pnand %p878_p1, %p1305_p11 }
 0x188   : > { %p884_p8 = por %p883_p12, %p882_p10 }
 0x189   : > { %p880_p5 = pneg %p879_p3 }
 0x18a   : > { %p886_p9 = por %p885_p2, %p884_p8 }
 0x18c   : > { %p887_p0 = pnand %p886_p9, %p880_p5 }
 0x18e   : > { %890 = shalt.err (!%p887_p0)
}
 0x18f   : > { %655 = dma.vmem_to_hbm [thread:$0]  (%p1305_p11), %s1235_s24, 32, %s1233_s14, %s468_s0  }
 0x190 PF: > { %s496_s10 = sand.u32 1, %s933_s15   ;;  %p1306_p4 = scmp.ne.s32.totalorder %s1296_s26, 0 }
 0x191   : > { %p1307_p13 = scmp.ge.s32.totalorder %s953_s20, 2  ;;  %s497_s23 = scalar_lea.sflag [#allocation4], %s496_s10 }
 0x193   : > { %p672_p6 = pnand %p1307_p13, %p1306_p4 }
 0x195   : > { %928 = dma.done.wait (!%p672_p6), %s497_s23, 32  }
 0x196   : > { %930 = vsyncadd (!%p672_p6), %s497_s23, 4294967264  ;;  %s24_s20 = sadd.s32 1, %s953_s20   ;;  %s1308_s15 = smov %s937_s16 }
 0x197   : > { %p21_p7 = scmp.ge.s32.totalorder %s24_s20, 4   ;;  %s1309_s16 = smov %s941_s17 }
 0x198   : > { %s1310_s17 = smov %s1133_s8  ;;  %s1311_s18 = smov %s949_s19 }
 0x199   : > { %s1312_s19 = smov %s1314_s22  ;;  %23 = sbr.rel (!%p21_p7) target bundleno = 11 (0xb), region = 104 }
 0x1a0   :  { %502 = vsyncpa [#allocation3], 1 }
 0x1a1   :  { %504 = vsyncpa [#allocation3 + $0x1], 1 }
 0x1a2   :  { %505 = vsyncpa [#allocation6], 1 }
 0x1a3   :  { %506 = vsyncpa [#allocation9], 1 }
 0x1a4   :  { %508 = vsyncpa [#allocation9 + $0x1], 1 }
 0x1a5   :  { %509 = vsyncpa [#allocation4], 1 }
 0x1a6   :  { %511 = vsyncpa [#allocation4 + $0x1], 1 }

// kernel: repmlp_resnet_forward.45
= control target key start
LH: loop header
LB: loop body
LE: loop exit
PB: predicated region body
PF: predicated region fallthrough
CT: control target
= control target key end

     0   :  { %8 = vsyncpa [#allocation4], 0  ;;  %s526_s0 = inlined_call_operand.hbm [shape: bf16[16,256], index: 0, kind: input, shape index: {}]   ;;  %s527_s1 = inlined_call_operand.hbm [shape: bf16[256,128], index: 1, kind: input, shape index: {}]   ;;  %s528_s2 = inlined_call_operand.hbm [shape: f32[1,128], index: 2, kind: input, shape index: {}]   ;;  %s529_s3 = inlined_call_operand.hbm [shape: f32[16,128], index: 3, kind: output, shape index: {}]  }
   0x1   :  { %9 = vsyncpa [#allocation7], 0 }
   0x2   :  { %10 = vsyncpa [#allocation5], 0  ;;  %s444_s12 = smov [#allocation6]   ;;  %s350_s16 = scalar_lea.hbm %s527_s1, 2048 }
   0x3   :  { %s28_s13 = sshll.u32 %s444_s12, 4  ;;  %p351_p0 = scmp.ne.s32.totalorder %s527_s1, %s350_s16  ;;  %s29_s13 = int_to_ptr.vmem [resolvable:$true] %s28_s13 }
   0x4   :  { %p354_p1 = scmp.lt.u32.totalorder %s350_s16, %s527_s1 }
   0x6   :  { %p356_p2 = pnand %p354_p1, %p351_p0 }
   0x8   :  { %359 = shalt.err (!%p356_p2)
}
   0x9   :  { %s360_s21 = scalar_lea.vmem %s29_s13, 2048  ;;  %p365_p4 = scmp.lt.s32.totalorder %s29_s13, %s29_s13 }
   0xa   :  { %p361_p3 = scmp.ne.s32.totalorder %s29_s13, %s360_s21  ;;  %p366_p5 = scmp.lt.s32.totalorder %s360_s21, %s360_s21 }
   0xc   :  { %p367_p6 = por %p366_p5, %p365_p4 }
   0xe   :  { %p368_p7 = pnand %p367_p6, %p361_p3 }
  0x10   :  { %371 = shalt.err (!%p368_p7)
}
  0x11   :  { %s445_s22 = smov 64   ;;  %s446_s23 = smov 4  }
  0x12   :  { %34 = dma.hbm_to_vmem [thread:$0]  %s527_s1, 2048, %s29_s13, [#allocation7], %s445_s22, %s445_s22, %s446_s23  }
  0x13   :  { %s447_s26 = smov [#allocation3]   ;;  %s372_s30 = scalar_lea.hbm %s526_s0, 256 }
  0x14   :  { %s16_s27 = sshll.u32 %s447_s26, 4  ;;  %p373_p8 = scmp.ne.s32.totalorder %s526_s0, %s372_s30  ;;  %s17_s27 = int_to_ptr.vmem [resolvable:$true] %s16_s27 }
  0x15   :  { %p376_p9 = scmp.lt.u32.totalorder %s372_s30, %s526_s0 }
  0x17   :  { %p378_p10 = pnand %p376_p9, %p373_p8 }
  0x19   :  { %381 = shalt.err (!%p378_p10)
}
  0x1a   :  { %s382_s8 = scalar_lea.vmem %s17_s27, 256  ;;  %p387_p12 = scmp.lt.s32.totalorder %s17_s27, %s17_s27 }
  0x1b   :  { %p383_p11 = scmp.ne.s32.totalorder %s17_s27, %s382_s8  ;;  %p388_p13 = scmp.lt.s32.totalorder %s382_s8, %s382_s8 }
  0x1d   :  { %p389_p0 = por %p388_p13, %p387_p12 }
  0x1f   :  { %p390_p1 = pnand %p389_p0, %p383_p11 }
  0x21   :  { %393 = shalt.err (!%p390_p1)
}
  0x22   :  { %s448_s1 = smov 128   ;;  %s449_s9 = smov 8  }
  0x23   :  { %22 = dma.hbm_to_vmem [thread:$0]  %s526_s0, 256, %s17_s27, [#allocation4], %s448_s1, %s448_s1, %s449_s9  }
  0x24   :  { %s450_s12 = smov [#allocation8]   ;;  %s394_s16 = scalar_lea.hbm %s528_s2, 16 }
  0x25   :  { %s41_s13 = sshll.u32 %s450_s12, 4  ;;  %p395_p2 = scmp.ne.s32.totalorder %s528_s2, %s394_s16  ;;  %s42_s13 = int_to_ptr.vmem [resolvable:$true] %s41_s13 }
  0x26   :  { %p398_p3 = scmp.lt.u32.totalorder %s394_s16, %s528_s2 }
  0x28   :  { %p400_p4 = pnand %p398_p3, %p395_p2 }
  0x2a   :  { %403 = shalt.err (!%p400_p4)
}
  0x2b   :  { %s404_s21 = scalar_lea.vmem %s42_s13, 16  ;;  %s408_s0 = scalar_lea.vmem %s42_s13, 32 }
  0x2c   :  { %p405_p5 = scmp.ne.s32.totalorder %s42_s13, %s404_s21  ;;  %p409_p6 = scmp.lt.s32.totalorder %s42_s13, %s42_s13 }
  0x2d   :  { %p410_p7 = scmp.lt.s32.totalorder %s408_s0, %s404_s21 }
  0x2f   :  { %p411_p8 = por %p410_p7, %p409_p6 }
  0x31   :  { %p412_p9 = pnand %p411_p8, %p405_p5 }
  0x33   :  { %415 = shalt.err (!%p412_p9)
}
  0x34   :  { %44 = dma.hbm_to_vmem [thread:$0]  %s528_s2, 16, %s42_s13, [#allocation7]  }
  0x35   :  { %438 = dma.done.wait [#allocation4], 256  }
  0x36   :  { %439 = vsyncadd [#allocation4], 4294967040 }
  0x37   :  { %440 = dma.done.wait [#allocation7], 2064  }
  0x38   :  { %441 = vsyncadd [#allocation7], 4294965232  ;;  %v331_v0 = vld [vmem:[#allocation6 + $0x40] sm:$0xff]   ;;  %v333_v2 = vld [vmem:[#allocation6 + $0x48] sm:$0xff]   ;;  %s451_s2 = smov [#allocation9]  }
  0x39   :  { %v332_v1 = vld [vmem:[#allocation6] sm:$0xff]   ;;  %301 = vmatprep.subr.bf16.mxu0 %v331_v0  ;;  %v334_v3 = vld [vmem:[#allocation6 + $0x8] sm:$0xff]   ;;  %v335_v4 = vld [vmem:[#allocation6 + $0x50] sm:$0xff]   ;;  %s269_s24 = sshll.u32 %s451_s2, 4  ;;  %s270_s24 = int_to_ptr.vmem [resolvable:$true] %s269_s24 }
  0x3a   :  { %302 = vmatpush3.bf16.msra.mxu0 %v332_v1  ;;  %v336_v5 = vld [vmem:[#allocation6 + $0x10] sm:$0xff]   ;;  %v337_v6 = vld [vmem:[#allocation6 + $0x58] sm:$0xff]   ;;  %v339_v8 = vld [vmem:[#allocation6 + $0x60] sm:$0xff]   ;;  %s416_s25 = scalar_lea.vmem %s270_s24, 256  ;;  %p421_p11 = scmp.lt.s32.totalorder %s270_s24, %s270_s24 }
  0x3b   :  { %303 = vmatprep.subr.bf16.mxu0 %v333_v2  ;;  %v338_v7 = vld [vmem:[#allocation6 + $0x18] sm:$0xff]   ;;  %v340_v9 = vld [vmem:[#allocation6 + $0x20] sm:$0xff]   ;;  %v341_v10 = vld [vmem:[#allocation6 + $0x68] sm:$0xff]   ;;  %p417_p10 = scmp.ne.s32.totalorder %s270_s24, %s416_s25  ;;  %p422_p12 = scmp.lt.s32.totalorder %s416_s25, %s416_s25 }
  0x3c   :  { %v349_v11 = vld [vmem:[#allocation3 + $0x4] ss:$8 sps:$4 sm:$0xff]   ;;  %v342_v12 = vld [vmem:[#allocation6 + $0x28] sm:$0xff]   ;;  %v347_v17 = vld [vmem:[#allocation3] ss:$8 sps:$4 sm:$0xff]  }
  0x3d   :  { %235 = vmatprep.mubr.bf16.mxu0 %v349_v11  ;;  %v343_v13 = vld [vmem:[#allocation6 + $0x70] sm:$0xff]   ;;  %v345_v15 = vld [vmem:[#allocation6 + $0x78] sm:$0xff]   ;;  %v300_v20 = vld [vmem:[#allocation8] ss:$0 sm:$0xff]  ;;  %p423_p13 = por %p422_p12, %p421_p11 }
  0x3e   :  { %304 = vmatpush3.bf16.msra.mxu0 %v334_v3  ;;  %v344_v14 = vld [vmem:[#allocation6 + $0x30] sm:$0xff]   ;;  %v346_v16 = vld [vmem:[#allocation6 + $0x38] sm:$0xff]  }
  0x3f   :  { %305 = vmatprep.subr.bf16.mxu0 %v335_v4  ;;  %p424_p0 = pnand %p423_p13, %p417_p10 }
  0x42   :  { %306 = vmatpush3.bf16.msra.mxu0 %v336_v5 }
  0x43   :  { %307 = vmatprep.subr.bf16.mxu0 %v337_v6 }
  0x46   :  { %308 = vmatpush3.bf16.msra.mxu0 %v338_v7 }
  0x47   :  { %309 = vmatprep.subr.bf16.mxu0 %v339_v8 }
  0x4a   :  { %310 = vmatpush3.bf16.msra.mxu0 %v340_v9 }
  0x4b   :  { %311 = vmatprep.subr.bf16.mxu0 %v341_v10 }
  0x4e   :  { %312 = vmatpush3.bf16.msra.mxu0 %v342_v12 }
  0x4f   :  { %313 = vmatprep.subr.bf16.mxu0 %v343_v13 }
  0x52   :  { %314 = vmatpush3.bf16.msra.mxu0 %v344_v14 }
  0x53   :  { %315 = vmatprep.subr.bf16.mxu0 %v345_v15 }
  0x56   :  { %316 = vmatpush3.bf16.msra.mxu0 %v346_v16 }
  0x59   :  { %236 = vmatmul.mubr.bf16.vlgmr.msra.gmra.mrb[0].mxu0 %v347_v17 }
 0x12c   :  { %v317_v18 = vpop.f32.mrb[0].mxu0 }
 0x12d   :  { %v318_v19 = vpop.f32.mrb[1].mxu0 }
 0x12e   :  { %v319_v21 = vadd.f32 %v318_v19, %v317_v18  ;;  %v320_v22 = vpop.f32.mrb[2].mxu0 }
 0x12f   :  { %v321_v23 = vpop.f32.mrb[3].mxu0 }
 0x130   :  { %v260_v24 = vadd.f32 %v319_v21, %v300_v20  ;;  %v322_v25 = vadd.f32 %v321_v23, %v320_v22 }
 0x132   :  { %262 = vst [vmem:[#allocation9] sm:$0xff] %v260_v24  ;;  %v261_v26 = vadd.f32 %v322_v25, %v300_v20 }
 0x134   :  { %263 = vst [vmem:[#allocation9 + $0x8] sm:$0xff] %v261_v26 }
 0x135   :  { %427 = shalt.err (!%p424_p0)
}
 0x136   :  { %s428_s28 = scalar_lea.hbm %s529_s3, 256 }
 0x137   :  { %p429_p1 = scmp.ne.s32.totalorder %s529_s3, %s428_s28  ;;  %p432_p2 = scmp.lt.u32.totalorder %s428_s28, %s529_s3 }
 0x139   :  { %p434_p3 = pnand %p432_p2, %p429_p1 }
 0x13b   :  { %437 = shalt.err (!%p434_p3)
}
 0x13c   :  { %275 = dma.vmem_to_hbm [thread:$0]  %s270_s24, 256, %s529_s3, [#allocation5], %s448_s1, %s448_s1, %s449_s9  }
 0x13d   :  { %442 = dma.done.wait [#allocation5], 256  }
 0x13e   :  { %443 = vsyncadd [#allocation5], 4294967040 }
 0x13f   :  { %279 = vsyncpa [#allocation4], 1 }
 0x140   :  { %280 = vsyncpa [#allocation7], 1 }
 0x141   :  { %281 = vsyncpa [#allocation5], 1 }

</bundles_post_ra>
